<compile_context>
chip_gen: v5e
topology: v5e:2x2
jax: 0.10.0
libtpu: 0.0.40
codegen_flags: <defaults>
</compile_context>

<pallas_src>
import functools
import math

import jax
import jax.numpy as jnp
from jax import lax
from jax.experimental import pallas as pl
from jax.experimental.pallas import tpu as pltpu  # noqa: F401  (TPU backend)


# ------------------------- in-kernel helper math ---------------------------

def _dot_t(x, w):
    """x: [M, K] contracted with w: [N, K] (PyTorch Linear layout) -> [M, N]."""
    return lax.dot_general(x, w, (((1,), (1,)), ((), ())),
                           preferred_element_type=jnp.float32)


def _layernorm(y, g, b, eps=1e-5):
    """LayerNorm over the last axis, biased variance (PyTorch semantics)."""
    mu = jnp.mean(y, axis=-1, keepdims=True)
    var = jnp.mean(jnp.square(y - mu), axis=-1, keepdims=True)
    return (y - mu) * lax.rsqrt(var + eps) * g + b


def _mha(xq, xkv, B, Sq, Sk, H, w_qkv, b_qkv, w_out, b_out, mask):
    """nn.MultiheadAttention forward (eval mode), fully in VMEM / vregs.

    xq: [B*Sq, E], xkv: [B*Sk, E] values.
    w_qkv: [3E, E], b_qkv: [1, 3E], w_out: [E, E], b_out: [1, E] (PyTorch layout).
    mask: optional [Sq, Sk] additive float mask (None -> no add emitted).
    Returns a [B*Sq, E] value (no scratch round-trip).
    """
    E = xq.shape[-1]
    Dh = E // H

    if xq is xkv:
        # Self-attention: one fused in-projection (lane-dense, N = 3E).
        qkv = _dot_t(xq, w_qkv) + b_qkv                      # [B*Sq, 3E]
        q = qkv[:, 0:E]
        k = qkv[:, E:2 * E]
        v = qkv[:, 2 * E:3 * E]
    else:
        # Cross-attention: Q from decoder, fused K/V from encoder memory.
        q = _dot_t(xq, w_qkv[0:E]) + b_qkv[:, 0:E]           # [B*Sq, E]
        kv = _dot_t(xkv, w_qkv[E:3 * E]) + b_qkv[:, E:3 * E]  # [B*Sk, 2E]
        k = kv[:, 0:E]
        v = kv[:, E:2 * E]

    q = q * (1.0 / math.sqrt(Dh))       # fold scale into the smaller operand

    q3 = q.reshape(B, Sq, E)
    k3 = k.reshape(B, Sk, E)
    v3 = v.reshape(B, Sk, E)

    heads = []
    for h in range(H):
        qs = q3[:, :, h * Dh:(h + 1) * Dh]                   # [B, Sq, Dh]
        ks = k3[:, :, h * Dh:(h + 1) * Dh]                   # [B, Sk, Dh]
        vs = v3[:, :, h * Dh:(h + 1) * Dh]                   # [B, Sk, Dh]
        s = jnp.einsum('bqd,bkd->bqk', qs, ks,
                       preferred_element_type=jnp.float32)   # [B, Sq, Sk]
        if mask is not None:
            s = s + mask
        s = s - jnp.max(s, axis=-1, keepdims=True)
        p = jnp.exp(s)
        p = p * pl.reciprocal(jnp.sum(p, axis=-1, keepdims=True), approx=True)
        heads.append(jnp.einsum('bqk,bkd->bqd', p, vs,
                                preferred_element_type=jnp.float32))
    # Reassemble heads (contiguous Dh column blocks) -> one out-projection.
    o = jnp.concatenate(heads, axis=-1).reshape(B * Sq, E)   # [B*Sq, E]
    return _dot_t(o, w_out) + b_out


def _ffn(x, w1, b1, w2, b2):
    h = jnp.maximum(_dot_t(x, w1) + b1, 0.0)     # relu
    return _dot_t(h, w2) + b2


# ----------------------------- fused kernel --------------------------------

def _transformer_kernel(*refs, batch, num_heads, num_layers,
                        has_src_mask, has_tgt_mask):
    it = iter(refs)
    src_ref = next(it)                       # [B*Ss, E]
    dst_ref = next(it)                       # [B*St, E]
    src_mask = next(it)[...] if has_src_mask else None
    tgt_mask = next(it)[...] if has_tgt_mask else None

    # Encoder stacked params ([L, ...] leading dim).
    e_qkv_w = next(it); e_qkv_b = next(it); e_out_w = next(it); e_out_b = next(it)
    e_l1_w = next(it); e_l1_b = next(it); e_l2_w = next(it); e_l2_b = next(it)
    e_n1_w = next(it); e_n1_b = next(it); e_n2_w = next(it); e_n2_b = next(it)
    en_w = next(it); en_b = next(it)
    # Decoder stacked params.
    d_sa_qkv_w = next(it); d_sa_qkv_b = next(it)
    d_sa_out_w = next(it); d_sa_out_b = next(it)
    d_ca_qkv_w = next(it); d_ca_qkv_b = next(it)
    d_ca_out_w = next(it); d_ca_out_b = next(it)
    d_l1_w = next(it); d_l1_b = next(it); d_l2_w = next(it); d_l2_b = next(it)
    d_n1_w = next(it); d_n1_b = next(it)
    d_n2_w = next(it); d_n2_b = next(it)
    d_n3_w = next(it); d_n3_b = next(it)
    dn_w = next(it); dn_b = next(it)
    fc_w = next(it); fc_b = next(it)
    o_ref = next(it)                         # [B, Vp]  (lane-dense padded)

    B = batch
    H = num_heads
    L = num_layers
    E = src_ref.shape[-1]
    Ss = src_ref.shape[0] // B
    St = dst_ref.shape[0] // B

    # ---------------- Encoder stack (post-norm, relu, eval) ----------------
    x = src_ref[...]
    for l in range(L):
        sa = _mha(x, x, B, Ss, Ss, H,
                  e_qkv_w[l], e_qkv_b[l], e_out_w[l], e_out_b[l], src_mask)
        x = _layernorm(x + sa, e_n1_w[l], e_n1_b[l])
        ff = _ffn(x, e_l1_w[l], e_l1_b[l], e_l2_w[l], e_l2_b[l])
        x = _layernorm(x + ff, e_n2_w[l], e_n2_b[l])
    mem = _layernorm(x, en_w[...], en_b[...])          # final enc norm

    # ---------------- Decoder stack (post-norm, relu, eval) ----------------
    y = dst_ref[...]
    for l in range(L):
        sa = _mha(y, y, B, St, St, H,
                  d_sa_qkv_w[l], d_sa_qkv_b[l], d_sa_out_w[l], d_sa_out_b[l],
                  tgt_mask)
        y = _layernorm(y + sa, d_n1_w[l], d_n1_b[l])
        ca = _mha(y, mem, B, St, Ss, H,
                  d_ca_qkv_w[l], d_ca_qkv_b[l], d_ca_out_w[l], d_ca_out_b[l],
                  None)                                # memory_mask always None
        y = _layernorm(y + ca, d_n2_w[l], d_n2_b[l])
        ff = _ffn(y, d_l1_w[l], d_l1_b[l], d_l2_w[l], d_l2_b[l])
        y = _layernorm(y + ff, d_n3_w[l], d_n3_b[l])
    y = _layernorm(y, dn_w[...], dn_b[...])            # final dec norm

    # ------------- Final projection of the last target position ------------
    last = y.reshape(B, St, E)[:, St - 1, :]           # [B, E], stays in vregs
    o_ref[...] = _dot_t(last, fc_w[...]) + fc_b[...]   # [B, Vp] lane-dense store


# ------------------------------- wrapper ------------------------------------

def _as_additive_mask(m):
    if m is None:
        return None
    if m.dtype == jnp.bool_:
        m = jnp.where(m, -1e9, 0.0)
    return m.astype(jnp.float32)


def transformer_text_generator(params, x, tgt, num_heads,
                               src_mask=None, tgt_mask=None):
    """Equivalent of TransformerTextGenerator.forward (eval mode)."""
    emb = params["embedding"]
    pos = params["pos_encoding"]
    B, Ss = x.shape
    St = tgt.shape[1]
    E = emb.shape[1]
    V = params["fc_w"].shape[0]
    Vp = ((V + 127) // 128) * 128            # lane-dense output width

    # Glue: embedding gather + learned positional encoding (plain JAX).
    src = (jnp.take(emb, x, axis=0) + pos[:, :Ss, :]).reshape(B * Ss, E)
    dst = (jnp.take(emb, tgt, axis=0) + pos[:, :St, :]).reshape(B * St, E)
    src = src.astype(jnp.float32)
    dst = dst.astype(jnp.float32)

    src_mask = _as_additive_mask(src_mask)
    tgt_mask = _as_additive_mask(tgt_mask)

    # Lane-dense final store: zero-pad the fc projection to Vp lanes.
    fc_w = jnp.pad(params["fc_w"], ((0, Vp - V), (0, 0)))
    fc_b = jnp.pad(params["fc_b"], ((0, 0), (0, Vp - V)))

    inputs = [src, dst]
    if src_mask is not None:
        inputs.append(src_mask)
    if tgt_mask is not None:
        inputs.append(tgt_mask)

    enc, dec = params["enc"], params["dec"]
    inputs += [
        enc["qkv_w"], enc["qkv_b"], enc["out_w"], enc["out_b"],
        enc["l1_w"], enc["l1_b"], enc["l2_w"], enc["l2_b"],
        enc["n1_w"], enc["n1_b"], enc["n2_w"], enc["n2_b"],
        params["enc_norm_w"], params["enc_norm_b"],
        dec["sa_qkv_w"], dec["sa_qkv_b"], dec["sa_out_w"], dec["sa_out_b"],
        dec["ca_qkv_w"], dec["ca_qkv_b"], dec["ca_out_w"], dec["ca_out_b"],
        dec["l1_w"], dec["l1_b"], dec["l2_w"], dec["l2_b"],
        dec["n1_w"], dec["n1_b"], dec["n2_w"], dec["n2_b"],
        dec["n3_w"], dec["n3_b"],
        params["dec_norm_w"], params["dec_norm_b"],
        fc_w, fc_b,
    ]

    L = enc["qkv_w"].shape[0]
    kernel = functools.partial(
        _transformer_kernel,
        batch=B, num_heads=num_heads, num_layers=L,
        has_src_mask=src_mask is not None,
        has_tgt_mask=tgt_mask is not None,
    )

    # Whole model in one pallas_call: every weight/activation lives in VMEM
    # (total footprint << 1 MiB here; trivially under any scoped VMEM limit).
    out = pl.pallas_call(
        kernel,
        out_shape=jax.ShapeDtypeStruct((B, Vp), jnp.float32),
    )(*inputs)
    return out[:, :V]


# ------------------------------ parameters ----------------------------------

def init_params(key, vocab_size, embed_size, num_heads, hidden_dim, num_layers):
    """Parameters in PyTorch layouts ([out, in] weights, in_proj [3E, E]),
    stacked per layer with a leading [L] dim so the fused kernel needs no
    boundary transposes or per-call reshapes."""
    keys = iter(jax.random.split(key, 64))
    L, E, Hd, V = num_layers, embed_size, hidden_dim, vocab_size

    def dense(shape, scale=0.02):
        return scale * jax.random.normal(next(keys), shape, jnp.float32)

    def zeros(shape):
        return jnp.zeros(shape, jnp.float32)

    def ones(shape):
        return jnp.ones(shape, jnp.float32)

    enc = dict(
        qkv_w=dense((L, 3 * E, E)), qkv_b=zeros((L, 1, 3 * E)),
        out_w=dense((L, E, E)), out_b=zeros((L, 1, E)),
        l1_w=dense((L, Hd, E)), l1_b=zeros((L, 1, Hd)),
        l2_w=dense((L, E, Hd)), l2_b=zeros((L, 1, E)),
        n1_w=ones((L, 1, E)), n1_b=zeros((L, 1, E)),
        n2_w=ones((L, 1, E)), n2_b=zeros((L, 1, E)),
    )
    dec = dict(
        sa_qkv_w=dense((L, 3 * E, E)), sa_qkv_b=zeros((L, 1, 3 * E)),
        sa_out_w=dense((L, E, E)), sa_out_b=zeros((L, 1, E)),
        ca_qkv_w=dense((L, 3 * E, E)), ca_qkv_b=zeros((L, 1, 3 * E)),
        ca_out_w=dense((L, E, E)), ca_out_b=zeros((L, 1, E)),
        l1_w=dense((L, Hd, E)), l1_b=zeros((L, 1, Hd)),
        l2_w=dense((L, E, Hd)), l2_b=zeros((L, 1, E)),
        n1_w=ones((L, 1, E)), n1_b=zeros((L, 1, E)),
        n2_w=ones((L, 1, E)), n2_b=zeros((L, 1, E)),
        n3_w=ones((L, 1, E)), n3_b=zeros((L, 1, E)),
    )
    return dict(
        embedding=jax.random.normal(next(keys), (V, E), jnp.float32),
        # nn.Parameter(torch.zeros(1, 100, embed_size)) — zero-initialized.
        pos_encoding=zeros((1, 100, E)),
        enc=enc, dec=dec,
        enc_norm_w=ones((1, E)), enc_norm_b=zeros((1, E)),
        dec_norm_w=ones((1, E)), dec_norm_b=zeros((1, E)),
        fc_w=dense((V, E)), fc_b=zeros((1, V)),
    )


# --------------------------------- main --------------------------------------

if __name__ == "__main__":
    vocab_size, embed_size, num_heads, hidden_dim, num_layers = 50, 32, 4, 64, 2
    B, S_src, S_tgt = 2, 8, 8

    key = jax.random.PRNGKey(0)
    pkey, xkey, tkey = jax.random.split(key, 3)

    params = init_params(pkey, vocab_size, embed_size, num_heads,
                         hidden_dim, num_layers)
    x = jax.random.randint(xkey, (B, S_src), 0, vocab_size, dtype=jnp.int32)
    tgt = jax.random.randint(tkey, (B, S_tgt), 0, vocab_size, dtype=jnp.int32)

    fwd = jax.jit(functools.partial(transformer_text_generator,
                                    num_heads=num_heads))

    # Default path (src_mask=None, tgt_mask=None, matching PyTorch defaults).
    logits = fwd(params, x, tgt)
    jax.block_until_ready(logits)
    assert logits.shape == (B, vocab_size), logits.shape
    assert bool(jnp.all(jnp.isfinite(logits)))

    # Also exercise the optional additive causal tgt_mask path.
    causal = jnp.where(jnp.triu(jnp.ones((S_tgt, S_tgt), jnp.bool_), k=1),
                       -1e9, 0.0).astype(jnp.float32)
    logits_m = fwd(params, x, tgt, tgt_mask=causal)
    jax.block_until_ready(logits_m)
    assert logits_m.shape == (B, vocab_size), logits_m.shape
    assert bool(jnp.all(jnp.isfinite(logits_m)))

    print("KERNEL_OK")
</pallas_src>

<mosaic_0001>
module attributes {stable_mosaic.version = 11 : i64} {
  func.func @_transformer_kernel(%arg0: memref<16x32xf32, #tpu.memory_space<vmem>>, %arg1: memref<16x32xf32, #tpu.memory_space<vmem>>, %arg2: memref<2x96x32xf32, #tpu.memory_space<vmem>>, %arg3: memref<2x1x96xf32, #tpu.memory_space<vmem>>, %arg4: memref<2x32x32xf32, #tpu.memory_space<vmem>>, %arg5: memref<2x1x32xf32, #tpu.memory_space<vmem>>, %arg6: memref<2x64x32xf32, #tpu.memory_space<vmem>>, %arg7: memref<2x1x64xf32, #tpu.memory_space<vmem>>, %arg8: memref<2x32x64xf32, #tpu.memory_space<vmem>>, %arg9: memref<2x1x32xf32, #tpu.memory_space<vmem>>, %arg10: memref<2x1x32xf32, #tpu.memory_space<vmem>>, %arg11: memref<2x1x32xf32, #tpu.memory_space<vmem>>, %arg12: memref<2x1x32xf32, #tpu.memory_space<vmem>>, %arg13: memref<2x1x32xf32, #tpu.memory_space<vmem>>, %arg14: memref<1x32xf32, #tpu.memory_space<vmem>>, %arg15: memref<1x32xf32, #tpu.memory_space<vmem>>, %arg16: memref<2x96x32xf32, #tpu.memory_space<vmem>>, %arg17: memref<2x1x96xf32, #tpu.memory_space<vmem>>, %arg18: memref<2x32x32xf32, #tpu.memory_space<vmem>>, %arg19: memref<2x1x32xf32, #tpu.memory_space<vmem>>, %arg20: memref<2x96x32xf32, #tpu.memory_space<vmem>>, %arg21: memref<2x1x96xf32, #tpu.memory_space<vmem>>, %arg22: memref<2x32x32xf32, #tpu.memory_space<vmem>>, %arg23: memref<2x1x32xf32, #tpu.memory_space<vmem>>, %arg24: memref<2x64x32xf32, #tpu.memory_space<vmem>>, %arg25: memref<2x1x64xf32, #tpu.memory_space<vmem>>, %arg26: memref<2x32x64xf32, #tpu.memory_space<vmem>>, %arg27: memref<2x1x32xf32, #tpu.memory_space<vmem>>, %arg28: memref<2x1x32xf32, #tpu.memory_space<vmem>>, %arg29: memref<2x1x32xf32, #tpu.memory_space<vmem>>, %arg30: memref<2x1x32xf32, #tpu.memory_space<vmem>>, %arg31: memref<2x1x32xf32, #tpu.memory_space<vmem>>, %arg32: memref<2x1x32xf32, #tpu.memory_space<vmem>>, %arg33: memref<2x1x32xf32, #tpu.memory_space<vmem>>, %arg34: memref<1x32xf32, #tpu.memory_space<vmem>>, %arg35: memref<1x32xf32, #tpu.memory_space<vmem>>, %arg36: memref<128x32xf32, #tpu.memory_space<vmem>>, %arg37: memref<1x128xf32, #tpu.memory_space<vmem>>, %arg38: memref<2x128xf32, #tpu.memory_space<vmem>>) attributes {dimension_semantics = [], scalar_prefetch = 0 : i64, scratch_operands = 0 : i64, tpu.core_type = #tpu.core_type<tc>} {
    %c0 = arith.constant 0 : index
    %c0_0 = arith.constant 0 : index
    %0 = vector.load %arg0[%c0, %c0_0] : memref<16x32xf32, #tpu.memory_space<vmem>>, vector<16x32xf32>
    %c0_1 = arith.constant 0 : index
    %c0_2 = arith.constant 0 : index
    %c0_3 = arith.constant 0 : index
    %1 = vector.load %arg2[%c0_1, %c0_2, %c0_3] : memref<2x96x32xf32, #tpu.memory_space<vmem>>, vector<1x96x32xf32>
    %2 = vector.shape_cast %1 : vector<1x96x32xf32> to vector<96x32xf32>
    %c0_4 = arith.constant 0 : index
    %c0_5 = arith.constant 0 : index
    %c0_6 = arith.constant 0 : index
    %3 = vector.load %arg3[%c0_4, %c0_5, %c0_6] : memref<2x1x96xf32, #tpu.memory_space<vmem>>, vector<1x1x96xf32>
    %4 = vector.shape_cast %3 : vector<1x1x96xf32> to vector<1x96xf32>
    %c0_7 = arith.constant 0 : index
    %c0_8 = arith.constant 0 : index
    %c0_9 = arith.constant 0 : index
    %5 = vector.load %arg4[%c0_7, %c0_8, %c0_9] : memref<2x32x32xf32, #tpu.memory_space<vmem>>, vector<1x32x32xf32>
    %6 = vector.shape_cast %5 : vector<1x32x32xf32> to vector<32x32xf32>
    %c0_10 = arith.constant 0 : index
    %c0_11 = arith.constant 0 : index
    %c0_12 = arith.constant 0 : index
    %7 = vector.load %arg5[%c0_10, %c0_11, %c0_12] : memref<2x1x32xf32, #tpu.memory_space<vmem>>, vector<1x1x32xf32>
    %8 = vector.shape_cast %7 : vector<1x1x32xf32> to vector<1x32xf32>
    %cst = arith.constant dense<0.000000e+00> : vector<16x96xf32>
    %9 = tpu.matmul %0, %2, %cst {dimension_numbers = #tpu.dot_dimension_numbers<[1], [1], [0], [0], [0, 0, 1, 0], [], []>} : vector<16x32xf32>, vector<96x32xf32>, vector<16x96xf32> -> vector<16x96xf32>
    %10 = vector.broadcast %4 : vector<1x96xf32> to vector<16x96xf32>
    %11 = arith.addf %9, %10 : vector<16x96xf32>
    %12 = vector.extract_strided_slice %11 {offsets = [0, 0], sizes = [16, 32], strides = [1, 1]} : vector<16x96xf32> to vector<16x32xf32>
    %13 = vector.extract_strided_slice %11 {offsets = [0, 32], sizes = [16, 32], strides = [1, 1]} : vector<16x96xf32> to vector<16x32xf32>
    %14 = vector.extract_strided_slice %11 {offsets = [0, 64], sizes = [16, 32], strides = [1, 1]} : vector<16x96xf32> to vector<16x32xf32>
    %cst_13 = arith.constant 0.353553385 : f32
    %15 = vector.broadcast %cst_13 : f32 to vector<16x32xf32>
    %16 = arith.mulf %12, %15 : vector<16x32xf32>
    %17 = vector.shape_cast %16 : vector<16x32xf32> to vector<2x8x32xf32>
    %18 = vector.shape_cast %13 : vector<16x32xf32> to vector<2x8x32xf32>
    %19 = vector.shape_cast %14 : vector<16x32xf32> to vector<2x8x32xf32>
    %20 = vector.extract_strided_slice %17 {offsets = [0, 0, 0], sizes = [2, 8, 8], strides = [1, 1, 1]} : vector<2x8x32xf32> to vector<2x8x8xf32>
    %21 = vector.extract_strided_slice %18 {offsets = [0, 0, 0], sizes = [2, 8, 8], strides = [1, 1, 1]} : vector<2x8x32xf32> to vector<2x8x8xf32>
    %22 = vector.extract_strided_slice %19 {offsets = [0, 0, 0], sizes = [2, 8, 8], strides = [1, 1, 1]} : vector<2x8x32xf32> to vector<2x8x8xf32>
    "tpu.trace_start"() <{level = 10 : i32, message = "bqd,bkd->bqk"}> : () -> ()
    %cst_14 = arith.constant dense<0.000000e+00> : vector<2x8x8xf32>
    %23 = tpu.matmul %20, %21, %cst_14 {dimension_numbers = #tpu.dot_dimension_numbers<[2], [2], [1], [1], [0, 0, 0, 1, 1, 1], [0], [0]>} : vector<2x8x8xf32>, vector<2x8x8xf32>, vector<2x8x8xf32> -> vector<2x8x8xf32>
    "tpu.trace_stop"() : () -> ()
    %cst_15 = arith.constant dense<0xFF800000> : vector<2x8xf32>
    %24 = vector.multi_reduction <maximumf>, %23, %cst_15 [2] : vector<2x8x8xf32> to vector<2x8xf32>
    %25 = vector.shape_cast %24 : vector<2x8xf32> to vector<2x8x1xf32>
    %26 = vector.broadcast %25 : vector<2x8x1xf32> to vector<2x8x8xf32>
    %27 = arith.subf %23, %26 : vector<2x8x8xf32>
    %28 = math.exp %27 : vector<2x8x8xf32>
    %cst_16 = arith.constant dense<0.000000e+00> : vector<2x8xf32>
    %29 = vector.multi_reduction <add>, %28, %cst_16 [2] : vector<2x8x8xf32> to vector<2x8xf32>
    %30 = vector.shape_cast %29 : vector<2x8xf32> to vector<2x8x1xf32>
    %31 = tpu.reciprocal %30 {approx = true} : vector<2x8x1xf32> -> vector<2x8x1xf32>
    %32 = vector.broadcast %31 : vector<2x8x1xf32> to vector<2x8x8xf32>
    %33 = arith.mulf %28, %32 : vector<2x8x8xf32>
    "tpu.trace_start"() <{level = 10 : i32, message = "bqk,bkd->bqd"}> : () -> ()
    %cst_17 = arith.constant dense<0.000000e+00> : vector<2x8x8xf32>
    %34 = tpu.matmul %33, %22, %cst_17 {dimension_numbers = #tpu.dot_dimension_numbers<[2], [1], [1], [2], [0, 0, 0, 1, 1, 2], [0], [0]>} : vector<2x8x8xf32>, vector<2x8x8xf32>, vector<2x8x8xf32> -> vector<2x8x8xf32>
    "tpu.trace_stop"() : () -> ()
    %35 = vector.extract_strided_slice %17 {offsets = [0, 0, 8], sizes = [2, 8, 8], strides = [1, 1, 1]} : vector<2x8x32xf32> to vector<2x8x8xf32>
    %36 = vector.extract_strided_slice %18 {offsets = [0, 0, 8], sizes = [2, 8, 8], strides = [1, 1, 1]} : vector<2x8x32xf32> to vector<2x8x8xf32>
    %37 = vector.extract_strided_slice %19 {offsets = [0, 0, 8], sizes = [2, 8, 8], strides = [1, 1, 1]} : vector<2x8x32xf32> to vector<2x8x8xf32>
    "tpu.trace_start"() <{level = 10 : i32, message = "bqd,bkd->bqk"}> : () -> ()
    %cst_18 = arith.constant dense<0.000000e+00> : vector<2x8x8xf32>
    %38 = tpu.matmul %35, %36, %cst_18 {dimension_numbers = #tpu.dot_dimension_numbers<[2], [2], [1], [1], [0, 0, 0, 1, 1, 1], [0], [0]>} : vector<2x8x8xf32>, vector<2x8x8xf32>, vector<2x8x8xf32> -> vector<2x8x8xf32>
    "tpu.trace_stop"() : () -> ()
    %cst_19 = arith.constant dense<0xFF800000> : vector<2x8xf32>
    %39 = vector.multi_reduction <maximumf>, %38, %cst_19 [2] : vector<2x8x8xf32> to vector<2x8xf32>
    %40 = vector.shape_cast %39 : vector<2x8xf32> to vector<2x8x1xf32>
    %41 = vector.broadcast %40 : vector<2x8x1xf32> to vector<2x8x8xf32>
    %42 = arith.subf %38, %41 : vector<2x8x8xf32>
    %43 = math.exp %42 : vector<2x8x8xf32>
    %cst_20 = arith.constant dense<0.000000e+00> : vector<2x8xf32>
    %44 = vector.multi_reduction <add>, %43, %cst_20 [2] : vector<2x8x8xf32> to vector<2x8xf32>
    %45 = vector.shape_cast %44 : vector<2x8xf32> to vector<2x8x1xf32>
    %46 = tpu.reciprocal %45 {approx = true} : vector<2x8x1xf32> -> vector<2x8x1xf32>
    %47 = vector.broadcast %46 : vector<2x8x1xf32> to vector<2x8x8xf32>
    %48 = arith.mulf %43, %47 : vector<2x8x8xf32>
    "tpu.trace_start"() <{level = 10 : i32, message = "bqk,bkd->bqd"}> : () -> ()
    %cst_21 = arith.constant dense<0.000000e+00> : vector<2x8x8xf32>
    %49 = tpu.matmul %48, %37, %cst_21 {dimension_numbers = #tpu.dot_dimension_numbers<[2], [1], [1], [2], [0, 0, 0, 1, 1, 2], [0], [0]>} : vector<2x8x8xf32>, vector<2x8x8xf32>, vector<2x8x8xf32> -> vector<2x8x8xf32>
    "tpu.trace_stop"() : () -> ()
    %50 = vector.extract_strided_slice %17 {offsets = [0, 0, 16], sizes = [2, 8, 8], strides = [1, 1, 1]} : vector<2x8x32xf32> to vector<2x8x8xf32>
    %51 = vector.extract_strided_slice %18 {offsets = [0, 0, 16], sizes = [2, 8, 8], strides = [1, 1, 1]} : vector<2x8x32xf32> to vector<2x8x8xf32>
    %52 = vector.extract_strided_slice %19 {offsets = [0, 0, 16], sizes = [2, 8, 8], strides = [1, 1, 1]} : vector<2x8x32xf32> to vector<2x8x8xf32>
    "tpu.trace_start"() <{level = 10 : i32, message = "bqd,bkd->bqk"}> : () -> ()
    %cst_22 = arith.constant dense<0.000000e+00> : vector<2x8x8xf32>
    %53 = tpu.matmul %50, %51, %cst_22 {dimension_numbers = #tpu.dot_dimension_numbers<[2], [2], [1], [1], [0, 0, 0, 1, 1, 1], [0], [0]>} : vector<2x8x8xf32>, vector<2x8x8xf32>, vector<2x8x8xf32> -> vector<2x8x8xf32>
    "tpu.trace_stop"() : () -> ()
    %cst_23 = arith.constant dense<0xFF800000> : vector<2x8xf32>
    %54 = vector.multi_reduction <maximumf>, %53, %cst_23 [2] : vector<2x8x8xf32> to vector<2x8xf32>
    %55 = vector.shape_cast %54 : vector<2x8xf32> to vector<2x8x1xf32>
    %56 = vector.broadcast %55 : vector<2x8x1xf32> to vector<2x8x8xf32>
    %57 = arith.subf %53, %56 : vector<2x8x8xf32>
    %58 = math.exp %57 : vector<2x8x8xf32>
    %cst_24 = arith.constant dense<0.000000e+00> : vector<2x8xf32>
    %59 = vector.multi_reduction <add>, %58, %cst_24 [2] : vector<2x8x8xf32> to vector<2x8xf32>
    %60 = vector.shape_cast %59 : vector<2x8xf32> to vector<2x8x1xf32>
    %61 = tpu.reciprocal %60 {approx = true} : vector<2x8x1xf32> -> vector<2x8x1xf32>
    %62 = vector.broadcast %61 : vector<2x8x1xf32> to vector<2x8x8xf32>
    %63 = arith.mulf %58, %62 : vector<2x8x8xf32>
    "tpu.trace_start"() <{level = 10 : i32, message = "bqk,bkd->bqd"}> : () -> ()
    %cst_25 = arith.constant dense<0.000000e+00> : vector<2x8x8xf32>
    %64 = tpu.matmul %63, %52, %cst_25 {dimension_numbers = #tpu.dot_dimension_numbers<[2], [1], [1], [2], [0, 0, 0, 1, 1, 2], [0], [0]>} : vector<2x8x8xf32>, vector<2x8x8xf32>, vector<2x8x8xf32> -> vector<2x8x8xf32>
    "tpu.trace_stop"() : () -> ()
    %65 = vector.extract_strided_slice %17 {offsets = [0, 0, 24], sizes = [2, 8, 8], strides = [1, 1, 1]} : vector<2x8x32xf32> to vector<2x8x8xf32>
    %66 = vector.extract_strided_slice %18 {offsets = [0, 0, 24], sizes = [2, 8, 8], strides = [1, 1, 1]} : vector<2x8x32xf32> to vector<2x8x8xf32>
    %67 = vector.extract_strided_slice %19 {offsets = [0, 0, 24], sizes = [2, 8, 8], strides = [1, 1, 1]} : vector<2x8x32xf32> to vector<2x8x8xf32>
    "tpu.trace_start"() <{level = 10 : i32, message = "bqd,bkd->bqk"}> : () -> ()
    %cst_26 = arith.constant dense<0.000000e+00> : vector<2x8x8xf32>
    %68 = tpu.matmul %65, %66, %cst_26 {dimension_numbers = #tpu.dot_dimension_numbers<[2], [2], [1], [1], [0, 0, 0, 1, 1, 1], [0], [0]>} : vector<2x8x8xf32>, vector<2x8x8xf32>, vector<2x8x8xf32> -> vector<2x8x8xf32>
    "tpu.trace_stop"() : () -> ()
    %cst_27 = arith.constant dense<0xFF800000> : vector<2x8xf32>
    %69 = vector.multi_reduction <maximumf>, %68, %cst_27 [2] : vector<2x8x8xf32> to vector<2x8xf32>
    %70 = vector.shape_cast %69 : vector<2x8xf32> to vector<2x8x1xf32>
    %71 = vector.broadcast %70 : vector<2x8x1xf32> to vector<2x8x8xf32>
    %72 = arith.subf %68, %71 : vector<2x8x8xf32>
    %73 = math.exp %72 : vector<2x8x8xf32>
    %cst_28 = arith.constant dense<0.000000e+00> : vector<2x8xf32>
    %74 = vector.multi_reduction <add>, %73, %cst_28 [2] : vector<2x8x8xf32> to vector<2x8xf32>
    %75 = vector.shape_cast %74 : vector<2x8xf32> to vector<2x8x1xf32>
    %76 = tpu.reciprocal %75 {approx = true} : vector<2x8x1xf32> -> vector<2x8x1xf32>
    %77 = vector.broadcast %76 : vector<2x8x1xf32> to vector<2x8x8xf32>
    %78 = arith.mulf %73, %77 : vector<2x8x8xf32>
    "tpu.trace_start"() <{level = 10 : i32, message = "bqk,bkd->bqd"}> : () -> ()
    %cst_29 = arith.constant dense<0.000000e+00> : vector<2x8x8xf32>
    %79 = tpu.matmul %78, %67, %cst_29 {dimension_numbers = #tpu.dot_dimension_numbers<[2], [1], [1], [2], [0, 0, 0, 1, 1, 2], [0], [0]>} : vector<2x8x8xf32>, vector<2x8x8xf32>, vector<2x8x8xf32> -> vector<2x8x8xf32>
    "tpu.trace_stop"() : () -> ()
    %80 = tpu.concatenate %34, %49, %64, %79 in 2 : vector<2x8x8xf32>, vector<2x8x8xf32>, vector<2x8x8xf32>, vector<2x8x8xf32> -> vector<2x8x32xf32>
    %81 = vector.shape_cast %80 : vector<2x8x32xf32> to vector<16x32xf32>
    %cst_30 = arith.constant dense<0.000000e+00> : vector<16x32xf32>
    %82 = tpu.matmul %81, %6, %cst_30 {dimension_numbers = #tpu.dot_dimension_numbers<[1], [1], [0], [0], [0, 0, 1, 0], [], []>} : vector<16x32xf32>, vector<32x32xf32>, vector<16x32xf32> -> vector<16x32xf32>
    %83 = vector.broadcast %8 : vector<1x32xf32> to vector<16x32xf32>
    %84 = arith.addf %82, %83 : vector<16x32xf32>
    %85 = arith.addf %0, %84 : vector<16x32xf32>
    %c0_31 = arith.constant 0 : index
    %c0_32 = arith.constant 0 : index
    %c0_33 = arith.constant 0 : index
    %86 = vector.load %arg10[%c0_31, %c0_32, %c0_33] : memref<2x1x32xf32, #tpu.memory_space<vmem>>, vector<1x1x32xf32>
    %87 = vector.shape_cast %86 : vector<1x1x32xf32> to vector<1x32xf32>
    %c0_34 = arith.constant 0 : index
    %c0_35 = arith.constant 0 : index
    %c0_36 = arith.constant 0 : index
    %88 = vector.load %arg11[%c0_34, %c0_35, %c0_36] : memref<2x1x32xf32, #tpu.memory_space<vmem>>, vector<1x1x32xf32>
    %89 = vector.shape_cast %88 : vector<1x1x32xf32> to vector<1x32xf32>
    %cst_37 = arith.constant dense<0.000000e+00> : vector<16xf32>
    %90 = vector.multi_reduction <add>, %85, %cst_37 [1] : vector<16x32xf32> to vector<16xf32>
    %91 = vector.shape_cast %90 : vector<16xf32> to vector<16x1xf32>
    %cst_38 = arith.constant 3.200000e+01 : f32
    %92 = vector.broadcast %cst_38 : f32 to vector<16x1xf32>
    %93 = arith.divf %91, %92 : vector<16x1xf32>
    %94 = vector.broadcast %93 : vector<16x1xf32> to vector<16x32xf32>
    %95 = arith.subf %85, %94 : vector<16x32xf32>
    %96 = arith.mulf %95, %95 : vector<16x32xf32>
    %cst_39 = arith.constant dense<0.000000e+00> : vector<16xf32>
    %97 = vector.multi_reduction <add>, %96, %cst_39 [1] : vector<16x32xf32> to vector<16xf32>
    %98 = vector.shape_cast %97 : vector<16xf32> to vector<16x1xf32>
    %cst_40 = arith.constant 3.200000e+01 : f32
    %99 = vector.broadcast %cst_40 : f32 to vector<16x1xf32>
    %100 = arith.divf %98, %99 : vector<16x1xf32>
    %101 = vector.broadcast %93 : vector<16x1xf32> to vector<16x32xf32>
    %102 = arith.subf %85, %101 : vector<16x32xf32>
    %cst_41 = arith.constant 9.99999974E-6 : f32
    %103 = vector.broadcast %cst_41 : f32 to vector<16x1xf32>
    %104 = arith.addf %100, %103 : vector<16x1xf32>
    %105 = math.rsqrt %104 : vector<16x1xf32>
    %106 = vector.broadcast %105 : vector<16x1xf32> to vector<16x32xf32>
    %107 = arith.mulf %102, %106 : vector<16x32xf32>
    %108 = vector.broadcast %87 : vector<1x32xf32> to vector<16x32xf32>
    %109 = arith.mulf %107, %108 : vector<16x32xf32>
    %110 = vector.broadcast %89 : vector<1x32xf32> to vector<16x32xf32>
    %111 = arith.addf %109, %110 : vector<16x32xf32>
    %c0_42 = arith.constant 0 : index
    %c0_43 = arith.constant 0 : index
    %c0_44 = arith.constant 0 : index
    %112 = vector.load %arg6[%c0_42, %c0_43, %c0_44] : memref<2x64x32xf32, #tpu.memory_space<vmem>>, vector<1x64x32xf32>
    %113 = vector.shape_cast %112 : vector<1x64x32xf32> to vector<64x32xf32>
    %c0_45 = arith.constant 0 : index
    %c0_46 = arith.constant 0 : index
    %c0_47 = arith.constant 0 : index
    %114 = vector.load %arg7[%c0_45, %c0_46, %c0_47] : memref<2x1x64xf32, #tpu.memory_space<vmem>>, vector<1x1x64xf32>
    %115 = vector.shape_cast %114 : vector<1x1x64xf32> to vector<1x64xf32>
    %c0_48 = arith.constant 0 : index
    %c0_49 = arith.constant 0 : index
    %c0_50 = arith.constant 0 : index
    %116 = vector.load %arg8[%c0_48, %c0_49, %c0_50] : memref<2x32x64xf32, #tpu.memory_space<vmem>>, vector<1x32x64xf32>
    %117 = vector.shape_cast %116 : vector<1x32x64xf32> to vector<32x64xf32>
    %c0_51 = arith.constant 0 : index
    %c0_52 = arith.constant 0 : index
    %c0_53 = arith.constant 0 : index
    %118 = vector.load %arg9[%c0_51, %c0_52, %c0_53] : memref<2x1x32xf32, #tpu.memory_space<vmem>>, vector<1x1x32xf32>
    %119 = vector.shape_cast %118 : vector<1x1x32xf32> to vector<1x32xf32>
    %cst_54 = arith.constant dense<0.000000e+00> : vector<16x64xf32>
    %120 = tpu.matmul %111, %113, %cst_54 {dimension_numbers = #tpu.dot_dimension_numbers<[1], [1], [0], [0], [0, 0, 1, 0], [], []>} : vector<16x32xf32>, vector<64x32xf32>, vector<16x64xf32> -> vector<16x64xf32>
    %121 = vector.broadcast %115 : vector<1x64xf32> to vector<16x64xf32>
    %122 = arith.addf %120, %121 : vector<16x64xf32>
    %cst_55 = arith.constant 0.000000e+00 : f32
    %123 = vector.broadcast %cst_55 : f32 to vector<16x64xf32>
    %124 = arith.maximumf %122, %123 : vector<16x64xf32>
    %cst_56 = arith.constant dense<0.000000e+00> : vector<16x32xf32>
    %125 = tpu.matmul %124, %117, %cst_56 {dimension_numbers = #tpu.dot_dimension_numbers<[1], [1], [0], [0], [0, 0, 1, 0], [], []>} : vector<16x64xf32>, vector<32x64xf32>, vector<16x32xf32> -> vector<16x32xf32>
    %126 = vector.broadcast %119 : vector<1x32xf32> to vector<16x32xf32>
    %127 = arith.addf %125, %126 : vector<16x32xf32>
    %128 = arith.addf %111, %127 : vector<16x32xf32>
    %c0_57 = arith.constant 0 : index
    %c0_58 = arith.constant 0 : index
    %c0_59 = arith.constant 0 : index
    %129 = vector.load %arg12[%c0_57, %c0_58, %c0_59] : memref<2x1x32xf32, #tpu.memory_space<vmem>>, vector<1x1x32xf32>
    %130 = vector.shape_cast %129 : vector<1x1x32xf32> to vector<1x32xf32>
    %c0_60 = arith.constant 0 : index
    %c0_61 = arith.constant 0 : index
    %c0_62 = arith.constant 0 : index
    %131 = vector.load %arg13[%c0_60, %c0_61, %c0_62] : memref<2x1x32xf32, #tpu.memory_space<vmem>>, vector<1x1x32xf32>
    %132 = vector.shape_cast %131 : vector<1x1x32xf32> to vector<1x32xf32>
    %cst_63 = arith.constant dense<0.000000e+00> : vector<16xf32>
    %133 = vector.multi_reduction <add>, %128, %cst_63 [1] : vector<16x32xf32> to vector<16xf32>
    %134 = vector.shape_cast %133 : vector<16xf32> to vector<16x1xf32>
    %cst_64 = arith.constant 3.200000e+01 : f32
    %135 = vector.broadcast %cst_64 : f32 to vector<16x1xf32>
    %136 = arith.divf %134, %135 : vector<16x1xf32>
    %137 = vector.broadcast %136 : vector<16x1xf32> to vector<16x32xf32>
    %138 = arith.subf %128, %137 : vector<16x32xf32>
    %139 = arith.mulf %138, %138 : vector<16x32xf32>
    %cst_65 = arith.constant dense<0.000000e+00> : vector<16xf32>
    %140 = vector.multi_reduction <add>, %139, %cst_65 [1] : vector<16x32xf32> to vector<16xf32>
    %141 = vector.shape_cast %140 : vector<16xf32> to vector<16x1xf32>
    %cst_66 = arith.constant 3.200000e+01 : f32
    %142 = vector.broadcast %cst_66 : f32 to vector<16x1xf32>
    %143 = arith.divf %141, %142 : vector<16x1xf32>
    %144 = vector.broadcast %136 : vector<16x1xf32> to vector<16x32xf32>
    %145 = arith.subf %128, %144 : vector<16x32xf32>
    %cst_67 = arith.constant 9.99999974E-6 : f32
    %146 = vector.broadcast %cst_67 : f32 to vector<16x1xf32>
    %147 = arith.addf %143, %146 : vector<16x1xf32>
    %148 = math.rsqrt %147 : vector<16x1xf32>
    %149 = vector.broadcast %148 : vector<16x1xf32> to vector<16x32xf32>
    %150 = arith.mulf %145, %149 : vector<16x32xf32>
    %151 = vector.broadcast %130 : vector<1x32xf32> to vector<16x32xf32>
    %152 = arith.mulf %150, %151 : vector<16x32xf32>
    %153 = vector.broadcast %132 : vector<1x32xf32> to vector<16x32xf32>
    %154 = arith.addf %152, %153 : vector<16x32xf32>
    %c1 = arith.constant 1 : index
    %c0_68 = arith.constant 0 : index
    %c0_69 = arith.constant 0 : index
    %155 = vector.load %arg2[%c1, %c0_68, %c0_69] : memref<2x96x32xf32, #tpu.memory_space<vmem>>, vector<1x96x32xf32>
    %156 = vector.shape_cast %155 : vector<1x96x32xf32> to vector<96x32xf32>
    %c1_70 = arith.constant 1 : index
    %c0_71 = arith.constant 0 : index
    %c0_72 = arith.constant 0 : index
    %157 = vector.load %arg3[%c1_70, %c0_71, %c0_72] : memref<2x1x96xf32, #tpu.memory_space<vmem>>, vector<1x1x96xf32>
    %158 = vector.shape_cast %157 : vector<1x1x96xf32> to vector<1x96xf32>
    %c1_73 = arith.constant 1 : index
    %c0_74 = arith.constant 0 : index
    %c0_75 = arith.constant 0 : index
    %159 = vector.load %arg4[%c1_73, %c0_74, %c0_75] : memref<2x32x32xf32, #tpu.memory_space<vmem>>, vector<1x32x32xf32>
    %160 = vector.shape_cast %159 : vector<1x32x32xf32> to vector<32x32xf32>
    %c1_76 = arith.constant 1 : index
    %c0_77 = arith.constant 0 : index
    %c0_78 = arith.constant 0 : index
    %161 = vector.load %arg5[%c1_76, %c0_77, %c0_78] : memref<2x1x32xf32, #tpu.memory_space<vmem>>, vector<1x1x32xf32>
    %162 = vector.shape_cast %161 : vector<1x1x32xf32> to vector<1x32xf32>
    %cst_79 = arith.constant dense<0.000000e+00> : vector<16x96xf32>
    %163 = tpu.matmul %154, %156, %cst_79 {dimension_numbers = #tpu.dot_dimension_numbers<[1], [1], [0], [0], [0, 0, 1, 0], [], []>} : vector<16x32xf32>, vector<96x32xf32>, vector<16x96xf32> -> vector<16x96xf32>
    %164 = vector.broadcast %158 : vector<1x96xf32> to vector<16x96xf32>
    %165 = arith.addf %163, %164 : vector<16x96xf32>
    %166 = vector.extract_strided_slice %165 {offsets = [0, 0], sizes = [16, 32], strides = [1, 1]} : vector<16x96xf32> to vector<16x32xf32>
    %167 = vector.extract_strided_slice %165 {offsets = [0, 32], sizes = [16, 32], strides = [1, 1]} : vector<16x96xf32> to vector<16x32xf32>
    %168 = vector.extract_strided_slice %165 {offsets = [0, 64], sizes = [16, 32], strides = [1, 1]} : vector<16x96xf32> to vector<16x32xf32>
    %cst_80 = arith.constant 0.353553385 : f32
    %169 = vector.broadcast %cst_80 : f32 to vector<16x32xf32>
    %170 = arith.mulf %166, %169 : vector<16x32xf32>
    %171 = vector.shape_cast %170 : vector<16x32xf32> to vector<2x8x32xf32>
    %172 = vector.shape_cast %167 : vector<16x32xf32> to vector<2x8x32xf32>
    %173 = vector.shape_cast %168 : vector<16x32xf32> to vector<2x8x32xf32>
    %174 = vector.extract_strided_slice %171 {offsets = [0, 0, 0], sizes = [2, 8, 8], strides = [1, 1, 1]} : vector<2x8x32xf32> to vector<2x8x8xf32>
    %175 = vector.extract_strided_slice %172 {offsets = [0, 0, 0], sizes = [2, 8, 8], strides = [1, 1, 1]} : vector<2x8x32xf32> to vector<2x8x8xf32>
    %176 = vector.extract_strided_slice %173 {offsets = [0, 0, 0], sizes = [2, 8, 8], strides = [1, 1, 1]} : vector<2x8x32xf32> to vector<2x8x8xf32>
    "tpu.trace_start"() <{level = 10 : i32, message = "bqd,bkd->bqk"}> : () -> ()
    %cst_81 = arith.constant dense<0.000000e+00> : vector<2x8x8xf32>
    %177 = tpu.matmul %174, %175, %cst_81 {dimension_numbers = #tpu.dot_dimension_numbers<[2], [2], [1], [1], [0, 0, 0, 1, 1, 1], [0], [0]>} : vector<2x8x8xf32>, vector<2x8x8xf32>, vector<2x8x8xf32> -> vector<2x8x8xf32>
    "tpu.trace_stop"() : () -> ()
    %cst_82 = arith.constant dense<0xFF800000> : vector<2x8xf32>
    %178 = vector.multi_reduction <maximumf>, %177, %cst_82 [2] : vector<2x8x8xf32> to vector<2x8xf32>
    %179 = vector.shape_cast %178 : vector<2x8xf32> to vector<2x8x1xf32>
    %180 = vector.broadcast %179 : vector<2x8x1xf32> to vector<2x8x8xf32>
    %181 = arith.subf %177, %180 : vector<2x8x8xf32>
    %182 = math.exp %181 : vector<2x8x8xf32>
    %cst_83 = arith.constant dense<0.000000e+00> : vector<2x8xf32>
    %183 = vector.multi_reduction <add>, %182, %cst_83 [2] : vector<2x8x8xf32> to vector<2x8xf32>
    %184 = vector.shape_cast %183 : vector<2x8xf32> to vector<2x8x1xf32>
    %185 = tpu.reciprocal %184 {approx = true} : vector<2x8x1xf32> -> vector<2x8x1xf32>
    %186 = vector.broadcast %185 : vector<2x8x1xf32> to vector<2x8x8xf32>
    %187 = arith.mulf %182, %186 : vector<2x8x8xf32>
    "tpu.trace_start"() <{level = 10 : i32, message = "bqk,bkd->bqd"}> : () -> ()
    %cst_84 = arith.constant dense<0.000000e+00> : vector<2x8x8xf32>
    %188 = tpu.matmul %187, %176, %cst_84 {dimension_numbers = #tpu.dot_dimension_numbers<[2], [1], [1], [2], [0, 0, 0, 1, 1, 2], [0], [0]>} : vector<2x8x8xf32>, vector<2x8x8xf32>, vector<2x8x8xf32> -> vector<2x8x8xf32>
    "tpu.trace_stop"() : () -> ()
    %189 = vector.extract_strided_slice %171 {offsets = [0, 0, 8], sizes = [2, 8, 8], strides = [1, 1, 1]} : vector<2x8x32xf32> to vector<2x8x8xf32>
    %190 = vector.extract_strided_slice %172 {offsets = [0, 0, 8], sizes = [2, 8, 8], strides = [1, 1, 1]} : vector<2x8x32xf32> to vector<2x8x8xf32>
    %191 = vector.extract_strided_slice %173 {offsets = [0, 0, 8], sizes = [2, 8, 8], strides = [1, 1, 1]} : vector<2x8x32xf32> to vector<2x8x8xf32>
    "tpu.trace_start"() <{level = 10 : i32, message = "bqd,bkd->bqk"}> : () -> ()
    %cst_85 = arith.constant dense<0.000000e+00> : vector<2x8x8xf32>
    %192 = tpu.matmul %189, %190, %cst_85 {dimension_numbers = #tpu.dot_dimension_numbers<[2], [2], [1], [1], [0, 0, 0, 1, 1, 1], [0], [0]>} : vector<2x8x8xf32>, vector<2x8x8xf32>, vector<2x8x8xf32> -> vector<2x8x8xf32>
    "tpu.trace_stop"() : () -> ()
    %cst_86 = arith.constant dense<0xFF800000> : vector<2x8xf32>
    %193 = vector.multi_reduction <maximumf>, %192, %cst_86 [2] : vector<2x8x8xf32> to vector<2x8xf32>
    %194 = vector.shape_cast %193 : vector<2x8xf32> to vector<2x8x1xf32>
    %195 = vector.broadcast %194 : vector<2x8x1xf32> to vector<2x8x8xf32>
    %196 = arith.subf %192, %195 : vector<2x8x8xf32>
    %197 = math.exp %196 : vector<2x8x8xf32>
    %cst_87 = arith.constant dense<0.000000e+00> : vector<2x8xf32>
    %198 = vector.multi_reduction <add>, %197, %cst_87 [2] : vector<2x8x8xf32> to vector<2x8xf32>
    %199 = vector.shape_cast %198 : vector<2x8xf32> to vector<2x8x1xf32>
    %200 = tpu.reciprocal %199 {approx = true} : vector<2x8x1xf32> -> vector<2x8x1xf32>
    %201 = vector.broadcast %200 : vector<2x8x1xf32> to vector<2x8x8xf32>
    %202 = arith.mulf %197, %201 : vector<2x8x8xf32>
    "tpu.trace_start"() <{level = 10 : i32, message = "bqk,bkd->bqd"}> : () -> ()
    %cst_88 = arith.constant dense<0.000000e+00> : vector<2x8x8xf32>
    %203 = tpu.matmul %202, %191, %cst_88 {dimension_numbers = #tpu.dot_dimension_numbers<[2], [1], [1], [2], [0, 0, 0, 1, 1, 2], [0], [0]>} : vector<2x8x8xf32>, vector<2x8x8xf32>, vector<2x8x8xf32> -> vector<2x8x8xf32>
    "tpu.trace_stop"() : () -> ()
    %204 = vector.extract_strided_slice %171 {offsets = [0, 0, 16], sizes = [2, 8, 8], strides = [1, 1, 1]} : vector<2x8x32xf32> to vector<2x8x8xf32>
    %205 = vector.extract_strided_slice %172 {offsets = [0, 0, 16], sizes = [2, 8, 8], strides = [1, 1, 1]} : vector<2x8x32xf32> to vector<2x8x8xf32>
    %206 = vector.extract_strided_slice %173 {offsets = [0, 0, 16], sizes = [2, 8, 8], strides = [1, 1, 1]} : vector<2x8x32xf32> to vector<2x8x8xf32>
    "tpu.trace_start"() <{level = 10 : i32, message = "bqd,bkd->bqk"}> : () -> ()
    %cst_89 = arith.constant dense<0.000000e+00> : vector<2x8x8xf32>
    %207 = tpu.matmul %204, %205, %cst_89 {dimension_numbers = #tpu.dot_dimension_numbers<[2], [2], [1], [1], [0, 0, 0, 1, 1, 1], [0], [0]>} : vector<2x8x8xf32>, vector<2x8x8xf32>, vector<2x8x8xf32> -> vector<2x8x8xf32>
    "tpu.trace_stop"() : () -> ()
    %cst_90 = arith.constant dense<0xFF800000> : vector<2x8xf32>
    %208 = vector.multi_reduction <maximumf>, %207, %cst_90 [2] : vector<2x8x8xf32> to vector<2x8xf32>
    %209 = vector.shape_cast %208 : vector<2x8xf32> to vector<2x8x1xf32>
    %210 = vector.broadcast %209 : vector<2x8x1xf32> to vector<2x8x8xf32>
    %211 = arith.subf %207, %210 : vector<2x8x8xf32>
    %212 = math.exp %211 : vector<2x8x8xf32>
    %cst_91 = arith.constant dense<0.000000e+00> : vector<2x8xf32>
    %213 = vector.multi_reduction <add>, %212, %cst_91 [2] : vector<2x8x8xf32> to vector<2x8xf32>
    %214 = vector.shape_cast %213 : vector<2x8xf32> to vector<2x8x1xf32>
    %215 = tpu.reciprocal %214 {approx = true} : vector<2x8x1xf32> -> vector<2x8x1xf32>
    %216 = vector.broadcast %215 : vector<2x8x1xf32> to vector<2x8x8xf32>
    %217 = arith.mulf %212, %216 : vector<2x8x8xf32>
    "tpu.trace_start"() <{level = 10 : i32, message = "bqk,bkd->bqd"}> : () -> ()
    %cst_92 = arith.constant dense<0.000000e+00> : vector<2x8x8xf32>
    %218 = tpu.matmul %217, %206, %cst_92 {dimension_numbers = #tpu.dot_dimension_numbers<[2], [1], [1], [2], [0, 0, 0, 1, 1, 2], [0], [0]>} : vector<2x8x8xf32>, vector<2x8x8xf32>, vector<2x8x8xf32> -> vector<2x8x8xf32>
    "tpu.trace_stop"() : () -> ()
    %219 = vector.extract_strided_slice %171 {offsets = [0, 0, 24], sizes = [2, 8, 8], strides = [1, 1, 1]} : vector<2x8x32xf32> to vector<2x8x8xf32>
    %220 = vector.extract_strided_slice %172 {offsets = [0, 0, 24], sizes = [2, 8, 8], strides = [1, 1, 1]} : vector<2x8x32xf32> to vector<2x8x8xf32>
    %221 = vector.extract_strided_slice %173 {offsets = [0, 0, 24], sizes = [2, 8, 8], strides = [1, 1, 1]} : vector<2x8x32xf32> to vector<2x8x8xf32>
    "tpu.trace_start"() <{level = 10 : i32, message = "bqd,bkd->bqk"}> : () -> ()
    %cst_93 = arith.constant dense<0.000000e+00> : vector<2x8x8xf32>
    %222 = tpu.matmul %219, %220, %cst_93 {dimension_numbers = #tpu.dot_dimension_numbers<[2], [2], [1], [1], [0, 0, 0, 1, 1, 1], [0], [0]>} : vector<2x8x8xf32>, vector<2x8x8xf32>, vector<2x8x8xf32> -> vector<2x8x8xf32>
    "tpu.trace_stop"() : () -> ()
    %cst_94 = arith.constant dense<0xFF800000> : vector<2x8xf32>
    %223 = vector.multi_reduction <maximumf>, %222, %cst_94 [2] : vector<2x8x8xf32> to vector<2x8xf32>
    %224 = vector.shape_cast %223 : vector<2x8xf32> to vector<2x8x1xf32>
    %225 = vector.broadcast %224 : vector<2x8x1xf32> to vector<2x8x8xf32>
    %226 = arith.subf %222, %225 : vector<2x8x8xf32>
    %227 = math.exp %226 : vector<2x8x8xf32>
    %cst_95 = arith.constant dense<0.000000e+00> : vector<2x8xf32>
    %228 = vector.multi_reduction <add>, %227, %cst_95 [2] : vector<2x8x8xf32> to vector<2x8xf32>
    %229 = vector.shape_cast %228 : vector<2x8xf32> to vector<2x8x1xf32>
    %230 = tpu.reciprocal %229 {approx = true} : vector<2x8x1xf32> -> vector<2x8x1xf32>
    %231 = vector.broadcast %230 : vector<2x8x1xf32> to vector<2x8x8xf32>
    %232 = arith.mulf %227, %231 : vector<2x8x8xf32>
    "tpu.trace_start"() <{level = 10 : i32, message = "bqk,bkd->bqd"}> : () -> ()
    %cst_96 = arith.constant dense<0.000000e+00> : vector<2x8x8xf32>
    %233 = tpu.matmul %232, %221, %cst_96 {dimension_numbers = #tpu.dot_dimension_numbers<[2], [1], [1], [2], [0, 0, 0, 1, 1, 2], [0], [0]>} : vector<2x8x8xf32>, vector<2x8x8xf32>, vector<2x8x8xf32> -> vector<2x8x8xf32>
    "tpu.trace_stop"() : () -> ()
    %234 = tpu.concatenate %188, %203, %218, %233 in 2 : vector<2x8x8xf32>, vector<2x8x8xf32>, vector<2x8x8xf32>, vector<2x8x8xf32> -> vector<2x8x32xf32>
    %235 = vector.shape_cast %234 : vector<2x8x32xf32> to vector<16x32xf32>
    %cst_97 = arith.constant dense<0.000000e+00> : vector<16x32xf32>
    %236 = tpu.matmul %235, %160, %cst_97 {dimension_numbers = #tpu.dot_dimension_numbers<[1], [1], [0], [0], [0, 0, 1, 0], [], []>} : vector<16x32xf32>, vector<32x32xf32>, vector<16x32xf32> -> vector<16x32xf32>
    %237 = vector.broadcast %162 : vector<1x32xf32> to vector<16x32xf32>
    %238 = arith.addf %236, %237 : vector<16x32xf32>
    %239 = arith.addf %154, %238 : vector<16x32xf32>
    %c1_98 = arith.constant 1 : index
    %c0_99 = arith.constant 0 : index
    %c0_100 = arith.constant 0 : index
    %240 = vector.load %arg10[%c1_98, %c0_99, %c0_100] : memref<2x1x32xf32, #tpu.memory_space<vmem>>, vector<1x1x32xf32>
    %241 = vector.shape_cast %240 : vector<1x1x32xf32> to vector<1x32xf32>
    %c1_101 = arith.constant 1 : index
    %c0_102 = arith.constant 0 : index
    %c0_103 = arith.constant 0 : index
    %242 = vector.load %arg11[%c1_101, %c0_102, %c0_103] : memref<2x1x32xf32, #tpu.memory_space<vmem>>, vector<1x1x32xf32>
    %243 = vector.shape_cast %242 : vector<1x1x32xf32> to vector<1x32xf32>
    %cst_104 = arith.constant dense<0.000000e+00> : vector<16xf32>
    %244 = vector.multi_reduction <add>, %239, %cst_104 [1] : vector<16x32xf32> to vector<16xf32>
    %245 = vector.shape_cast %244 : vector<16xf32> to vector<16x1xf32>
    %cst_105 = arith.constant 3.200000e+01 : f32
    %246 = vector.broadcast %cst_105 : f32 to vector<16x1xf32>
    %247 = arith.divf %245, %246 : vector<16x1xf32>
    %248 = vector.broadcast %247 : vector<16x1xf32> to vector<16x32xf32>
    %249 = arith.subf %239, %248 : vector<16x32xf32>
    %250 = arith.mulf %249, %249 : vector<16x32xf32>
    %cst_106 = arith.constant dense<0.000000e+00> : vector<16xf32>
    %251 = vector.multi_reduction <add>, %250, %cst_106 [1] : vector<16x32xf32> to vector<16xf32>
    %252 = vector.shape_cast %251 : vector<16xf32> to vector<16x1xf32>
    %cst_107 = arith.constant 3.200000e+01 : f32
    %253 = vector.broadcast %cst_107 : f32 to vector<16x1xf32>
    %254 = arith.divf %252, %253 : vector<16x1xf32>
    %255 = vector.broadcast %247 : vector<16x1xf32> to vector<16x32xf32>
    %256 = arith.subf %239, %255 : vector<16x32xf32>
    %cst_108 = arith.constant 9.99999974E-6 : f32
    %257 = vector.broadcast %cst_108 : f32 to vector<16x1xf32>
    %258 = arith.addf %254, %257 : vector<16x1xf32>
    %259 = math.rsqrt %258 : vector<16x1xf32>
    %260 = vector.broadcast %259 : vector<16x1xf32> to vector<16x32xf32>
    %261 = arith.mulf %256, %260 : vector<16x32xf32>
    %262 = vector.broadcast %241 : vector<1x32xf32> to vector<16x32xf32>
    %263 = arith.mulf %261, %262 : vector<16x32xf32>
    %264 = vector.broadcast %243 : vector<1x32xf32> to vector<16x32xf32>
    %265 = arith.addf %263, %264 : vector<16x32xf32>
    %c1_109 = arith.constant 1 : index
    %c0_110 = arith.constant 0 : index
    %c0_111 = arith.constant 0 : index
    %266 = vector.load %arg6[%c1_109, %c0_110, %c0_111] : memref<2x64x32xf32, #tpu.memory_space<vmem>>, vector<1x64x32xf32>
    %267 = vector.shape_cast %266 : vector<1x64x32xf32> to vector<64x32xf32>
    %c1_112 = arith.constant 1 : index
    %c0_113 = arith.constant 0 : index
    %c0_114 = arith.constant 0 : index
    %268 = vector.load %arg7[%c1_112, %c0_113, %c0_114] : memref<2x1x64xf32, #tpu.memory_space<vmem>>, vector<1x1x64xf32>
    %269 = vector.shape_cast %268 : vector<1x1x64xf32> to vector<1x64xf32>
    %c1_115 = arith.constant 1 : index
    %c0_116 = arith.constant 0 : index
    %c0_117 = arith.constant 0 : index
    %270 = vector.load %arg8[%c1_115, %c0_116, %c0_117] : memref<2x32x64xf32, #tpu.memory_space<vmem>>, vector<1x32x64xf32>
    %271 = vector.shape_cast %270 : vector<1x32x64xf32> to vector<32x64xf32>
    %c1_118 = arith.constant 1 : index
    %c0_119 = arith.constant 0 : index
    %c0_120 = arith.constant 0 : index
    %272 = vector.load %arg9[%c1_118, %c0_119, %c0_120] : memref<2x1x32xf32, #tpu.memory_space<vmem>>, vector<1x1x32xf32>
    %273 = vector.shape_cast %272 : vector<1x1x32xf32> to vector<1x32xf32>
    %cst_121 = arith.constant dense<0.000000e+00> : vector<16x64xf32>
    %274 = tpu.matmul %265, %267, %cst_121 {dimension_numbers = #tpu.dot_dimension_numbers<[1], [1], [0], [0], [0, 0, 1, 0], [], []>} : vector<16x32xf32>, vector<64x32xf32>, vector<16x64xf32> -> vector<16x64xf32>
    %275 = vector.broadcast %269 : vector<1x64xf32> to vector<16x64xf32>
    %276 = arith.addf %274, %275 : vector<16x64xf32>
    %cst_122 = arith.constant 0.000000e+00 : f32
    %277 = vector.broadcast %cst_122 : f32 to vector<16x64xf32>
    %278 = arith.maximumf %276, %277 : vector<16x64xf32>
    %cst_123 = arith.constant dense<0.000000e+00> : vector<16x32xf32>
    %279 = tpu.matmul %278, %271, %cst_123 {dimension_numbers = #tpu.dot_dimension_numbers<[1], [1], [0], [0], [0, 0, 1, 0], [], []>} : vector<16x64xf32>, vector<32x64xf32>, vector<16x32xf32> -> vector<16x32xf32>
    %280 = vector.broadcast %273 : vector<1x32xf32> to vector<16x32xf32>
    %281 = arith.addf %279, %280 : vector<16x32xf32>
    %282 = arith.addf %265, %281 : vector<16x32xf32>
    %c1_124 = arith.constant 1 : index
    %c0_125 = arith.constant 0 : index
    %c0_126 = arith.constant 0 : index
    %283 = vector.load %arg12[%c1_124, %c0_125, %c0_126] : memref<2x1x32xf32, #tpu.memory_space<vmem>>, vector<1x1x32xf32>
    %284 = vector.shape_cast %283 : vector<1x1x32xf32> to vector<1x32xf32>
    %c1_127 = arith.constant 1 : index
    %c0_128 = arith.constant 0 : index
    %c0_129 = arith.constant 0 : index
    %285 = vector.load %arg13[%c1_127, %c0_128, %c0_129] : memref<2x1x32xf32, #tpu.memory_space<vmem>>, vector<1x1x32xf32>
    %286 = vector.shape_cast %285 : vector<1x1x32xf32> to vector<1x32xf32>
    %cst_130 = arith.constant dense<0.000000e+00> : vector<16xf32>
    %287 = vector.multi_reduction <add>, %282, %cst_130 [1] : vector<16x32xf32> to vector<16xf32>
    %288 = vector.shape_cast %287 : vector<16xf32> to vector<16x1xf32>
    %cst_131 = arith.constant 3.200000e+01 : f32
    %289 = vector.broadcast %cst_131 : f32 to vector<16x1xf32>
    %290 = arith.divf %288, %289 : vector<16x1xf32>
    %291 = vector.broadcast %290 : vector<16x1xf32> to vector<16x32xf32>
    %292 = arith.subf %282, %291 : vector<16x32xf32>
    %293 = arith.mulf %292, %292 : vector<16x32xf32>
    %cst_132 = arith.constant dense<0.000000e+00> : vector<16xf32>
    %294 = vector.multi_reduction <add>, %293, %cst_132 [1] : vector<16x32xf32> to vector<16xf32>
    %295 = vector.shape_cast %294 : vector<16xf32> to vector<16x1xf32>
    %cst_133 = arith.constant 3.200000e+01 : f32
    %296 = vector.broadcast %cst_133 : f32 to vector<16x1xf32>
    %297 = arith.divf %295, %296 : vector<16x1xf32>
    %298 = vector.broadcast %290 : vector<16x1xf32> to vector<16x32xf32>
    %299 = arith.subf %282, %298 : vector<16x32xf32>
    %cst_134 = arith.constant 9.99999974E-6 : f32
    %300 = vector.broadcast %cst_134 : f32 to vector<16x1xf32>
    %301 = arith.addf %297, %300 : vector<16x1xf32>
    %302 = math.rsqrt %301 : vector<16x1xf32>
    %303 = vector.broadcast %302 : vector<16x1xf32> to vector<16x32xf32>
    %304 = arith.mulf %299, %303 : vector<16x32xf32>
    %305 = vector.broadcast %284 : vector<1x32xf32> to vector<16x32xf32>
    %306 = arith.mulf %304, %305 : vector<16x32xf32>
    %307 = vector.broadcast %286 : vector<1x32xf32> to vector<16x32xf32>
    %308 = arith.addf %306, %307 : vector<16x32xf32>
    %c0_135 = arith.constant 0 : index
    %c0_136 = arith.constant 0 : index
    %309 = vector.load %arg14[%c0_135, %c0_136] : memref<1x32xf32, #tpu.memory_space<vmem>>, vector<1x32xf32>
    %c0_137 = arith.constant 0 : index
    %c0_138 = arith.constant 0 : index
    %310 = vector.load %arg15[%c0_137, %c0_138] : memref<1x32xf32, #tpu.memory_space<vmem>>, vector<1x32xf32>
    %cst_139 = arith.constant dense<0.000000e+00> : vector<16xf32>
    %311 = vector.multi_reduction <add>, %308, %cst_139 [1] : vector<16x32xf32> to vector<16xf32>
    %312 = vector.shape_cast %311 : vector<16xf32> to vector<16x1xf32>
    %cst_140 = arith.constant 3.200000e+01 : f32
    %313 = vector.broadcast %cst_140 : f32 to vector<16x1xf32>
    %314 = arith.divf %312, %313 : vector<16x1xf32>
    %315 = vector.broadcast %314 : vector<16x1xf32> to vector<16x32xf32>
    %316 = arith.subf %308, %315 : vector<16x32xf32>
    %317 = arith.mulf %316, %316 : vector<16x32xf32>
    %cst_141 = arith.constant dense<0.000000e+00> : vector<16xf32>
    %318 = vector.multi_reduction <add>, %317, %cst_141 [1] : vector<16x32xf32> to vector<16xf32>
    %319 = vector.shape_cast %318 : vector<16xf32> to vector<16x1xf32>
    %cst_142 = arith.constant 3.200000e+01 : f32
    %320 = vector.broadcast %cst_142 : f32 to vector<16x1xf32>
    %321 = arith.divf %319, %320 : vector<16x1xf32>
    %322 = vector.broadcast %314 : vector<16x1xf32> to vector<16x32xf32>
    %323 = arith.subf %308, %322 : vector<16x32xf32>
    %cst_143 = arith.constant 9.99999974E-6 : f32
    %324 = vector.broadcast %cst_143 : f32 to vector<16x1xf32>
    %325 = arith.addf %321, %324 : vector<16x1xf32>
    %326 = math.rsqrt %325 : vector<16x1xf32>
    %327 = vector.broadcast %326 : vector<16x1xf32> to vector<16x32xf32>
    %328 = arith.mulf %323, %327 : vector<16x32xf32>
    %329 = vector.broadcast %309 : vector<1x32xf32> to vector<16x32xf32>
    %330 = arith.mulf %328, %329 : vector<16x32xf32>
    %331 = vector.broadcast %310 : vector<1x32xf32> to vector<16x32xf32>
    %332 = arith.addf %330, %331 : vector<16x32xf32>
    %c0_144 = arith.constant 0 : index
    %c0_145 = arith.constant 0 : index
    %333 = vector.load %arg1[%c0_144, %c0_145] : memref<16x32xf32, #tpu.memory_space<vmem>>, vector<16x32xf32>
    %c0_146 = arith.constant 0 : index
    %c0_147 = arith.constant 0 : index
    %c0_148 = arith.constant 0 : index
    %334 = vector.load %arg16[%c0_146, %c0_147, %c0_148] : memref<2x96x32xf32, #tpu.memory_space<vmem>>, vector<1x96x32xf32>
    %335 = vector.shape_cast %334 : vector<1x96x32xf32> to vector<96x32xf32>
    %c0_149 = arith.constant 0 : index
    %c0_150 = arith.constant 0 : index
    %c0_151 = arith.constant 0 : index
    %336 = vector.load %arg17[%c0_149, %c0_150, %c0_151] : memref<2x1x96xf32, #tpu.memory_space<vmem>>, vector<1x1x96xf32>
    %337 = vector.shape_cast %336 : vector<1x1x96xf32> to vector<1x96xf32>
    %c0_152 = arith.constant 0 : index
    %c0_153 = arith.constant 0 : index
    %c0_154 = arith.constant 0 : index
    %338 = vector.load %arg18[%c0_152, %c0_153, %c0_154] : memref<2x32x32xf32, #tpu.memory_space<vmem>>, vector<1x32x32xf32>
    %339 = vector.shape_cast %338 : vector<1x32x32xf32> to vector<32x32xf32>
    %c0_155 = arith.constant 0 : index
    %c0_156 = arith.constant 0 : index
    %c0_157 = arith.constant 0 : index
    %340 = vector.load %arg19[%c0_155, %c0_156, %c0_157] : memref<2x1x32xf32, #tpu.memory_space<vmem>>, vector<1x1x32xf32>
    %341 = vector.shape_cast %340 : vector<1x1x32xf32> to vector<1x32xf32>
    %cst_158 = arith.constant dense<0.000000e+00> : vector<16x96xf32>
    %342 = tpu.matmul %333, %335, %cst_158 {dimension_numbers = #tpu.dot_dimension_numbers<[1], [1], [0], [0], [0, 0, 1, 0], [], []>} : vector<16x32xf32>, vector<96x32xf32>, vector<16x96xf32> -> vector<16x96xf32>
    %343 = vector.broadcast %337 : vector<1x96xf32> to vector<16x96xf32>
    %344 = arith.addf %342, %343 : vector<16x96xf32>
    %345 = vector.extract_strided_slice %344 {offsets = [0, 0], sizes = [16, 32], strides = [1, 1]} : vector<16x96xf32> to vector<16x32xf32>
    %346 = vector.extract_strided_slice %344 {offsets = [0, 32], sizes = [16, 32], strides = [1, 1]} : vector<16x96xf32> to vector<16x32xf32>
    %347 = vector.extract_strided_slice %344 {offsets = [0, 64], sizes = [16, 32], strides = [1, 1]} : vector<16x96xf32> to vector<16x32xf32>
    %cst_159 = arith.constant 0.353553385 : f32
    %348 = vector.broadcast %cst_159 : f32 to vector<16x32xf32>
    %349 = arith.mulf %345, %348 : vector<16x32xf32>
    %350 = vector.shape_cast %349 : vector<16x32xf32> to vector<2x8x32xf32>
    %351 = vector.shape_cast %346 : vector<16x32xf32> to vector<2x8x32xf32>
    %352 = vector.shape_cast %347 : vector<16x32xf32> to vector<2x8x32xf32>
    %353 = vector.extract_strided_slice %350 {offsets = [0, 0, 0], sizes = [2, 8, 8], strides = [1, 1, 1]} : vector<2x8x32xf32> to vector<2x8x8xf32>
    %354 = vector.extract_strided_slice %351 {offsets = [0, 0, 0], sizes = [2, 8, 8], strides = [1, 1, 1]} : vector<2x8x32xf32> to vector<2x8x8xf32>
    %355 = vector.extract_strided_slice %352 {offsets = [0, 0, 0], sizes = [2, 8, 8], strides = [1, 1, 1]} : vector<2x8x32xf32> to vector<2x8x8xf32>
    "tpu.trace_start"() <{level = 10 : i32, message = "bqd,bkd->bqk"}> : () -> ()
    %cst_160 = arith.constant dense<0.000000e+00> : vector<2x8x8xf32>
    %356 = tpu.matmul %353, %354, %cst_160 {dimension_numbers = #tpu.dot_dimension_numbers<[2], [2], [1], [1], [0, 0, 0, 1, 1, 1], [0], [0]>} : vector<2x8x8xf32>, vector<2x8x8xf32>, vector<2x8x8xf32> -> vector<2x8x8xf32>
    "tpu.trace_stop"() : () -> ()
    %cst_161 = arith.constant dense<0xFF800000> : vector<2x8xf32>
    %357 = vector.multi_reduction <maximumf>, %356, %cst_161 [2] : vector<2x8x8xf32> to vector<2x8xf32>
    %358 = vector.shape_cast %357 : vector<2x8xf32> to vector<2x8x1xf32>
    %359 = vector.broadcast %358 : vector<2x8x1xf32> to vector<2x8x8xf32>
    %360 = arith.subf %356, %359 : vector<2x8x8xf32>
    %361 = math.exp %360 : vector<2x8x8xf32>
    %cst_162 = arith.constant dense<0.000000e+00> : vector<2x8xf32>
    %362 = vector.multi_reduction <add>, %361, %cst_162 [2] : vector<2x8x8xf32> to vector<2x8xf32>
    %363 = vector.shape_cast %362 : vector<2x8xf32> to vector<2x8x1xf32>
    %364 = tpu.reciprocal %363 {approx = true} : vector<2x8x1xf32> -> vector<2x8x1xf32>
    %365 = vector.broadcast %364 : vector<2x8x1xf32> to vector<2x8x8xf32>
    %366 = arith.mulf %361, %365 : vector<2x8x8xf32>
    "tpu.trace_start"() <{level = 10 : i32, message = "bqk,bkd->bqd"}> : () -> ()
    %cst_163 = arith.constant dense<0.000000e+00> : vector<2x8x8xf32>
    %367 = tpu.matmul %366, %355, %cst_163 {dimension_numbers = #tpu.dot_dimension_numbers<[2], [1], [1], [2], [0, 0, 0, 1, 1, 2], [0], [0]>} : vector<2x8x8xf32>, vector<2x8x8xf32>, vector<2x8x8xf32> -> vector<2x8x8xf32>
    "tpu.trace_stop"() : () -> ()
    %368 = vector.extract_strided_slice %350 {offsets = [0, 0, 8], sizes = [2, 8, 8], strides = [1, 1, 1]} : vector<2x8x32xf32> to vector<2x8x8xf32>
    %369 = vector.extract_strided_slice %351 {offsets = [0, 0, 8], sizes = [2, 8, 8], strides = [1, 1, 1]} : vector<2x8x32xf32> to vector<2x8x8xf32>
    %370 = vector.extract_strided_slice %352 {offsets = [0, 0, 8], sizes = [2, 8, 8], strides = [1, 1, 1]} : vector<2x8x32xf32> to vector<2x8x8xf32>
    "tpu.trace_start"() <{level = 10 : i32, message = "bqd,bkd->bqk"}> : () -> ()
    %cst_164 = arith.constant dense<0.000000e+00> : vector<2x8x8xf32>
    %371 = tpu.matmul %368, %369, %cst_164 {dimension_numbers = #tpu.dot_dimension_numbers<[2], [2], [1], [1], [0, 0, 0, 1, 1, 1], [0], [0]>} : vector<2x8x8xf32>, vector<2x8x8xf32>, vector<2x8x8xf32> -> vector<2x8x8xf32>
    "tpu.trace_stop"() : () -> ()
    %cst_165 = arith.constant dense<0xFF800000> : vector<2x8xf32>
    %372 = vector.multi_reduction <maximumf>, %371, %cst_165 [2] : vector<2x8x8xf32> to vector<2x8xf32>
    %373 = vector.shape_cast %372 : vector<2x8xf32> to vector<2x8x1xf32>
    %374 = vector.broadcast %373 : vector<2x8x1xf32> to vector<2x8x8xf32>
    %375 = arith.subf %371, %374 : vector<2x8x8xf32>
    %376 = math.exp %375 : vector<2x8x8xf32>
    %cst_166 = arith.constant dense<0.000000e+00> : vector<2x8xf32>
    %377 = vector.multi_reduction <add>, %376, %cst_166 [2] : vector<2x8x8xf32> to vector<2x8xf32>
    %378 = vector.shape_cast %377 : vector<2x8xf32> to vector<2x8x1xf32>
    %379 = tpu.reciprocal %378 {approx = true} : vector<2x8x1xf32> -> vector<2x8x1xf32>
    %380 = vector.broadcast %379 : vector<2x8x1xf32> to vector<2x8x8xf32>
    %381 = arith.mulf %376, %380 : vector<2x8x8xf32>
    "tpu.trace_start"() <{level = 10 : i32, message = "bqk,bkd->bqd"}> : () -> ()
    %cst_167 = arith.constant dense<0.000000e+00> : vector<2x8x8xf32>
    %382 = tpu.matmul %381, %370, %cst_167 {dimension_numbers = #tpu.dot_dimension_numbers<[2], [1], [1], [2], [0, 0, 0, 1, 1, 2], [0], [0]>} : vector<2x8x8xf32>, vector<2x8x8xf32>, vector<2x8x8xf32> -> vector<2x8x8xf32>
    "tpu.trace_stop"() : () -> ()
    %383 = vector.extract_strided_slice %350 {offsets = [0, 0, 16], sizes = [2, 8, 8], strides = [1, 1, 1]} : vector<2x8x32xf32> to vector<2x8x8xf32>
    %384 = vector.extract_strided_slice %351 {offsets = [0, 0, 16], sizes = [2, 8, 8], strides = [1, 1, 1]} : vector<2x8x32xf32> to vector<2x8x8xf32>
    %385 = vector.extract_strided_slice %352 {offsets = [0, 0, 16], sizes = [2, 8, 8], strides = [1, 1, 1]} : vector<2x8x32xf32> to vector<2x8x8xf32>
    "tpu.trace_start"() <{level = 10 : i32, message = "bqd,bkd->bqk"}> : () -> ()
    %cst_168 = arith.constant dense<0.000000e+00> : vector<2x8x8xf32>
    %386 = tpu.matmul %383, %384, %cst_168 {dimension_numbers = #tpu.dot_dimension_numbers<[2], [2], [1], [1], [0, 0, 0, 1, 1, 1], [0], [0]>} : vector<2x8x8xf32>, vector<2x8x8xf32>, vector<2x8x8xf32> -> vector<2x8x8xf32>
    "tpu.trace_stop"() : () -> ()
    %cst_169 = arith.constant dense<0xFF800000> : vector<2x8xf32>
    %387 = vector.multi_reduction <maximumf>, %386, %cst_169 [2] : vector<2x8x8xf32> to vector<2x8xf32>
    %388 = vector.shape_cast %387 : vector<2x8xf32> to vector<2x8x1xf32>
    %389 = vector.broadcast %388 : vector<2x8x1xf32> to vector<2x8x8xf32>
    %390 = arith.subf %386, %389 : vector<2x8x8xf32>
    %391 = math.exp %390 : vector<2x8x8xf32>
    %cst_170 = arith.constant dense<0.000000e+00> : vector<2x8xf32>
    %392 = vector.multi_reduction <add>, %391, %cst_170 [2] : vector<2x8x8xf32> to vector<2x8xf32>
    %393 = vector.shape_cast %392 : vector<2x8xf32> to vector<2x8x1xf32>
    %394 = tpu.reciprocal %393 {approx = true} : vector<2x8x1xf32> -> vector<2x8x1xf32>
    %395 = vector.broadcast %394 : vector<2x8x1xf32> to vector<2x8x8xf32>
    %396 = arith.mulf %391, %395 : vector<2x8x8xf32>
    "tpu.trace_start"() <{level = 10 : i32, message = "bqk,bkd->bqd"}> : () -> ()
    %cst_171 = arith.constant dense<0.000000e+00> : vector<2x8x8xf32>
    %397 = tpu.matmul %396, %385, %cst_171 {dimension_numbers = #tpu.dot_dimension_numbers<[2], [1], [1], [2], [0, 0, 0, 1, 1, 2], [0], [0]>} : vector<2x8x8xf32>, vector<2x8x8xf32>, vector<2x8x8xf32> -> vector<2x8x8xf32>
    "tpu.trace_stop"() : () -> ()
    %398 = vector.extract_strided_slice %350 {offsets = [0, 0, 24], sizes = [2, 8, 8], strides = [1, 1, 1]} : vector<2x8x32xf32> to vector<2x8x8xf32>
    %399 = vector.extract_strided_slice %351 {offsets = [0, 0, 24], sizes = [2, 8, 8], strides = [1, 1, 1]} : vector<2x8x32xf32> to vector<2x8x8xf32>
    %400 = vector.extract_strided_slice %352 {offsets = [0, 0, 24], sizes = [2, 8, 8], strides = [1, 1, 1]} : vector<2x8x32xf32> to vector<2x8x8xf32>
    "tpu.trace_start"() <{level = 10 : i32, message = "bqd,bkd->bqk"}> : () -> ()
    %cst_172 = arith.constant dense<0.000000e+00> : vector<2x8x8xf32>
    %401 = tpu.matmul %398, %399, %cst_172 {dimension_numbers = #tpu.dot_dimension_numbers<[2], [2], [1], [1], [0, 0, 0, 1, 1, 1], [0], [0]>} : vector<2x8x8xf32>, vector<2x8x8xf32>, vector<2x8x8xf32> -> vector<2x8x8xf32>
    "tpu.trace_stop"() : () -> ()
    %cst_173 = arith.constant dense<0xFF800000> : vector<2x8xf32>
    %402 = vector.multi_reduction <maximumf>, %401, %cst_173 [2] : vector<2x8x8xf32> to vector<2x8xf32>
    %403 = vector.shape_cast %402 : vector<2x8xf32> to vector<2x8x1xf32>
    %404 = vector.broadcast %403 : vector<2x8x1xf32> to vector<2x8x8xf32>
    %405 = arith.subf %401, %404 : vector<2x8x8xf32>
    %406 = math.exp %405 : vector<2x8x8xf32>
    %cst_174 = arith.constant dense<0.000000e+00> : vector<2x8xf32>
    %407 = vector.multi_reduction <add>, %406, %cst_174 [2] : vector<2x8x8xf32> to vector<2x8xf32>
    %408 = vector.shape_cast %407 : vector<2x8xf32> to vector<2x8x1xf32>
    %409 = tpu.reciprocal %408 {approx = true} : vector<2x8x1xf32> -> vector<2x8x1xf32>
    %410 = vector.broadcast %409 : vector<2x8x1xf32> to vector<2x8x8xf32>
    %411 = arith.mulf %406, %410 : vector<2x8x8xf32>
    "tpu.trace_start"() <{level = 10 : i32, message = "bqk,bkd->bqd"}> : () -> ()
    %cst_175 = arith.constant dense<0.000000e+00> : vector<2x8x8xf32>
    %412 = tpu.matmul %411, %400, %cst_175 {dimension_numbers = #tpu.dot_dimension_numbers<[2], [1], [1], [2], [0, 0, 0, 1, 1, 2], [0], [0]>} : vector<2x8x8xf32>, vector<2x8x8xf32>, vector<2x8x8xf32> -> vector<2x8x8xf32>
    "tpu.trace_stop"() : () -> ()
    %413 = tpu.concatenate %367, %382, %397, %412 in 2 : vector<2x8x8xf32>, vector<2x8x8xf32>, vector<2x8x8xf32>, vector<2x8x8xf32> -> vector<2x8x32xf32>
    %414 = vector.shape_cast %413 : vector<2x8x32xf32> to vector<16x32xf32>
    %cst_176 = arith.constant dense<0.000000e+00> : vector<16x32xf32>
    %415 = tpu.matmul %414, %339, %cst_176 {dimension_numbers = #tpu.dot_dimension_numbers<[1], [1], [0], [0], [0, 0, 1, 0], [], []>} : vector<16x32xf32>, vector<32x32xf32>, vector<16x32xf32> -> vector<16x32xf32>
    %416 = vector.broadcast %341 : vector<1x32xf32> to vector<16x32xf32>
    %417 = arith.addf %415, %416 : vector<16x32xf32>
    %418 = arith.addf %333, %417 : vector<16x32xf32>
    %c0_177 = arith.constant 0 : index
    %c0_178 = arith.constant 0 : index
    %c0_179 = arith.constant 0 : index
    %419 = vector.load %arg28[%c0_177, %c0_178, %c0_179] : memref<2x1x32xf32, #tpu.memory_space<vmem>>, vector<1x1x32xf32>
    %420 = vector.shape_cast %419 : vector<1x1x32xf32> to vector<1x32xf32>
    %c0_180 = arith.constant 0 : index
    %c0_181 = arith.constant 0 : index
    %c0_182 = arith.constant 0 : index
    %421 = vector.load %arg29[%c0_180, %c0_181, %c0_182] : memref<2x1x32xf32, #tpu.memory_space<vmem>>, vector<1x1x32xf32>
    %422 = vector.shape_cast %421 : vector<1x1x32xf32> to vector<1x32xf32>
    %cst_183 = arith.constant dense<0.000000e+00> : vector<16xf32>
    %423 = vector.multi_reduction <add>, %418, %cst_183 [1] : vector<16x32xf32> to vector<16xf32>
    %424 = vector.shape_cast %423 : vector<16xf32> to vector<16x1xf32>
    %cst_184 = arith.constant 3.200000e+01 : f32
    %425 = vector.broadcast %cst_184 : f32 to vector<16x1xf32>
    %426 = arith.divf %424, %425 : vector<16x1xf32>
    %427 = vector.broadcast %426 : vector<16x1xf32> to vector<16x32xf32>
    %428 = arith.subf %418, %427 : vector<16x32xf32>
    %429 = arith.mulf %428, %428 : vector<16x32xf32>
    %cst_185 = arith.constant dense<0.000000e+00> : vector<16xf32>
    %430 = vector.multi_reduction <add>, %429, %cst_185 [1] : vector<16x32xf32> to vector<16xf32>
    %431 = vector.shape_cast %430 : vector<16xf32> to vector<16x1xf32>
    %cst_186 = arith.constant 3.200000e+01 : f32
    %432 = vector.broadcast %cst_186 : f32 to vector<16x1xf32>
    %433 = arith.divf %431, %432 : vector<16x1xf32>
    %434 = vector.broadcast %426 : vector<16x1xf32> to vector<16x32xf32>
    %435 = arith.subf %418, %434 : vector<16x32xf32>
    %cst_187 = arith.constant 9.99999974E-6 : f32
    %436 = vector.broadcast %cst_187 : f32 to vector<16x1xf32>
    %437 = arith.addf %433, %436 : vector<16x1xf32>
    %438 = math.rsqrt %437 : vector<16x1xf32>
    %439 = vector.broadcast %438 : vector<16x1xf32> to vector<16x32xf32>
    %440 = arith.mulf %435, %439 : vector<16x32xf32>
    %441 = vector.broadcast %420 : vector<1x32xf32> to vector<16x32xf32>
    %442 = arith.mulf %440, %441 : vector<16x32xf32>
    %443 = vector.broadcast %422 : vector<1x32xf32> to vector<16x32xf32>
    %444 = arith.addf %442, %443 : vector<16x32xf32>
    %c0_188 = arith.constant 0 : index
    %c0_189 = arith.constant 0 : index
    %c0_190 = arith.constant 0 : index
    %445 = vector.load %arg20[%c0_188, %c0_189, %c0_190] : memref<2x96x32xf32, #tpu.memory_space<vmem>>, vector<1x96x32xf32>
    %446 = vector.shape_cast %445 : vector<1x96x32xf32> to vector<96x32xf32>
    %c0_191 = arith.constant 0 : index
    %c0_192 = arith.constant 0 : index
    %c0_193 = arith.constant 0 : index
    %447 = vector.load %arg21[%c0_191, %c0_192, %c0_193] : memref<2x1x96xf32, #tpu.memory_space<vmem>>, vector<1x1x96xf32>
    %448 = vector.shape_cast %447 : vector<1x1x96xf32> to vector<1x96xf32>
    %c0_194 = arith.constant 0 : index
    %c0_195 = arith.constant 0 : index
    %c0_196 = arith.constant 0 : index
    %449 = vector.load %arg22[%c0_194, %c0_195, %c0_196] : memref<2x32x32xf32, #tpu.memory_space<vmem>>, vector<1x32x32xf32>
    %450 = vector.shape_cast %449 : vector<1x32x32xf32> to vector<32x32xf32>
    %c0_197 = arith.constant 0 : index
    %c0_198 = arith.constant 0 : index
    %c0_199 = arith.constant 0 : index
    %451 = vector.load %arg23[%c0_197, %c0_198, %c0_199] : memref<2x1x32xf32, #tpu.memory_space<vmem>>, vector<1x1x32xf32>
    %452 = vector.shape_cast %451 : vector<1x1x32xf32> to vector<1x32xf32>
    %453 = vector.extract_strided_slice %446 {offsets = [0, 0], sizes = [32, 32], strides = [1, 1]} : vector<96x32xf32> to vector<32x32xf32>
    %cst_200 = arith.constant dense<0.000000e+00> : vector<16x32xf32>
    %454 = tpu.matmul %444, %453, %cst_200 {dimension_numbers = #tpu.dot_dimension_numbers<[1], [1], [0], [0], [0, 0, 1, 0], [], []>} : vector<16x32xf32>, vector<32x32xf32>, vector<16x32xf32> -> vector<16x32xf32>
    %455 = vector.extract_strided_slice %448 {offsets = [0, 0], sizes = [1, 32], strides = [1, 1]} : vector<1x96xf32> to vector<1x32xf32>
    %456 = vector.broadcast %455 : vector<1x32xf32> to vector<16x32xf32>
    %457 = arith.addf %454, %456 : vector<16x32xf32>
    %458 = vector.extract_strided_slice %446 {offsets = [32, 0], sizes = [64, 32], strides = [1, 1]} : vector<96x32xf32> to vector<64x32xf32>
    %cst_201 = arith.constant dense<0.000000e+00> : vector<16x64xf32>
    %459 = tpu.matmul %332, %458, %cst_201 {dimension_numbers = #tpu.dot_dimension_numbers<[1], [1], [0], [0], [0, 0, 1, 0], [], []>} : vector<16x32xf32>, vector<64x32xf32>, vector<16x64xf32> -> vector<16x64xf32>
    %460 = vector.extract_strided_slice %448 {offsets = [0, 32], sizes = [1, 64], strides = [1, 1]} : vector<1x96xf32> to vector<1x64xf32>
    %461 = vector.broadcast %460 : vector<1x64xf32> to vector<16x64xf32>
    %462 = arith.addf %459, %461 : vector<16x64xf32>
    %463 = vector.extract_strided_slice %462 {offsets = [0, 0], sizes = [16, 32], strides = [1, 1]} : vector<16x64xf32> to vector<16x32xf32>
    %464 = vector.extract_strided_slice %462 {offsets = [0, 32], sizes = [16, 32], strides = [1, 1]} : vector<16x64xf32> to vector<16x32xf32>
    %cst_202 = arith.constant 0.353553385 : f32
    %465 = vector.broadcast %cst_202 : f32 to vector<16x32xf32>
    %466 = arith.mulf %457, %465 : vector<16x32xf32>
    %467 = vector.shape_cast %466 : vector<16x32xf32> to vector<2x8x32xf32>
    %468 = vector.shape_cast %463 : vector<16x32xf32> to vector<2x8x32xf32>
    %469 = vector.shape_cast %464 : vector<16x32xf32> to vector<2x8x32xf32>
    %470 = vector.extract_strided_slice %467 {offsets = [0, 0, 0], sizes = [2, 8, 8], strides = [1, 1, 1]} : vector<2x8x32xf32> to vector<2x8x8xf32>
    %471 = vector.extract_strided_slice %468 {offsets = [0, 0, 0], sizes = [2, 8, 8], strides = [1, 1, 1]} : vector<2x8x32xf32> to vector<2x8x8xf32>
    %472 = vector.extract_strided_slice %469 {offsets = [0, 0, 0], sizes = [2, 8, 8], strides = [1, 1, 1]} : vector<2x8x32xf32> to vector<2x8x8xf32>
    "tpu.trace_start"() <{level = 10 : i32, message = "bqd,bkd->bqk"}> : () -> ()
    %cst_203 = arith.constant dense<0.000000e+00> : vector<2x8x8xf32>
    %473 = tpu.matmul %470, %471, %cst_203 {dimension_numbers = #tpu.dot_dimension_numbers<[2], [2], [1], [1], [0, 0, 0, 1, 1, 1], [0], [0]>} : vector<2x8x8xf32>, vector<2x8x8xf32>, vector<2x8x8xf32> -> vector<2x8x8xf32>
    "tpu.trace_stop"() : () -> ()
    %cst_204 = arith.constant dense<0xFF800000> : vector<2x8xf32>
    %474 = vector.multi_reduction <maximumf>, %473, %cst_204 [2] : vector<2x8x8xf32> to vector<2x8xf32>
    %475 = vector.shape_cast %474 : vector<2x8xf32> to vector<2x8x1xf32>
    %476 = vector.broadcast %475 : vector<2x8x1xf32> to vector<2x8x8xf32>
    %477 = arith.subf %473, %476 : vector<2x8x8xf32>
    %478 = math.exp %477 : vector<2x8x8xf32>
    %cst_205 = arith.constant dense<0.000000e+00> : vector<2x8xf32>
    %479 = vector.multi_reduction <add>, %478, %cst_205 [2] : vector<2x8x8xf32> to vector<2x8xf32>
    %480 = vector.shape_cast %479 : vector<2x8xf32> to vector<2x8x1xf32>
    %481 = tpu.reciprocal %480 {approx = true} : vector<2x8x1xf32> -> vector<2x8x1xf32>
    %482 = vector.broadcast %481 : vector<2x8x1xf32> to vector<2x8x8xf32>
    %483 = arith.mulf %478, %482 : vector<2x8x8xf32>
    "tpu.trace_start"() <{level = 10 : i32, message = "bqk,bkd->bqd"}> : () -> ()
    %cst_206 = arith.constant dense<0.000000e+00> : vector<2x8x8xf32>
    %484 = tpu.matmul %483, %472, %cst_206 {dimension_numbers = #tpu.dot_dimension_numbers<[2], [1], [1], [2], [0, 0, 0, 1, 1, 2], [0], [0]>} : vector<2x8x8xf32>, vector<2x8x8xf32>, vector<2x8x8xf32> -> vector<2x8x8xf32>
    "tpu.trace_stop"() : () -> ()
    %485 = vector.extract_strided_slice %467 {offsets = [0, 0, 8], sizes = [2, 8, 8], strides = [1, 1, 1]} : vector<2x8x32xf32> to vector<2x8x8xf32>
    %486 = vector.extract_strided_slice %468 {offsets = [0, 0, 8], sizes = [2, 8, 8], strides = [1, 1, 1]} : vector<2x8x32xf32> to vector<2x8x8xf32>
    %487 = vector.extract_strided_slice %469 {offsets = [0, 0, 8], sizes = [2, 8, 8], strides = [1, 1, 1]} : vector<2x8x32xf32> to vector<2x8x8xf32>
    "tpu.trace_start"() <{level = 10 : i32, message = "bqd,bkd->bqk"}> : () -> ()
    %cst_207 = arith.constant dense<0.000000e+00> : vector<2x8x8xf32>
    %488 = tpu.matmul %485, %486, %cst_207 {dimension_numbers = #tpu.dot_dimension_numbers<[2], [2], [1], [1], [0, 0, 0, 1, 1, 1], [0], [0]>} : vector<2x8x8xf32>, vector<2x8x8xf32>, vector<2x8x8xf32> -> vector<2x8x8xf32>
    "tpu.trace_stop"() : () -> ()
    %cst_208 = arith.constant dense<0xFF800000> : vector<2x8xf32>
    %489 = vector.multi_reduction <maximumf>, %488, %cst_208 [2] : vector<2x8x8xf32> to vector<2x8xf32>
    %490 = vector.shape_cast %489 : vector<2x8xf32> to vector<2x8x1xf32>
    %491 = vector.broadcast %490 : vector<2x8x1xf32> to vector<2x8x8xf32>
    %492 = arith.subf %488, %491 : vector<2x8x8xf32>
    %493 = math.exp %492 : vector<2x8x8xf32>
    %cst_209 = arith.constant dense<0.000000e+00> : vector<2x8xf32>
    %494 = vector.multi_reduction <add>, %493, %cst_209 [2] : vector<2x8x8xf32> to vector<2x8xf32>
    %495 = vector.shape_cast %494 : vector<2x8xf32> to vector<2x8x1xf32>
    %496 = tpu.reciprocal %495 {approx = true} : vector<2x8x1xf32> -> vector<2x8x1xf32>
    %497 = vector.broadcast %496 : vector<2x8x1xf32> to vector<2x8x8xf32>
    %498 = arith.mulf %493, %497 : vector<2x8x8xf32>
    "tpu.trace_start"() <{level = 10 : i32, message = "bqk,bkd->bqd"}> : () -> ()
    %cst_210 = arith.constant dense<0.000000e+00> : vector<2x8x8xf32>
    %499 = tpu.matmul %498, %487, %cst_210 {dimension_numbers = #tpu.dot_dimension_numbers<[2], [1], [1], [2], [0, 0, 0, 1, 1, 2], [0], [0]>} : vector<2x8x8xf32>, vector<2x8x8xf32>, vector<2x8x8xf32> -> vector<2x8x8xf32>
    "tpu.trace_stop"() : () -> ()
    %500 = vector.extract_strided_slice %467 {offsets = [0, 0, 16], sizes = [2, 8, 8], strides = [1, 1, 1]} : vector<2x8x32xf32> to vector<2x8x8xf32>
    %501 = vector.extract_strided_slice %468 {offsets = [0, 0, 16], sizes = [2, 8, 8], strides = [1, 1, 1]} : vector<2x8x32xf32> to vector<2x8x8xf32>
    %502 = vector.extract_strided_slice %469 {offsets = [0, 0, 16], sizes = [2, 8, 8], strides = [1, 1, 1]} : vector<2x8x32xf32> to vector<2x8x8xf32>
    "tpu.trace_start"() <{level = 10 : i32, message = "bqd,bkd->bqk"}> : () -> ()
    %cst_211 = arith.constant dense<0.000000e+00> : vector<2x8x8xf32>
    %503 = tpu.matmul %500, %501, %cst_211 {dimension_numbers = #tpu.dot_dimension_numbers<[2], [2], [1], [1], [0, 0, 0, 1, 1, 1], [0], [0]>} : vector<2x8x8xf32>, vector<2x8x8xf32>, vector<2x8x8xf32> -> vector<2x8x8xf32>
    "tpu.trace_stop"() : () -> ()
    %cst_212 = arith.constant dense<0xFF800000> : vector<2x8xf32>
    %504 = vector.multi_reduction <maximumf>, %503, %cst_212 [2] : vector<2x8x8xf32> to vector<2x8xf32>
    %505 = vector.shape_cast %504 : vector<2x8xf32> to vector<2x8x1xf32>
    %506 = vector.broadcast %505 : vector<2x8x1xf32> to vector<2x8x8xf32>
    %507 = arith.subf %503, %506 : vector<2x8x8xf32>
    %508 = math.exp %507 : vector<2x8x8xf32>
    %cst_213 = arith.constant dense<0.000000e+00> : vector<2x8xf32>
    %509 = vector.multi_reduction <add>, %508, %cst_213 [2] : vector<2x8x8xf32> to vector<2x8xf32>
    %510 = vector.shape_cast %509 : vector<2x8xf32> to vector<2x8x1xf32>
    %511 = tpu.reciprocal %510 {approx = true} : vector<2x8x1xf32> -> vector<2x8x1xf32>
    %512 = vector.broadcast %511 : vector<2x8x1xf32> to vector<2x8x8xf32>
    %513 = arith.mulf %508, %512 : vector<2x8x8xf32>
    "tpu.trace_start"() <{level = 10 : i32, message = "bqk,bkd->bqd"}> : () -> ()
    %cst_214 = arith.constant dense<0.000000e+00> : vector<2x8x8xf32>
    %514 = tpu.matmul %513, %502, %cst_214 {dimension_numbers = #tpu.dot_dimension_numbers<[2], [1], [1], [2], [0, 0, 0, 1, 1, 2], [0], [0]>} : vector<2x8x8xf32>, vector<2x8x8xf32>, vector<2x8x8xf32> -> vector<2x8x8xf32>
    "tpu.trace_stop"() : () -> ()
    %515 = vector.extract_strided_slice %467 {offsets = [0, 0, 24], sizes = [2, 8, 8], strides = [1, 1, 1]} : vector<2x8x32xf32> to vector<2x8x8xf32>
    %516 = vector.extract_strided_slice %468 {offsets = [0, 0, 24], sizes = [2, 8, 8], strides = [1, 1, 1]} : vector<2x8x32xf32> to vector<2x8x8xf32>
    %517 = vector.extract_strided_slice %469 {offsets = [0, 0, 24], sizes = [2, 8, 8], strides = [1, 1, 1]} : vector<2x8x32xf32> to vector<2x8x8xf32>
    "tpu.trace_start"() <{level = 10 : i32, message = "bqd,bkd->bqk"}> : () -> ()
    %cst_215 = arith.constant dense<0.000000e+00> : vector<2x8x8xf32>
    %518 = tpu.matmul %515, %516, %cst_215 {dimension_numbers = #tpu.dot_dimension_numbers<[2], [2], [1], [1], [0, 0, 0, 1, 1, 1], [0], [0]>} : vector<2x8x8xf32>, vector<2x8x8xf32>, vector<2x8x8xf32> -> vector<2x8x8xf32>
    "tpu.trace_stop"() : () -> ()
    %cst_216 = arith.constant dense<0xFF800000> : vector<2x8xf32>
    %519 = vector.multi_reduction <maximumf>, %518, %cst_216 [2] : vector<2x8x8xf32> to vector<2x8xf32>
    %520 = vector.shape_cast %519 : vector<2x8xf32> to vector<2x8x1xf32>
    %521 = vector.broadcast %520 : vector<2x8x1xf32> to vector<2x8x8xf32>
    %522 = arith.subf %518, %521 : vector<2x8x8xf32>
    %523 = math.exp %522 : vector<2x8x8xf32>
    %cst_217 = arith.constant dense<0.000000e+00> : vector<2x8xf32>
    %524 = vector.multi_reduction <add>, %523, %cst_217 [2] : vector<2x8x8xf32> to vector<2x8xf32>
    %525 = vector.shape_cast %524 : vector<2x8xf32> to vector<2x8x1xf32>
    %526 = tpu.reciprocal %525 {approx = true} : vector<2x8x1xf32> -> vector<2x8x1xf32>
    %527 = vector.broadcast %526 : vector<2x8x1xf32> to vector<2x8x8xf32>
    %528 = arith.mulf %523, %527 : vector<2x8x8xf32>
    "tpu.trace_start"() <{level = 10 : i32, message = "bqk,bkd->bqd"}> : () -> ()
    %cst_218 = arith.constant dense<0.000000e+00> : vector<2x8x8xf32>
    %529 = tpu.matmul %528, %517, %cst_218 {dimension_numbers = #tpu.dot_dimension_numbers<[2], [1], [1], [2], [0, 0, 0, 1, 1, 2], [0], [0]>} : vector<2x8x8xf32>, vector<2x8x8xf32>, vector<2x8x8xf32> -> vector<2x8x8xf32>
    "tpu.trace_stop"() : () -> ()
    %530 = tpu.concatenate %484, %499, %514, %529 in 2 : vector<2x8x8xf32>, vector<2x8x8xf32>, vector<2x8x8xf32>, vector<2x8x8xf32> -> vector<2x8x32xf32>
    %531 = vector.shape_cast %530 : vector<2x8x32xf32> to vector<16x32xf32>
    %cst_219 = arith.constant dense<0.000000e+00> : vector<16x32xf32>
    %532 = tpu.matmul %531, %450, %cst_219 {dimension_numbers = #tpu.dot_dimension_numbers<[1], [1], [0], [0], [0, 0, 1, 0], [], []>} : vector<16x32xf32>, vector<32x32xf32>, vector<16x32xf32> -> vector<16x32xf32>
    %533 = vector.broadcast %452 : vector<1x32xf32> to vector<16x32xf32>
    %534 = arith.addf %532, %533 : vector<16x32xf32>
    %535 = arith.addf %444, %534 : vector<16x32xf32>
    %c0_220 = arith.constant 0 : index
    %c0_221 = arith.constant 0 : index
    %c0_222 = arith.constant 0 : index
    %536 = vector.load %arg30[%c0_220, %c0_221, %c0_222] : memref<2x1x32xf32, #tpu.memory_space<vmem>>, vector<1x1x32xf32>
    %537 = vector.shape_cast %536 : vector<1x1x32xf32> to vector<1x32xf32>
    %c0_223 = arith.constant 0 : index
    %c0_224 = arith.constant 0 : index
    %c0_225 = arith.constant 0 : index
    %538 = vector.load %arg31[%c0_223, %c0_224, %c0_225] : memref<2x1x32xf32, #tpu.memory_space<vmem>>, vector<1x1x32xf32>
    %539 = vector.shape_cast %538 : vector<1x1x32xf32> to vector<1x32xf32>
    %cst_226 = arith.constant dense<0.000000e+00> : vector<16xf32>
    %540 = vector.multi_reduction <add>, %535, %cst_226 [1] : vector<16x32xf32> to vector<16xf32>
    %541 = vector.shape_cast %540 : vector<16xf32> to vector<16x1xf32>
    %cst_227 = arith.constant 3.200000e+01 : f32
    %542 = vector.broadcast %cst_227 : f32 to vector<16x1xf32>
    %543 = arith.divf %541, %542 : vector<16x1xf32>
    %544 = vector.broadcast %543 : vector<16x1xf32> to vector<16x32xf32>
    %545 = arith.subf %535, %544 : vector<16x32xf32>
    %546 = arith.mulf %545, %545 : vector<16x32xf32>
    %cst_228 = arith.constant dense<0.000000e+00> : vector<16xf32>
    %547 = vector.multi_reduction <add>, %546, %cst_228 [1] : vector<16x32xf32> to vector<16xf32>
    %548 = vector.shape_cast %547 : vector<16xf32> to vector<16x1xf32>
    %cst_229 = arith.constant 3.200000e+01 : f32
    %549 = vector.broadcast %cst_229 : f32 to vector<16x1xf32>
    %550 = arith.divf %548, %549 : vector<16x1xf32>
    %551 = vector.broadcast %543 : vector<16x1xf32> to vector<16x32xf32>
    %552 = arith.subf %535, %551 : vector<16x32xf32>
    %cst_230 = arith.constant 9.99999974E-6 : f32
    %553 = vector.broadcast %cst_230 : f32 to vector<16x1xf32>
    %554 = arith.addf %550, %553 : vector<16x1xf32>
    %555 = math.rsqrt %554 : vector<16x1xf32>
    %556 = vector.broadcast %555 : vector<16x1xf32> to vector<16x32xf32>
    %557 = arith.mulf %552, %556 : vector<16x32xf32>
    %558 = vector.broadcast %537 : vector<1x32xf32> to vector<16x32xf32>
    %559 = arith.mulf %557, %558 : vector<16x32xf32>
    %560 = vector.broadcast %539 : vector<1x32xf32> to vector<16x32xf32>
    %561 = arith.addf %559, %560 : vector<16x32xf32>
    %c0_231 = arith.constant 0 : index
    %c0_232 = arith.constant 0 : index
    %c0_233 = arith.constant 0 : index
    %562 = vector.load %arg24[%c0_231, %c0_232, %c0_233] : memref<2x64x32xf32, #tpu.memory_space<vmem>>, vector<1x64x32xf32>
    %563 = vector.shape_cast %562 : vector<1x64x32xf32> to vector<64x32xf32>
    %c0_234 = arith.constant 0 : index
    %c0_235 = arith.constant 0 : index
    %c0_236 = arith.constant 0 : index
    %564 = vector.load %arg25[%c0_234, %c0_235, %c0_236] : memref<2x1x64xf32, #tpu.memory_space<vmem>>, vector<1x1x64xf32>
    %565 = vector.shape_cast %564 : vector<1x1x64xf32> to vector<1x64xf32>
    %c0_237 = arith.constant 0 : index
    %c0_238 = arith.constant 0 : index
    %c0_239 = arith.constant 0 : index
    %566 = vector.load %arg26[%c0_237, %c0_238, %c0_239] : memref<2x32x64xf32, #tpu.memory_space<vmem>>, vector<1x32x64xf32>
    %567 = vector.shape_cast %566 : vector<1x32x64xf32> to vector<32x64xf32>
    %c0_240 = arith.constant 0 : index
    %c0_241 = arith.constant 0 : index
    %c0_242 = arith.constant 0 : index
    %568 = vector.load %arg27[%c0_240, %c0_241, %c0_242] : memref<2x1x32xf32, #tpu.memory_space<vmem>>, vector<1x1x32xf32>
    %569 = vector.shape_cast %568 : vector<1x1x32xf32> to vector<1x32xf32>
    %cst_243 = arith.constant dense<0.000000e+00> : vector<16x64xf32>
    %570 = tpu.matmul %561, %563, %cst_243 {dimension_numbers = #tpu.dot_dimension_numbers<[1], [1], [0], [0], [0, 0, 1, 0], [], []>} : vector<16x32xf32>, vector<64x32xf32>, vector<16x64xf32> -> vector<16x64xf32>
    %571 = vector.broadcast %565 : vector<1x64xf32> to vector<16x64xf32>
    %572 = arith.addf %570, %571 : vector<16x64xf32>
    %cst_244 = arith.constant 0.000000e+00 : f32
    %573 = vector.broadcast %cst_244 : f32 to vector<16x64xf32>
    %574 = arith.maximumf %572, %573 : vector<16x64xf32>
    %cst_245 = arith.constant dense<0.000000e+00> : vector<16x32xf32>
    %575 = tpu.matmul %574, %567, %cst_245 {dimension_numbers = #tpu.dot_dimension_numbers<[1], [1], [0], [0], [0, 0, 1, 0], [], []>} : vector<16x64xf32>, vector<32x64xf32>, vector<16x32xf32> -> vector<16x32xf32>
    %576 = vector.broadcast %569 : vector<1x32xf32> to vector<16x32xf32>
    %577 = arith.addf %575, %576 : vector<16x32xf32>
    %578 = arith.addf %561, %577 : vector<16x32xf32>
    %c0_246 = arith.constant 0 : index
    %c0_247 = arith.constant 0 : index
    %c0_248 = arith.constant 0 : index
    %579 = vector.load %arg32[%c0_246, %c0_247, %c0_248] : memref<2x1x32xf32, #tpu.memory_space<vmem>>, vector<1x1x32xf32>
    %580 = vector.shape_cast %579 : vector<1x1x32xf32> to vector<1x32xf32>
    %c0_249 = arith.constant 0 : index
    %c0_250 = arith.constant 0 : index
    %c0_251 = arith.constant 0 : index
    %581 = vector.load %arg33[%c0_249, %c0_250, %c0_251] : memref<2x1x32xf32, #tpu.memory_space<vmem>>, vector<1x1x32xf32>
    %582 = vector.shape_cast %581 : vector<1x1x32xf32> to vector<1x32xf32>
    %cst_252 = arith.constant dense<0.000000e+00> : vector<16xf32>
    %583 = vector.multi_reduction <add>, %578, %cst_252 [1] : vector<16x32xf32> to vector<16xf32>
    %584 = vector.shape_cast %583 : vector<16xf32> to vector<16x1xf32>
    %cst_253 = arith.constant 3.200000e+01 : f32
    %585 = vector.broadcast %cst_253 : f32 to vector<16x1xf32>
    %586 = arith.divf %584, %585 : vector<16x1xf32>
    %587 = vector.broadcast %586 : vector<16x1xf32> to vector<16x32xf32>
    %588 = arith.subf %578, %587 : vector<16x32xf32>
    %589 = arith.mulf %588, %588 : vector<16x32xf32>
    %cst_254 = arith.constant dense<0.000000e+00> : vector<16xf32>
    %590 = vector.multi_reduction <add>, %589, %cst_254 [1] : vector<16x32xf32> to vector<16xf32>
    %591 = vector.shape_cast %590 : vector<16xf32> to vector<16x1xf32>
    %cst_255 = arith.constant 3.200000e+01 : f32
    %592 = vector.broadcast %cst_255 : f32 to vector<16x1xf32>
    %593 = arith.divf %591, %592 : vector<16x1xf32>
    %594 = vector.broadcast %586 : vector<16x1xf32> to vector<16x32xf32>
    %595 = arith.subf %578, %594 : vector<16x32xf32>
    %cst_256 = arith.constant 9.99999974E-6 : f32
    %596 = vector.broadcast %cst_256 : f32 to vector<16x1xf32>
    %597 = arith.addf %593, %596 : vector<16x1xf32>
    %598 = math.rsqrt %597 : vector<16x1xf32>
    %599 = vector.broadcast %598 : vector<16x1xf32> to vector<16x32xf32>
    %600 = arith.mulf %595, %599 : vector<16x32xf32>
    %601 = vector.broadcast %580 : vector<1x32xf32> to vector<16x32xf32>
    %602 = arith.mulf %600, %601 : vector<16x32xf32>
    %603 = vector.broadcast %582 : vector<1x32xf32> to vector<16x32xf32>
    %604 = arith.addf %602, %603 : vector<16x32xf32>
    %c1_257 = arith.constant 1 : index
    %c0_258 = arith.constant 0 : index
    %c0_259 = arith.constant 0 : index
    %605 = vector.load %arg16[%c1_257, %c0_258, %c0_259] : memref<2x96x32xf32, #tpu.memory_space<vmem>>, vector<1x96x32xf32>
    %606 = vector.shape_cast %605 : vector<1x96x32xf32> to vector<96x32xf32>
    %c1_260 = arith.constant 1 : index
    %c0_261 = arith.constant 0 : index
    %c0_262 = arith.constant 0 : index
    %607 = vector.load %arg17[%c1_260, %c0_261, %c0_262] : memref<2x1x96xf32, #tpu.memory_space<vmem>>, vector<1x1x96xf32>
    %608 = vector.shape_cast %607 : vector<1x1x96xf32> to vector<1x96xf32>
    %c1_263 = arith.constant 1 : index
    %c0_264 = arith.constant 0 : index
    %c0_265 = arith.constant 0 : index
    %609 = vector.load %arg18[%c1_263, %c0_264, %c0_265] : memref<2x32x32xf32, #tpu.memory_space<vmem>>, vector<1x32x32xf32>
    %610 = vector.shape_cast %609 : vector<1x32x32xf32> to vector<32x32xf32>
    %c1_266 = arith.constant 1 : index
    %c0_267 = arith.constant 0 : index
    %c0_268 = arith.constant 0 : index
    %611 = vector.load %arg19[%c1_266, %c0_267, %c0_268] : memref<2x1x32xf32, #tpu.memory_space<vmem>>, vector<1x1x32xf32>
    %612 = vector.shape_cast %611 : vector<1x1x32xf32> to vector<1x32xf32>
    %cst_269 = arith.constant dense<0.000000e+00> : vector<16x96xf32>
    %613 = tpu.matmul %604, %606, %cst_269 {dimension_numbers = #tpu.dot_dimension_numbers<[1], [1], [0], [0], [0, 0, 1, 0], [], []>} : vector<16x32xf32>, vector<96x32xf32>, vector<16x96xf32> -> vector<16x96xf32>
    %614 = vector.broadcast %608 : vector<1x96xf32> to vector<16x96xf32>
    %615 = arith.addf %613, %614 : vector<16x96xf32>
    %616 = vector.extract_strided_slice %615 {offsets = [0, 0], sizes = [16, 32], strides = [1, 1]} : vector<16x96xf32> to vector<16x32xf32>
    %617 = vector.extract_strided_slice %615 {offsets = [0, 32], sizes = [16, 32], strides = [1, 1]} : vector<16x96xf32> to vector<16x32xf32>
    %618 = vector.extract_strided_slice %615 {offsets = [0, 64], sizes = [16, 32], strides = [1, 1]} : vector<16x96xf32> to vector<16x32xf32>
    %cst_270 = arith.constant 0.353553385 : f32
    %619 = vector.broadcast %cst_270 : f32 to vector<16x32xf32>
    %620 = arith.mulf %616, %619 : vector<16x32xf32>
    %621 = vector.shape_cast %620 : vector<16x32xf32> to vector<2x8x32xf32>
    %622 = vector.shape_cast %617 : vector<16x32xf32> to vector<2x8x32xf32>
    %623 = vector.shape_cast %618 : vector<16x32xf32> to vector<2x8x32xf32>
    %624 = vector.extract_strided_slice %621 {offsets = [0, 0, 0], sizes = [2, 8, 8], strides = [1, 1, 1]} : vector<2x8x32xf32> to vector<2x8x8xf32>
    %625 = vector.extract_strided_slice %622 {offsets = [0, 0, 0], sizes = [2, 8, 8], strides = [1, 1, 1]} : vector<2x8x32xf32> to vector<2x8x8xf32>
    %626 = vector.extract_strided_slice %623 {offsets = [0, 0, 0], sizes = [2, 8, 8], strides = [1, 1, 1]} : vector<2x8x32xf32> to vector<2x8x8xf32>
    "tpu.trace_start"() <{level = 10 : i32, message = "bqd,bkd->bqk"}> : () -> ()
    %cst_271 = arith.constant dense<0.000000e+00> : vector<2x8x8xf32>
    %627 = tpu.matmul %624, %625, %cst_271 {dimension_numbers = #tpu.dot_dimension_numbers<[2], [2], [1], [1], [0, 0, 0, 1, 1, 1], [0], [0]>} : vector<2x8x8xf32>, vector<2x8x8xf32>, vector<2x8x8xf32> -> vector<2x8x8xf32>
    "tpu.trace_stop"() : () -> ()
    %cst_272 = arith.constant dense<0xFF800000> : vector<2x8xf32>
    %628 = vector.multi_reduction <maximumf>, %627, %cst_272 [2] : vector<2x8x8xf32> to vector<2x8xf32>
    %629 = vector.shape_cast %628 : vector<2x8xf32> to vector<2x8x1xf32>
    %630 = vector.broadcast %629 : vector<2x8x1xf32> to vector<2x8x8xf32>
    %631 = arith.subf %627, %630 : vector<2x8x8xf32>
    %632 = math.exp %631 : vector<2x8x8xf32>
    %cst_273 = arith.constant dense<0.000000e+00> : vector<2x8xf32>
    %633 = vector.multi_reduction <add>, %632, %cst_273 [2] : vector<2x8x8xf32> to vector<2x8xf32>
    %634 = vector.shape_cast %633 : vector<2x8xf32> to vector<2x8x1xf32>
    %635 = tpu.reciprocal %634 {approx = true} : vector<2x8x1xf32> -> vector<2x8x1xf32>
    %636 = vector.broadcast %635 : vector<2x8x1xf32> to vector<2x8x8xf32>
    %637 = arith.mulf %632, %636 : vector<2x8x8xf32>
    "tpu.trace_start"() <{level = 10 : i32, message = "bqk,bkd->bqd"}> : () -> ()
    %cst_274 = arith.constant dense<0.000000e+00> : vector<2x8x8xf32>
    %638 = tpu.matmul %637, %626, %cst_274 {dimension_numbers = #tpu.dot_dimension_numbers<[2], [1], [1], [2], [0, 0, 0, 1, 1, 2], [0], [0]>} : vector<2x8x8xf32>, vector<2x8x8xf32>, vector<2x8x8xf32> -> vector<2x8x8xf32>
    "tpu.trace_stop"() : () -> ()
    %639 = vector.extract_strided_slice %621 {offsets = [0, 0, 8], sizes = [2, 8, 8], strides = [1, 1, 1]} : vector<2x8x32xf32> to vector<2x8x8xf32>
    %640 = vector.extract_strided_slice %622 {offsets = [0, 0, 8], sizes = [2, 8, 8], strides = [1, 1, 1]} : vector<2x8x32xf32> to vector<2x8x8xf32>
    %641 = vector.extract_strided_slice %623 {offsets = [0, 0, 8], sizes = [2, 8, 8], strides = [1, 1, 1]} : vector<2x8x32xf32> to vector<2x8x8xf32>
    "tpu.trace_start"() <{level = 10 : i32, message = "bqd,bkd->bqk"}> : () -> ()
    %cst_275 = arith.constant dense<0.000000e+00> : vector<2x8x8xf32>
    %642 = tpu.matmul %639, %640, %cst_275 {dimension_numbers = #tpu.dot_dimension_numbers<[2], [2], [1], [1], [0, 0, 0, 1, 1, 1], [0], [0]>} : vector<2x8x8xf32>, vector<2x8x8xf32>, vector<2x8x8xf32> -> vector<2x8x8xf32>
    "tpu.trace_stop"() : () -> ()
    %cst_276 = arith.constant dense<0xFF800000> : vector<2x8xf32>
    %643 = vector.multi_reduction <maximumf>, %642, %cst_276 [2] : vector<2x8x8xf32> to vector<2x8xf32>
    %644 = vector.shape_cast %643 : vector<2x8xf32> to vector<2x8x1xf32>
    %645 = vector.broadcast %644 : vector<2x8x1xf32> to vector<2x8x8xf32>
    %646 = arith.subf %642, %645 : vector<2x8x8xf32>
    %647 = math.exp %646 : vector<2x8x8xf32>
    %cst_277 = arith.constant dense<0.000000e+00> : vector<2x8xf32>
    %648 = vector.multi_reduction <add>, %647, %cst_277 [2] : vector<2x8x8xf32> to vector<2x8xf32>
    %649 = vector.shape_cast %648 : vector<2x8xf32> to vector<2x8x1xf32>
    %650 = tpu.reciprocal %649 {approx = true} : vector<2x8x1xf32> -> vector<2x8x1xf32>
    %651 = vector.broadcast %650 : vector<2x8x1xf32> to vector<2x8x8xf32>
    %652 = arith.mulf %647, %651 : vector<2x8x8xf32>
    "tpu.trace_start"() <{level = 10 : i32, message = "bqk,bkd->bqd"}> : () -> ()
    %cst_278 = arith.constant dense<0.000000e+00> : vector<2x8x8xf32>
    %653 = tpu.matmul %652, %641, %cst_278 {dimension_numbers = #tpu.dot_dimension_numbers<[2], [1], [1], [2], [0, 0, 0, 1, 1, 2], [0], [0]>} : vector<2x8x8xf32>, vector<2x8x8xf32>, vector<2x8x8xf32> -> vector<2x8x8xf32>
    "tpu.trace_stop"() : () -> ()
    %654 = vector.extract_strided_slice %621 {offsets = [0, 0, 16], sizes = [2, 8, 8], strides = [1, 1, 1]} : vector<2x8x32xf32> to vector<2x8x8xf32>
    %655 = vector.extract_strided_slice %622 {offsets = [0, 0, 16], sizes = [2, 8, 8], strides = [1, 1, 1]} : vector<2x8x32xf32> to vector<2x8x8xf32>
    %656 = vector.extract_strided_slice %623 {offsets = [0, 0, 16], sizes = [2, 8, 8], strides = [1, 1, 1]} : vector<2x8x32xf32> to vector<2x8x8xf32>
    "tpu.trace_start"() <{level = 10 : i32, message = "bqd,bkd->bqk"}> : () -> ()
    %cst_279 = arith.constant dense<0.000000e+00> : vector<2x8x8xf32>
    %657 = tpu.matmul %654, %655, %cst_279 {dimension_numbers = #tpu.dot_dimension_numbers<[2], [2], [1], [1], [0, 0, 0, 1, 1, 1], [0], [0]>} : vector<2x8x8xf32>, vector<2x8x8xf32>, vector<2x8x8xf32> -> vector<2x8x8xf32>
    "tpu.trace_stop"() : () -> ()
    %cst_280 = arith.constant dense<0xFF800000> : vector<2x8xf32>
    %658 = vector.multi_reduction <maximumf>, %657, %cst_280 [2] : vector<2x8x8xf32> to vector<2x8xf32>
    %659 = vector.shape_cast %658 : vector<2x8xf32> to vector<2x8x1xf32>
    %660 = vector.broadcast %659 : vector<2x8x1xf32> to vector<2x8x8xf32>
    %661 = arith.subf %657, %660 : vector<2x8x8xf32>
    %662 = math.exp %661 : vector<2x8x8xf32>
    %cst_281 = arith.constant dense<0.000000e+00> : vector<2x8xf32>
    %663 = vector.multi_reduction <add>, %662, %cst_281 [2] : vector<2x8x8xf32> to vector<2x8xf32>
    %664 = vector.shape_cast %663 : vector<2x8xf32> to vector<2x8x1xf32>
    %665 = tpu.reciprocal %664 {approx = true} : vector<2x8x1xf32> -> vector<2x8x1xf32>
    %666 = vector.broadcast %665 : vector<2x8x1xf32> to vector<2x8x8xf32>
    %667 = arith.mulf %662, %666 : vector<2x8x8xf32>
    "tpu.trace_start"() <{level = 10 : i32, message = "bqk,bkd->bqd"}> : () -> ()
    %cst_282 = arith.constant dense<0.000000e+00> : vector<2x8x8xf32>
    %668 = tpu.matmul %667, %656, %cst_282 {dimension_numbers = #tpu.dot_dimension_numbers<[2], [1], [1], [2], [0, 0, 0, 1, 1, 2], [0], [0]>} : vector<2x8x8xf32>, vector<2x8x8xf32>, vector<2x8x8xf32> -> vector<2x8x8xf32>
    "tpu.trace_stop"() : () -> ()
    %669 = vector.extract_strided_slice %621 {offsets = [0, 0, 24], sizes = [2, 8, 8], strides = [1, 1, 1]} : vector<2x8x32xf32> to vector<2x8x8xf32>
    %670 = vector.extract_strided_slice %622 {offsets = [0, 0, 24], sizes = [2, 8, 8], strides = [1, 1, 1]} : vector<2x8x32xf32> to vector<2x8x8xf32>
    %671 = vector.extract_strided_slice %623 {offsets = [0, 0, 24], sizes = [2, 8, 8], strides = [1, 1, 1]} : vector<2x8x32xf32> to vector<2x8x8xf32>
    "tpu.trace_start"() <{level = 10 : i32, message = "bqd,bkd->bqk"}> : () -> ()
    %cst_283 = arith.constant dense<0.000000e+00> : vector<2x8x8xf32>
    %672 = tpu.matmul %669, %670, %cst_283 {dimension_numbers = #tpu.dot_dimension_numbers<[2], [2], [1], [1], [0, 0, 0, 1, 1, 1], [0], [0]>} : vector<2x8x8xf32>, vector<2x8x8xf32>, vector<2x8x8xf32> -> vector<2x8x8xf32>
    "tpu.trace_stop"() : () -> ()
    %cst_284 = arith.constant dense<0xFF800000> : vector<2x8xf32>
    %673 = vector.multi_reduction <maximumf>, %672, %cst_284 [2] : vector<2x8x8xf32> to vector<2x8xf32>
    %674 = vector.shape_cast %673 : vector<2x8xf32> to vector<2x8x1xf32>
    %675 = vector.broadcast %674 : vector<2x8x1xf32> to vector<2x8x8xf32>
    %676 = arith.subf %672, %675 : vector<2x8x8xf32>
    %677 = math.exp %676 : vector<2x8x8xf32>
    %cst_285 = arith.constant dense<0.000000e+00> : vector<2x8xf32>
    %678 = vector.multi_reduction <add>, %677, %cst_285 [2] : vector<2x8x8xf32> to vector<2x8xf32>
    %679 = vector.shape_cast %678 : vector<2x8xf32> to vector<2x8x1xf32>
    %680 = tpu.reciprocal %679 {approx = true} : vector<2x8x1xf32> -> vector<2x8x1xf32>
    %681 = vector.broadcast %680 : vector<2x8x1xf32> to vector<2x8x8xf32>
    %682 = arith.mulf %677, %681 : vector<2x8x8xf32>
    "tpu.trace_start"() <{level = 10 : i32, message = "bqk,bkd->bqd"}> : () -> ()
    %cst_286 = arith.constant dense<0.000000e+00> : vector<2x8x8xf32>
    %683 = tpu.matmul %682, %671, %cst_286 {dimension_numbers = #tpu.dot_dimension_numbers<[2], [1], [1], [2], [0, 0, 0, 1, 1, 2], [0], [0]>} : vector<2x8x8xf32>, vector<2x8x8xf32>, vector<2x8x8xf32> -> vector<2x8x8xf32>
    "tpu.trace_stop"() : () -> ()
    %684 = tpu.concatenate %638, %653, %668, %683 in 2 : vector<2x8x8xf32>, vector<2x8x8xf32>, vector<2x8x8xf32>, vector<2x8x8xf32> -> vector<2x8x32xf32>
    %685 = vector.shape_cast %684 : vector<2x8x32xf32> to vector<16x32xf32>
    %cst_287 = arith.constant dense<0.000000e+00> : vector<16x32xf32>
    %686 = tpu.matmul %685, %610, %cst_287 {dimension_numbers = #tpu.dot_dimension_numbers<[1], [1], [0], [0], [0, 0, 1, 0], [], []>} : vector<16x32xf32>, vector<32x32xf32>, vector<16x32xf32> -> vector<16x32xf32>
    %687 = vector.broadcast %612 : vector<1x32xf32> to vector<16x32xf32>
    %688 = arith.addf %686, %687 : vector<16x32xf32>
    %689 = arith.addf %604, %688 : vector<16x32xf32>
    %c1_288 = arith.constant 1 : index
    %c0_289 = arith.constant 0 : index
    %c0_290 = arith.constant 0 : index
    %690 = vector.load %arg28[%c1_288, %c0_289, %c0_290] : memref<2x1x32xf32, #tpu.memory_space<vmem>>, vector<1x1x32xf32>
    %691 = vector.shape_cast %690 : vector<1x1x32xf32> to vector<1x32xf32>
    %c1_291 = arith.constant 1 : index
    %c0_292 = arith.constant 0 : index
    %c0_293 = arith.constant 0 : index
    %692 = vector.load %arg29[%c1_291, %c0_292, %c0_293] : memref<2x1x32xf32, #tpu.memory_space<vmem>>, vector<1x1x32xf32>
    %693 = vector.shape_cast %692 : vector<1x1x32xf32> to vector<1x32xf32>
    %cst_294 = arith.constant dense<0.000000e+00> : vector<16xf32>
    %694 = vector.multi_reduction <add>, %689, %cst_294 [1] : vector<16x32xf32> to vector<16xf32>
    %695 = vector.shape_cast %694 : vector<16xf32> to vector<16x1xf32>
    %cst_295 = arith.constant 3.200000e+01 : f32
    %696 = vector.broadcast %cst_295 : f32 to vector<16x1xf32>
    %697 = arith.divf %695, %696 : vector<16x1xf32>
    %698 = vector.broadcast %697 : vector<16x1xf32> to vector<16x32xf32>
    %699 = arith.subf %689, %698 : vector<16x32xf32>
    %700 = arith.mulf %699, %699 : vector<16x32xf32>
    %cst_296 = arith.constant dense<0.000000e+00> : vector<16xf32>
    %701 = vector.multi_reduction <add>, %700, %cst_296 [1] : vector<16x32xf32> to vector<16xf32>
    %702 = vector.shape_cast %701 : vector<16xf32> to vector<16x1xf32>
    %cst_297 = arith.constant 3.200000e+01 : f32
    %703 = vector.broadcast %cst_297 : f32 to vector<16x1xf32>
    %704 = arith.divf %702, %703 : vector<16x1xf32>
    %705 = vector.broadcast %697 : vector<16x1xf32> to vector<16x32xf32>
    %706 = arith.subf %689, %705 : vector<16x32xf32>
    %cst_298 = arith.constant 9.99999974E-6 : f32
    %707 = vector.broadcast %cst_298 : f32 to vector<16x1xf32>
    %708 = arith.addf %704, %707 : vector<16x1xf32>
    %709 = math.rsqrt %708 : vector<16x1xf32>
    %710 = vector.broadcast %709 : vector<16x1xf32> to vector<16x32xf32>
    %711 = arith.mulf %706, %710 : vector<16x32xf32>
    %712 = vector.broadcast %691 : vector<1x32xf32> to vector<16x32xf32>
    %713 = arith.mulf %711, %712 : vector<16x32xf32>
    %714 = vector.broadcast %693 : vector<1x32xf32> to vector<16x32xf32>
    %715 = arith.addf %713, %714 : vector<16x32xf32>
    %c1_299 = arith.constant 1 : index
    %c0_300 = arith.constant 0 : index
    %c0_301 = arith.constant 0 : index
    %716 = vector.load %arg20[%c1_299, %c0_300, %c0_301] : memref<2x96x32xf32, #tpu.memory_space<vmem>>, vector<1x96x32xf32>
    %717 = vector.shape_cast %716 : vector<1x96x32xf32> to vector<96x32xf32>
    %c1_302 = arith.constant 1 : index
    %c0_303 = arith.constant 0 : index
    %c0_304 = arith.constant 0 : index
    %718 = vector.load %arg21[%c1_302, %c0_303, %c0_304] : memref<2x1x96xf32, #tpu.memory_space<vmem>>, vector<1x1x96xf32>
    %719 = vector.shape_cast %718 : vector<1x1x96xf32> to vector<1x96xf32>
    %c1_305 = arith.constant 1 : index
    %c0_306 = arith.constant 0 : index
    %c0_307 = arith.constant 0 : index
    %720 = vector.load %arg22[%c1_305, %c0_306, %c0_307] : memref<2x32x32xf32, #tpu.memory_space<vmem>>, vector<1x32x32xf32>
    %721 = vector.shape_cast %720 : vector<1x32x32xf32> to vector<32x32xf32>
    %c1_308 = arith.constant 1 : index
    %c0_309 = arith.constant 0 : index
    %c0_310 = arith.constant 0 : index
    %722 = vector.load %arg23[%c1_308, %c0_309, %c0_310] : memref<2x1x32xf32, #tpu.memory_space<vmem>>, vector<1x1x32xf32>
    %723 = vector.shape_cast %722 : vector<1x1x32xf32> to vector<1x32xf32>
    %724 = vector.extract_strided_slice %717 {offsets = [0, 0], sizes = [32, 32], strides = [1, 1]} : vector<96x32xf32> to vector<32x32xf32>
    %cst_311 = arith.constant dense<0.000000e+00> : vector<16x32xf32>
    %725 = tpu.matmul %715, %724, %cst_311 {dimension_numbers = #tpu.dot_dimension_numbers<[1], [1], [0], [0], [0, 0, 1, 0], [], []>} : vector<16x32xf32>, vector<32x32xf32>, vector<16x32xf32> -> vector<16x32xf32>
    %726 = vector.extract_strided_slice %719 {offsets = [0, 0], sizes = [1, 32], strides = [1, 1]} : vector<1x96xf32> to vector<1x32xf32>
    %727 = vector.broadcast %726 : vector<1x32xf32> to vector<16x32xf32>
    %728 = arith.addf %725, %727 : vector<16x32xf32>
    %729 = vector.extract_strided_slice %717 {offsets = [32, 0], sizes = [64, 32], strides = [1, 1]} : vector<96x32xf32> to vector<64x32xf32>
    %cst_312 = arith.constant dense<0.000000e+00> : vector<16x64xf32>
    %730 = tpu.matmul %332, %729, %cst_312 {dimension_numbers = #tpu.dot_dimension_numbers<[1], [1], [0], [0], [0, 0, 1, 0], [], []>} : vector<16x32xf32>, vector<64x32xf32>, vector<16x64xf32> -> vector<16x64xf32>
    %731 = vector.extract_strided_slice %719 {offsets = [0, 32], sizes = [1, 64], strides = [1, 1]} : vector<1x96xf32> to vector<1x64xf32>
    %732 = vector.broadcast %731 : vector<1x64xf32> to vector<16x64xf32>
    %733 = arith.addf %730, %732 : vector<16x64xf32>
    %734 = vector.extract_strided_slice %733 {offsets = [0, 0], sizes = [16, 32], strides = [1, 1]} : vector<16x64xf32> to vector<16x32xf32>
    %735 = vector.extract_strided_slice %733 {offsets = [0, 32], sizes = [16, 32], strides = [1, 1]} : vector<16x64xf32> to vector<16x32xf32>
    %cst_313 = arith.constant 0.353553385 : f32
    %736 = vector.broadcast %cst_313 : f32 to vector<16x32xf32>
    %737 = arith.mulf %728, %736 : vector<16x32xf32>
    %738 = vector.shape_cast %737 : vector<16x32xf32> to vector<2x8x32xf32>
    %739 = vector.shape_cast %734 : vector<16x32xf32> to vector<2x8x32xf32>
    %740 = vector.shape_cast %735 : vector<16x32xf32> to vector<2x8x32xf32>
    %741 = vector.extract_strided_slice %738 {offsets = [0, 0, 0], sizes = [2, 8, 8], strides = [1, 1, 1]} : vector<2x8x32xf32> to vector<2x8x8xf32>
    %742 = vector.extract_strided_slice %739 {offsets = [0, 0, 0], sizes = [2, 8, 8], strides = [1, 1, 1]} : vector<2x8x32xf32> to vector<2x8x8xf32>
    %743 = vector.extract_strided_slice %740 {offsets = [0, 0, 0], sizes = [2, 8, 8], strides = [1, 1, 1]} : vector<2x8x32xf32> to vector<2x8x8xf32>
    "tpu.trace_start"() <{level = 10 : i32, message = "bqd,bkd->bqk"}> : () -> ()
    %cst_314 = arith.constant dense<0.000000e+00> : vector<2x8x8xf32>
    %744 = tpu.matmul %741, %742, %cst_314 {dimension_numbers = #tpu.dot_dimension_numbers<[2], [2], [1], [1], [0, 0, 0, 1, 1, 1], [0], [0]>} : vector<2x8x8xf32>, vector<2x8x8xf32>, vector<2x8x8xf32> -> vector<2x8x8xf32>
    "tpu.trace_stop"() : () -> ()
    %cst_315 = arith.constant dense<0xFF800000> : vector<2x8xf32>
    %745 = vector.multi_reduction <maximumf>, %744, %cst_315 [2] : vector<2x8x8xf32> to vector<2x8xf32>
    %746 = vector.shape_cast %745 : vector<2x8xf32> to vector<2x8x1xf32>
    %747 = vector.broadcast %746 : vector<2x8x1xf32> to vector<2x8x8xf32>
    %748 = arith.subf %744, %747 : vector<2x8x8xf32>
    %749 = math.exp %748 : vector<2x8x8xf32>
    %cst_316 = arith.constant dense<0.000000e+00> : vector<2x8xf32>
    %750 = vector.multi_reduction <add>, %749, %cst_316 [2] : vector<2x8x8xf32> to vector<2x8xf32>
    %751 = vector.shape_cast %750 : vector<2x8xf32> to vector<2x8x1xf32>
    %752 = tpu.reciprocal %751 {approx = true} : vector<2x8x1xf32> -> vector<2x8x1xf32>
    %753 = vector.broadcast %752 : vector<2x8x1xf32> to vector<2x8x8xf32>
    %754 = arith.mulf %749, %753 : vector<2x8x8xf32>
    "tpu.trace_start"() <{level = 10 : i32, message = "bqk,bkd->bqd"}> : () -> ()
    %cst_317 = arith.constant dense<0.000000e+00> : vector<2x8x8xf32>
    %755 = tpu.matmul %754, %743, %cst_317 {dimension_numbers = #tpu.dot_dimension_numbers<[2], [1], [1], [2], [0, 0, 0, 1, 1, 2], [0], [0]>} : vector<2x8x8xf32>, vector<2x8x8xf32>, vector<2x8x8xf32> -> vector<2x8x8xf32>
    "tpu.trace_stop"() : () -> ()
    %756 = vector.extract_strided_slice %738 {offsets = [0, 0, 8], sizes = [2, 8, 8], strides = [1, 1, 1]} : vector<2x8x32xf32> to vector<2x8x8xf32>
    %757 = vector.extract_strided_slice %739 {offsets = [0, 0, 8], sizes = [2, 8, 8], strides = [1, 1, 1]} : vector<2x8x32xf32> to vector<2x8x8xf32>
    %758 = vector.extract_strided_slice %740 {offsets = [0, 0, 8], sizes = [2, 8, 8], strides = [1, 1, 1]} : vector<2x8x32xf32> to vector<2x8x8xf32>
    "tpu.trace_start"() <{level = 10 : i32, message = "bqd,bkd->bqk"}> : () -> ()
    %cst_318 = arith.constant dense<0.000000e+00> : vector<2x8x8xf32>
    %759 = tpu.matmul %756, %757, %cst_318 {dimension_numbers = #tpu.dot_dimension_numbers<[2], [2], [1], [1], [0, 0, 0, 1, 1, 1], [0], [0]>} : vector<2x8x8xf32>, vector<2x8x8xf32>, vector<2x8x8xf32> -> vector<2x8x8xf32>
    "tpu.trace_stop"() : () -> ()
    %cst_319 = arith.constant dense<0xFF800000> : vector<2x8xf32>
    %760 = vector.multi_reduction <maximumf>, %759, %cst_319 [2] : vector<2x8x8xf32> to vector<2x8xf32>
    %761 = vector.shape_cast %760 : vector<2x8xf32> to vector<2x8x1xf32>
    %762 = vector.broadcast %761 : vector<2x8x1xf32> to vector<2x8x8xf32>
    %763 = arith.subf %759, %762 : vector<2x8x8xf32>
    %764 = math.exp %763 : vector<2x8x8xf32>
    %cst_320 = arith.constant dense<0.000000e+00> : vector<2x8xf32>
    %765 = vector.multi_reduction <add>, %764, %cst_320 [2] : vector<2x8x8xf32> to vector<2x8xf32>
    %766 = vector.shape_cast %765 : vector<2x8xf32> to vector<2x8x1xf32>
    %767 = tpu.reciprocal %766 {approx = true} : vector<2x8x1xf32> -> vector<2x8x1xf32>
    %768 = vector.broadcast %767 : vector<2x8x1xf32> to vector<2x8x8xf32>
    %769 = arith.mulf %764, %768 : vector<2x8x8xf32>
    "tpu.trace_start"() <{level = 10 : i32, message = "bqk,bkd->bqd"}> : () -> ()
    %cst_321 = arith.constant dense<0.000000e+00> : vector<2x8x8xf32>
    %770 = tpu.matmul %769, %758, %cst_321 {dimension_numbers = #tpu.dot_dimension_numbers<[2], [1], [1], [2], [0, 0, 0, 1, 1, 2], [0], [0]>} : vector<2x8x8xf32>, vector<2x8x8xf32>, vector<2x8x8xf32> -> vector<2x8x8xf32>
    "tpu.trace_stop"() : () -> ()
    %771 = vector.extract_strided_slice %738 {offsets = [0, 0, 16], sizes = [2, 8, 8], strides = [1, 1, 1]} : vector<2x8x32xf32> to vector<2x8x8xf32>
    %772 = vector.extract_strided_slice %739 {offsets = [0, 0, 16], sizes = [2, 8, 8], strides = [1, 1, 1]} : vector<2x8x32xf32> to vector<2x8x8xf32>
    %773 = vector.extract_strided_slice %740 {offsets = [0, 0, 16], sizes = [2, 8, 8], strides = [1, 1, 1]} : vector<2x8x32xf32> to vector<2x8x8xf32>
    "tpu.trace_start"() <{level = 10 : i32, message = "bqd,bkd->bqk"}> : () -> ()
    %cst_322 = arith.constant dense<0.000000e+00> : vector<2x8x8xf32>
    %774 = tpu.matmul %771, %772, %cst_322 {dimension_numbers = #tpu.dot_dimension_numbers<[2], [2], [1], [1], [0, 0, 0, 1, 1, 1], [0], [0]>} : vector<2x8x8xf32>, vector<2x8x8xf32>, vector<2x8x8xf32> -> vector<2x8x8xf32>
    "tpu.trace_stop"() : () -> ()
    %cst_323 = arith.constant dense<0xFF800000> : vector<2x8xf32>
    %775 = vector.multi_reduction <maximumf>, %774, %cst_323 [2] : vector<2x8x8xf32> to vector<2x8xf32>
    %776 = vector.shape_cast %775 : vector<2x8xf32> to vector<2x8x1xf32>
    %777 = vector.broadcast %776 : vector<2x8x1xf32> to vector<2x8x8xf32>
    %778 = arith.subf %774, %777 : vector<2x8x8xf32>
    %779 = math.exp %778 : vector<2x8x8xf32>
    %cst_324 = arith.constant dense<0.000000e+00> : vector<2x8xf32>
    %780 = vector.multi_reduction <add>, %779, %cst_324 [2] : vector<2x8x8xf32> to vector<2x8xf32>
    %781 = vector.shape_cast %780 : vector<2x8xf32> to vector<2x8x1xf32>
    %782 = tpu.reciprocal %781 {approx = true} : vector<2x8x1xf32> -> vector<2x8x1xf32>
    %783 = vector.broadcast %782 : vector<2x8x1xf32> to vector<2x8x8xf32>
    %784 = arith.mulf %779, %783 : vector<2x8x8xf32>
    "tpu.trace_start"() <{level = 10 : i32, message = "bqk,bkd->bqd"}> : () -> ()
    %cst_325 = arith.constant dense<0.000000e+00> : vector<2x8x8xf32>
    %785 = tpu.matmul %784, %773, %cst_325 {dimension_numbers = #tpu.dot_dimension_numbers<[2], [1], [1], [2], [0, 0, 0, 1, 1, 2], [0], [0]>} : vector<2x8x8xf32>, vector<2x8x8xf32>, vector<2x8x8xf32> -> vector<2x8x8xf32>
    "tpu.trace_stop"() : () -> ()
    %786 = vector.extract_strided_slice %738 {offsets = [0, 0, 24], sizes = [2, 8, 8], strides = [1, 1, 1]} : vector<2x8x32xf32> to vector<2x8x8xf32>
    %787 = vector.extract_strided_slice %739 {offsets = [0, 0, 24], sizes = [2, 8, 8], strides = [1, 1, 1]} : vector<2x8x32xf32> to vector<2x8x8xf32>
    %788 = vector.extract_strided_slice %740 {offsets = [0, 0, 24], sizes = [2, 8, 8], strides = [1, 1, 1]} : vector<2x8x32xf32> to vector<2x8x8xf32>
    "tpu.trace_start"() <{level = 10 : i32, message = "bqd,bkd->bqk"}> : () -> ()
    %cst_326 = arith.constant dense<0.000000e+00> : vector<2x8x8xf32>
    %789 = tpu.matmul %786, %787, %cst_326 {dimension_numbers = #tpu.dot_dimension_numbers<[2], [2], [1], [1], [0, 0, 0, 1, 1, 1], [0], [0]>} : vector<2x8x8xf32>, vector<2x8x8xf32>, vector<2x8x8xf32> -> vector<2x8x8xf32>
    "tpu.trace_stop"() : () -> ()
    %cst_327 = arith.constant dense<0xFF800000> : vector<2x8xf32>
    %790 = vector.multi_reduction <maximumf>, %789, %cst_327 [2] : vector<2x8x8xf32> to vector<2x8xf32>
    %791 = vector.shape_cast %790 : vector<2x8xf32> to vector<2x8x1xf32>
    %792 = vector.broadcast %791 : vector<2x8x1xf32> to vector<2x8x8xf32>
    %793 = arith.subf %789, %792 : vector<2x8x8xf32>
    %794 = math.exp %793 : vector<2x8x8xf32>
    %cst_328 = arith.constant dense<0.000000e+00> : vector<2x8xf32>
    %795 = vector.multi_reduction <add>, %794, %cst_328 [2] : vector<2x8x8xf32> to vector<2x8xf32>
    %796 = vector.shape_cast %795 : vector<2x8xf32> to vector<2x8x1xf32>
    %797 = tpu.reciprocal %796 {approx = true} : vector<2x8x1xf32> -> vector<2x8x1xf32>
    %798 = vector.broadcast %797 : vector<2x8x1xf32> to vector<2x8x8xf32>
    %799 = arith.mulf %794, %798 : vector<2x8x8xf32>
    "tpu.trace_start"() <{level = 10 : i32, message = "bqk,bkd->bqd"}> : () -> ()
    %cst_329 = arith.constant dense<0.000000e+00> : vector<2x8x8xf32>
    %800 = tpu.matmul %799, %788, %cst_329 {dimension_numbers = #tpu.dot_dimension_numbers<[2], [1], [1], [2], [0, 0, 0, 1, 1, 2], [0], [0]>} : vector<2x8x8xf32>, vector<2x8x8xf32>, vector<2x8x8xf32> -> vector<2x8x8xf32>
    "tpu.trace_stop"() : () -> ()
    %801 = tpu.concatenate %755, %770, %785, %800 in 2 : vector<2x8x8xf32>, vector<2x8x8xf32>, vector<2x8x8xf32>, vector<2x8x8xf32> -> vector<2x8x32xf32>
    %802 = vector.shape_cast %801 : vector<2x8x32xf32> to vector<16x32xf32>
    %cst_330 = arith.constant dense<0.000000e+00> : vector<16x32xf32>
    %803 = tpu.matmul %802, %721, %cst_330 {dimension_numbers = #tpu.dot_dimension_numbers<[1], [1], [0], [0], [0, 0, 1, 0], [], []>} : vector<16x32xf32>, vector<32x32xf32>, vector<16x32xf32> -> vector<16x32xf32>
    %804 = vector.broadcast %723 : vector<1x32xf32> to vector<16x32xf32>
    %805 = arith.addf %803, %804 : vector<16x32xf32>
    %806 = arith.addf %715, %805 : vector<16x32xf32>
    %c1_331 = arith.constant 1 : index
    %c0_332 = arith.constant 0 : index
    %c0_333 = arith.constant 0 : index
    %807 = vector.load %arg30[%c1_331, %c0_332, %c0_333] : memref<2x1x32xf32, #tpu.memory_space<vmem>>, vector<1x1x32xf32>
    %808 = vector.shape_cast %807 : vector<1x1x32xf32> to vector<1x32xf32>
    %c1_334 = arith.constant 1 : index
    %c0_335 = arith.constant 0 : index
    %c0_336 = arith.constant 0 : index
    %809 = vector.load %arg31[%c1_334, %c0_335, %c0_336] : memref<2x1x32xf32, #tpu.memory_space<vmem>>, vector<1x1x32xf32>
    %810 = vector.shape_cast %809 : vector<1x1x32xf32> to vector<1x32xf32>
    %cst_337 = arith.constant dense<0.000000e+00> : vector<16xf32>
    %811 = vector.multi_reduction <add>, %806, %cst_337 [1] : vector<16x32xf32> to vector<16xf32>
    %812 = vector.shape_cast %811 : vector<16xf32> to vector<16x1xf32>
    %cst_338 = arith.constant 3.200000e+01 : f32
    %813 = vector.broadcast %cst_338 : f32 to vector<16x1xf32>
    %814 = arith.divf %812, %813 : vector<16x1xf32>
    %815 = vector.broadcast %814 : vector<16x1xf32> to vector<16x32xf32>
    %816 = arith.subf %806, %815 : vector<16x32xf32>
    %817 = arith.mulf %816, %816 : vector<16x32xf32>
    %cst_339 = arith.constant dense<0.000000e+00> : vector<16xf32>
    %818 = vector.multi_reduction <add>, %817, %cst_339 [1] : vector<16x32xf32> to vector<16xf32>
    %819 = vector.shape_cast %818 : vector<16xf32> to vector<16x1xf32>
    %cst_340 = arith.constant 3.200000e+01 : f32
    %820 = vector.broadcast %cst_340 : f32 to vector<16x1xf32>
    %821 = arith.divf %819, %820 : vector<16x1xf32>
    %822 = vector.broadcast %814 : vector<16x1xf32> to vector<16x32xf32>
    %823 = arith.subf %806, %822 : vector<16x32xf32>
    %cst_341 = arith.constant 9.99999974E-6 : f32
    %824 = vector.broadcast %cst_341 : f32 to vector<16x1xf32>
    %825 = arith.addf %821, %824 : vector<16x1xf32>
    %826 = math.rsqrt %825 : vector<16x1xf32>
    %827 = vector.broadcast %826 : vector<16x1xf32> to vector<16x32xf32>
    %828 = arith.mulf %823, %827 : vector<16x32xf32>
    %829 = vector.broadcast %808 : vector<1x32xf32> to vector<16x32xf32>
    %830 = arith.mulf %828, %829 : vector<16x32xf32>
    %831 = vector.broadcast %810 : vector<1x32xf32> to vector<16x32xf32>
    %832 = arith.addf %830, %831 : vector<16x32xf32>
    %c1_342 = arith.constant 1 : index
    %c0_343 = arith.constant 0 : index
    %c0_344 = arith.constant 0 : index
    %833 = vector.load %arg24[%c1_342, %c0_343, %c0_344] : memref<2x64x32xf32, #tpu.memory_space<vmem>>, vector<1x64x32xf32>
    %834 = vector.shape_cast %833 : vector<1x64x32xf32> to vector<64x32xf32>
    %c1_345 = arith.constant 1 : index
    %c0_346 = arith.constant 0 : index
    %c0_347 = arith.constant 0 : index
    %835 = vector.load %arg25[%c1_345, %c0_346, %c0_347] : memref<2x1x64xf32, #tpu.memory_space<vmem>>, vector<1x1x64xf32>
    %836 = vector.shape_cast %835 : vector<1x1x64xf32> to vector<1x64xf32>
    %c1_348 = arith.constant 1 : index
    %c0_349 = arith.constant 0 : index
    %c0_350 = arith.constant 0 : index
    %837 = vector.load %arg26[%c1_348, %c0_349, %c0_350] : memref<2x32x64xf32, #tpu.memory_space<vmem>>, vector<1x32x64xf32>
    %838 = vector.shape_cast %837 : vector<1x32x64xf32> to vector<32x64xf32>
    %c1_351 = arith.constant 1 : index
    %c0_352 = arith.constant 0 : index
    %c0_353 = arith.constant 0 : index
    %839 = vector.load %arg27[%c1_351, %c0_352, %c0_353] : memref<2x1x32xf32, #tpu.memory_space<vmem>>, vector<1x1x32xf32>
    %840 = vector.shape_cast %839 : vector<1x1x32xf32> to vector<1x32xf32>
    %cst_354 = arith.constant dense<0.000000e+00> : vector<16x64xf32>
    %841 = tpu.matmul %832, %834, %cst_354 {dimension_numbers = #tpu.dot_dimension_numbers<[1], [1], [0], [0], [0, 0, 1, 0], [], []>} : vector<16x32xf32>, vector<64x32xf32>, vector<16x64xf32> -> vector<16x64xf32>
    %842 = vector.broadcast %836 : vector<1x64xf32> to vector<16x64xf32>
    %843 = arith.addf %841, %842 : vector<16x64xf32>
    %cst_355 = arith.constant 0.000000e+00 : f32
    %844 = vector.broadcast %cst_355 : f32 to vector<16x64xf32>
    %845 = arith.maximumf %843, %844 : vector<16x64xf32>
    %cst_356 = arith.constant dense<0.000000e+00> : vector<16x32xf32>
    %846 = tpu.matmul %845, %838, %cst_356 {dimension_numbers = #tpu.dot_dimension_numbers<[1], [1], [0], [0], [0, 0, 1, 0], [], []>} : vector<16x64xf32>, vector<32x64xf32>, vector<16x32xf32> -> vector<16x32xf32>
    %847 = vector.broadcast %840 : vector<1x32xf32> to vector<16x32xf32>
    %848 = arith.addf %846, %847 : vector<16x32xf32>
    %849 = arith.addf %832, %848 : vector<16x32xf32>
    %c1_357 = arith.constant 1 : index
    %c0_358 = arith.constant 0 : index
    %c0_359 = arith.constant 0 : index
    %850 = vector.load %arg32[%c1_357, %c0_358, %c0_359] : memref<2x1x32xf32, #tpu.memory_space<vmem>>, vector<1x1x32xf32>
    %851 = vector.shape_cast %850 : vector<1x1x32xf32> to vector<1x32xf32>
    %c1_360 = arith.constant 1 : index
    %c0_361 = arith.constant 0 : index
    %c0_362 = arith.constant 0 : index
    %852 = vector.load %arg33[%c1_360, %c0_361, %c0_362] : memref<2x1x32xf32, #tpu.memory_space<vmem>>, vector<1x1x32xf32>
    %853 = vector.shape_cast %852 : vector<1x1x32xf32> to vector<1x32xf32>
    %cst_363 = arith.constant dense<0.000000e+00> : vector<16xf32>
    %854 = vector.multi_reduction <add>, %849, %cst_363 [1] : vector<16x32xf32> to vector<16xf32>
    %855 = vector.shape_cast %854 : vector<16xf32> to vector<16x1xf32>
    %cst_364 = arith.constant 3.200000e+01 : f32
    %856 = vector.broadcast %cst_364 : f32 to vector<16x1xf32>
    %857 = arith.divf %855, %856 : vector<16x1xf32>
    %858 = vector.broadcast %857 : vector<16x1xf32> to vector<16x32xf32>
    %859 = arith.subf %849, %858 : vector<16x32xf32>
    %860 = arith.mulf %859, %859 : vector<16x32xf32>
    %cst_365 = arith.constant dense<0.000000e+00> : vector<16xf32>
    %861 = vector.multi_reduction <add>, %860, %cst_365 [1] : vector<16x32xf32> to vector<16xf32>
    %862 = vector.shape_cast %861 : vector<16xf32> to vector<16x1xf32>
    %cst_366 = arith.constant 3.200000e+01 : f32
    %863 = vector.broadcast %cst_366 : f32 to vector<16x1xf32>
    %864 = arith.divf %862, %863 : vector<16x1xf32>
    %865 = vector.broadcast %857 : vector<16x1xf32> to vector<16x32xf32>
    %866 = arith.subf %849, %865 : vector<16x32xf32>
    %cst_367 = arith.constant 9.99999974E-6 : f32
    %867 = vector.broadcast %cst_367 : f32 to vector<16x1xf32>
    %868 = arith.addf %864, %867 : vector<16x1xf32>
    %869 = math.rsqrt %868 : vector<16x1xf32>
    %870 = vector.broadcast %869 : vector<16x1xf32> to vector<16x32xf32>
    %871 = arith.mulf %866, %870 : vector<16x32xf32>
    %872 = vector.broadcast %851 : vector<1x32xf32> to vector<16x32xf32>
    %873 = arith.mulf %871, %872 : vector<16x32xf32>
    %874 = vector.broadcast %853 : vector<1x32xf32> to vector<16x32xf32>
    %875 = arith.addf %873, %874 : vector<16x32xf32>
    %c0_368 = arith.constant 0 : index
    %c0_369 = arith.constant 0 : index
    %876 = vector.load %arg34[%c0_368, %c0_369] : memref<1x32xf32, #tpu.memory_space<vmem>>, vector<1x32xf32>
    %c0_370 = arith.constant 0 : index
    %c0_371 = arith.constant 0 : index
    %877 = vector.load %arg35[%c0_370, %c0_371] : memref<1x32xf32, #tpu.memory_space<vmem>>, vector<1x32xf32>
    %cst_372 = arith.constant dense<0.000000e+00> : vector<16xf32>
    %878 = vector.multi_reduction <add>, %875, %cst_372 [1] : vector<16x32xf32> to vector<16xf32>
    %879 = vector.shape_cast %878 : vector<16xf32> to vector<16x1xf32>
    %cst_373 = arith.constant 3.200000e+01 : f32
    %880 = vector.broadcast %cst_373 : f32 to vector<16x1xf32>
    %881 = arith.divf %879, %880 : vector<16x1xf32>
    %882 = vector.broadcast %881 : vector<16x1xf32> to vector<16x32xf32>
    %883 = arith.subf %875, %882 : vector<16x32xf32>
    %884 = arith.mulf %883, %883 : vector<16x32xf32>
    %cst_374 = arith.constant dense<0.000000e+00> : vector<16xf32>
    %885 = vector.multi_reduction <add>, %884, %cst_374 [1] : vector<16x32xf32> to vector<16xf32>
    %886 = vector.shape_cast %885 : vector<16xf32> to vector<16x1xf32>
    %cst_375 = arith.constant 3.200000e+01 : f32
    %887 = vector.broadcast %cst_375 : f32 to vector<16x1xf32>
    %888 = arith.divf %886, %887 : vector<16x1xf32>
    %889 = vector.broadcast %881 : vector<16x1xf32> to vector<16x32xf32>
    %890 = arith.subf %875, %889 : vector<16x32xf32>
    %cst_376 = arith.constant 9.99999974E-6 : f32
    %891 = vector.broadcast %cst_376 : f32 to vector<16x1xf32>
    %892 = arith.addf %888, %891 : vector<16x1xf32>
    %893 = math.rsqrt %892 : vector<16x1xf32>
    %894 = vector.broadcast %893 : vector<16x1xf32> to vector<16x32xf32>
    %895 = arith.mulf %890, %894 : vector<16x32xf32>
    %896 = vector.broadcast %876 : vector<1x32xf32> to vector<16x32xf32>
    %897 = arith.mulf %895, %896 : vector<16x32xf32>
    %898 = vector.broadcast %877 : vector<1x32xf32> to vector<16x32xf32>
    %899 = arith.addf %897, %898 : vector<16x32xf32>
    %900 = vector.shape_cast %899 : vector<16x32xf32> to vector<2x8x32xf32>
    %901 = vector.extract_strided_slice %900 {offsets = [0, 7, 0], sizes = [2, 1, 32], strides = [1, 1, 1]} : vector<2x8x32xf32> to vector<2x1x32xf32>
    %902 = vector.shape_cast %901 : vector<2x1x32xf32> to vector<2x32xf32>
    %c0_377 = arith.constant 0 : index
    %c0_378 = arith.constant 0 : index
    %903 = vector.load %arg36[%c0_377, %c0_378] : memref<128x32xf32, #tpu.memory_space<vmem>>, vector<128x32xf32>
    %cst_379 = arith.constant dense<0.000000e+00> : vector<2x128xf32>
    %904 = tpu.matmul %902, %903, %cst_379 {dimension_numbers = #tpu.dot_dimension_numbers<[1], [1], [0], [0], [0, 0, 1, 0], [], []>} : vector<2x32xf32>, vector<128x32xf32>, vector<2x128xf32> -> vector<2x128xf32>
    %c0_380 = arith.constant 0 : index
    %c0_381 = arith.constant 0 : index
    %905 = vector.load %arg37[%c0_380, %c0_381] : memref<1x128xf32, #tpu.memory_space<vmem>>, vector<1x128xf32>
    %906 = vector.broadcast %905 : vector<1x128xf32> to vector<2x128xf32>
    %907 = arith.addf %904, %906 : vector<2x128xf32>
    %c0_382 = arith.constant 0 : index
    %c0_383 = arith.constant 0 : index
    %908 = vector.load %arg38[%c0_382, %c0_383] : memref<2x128xf32, #tpu.memory_space<vmem>>, vector<2x128xf32>
    tpu.vector_store %arg38[%c0_382, %c0_383], %907 {strides = array<i32>} : memref<2x128xf32, #tpu.memory_space<vmem>>, vector<2x128xf32>,
    return
  }
}

</mosaic_0001>

<bundles_post_ra>
// kernel: transformer_text_generator.1
= control target key start
LH: loop header
LB: loop body
LE: loop exit
PB: predicated region body
PF: predicated region fallthrough
CT: control target
= control target key end

     0   :  { %s6477_s6 = smov 1   ;;  %s6478_s10 = smov 2   ;;  %s8055_s0 = inlined_call_operand.smem [shape: u32[39], index: -1, kind: input, shape index: {}] }
   0x1   :  { %s6539_s5 = sld [smem:[%s8055_s0]]   ;;  %s6479_s14 = smov 3  }
   0x2   :  { %s6544_s9 = sld [smem:[%s8055_s0 + %s6477_s6]]   ;;  %s6480_s18 = smov 4  }
   0x3   :  { %s6549_s13 = sld [smem:[%s8055_s0 + %s6478_s10]]   ;;  %s6481_s22 = smov 5  }
   0x4   :  { %s6554_s17 = sld [smem:[%s8055_s0 + %s6479_s14]]   ;;  %s6482_s26 = smov 6  }
   0x5   :  { %s6559_s21 = sld [smem:[%s8055_s0 + %s6480_s18]]   ;;  %s6483_s30 = smov 7  }
   0x6   :  { %s6564_s25 = sld [smem:[%s8055_s0 + %s6481_s22]]   ;;  %s6484_s4 = smov 8  }
   0x7   :  { %s6569_s29 = sld [smem:[%s8055_s0 + %s6482_s26]]   ;;  %s6485_s10 = smov 9  }
   0x8   :  { %8084 = sst [smem:[#allocation5_spill]] %s6544_s9  ;;  %s6486_s15 = smov 10  }
   0x9   :  { %s6574_s3 = sld [smem:[%s8055_s0 + %s6483_s30]]   ;;  %s6487_s20 = smov 11  }
   0xa   :  { %s6579_s8 = sld [smem:[%s8055_s0 + %s6484_s4]]   ;;  %s6488_s26 = smov 12  }
   0xb   :  { %s6584_s14 = sld [smem:[%s8055_s0 + %s6485_s10]]   ;;  %s6489_s1 = smov 13  }
   0xc   :  { %s6589_s19 = sld [smem:[%s8055_s0 + %s6486_s15]]   ;;  %s6490_s7 = smov 14  }
   0xd   :  { %s6594_s24 = sld [smem:[%s8055_s0 + %s6487_s20]]   ;;  %s6491_s15 = smov 15  }
   0xe   :  { %s6599_s30 = sld [smem:[%s8055_s0 + %s6488_s26]]   ;;  %s6492_s22 = smov 16  }
   0xf   :  { %s6604_s6 = sld [smem:[%s8055_s0 + %s6489_s1]]   ;;  %s6493_s28 = smov 17  }
  0x10   :  { %s6609_s12 = sld [smem:[%s8055_s0 + %s6490_s7]]   ;;  %s6494_s7 = smov 18  }
  0x11   :  { %s6614_s20 = sld [smem:[%s8055_s0 + %s6491_s15]]   ;;  %s6495_s15 = smov 19  }
  0x12   :  { %s6619_s27 = sld [smem:[%s8055_s0 + %s6492_s22]]   ;;  %s6496_s22 = smov 20  }
  0x13   :  { %s6624_s4 = sld [smem:[%s8055_s0 + %s6493_s28]]   ;;  %s6497_s28 = smov 21  }
  0x14   :  { %s6639_s9 = sld [smem:[%s8055_s0 + %s6496_s22]]   ;;  %s6500_s22 = smov 24  }
  0x16   :  { %8085 = sst [smem:[#allocation6_spill]] %s6609_s12 }
  0x17   :  { %8086 = sst [smem:[#allocation7_spill]] %s6614_s20 }
  0x18   :  { %s6629_s12 = sld [smem:[%s8055_s0 + %s6494_s7]]   ;;  %s6498_s7 = smov 22  }
  0x19   :  { %8087 = sst [smem:[#allocation8_spill]] %s6624_s4 }
  0x1a   :  { %s6634_s20 = sld [smem:[%s8055_s0 + %s6495_s15]]   ;;  %s6499_s15 = smov 23  }
  0x1b   :  { %8090 = sst [smem:[#allocation11_spill]] %s6639_s9 }
  0x1c   :  { %s6644_s4 = sld [smem:[%s8055_s0 + %s6497_s28]]   ;;  %s6501_s28 = smov 25  }
  0x1d   :  { %s6659_s9 = sld [smem:[%s8055_s0 + %s6500_s22]]   ;;  %s6504_s22 = smov 28  }
  0x1e   :  { %8088 = sst [smem:[#allocation9_spill]] %s6629_s12 }
  0x1f   :  { %s6649_s12 = sld [smem:[%s8055_s0 + %s6498_s7]]   ;;  %s6502_s7 = smov 26  }
  0x20   :  { %8089 = sst [smem:[#allocation10_spill]] %s6634_s20 }
  0x21   :  { %s6654_s20 = sld [smem:[%s8055_s0 + %s6499_s15]]   ;;  %s6503_s15 = smov 27  }
  0x22   :  { %8091 = sst [smem:[#allocation12_spill]] %s6644_s4 }
  0x23   :  { %8094 = sst [smem:[#allocation15_spill]] %s6659_s9 }
  0x24   :  { %s6664_s4 = sld [smem:[%s8055_s0 + %s6501_s28]]   ;;  %s6505_s28 = smov 29  }
  0x25   :  { %8092 = sst [smem:[#allocation13_spill]] %s6649_s12 }
  0x26   :  { %s6669_s12 = sld [smem:[%s8055_s0 + %s6502_s7]]   ;;  %s6506_s7 = smov 30  }
  0x27   :  { %8093 = sst [smem:[#allocation14_spill]] %s6654_s20 }
  0x28   :  { %s6674_s20 = sld [smem:[%s8055_s0 + %s6503_s15]]   ;;  %s6507_s15 = smov 31  }
  0x29   :  { %s6679_s9 = sld [smem:[%s8055_s0 + %s6504_s22]]   ;;  %s6508_s22 = smov 32  }
  0x2a   :  { %8095 = sst [smem:[#allocation16_spill]] %s6664_s4 }
  0x2b   :  { %s6684_s4 = sld [smem:[%s8055_s0 + %s6505_s28]]   ;;  %s6509_s28 = smov 33  }
  0x2c   :  { %8096 = sst [smem:[#allocation17_spill]] %s6669_s12 }
  0x2d   :  { %s6689_s12 = sld [smem:[%s8055_s0 + %s6506_s7]]   ;;  %s6510_s7 = smov 34  }
  0x2e   :  { %8097 = sst [smem:[#allocation18_spill]] %s6674_s20 }
  0x2f   :  { %8098 = sst [smem:[#allocation19_spill]] %s6679_s9 }
  0x30   :  { %s6694_s20 = sld [smem:[%s8055_s0 + %s6507_s15]]   ;;  %s6511_s15 = smov 35  }
  0x31   :  { %8099 = sst [smem:[#allocation20_spill]] %s6684_s4 }
  0x32   :  { %s6699_s9 = sld [smem:[%s8055_s0 + %s6508_s22]]   ;;  %s6512_s22 = smov 36  }
  0x33   :  { %8100 = sst [smem:[#allocation21_spill]] %s6689_s12 }
  0x34   :  { %s6704_s4 = sld [smem:[%s8055_s0 + %s6509_s28]]   ;;  %s6513_s28 = smov 37  }
  0x35   :  { %s6709_s12 = sld [smem:[%s8055_s0 + %s6510_s7]]   ;;  %s6514_s7 = smov 38  }
  0x36   :  { %8101 = sst [smem:[#allocation22_spill]] %s6694_s20 }
  0x37   :  { %s6714_s20 = sld [smem:[%s8055_s0 + %s6511_s15]]  }
  0x38   :  { %8102 = sst [smem:[#allocation23_spill]] %s6699_s9 }
  0x39   :  { %s6719_s9 = sld [smem:[%s8055_s0 + %s6512_s22]]  }
  0x3a   :  { %8103 = sst [smem:[#allocation24_spill]] %s6704_s4 }
  0x3b   :  { %8104 = sst [smem:[#allocation25_spill]] %s6709_s12 }
  0x3c   :  { %s6724_s4 = sld [smem:[%s8055_s0 + %s6513_s28]]  }
  0x3d   :  { %s6729_s12 = sld [smem:[%s8055_s0 + %s6514_s7]]  }
  0x3e   :  { %v172_v0 = vld [vmem:[%s6549_s13 + $0x58] sm:$0xff]  ;;  %vm182_vm0 = vcmask 261120   ;;  %v171_v1 = vld [vmem:[%s6549_s13 + $0x50] sm:$0xff]  ;;  %v170_v2 = vld [vmem:[%s6549_s13 + $0x48] sm:$0xff] }
  0x3f   :  { %5654 = vmatpush.xpose.msk.msra.mxu0 %vm182_vm0, %v172_v0  ;;  %v169_v3 = vld [vmem:[%s6549_s13 + $0x40] sm:$0xff]  ;;  %v168_v4 = vld [vmem:[%s6549_s13 + $0x38] sm:$0xff]  ;;  %v167_v5 = vld [vmem:[%s6549_s13 + $0x30] sm:$0xff] }
  0x43   :  { %5655 = vmatpush.xpose.msk.msra.mxu0 %vm182_vm0, %v171_v1 }
  0x47   :  { %5656 = vmatpush.xpose.msk.msra.mxu0 %vm182_vm0, %v170_v2 }
  0x4b   :  { %5657 = vmatpush.xpose.msk.msra.mxu0 %vm182_vm0, %v169_v3 }
  0x4f   :  { %5658 = vmatpush.xpose.msk.msra.mxu0 %vm182_vm0, %v168_v4 }
  0x50   :  { %82 = vsyncpa [#allocation3], 0  ;;  %v166_v6 = vld [vmem:[%s6549_s13 + $0x28] sm:$0xff]  ;;  %v165_v7 = vld [vmem:[%s6549_s13 + $0x20] sm:$0xff]  ;;  %s6515_s0 = smov 88   ;;  %s6516_s15 = smov 96  }
  0x51   :  { %v164_v8 = vld [vmem:[%s6549_s13 + $0x18] sm:$0xff]  ;;  %v163_v9 = vld [vmem:[%s6549_s13 + $0x10] sm:$0xff]  ;;  %v162_v10 = vld [vmem:[%s6549_s13 + $0x8] sm:$0xff]  ;;  %s6518_s16 = smov 80   ;;  %vm253_vm1 = vcmask 64512   ;;  %s6519_s18 = smov 56  }
  0x52   :  { %v161_v11 = vld [vmem:[%s6549_s13] sm:$0xff]  ;;  %v6761_v13 = vld [vmem:[%s6539_s5 + $0x8] sm:$0xff]  ;;  %s6520_s22 = smov 64   ;;  %s6521_s23 = smov 112   ;;  %vm797_vm2 = vcmask 130048   ;;  %vm800_vm3 = vcmask 195584  }
  0x53   :  { %5659 = vmatpush.xpose.msk.msra.mxu0 %vm182_vm0, %v167_v5  ;;  %v6756_v12 = vld [vmem:[%s6539_s5] sm:$0xff]  ;;  %s6517_s5 = smov 120   ;;  %s6522_s26 = smov 72   ;;  %vm987_vm8 = vcmask 523264  }
  0x54   :  { %v6164_v14 = vld [vmem:[%s6554_s17] ss:$0 sm:$0xff]  ;;  %s6523_s28 = smov 104   ;;  %s8080_s1 = smov 48  }
  0x55   :  { %s8082_s2 = smov 40   ;;  %s8078_s7 = smov 8  }
  0x56   :  { %s8076_s10 = smov 16   ;;  %s8074_s11 = smov 24  }
  0x57   :  { %5660 = vmatpush.xpose.msk.msra.mxu0 %vm182_vm0, %v166_v6 }
  0x5b   :  { %5661 = vmatpush.xpose.msk.msra.mxu0 %vm182_vm0, %v165_v7 }
  0x5f   :  { %5662 = vmatpush.xpose.msk.msra.mxu0 %vm182_vm0, %v164_v8 }
  0x63   :  { %5663 = vmatpush.xpose.msk.msra.mxu0 %vm182_vm0, %v163_v9 }
  0x67   :  { %5664 = vmatpush.xpose.msk.msra.mxu0 %vm182_vm0, %v162_v10 }
  0x6b   :  { %5665 = vmatpush.xpose.msk.msra.mxu0 %vm182_vm0, %v161_v11 }
  0x6e   :  { %5666 = vmatmul.msk.f32.vlgmr.msra.gmra.mxu0 %vm182_vm0, %v6756_v12 }
  0x76   :  { %5667 = vmatmul.msk.f32.gmra.mxu0 %vm182_vm0, %v6761_v13 }
  0xeb   :  { %v242_v15 = vpop.f32.mrf.mxu0 }
  0xec   :  { %v6766_v16 = vadd.f32 %v6164_v14, %v242_v15 }
  0xee   :  { %383 = vrot.lane.b32.xlu1 %v6766_v16, %s6515_s0  ;;  %251 = vrot.lane.b32.xlu0 %v6766_v16, %s6516_s15  ;;  %v6775_v19 = vmul.f32 0.35355338, %v6766_v16 }
  0xf3   :  { %v245_v17 = vpop.f32.mrf.mxu0 }
  0xf4   :  { %v6772_v18 = vadd.f32 %v6164_v14, %v245_v17 }
  0xf6   :  { %280 = vrot.lane.b32.xlu0 %v6772_v18, %s6516_s15  ;;  %381 = vrot.lane.b32.xlu1 %v6775_v19, %s6517_s5  ;;  %v6782_v20 = vmul.f32 0.35355338, %v6772_v18  ;;  %v6805_v31 = vpack.i.bf16 %v6772_v18, %v6766_v16 }
  0xfe   :  { %409 = vrot.lane.b32.xlu1 %v6782_v20, %s6517_s5 }
 0x106   :  { %513 = vrot.lane.b32.xlu1 %v6766_v16, %s6518_s16 }
 0x160   :  { %v384_v21 = vpop.permute.xlu1 %383  ;;  %v252_v22 = vpop.permute.xlu0 %251 }
 0x161   :  { %5668 = vmatpush.xpose.msk.msra.mxu3 %vm253_vm1, %v252_v22  ;;  %5674 = vmatpush.xpose.msk.msra.mxu1 %vm253_vm1, %v384_v21 }
 0x164   :  { %5669 = vmatmul.msk.f32.vlgmr.msra.gmra.mxu3 %vm253_vm1, %v6775_v19 }
 0x168   :  { %v281_v23 = vpop.permute.xlu0 %280  ;;  %v382_v24 = vpop.permute.xlu1 %381 }
 0x169   :  { %5670 = vmatpush.xpose.msk.msra.mxu2 %vm253_vm1, %v281_v23  ;;  %5675 = vmatmul.msk.f32.vlgmr.msra.gmra.mxu1 %vm253_vm1, %v382_v24 }
 0x16c   :  { %5671 = vmatmul.msk.f32.vlgmr.msra.gmra.mxu2 %vm253_vm1, %v6782_v20 }
 0x170   :  { %v410_v39 = vpop.permute.xlu1 %409 }
 0x178   :  { %v514_v51 = vpop.permute.xlu1 %513 }
 0x1e6   :  { %v406_v25 = vpop.f32.mrf.mxu1 }
 0x1e7   :  { %v276_v26 = vpop.f32.mrf.mxu3  ;;  %v437_v27 = vsel %vm253_vm1, %v406_v25, -inf }
 0x1e8   :  { %438 = vmax.xlane.f32.xlu0 %v437_v27  ;;  %v307_v28 = vsel %vm253_vm1, %v276_v26, -inf }
 0x1e9   :  { %308 = vmax.xlane.f32.xlu2 %v307_v28 }
 0x1ef   :  { %v304_v29 = vpop.f32.mrf.mxu2 }
 0x1f0   :  { %v310_v30 = vsel %vm253_vm1, %v304_v29, -inf }
 0x1f1   :  { %311 = vmax.xlane.f32.xlu2 %v310_v30 }
 0x1fc   :  { %411 = vrot.lane.b32.xlu0 %v6772_v18, %s6515_s0 }
 0x204   :  { %459 = vrot.lane.b32.xlu0 %v6766_v16, %s6519_s18 }
 0x209   :  { %6150 = vrot.lane.b32.xlu2 %v6805_v31, %s6520_s22 }
 0x20c   :  { %511 = vrot.lane.b32.xlu0 %v6775_v19, %s6521_s23 }
 0x214   :  { %643 = vrot.lane.b32.xlu0 %v6766_v16, %s6522_s26 }
 0x25b   :  { %v439_v32 = vpop.xlane.xlu0 %438 }
 0x25c   :  { %v443_v33 = vsub.f32 %v406_v25, %v439_v32  ;;  %v309_v34 = vpop.xlane.xlu2 %308 }
 0x25d   :  { %v313_v35 = vsub.f32 %v276_v26, %v309_v34 }
 0x25e   :  { %v445_v36 = vmul.f32 1.442695, %v443_v33 }
 0x25f   :  { %v315_v37 = vmul.f32 1.442695, %v313_v35 }
 0x260   :  { %6209 = vpow2.f32 %v445_v36 }
 0x261   :  { %6211 = vpow2.f32 %v315_v37 }
 0x264   :  { %v312_v38 = vpop.xlane.xlu2 %311 }
 0x265   :  { %v314_v40 = vsub.f32 %v304_v29, %v312_v38 }
 0x266   :  { %v6210_v41 = vpop.eup %6209 }
 0x267   :  { %v6212_v42 = vpop.eup %6211  ;;  %v317_v43 = vmul.f32 1.442695, %v314_v40  ;;  %v449_v44 = vsel %vm253_vm1, %v6210_v41, 0.0 }
 0x268   :  { %450 = vadd.xlane.f32.xlu2 %v449_v44  ;;  %v319_v45 = vsel %vm253_vm1, %v6212_v42, 0.0 }
 0x269   :  { %6213 = vpow2.f32 %v317_v43  ;;  %320 = vadd.xlane.f32.xlu1 %v319_v45 }
 0x26c   :  { %v6151_v46 = vpop.permute.xlu2 %6150 }
 0x26d   :  { %v6153_v47 = vunpack.i.h.bf16 %v6151_v46  ;;  %v6152_v48 = vunpack.i.l.bf16 %v6151_v46 }
 0x26e   :  { %v412_v49 = vpop.permute.xlu0 %411 }
 0x26f   :  { %v6214_v50 = vpop.eup %6213  ;;  %350 = vmatpush.msrb.mxu3 %v6152_v48  ;;  %5676 = vmatpush.xpose.msk.msrb.mxu2 %vm253_vm1, %v412_v49 }
 0x270   :  { %v322_v52 = vsel %vm253_vm1, %v6214_v50, 0.0 }
 0x271   :  { %376 = vmatpush.msra.mxu3 %v6153_v47  ;;  %323 = vadd.xlane.f32.xlu2 %v322_v52 }
 0x272   :  { %5677 = vmatmul.msk.f32.vlgmr.msrb.gmra.mxu2 %vm253_vm1, %v410_v39 }
 0x273   :  { %5680 = vmatpush.xpose.msk.msra.mxu2 %vm253_vm1, %v514_v51 }
 0x276   :  { %v460_v53 = vpop.permute.xlu0 %459 }
 0x27e   :  { %v512_v54 = vpop.permute.xlu0 %511 }
 0x27f   :  { %5681 = vmatmul.msk.f32.vlgmr.msra.gmra.mxu2 %vm253_vm1, %v512_v54 }
 0x282   :  { %539 = vrot.lane.b32.xlu1 %v6782_v20, %s6521_s23 }
 0x286   :  { %v644_v2 = vpop.permute.xlu0 %643 }
 0x289   :  { %541 = vrot.lane.b32.xlu2 %v6772_v18, %s6518_s16 }
 0x28a   :  { %641 = vrot.lane.b32.xlu1 %v6775_v19, %s6523_s28 }
 0x2db   :  { %v451_v55 = vpop.xlane.xlu2 %450 }
 0x2dc   :  { %v321_v56 = vpop.xlane.xlu1 %320 }
 0x2dd   :  { %6215 = vrcp.f32 %v321_v56 }
 0x2e3   :  { %v6216_v57 = vpop.eup %6215 }
 0x2e4   :  { %v324_v58 = vpop.xlane.xlu2 %323  ;;  %v327_v59 = vmul.f32 %v6216_v57, %v6212_v42 }
 0x2e5   :  { %6217 = vrcp.f32 %v324_v58 }
 0x2e6   :  { %5672 = vmatmul.msk.f32.vlgmr.msrb.gmra.mxu3 %vm253_vm1, %v327_v59  ;;  %6219 = vrcp.f32 %v451_v55 }
 0x2e7   :  { %480 = vmatpush.msrb.mxu3 %v460_v53 }
 0x2eb   :  { %v6218_v60 = vpop.eup %6217 }
 0x2ec   :  { %v328_v61 = vmul.f32 %v6218_v60, %v6214_v50  ;;  %v542_v62 = vpop.permute.xlu2 %541  ;;  %v6220_v63 = vpop.eup %6219 }
 0x2ed   :  { %v457_v0 = vmul.f32 %v6220_v63, %v6210_v41 }
 0x2ee   :  { %5673 = vmatmul.msk.f32.vlgmr.msra.gmra.mxu3 %vm253_vm1, %v328_v61  ;;  %v177_v61 = vld [vmem:[%s6559_s21 + $0x18] sm:$0xff] }
 0x2ef   :  { %5682 = vmatpush.xpose.msk.msra.mxu3 %vm253_vm1, %v542_v62  ;;  %v176_v62 = vld [vmem:[%s6559_s21 + $0x10] sm:$0xff] }
 0x2f4   :  { %v540_v4 = vpop.permute.xlu1 %539 }
 0x2f5   :  { %v434_v1 = vpop.f32.mrf.mxu2 }
 0x2f6   :  { %5678 = vmatmul.msk.f32.vlgmr.msrb.gmra.mxu3 %vm253_vm1, %v457_v0  ;;  %v440_v3 = vsel %vm253_vm1, %v434_v1, -inf  ;;  %v175_v0 = vld [vmem:[%s6559_s21 + $0x8] sm:$0xff] }
 0x2f7   :  { %5686 = vmatpush.xpose.msk.msrb.mxu3 %vm253_vm1, %v644_v2  ;;  %441 = vmax.xlane.f32.xlu0 %v440_v3  ;;  %v174_v2 = vld [vmem:[%s6559_s21] sm:$0xff] }
 0x2fc   :  { %v642_v7 = vpop.permute.xlu1 %641 }
 0x2fe   :  { %5683 = vmatmul.msk.f32.vlgmr.msra.gmra.mxu3 %vm253_vm1, %v540_v4 }
 0x302   :  { %v536_v5 = vpop.f32.mrf.mxu2 }
 0x303   :  { %v567_v6 = vsel %vm253_vm1, %v536_v5, -inf }
 0x304   :  { %568 = vmax.xlane.f32.xlu1 %v567_v6 }
 0x306   :  { %5687 = vmatmul.msk.f32.vlgmr.msrb.gmra.mxu3 %vm253_vm1, %v642_v7 }
 0x369   :  { %v6835_v8 = vpop.f32.mrf.mxu3 }
 0x36a   :  { %v442_v9 = vpop.xlane.xlu0 %441 }
 0x36b   :  { %v444_v10 = vsub.f32 %v434_v1, %v442_v9 }
 0x36d   :  { %v447_v11 = vmul.f32 1.442695, %v444_v10 }
 0x36f   :  { %6221 = vpow2.f32 %v447_v11 }
 0x371   :  { %v6837_v14 = vpop.f32.mrf.mxu3 }
 0x375   :  { %v6222_v15 = vpop.eup %6221 }
 0x376   :  { %v452_v17 = vsel %vm253_vm1, %v6222_v15, 0.0 }
 0x377   :  { %453 = vadd.xlane.f32.xlu1 %v452_v17  ;;  %v569_v21 = vpop.xlane.xlu1 %568 }
 0x378   :  { %v573_v22 = vsub.f32 %v536_v5, %v569_v21 }
 0x379   :  { %v482_v19 = vpop.f32.mrf.mxu3 }
 0x37a   :  { %v575_v25 = vmul.f32 1.442695, %v573_v22 }
 0x37c   :  { %6223 = vpow2.f32 %v575_v25 }
 0x381   :  { %v564_v23 = vpop.f32.mrf.mxu3 }
 0x382   :  { %v570_v24 = vsel %vm253_vm1, %v564_v23, -inf  ;;  %v6224_v28 = vpop.eup %6223 }
 0x383   :  { %571 = vmax.xlane.f32.xlu2 %v570_v24  ;;  %v579_v29 = vsel %vm253_vm1, %v6224_v28, 0.0 }
 0x389   :  { %v666_v26 = vpop.f32.mrf.mxu3 }
 0x38a   :  { %v697_v27 = vsel %vm253_vm1, %v666_v26, -inf }
 0x38b   :  { %698 = vmax.xlane.f32.xlu0 %v697_v27 }
 0x393   :  { %580 = vadd.xlane.f32.xlu0 %v579_v29 }
 0x39b   :  { %485 = vrot.lane.b32.xlu2 %v6772_v18, %s6519_s18 }
 0x3a3   :  { %669 = vrot.lane.b32.xlu2 %v6782_v20, %s6523_s28 }
 0x3a7   :  { %6155 = vrot.lane.b32.xlu0 %v6805_v31, %s8080_s1 }
 0x3af   :  { %719 = vrot.lane.b32.xlu0 %v6766_v16, %s8082_s2 }
 0x3b7   :  { %773 = vrot.lane.b32.xlu0 %v482_v19, %s8078_s7 }
 0x3ea   :  { %v454_v30 = vpop.xlane.xlu1 %453 }
 0x3eb   :  { %6225 = vrcp.f32 %v454_v30 }
 0x3f1   :  { %v6226_v35 = vpop.eup %6225 }
 0x3f2   :  { %v458_v37 = vmul.f32 %v6226_v35, %v6222_v15 }
 0x3f6   :  { %v572_v32 = vpop.xlane.xlu2 %571 }
 0x3f7   :  { %v574_v33 = vsub.f32 %v564_v23, %v572_v32 }
 0x3f9   :  { %v577_v34 = vmul.f32 1.442695, %v574_v33 }
 0x3fb   :  { %6227 = vpow2.f32 %v577_v34 }
 0x3fe   :  { %v699_v36 = vpop.xlane.xlu0 %698  ;;  %v486_v20 = vpop.permute.xlu2 %485 }
 0x3ff   :  { %v703_v38 = vsub.f32 %v666_v26, %v699_v36  ;;  %506 = vmatpush.msrb.mxu1 %v486_v20 }
 0x400   :  { %5679 = vmatmul.msk.f32.vlgmr.msrb.gmra.mxu1 %vm253_vm1, %v458_v37 }
 0x401   :  { %v6228_v31 = vpop.eup %6227  ;;  %v705_v39 = vmul.f32 1.442695, %v703_v38 }
 0x402   :  { %v582_v16 = vsel %vm253_vm1, %v6228_v31, 0.0 }
 0x403   :  { %6229 = vpow2.f32 %v705_v39  ;;  %583 = vadd.xlane.f32.xlu1 %v582_v16  ;;  %v919_v39 = vld [vmem:[%s6569_s29 + $0x38] sm:$0xff]  ;;  %v918_v16 = vld [vmem:[%s6569_s29 + $0x30] sm:$0xff] }
 0x406   :  { %v581_v42 = vpop.xlane.xlu0 %580  ;;  %v670_v57 = vpop.permute.xlu2 %669 }
 0x407   :  { %6231 = vrcp.f32 %v581_v42  ;;  %v915_v42 = vld [vmem:[%s6569_s29 + $0x18] sm:$0xff] }
 0x409   :  { %v6230_v40 = vpop.eup %6229 }
 0x40a   :  { %v709_v41 = vsel %vm253_vm1, %v6230_v40, 0.0 }
 0x40b   :  { %710 = vadd.xlane.f32.xlu1 %v709_v41  ;;  %v916_v41 = vld [vmem:[%s6569_s29 + $0x20] sm:$0xff] }
 0x40d   :  { %v6232_v43 = vpop.eup %6231 }
 0x40e   :  { %v587_v47 = vmul.f32 %v6232_v43, %v6224_v28  ;;  %v6529_v28 = vmov 32.0   ;;  %v914_v43 = vld [vmem:[%s6569_s29 + $0x10] sm:$0xff] }
 0x419   :  { %v6156_v44 = vpop.permute.xlu0 %6155 }
 0x41a   :  { %v6158_v45 = vunpack.i.h.bf16 %v6156_v44  ;;  %v6157_v46 = vunpack.i.l.bf16 %v6156_v44 }
 0x41c   :  { %610 = vmatpush.msra.mxu1 %v6157_v46  ;;  %636 = vmatpush.msrb.mxu2 %v6158_v45  ;;  %v913_v45 = vld [vmem:[%s6569_s29 + $0x8] sm:$0xff]  ;;  %v912_v46 = vld [vmem:[%s6569_s29] sm:$0xff] }
 0x41d   :  { %5684 = vmatmul.msk.f32.vlgmr.msra.gmra.mxu1 %vm253_vm1, %v587_v47 }
 0x421   :  { %v720_v48 = vpop.permute.xlu0 %719 }
 0x422   :  { %740 = vmatpush.msra.mxu2 %v720_v48 }
 0x424   :  { %671 = vrot.lane.b32.xlu1 %v6772_v18, %s6522_s26 }
 0x429   :  { %v774_v3 = vpop.permute.xlu0 %773 }
 0x476   :  { %v584_v49 = vpop.xlane.xlu1 %583 }
 0x477   :  { %6233 = vrcp.f32 %v584_v49 }
 0x47d   :  { %v6234_v50 = vpop.eup %6233  ;;  %v508_v55 = vpop.f32.mrf.mxu1 }
 0x47e   :  { %v588_v51 = vmul.f32 %v6234_v50, %v6228_v31  ;;  %v711_v52 = vpop.xlane.xlu1 %710 }
 0x47f   :  { %6235 = vrcp.f32 %v711_v52 }
 0x480   :  { %5685 = vmatmul.msk.f32.vlgmr.msrb.gmra.mxu2 %vm253_vm1, %v588_v51 }
 0x481   :  { %5692 = vmatpush.xpose.msk.msrb.mxu2 %vm182_vm0, %v177_v61 }
 0x485   :  { %v6236_v53 = vpop.eup %6235  ;;  %5693 = vmatpush.xpose.msk.msrb.mxu2 %vm182_vm0, %v176_v62 }
 0x486   :  { %v717_v54 = vmul.f32 %v6236_v53, %v6230_v40  ;;  %v917_v40 = vld [vmem:[%s6569_s29 + $0x28] sm:$0xff] }
 0x488   :  { %5690 = vmatmul.msk.f32.vlgmr.msra.gmra.mxu2 %vm253_vm1, %v717_v54 }
 0x489   :  { %5694 = vmatpush.xpose.msk.msrb.mxu2 %vm182_vm0, %v175_v0 }
 0x48d   :  { %5695 = vmatpush.xpose.msk.msrb.mxu2 %vm182_vm0, %v174_v2  ;;  %v924_v2 = vld [vmem:[%s6579_s8 + $0x18] sm:$0xff] }
 0x491   :  { %5698 = vmatpush.xpose.msk.msra.mxu2 %vm182_vm0, %v919_v39 }
 0x495   :  { %5699 = vmatpush.xpose.msk.msra.mxu2 %vm182_vm0, %v918_v16 }
 0x496   :  { %v672_v56 = vpop.permute.xlu1 %671 }
 0x497   :  { %5688 = vmatpush.xpose.msk.msrb.mxu1 %vm253_vm1, %v672_v56 }
 0x499   :  { %5700 = vmatpush.xpose.msk.msra.mxu2 %vm182_vm0, %v917_v40  ;;  %v5723_v40 = vld [vmem:[%s6549_s13 + $0xa8] sm:$0xff] }
 0x49a   :  { %v612_v58 = vpop.f32.mrf.mxu1  ;;  %5689 = vmatmul.msk.f32.vlgmr.msrb.gmra.mxu1 %vm253_vm1, %v670_v57 }
 0x49b   :  { %781 = vrot.lane.b32.xlu0 %v612_v58, %s8076_s10 }
 0x49d   :  { %5701 = vmatpush.xpose.msk.msra.mxu2 %vm182_vm0, %v916_v41 }
 0x4a1   :  { %5702 = vmatpush.xpose.msk.msra.mxu2 %vm182_vm0, %v915_v42 }
 0x4a5   :  { %5703 = vmatpush.xpose.msk.msra.mxu2 %vm182_vm0, %v914_v43 }
 0x4a9   :  { %5704 = vmatpush.xpose.msk.msra.mxu2 %vm182_vm0, %v913_v45 }
 0x4ad   :  { %5705 = vmatpush.xpose.msk.msra.mxu2 %vm182_vm0, %v912_v46 }
 0x503   :  { %v638_v59 = vpop.f32.mrf.mxu2 }
 0x50b   :  { %v742_v60 = vpop.f32.mrf.mxu2 }
 0x50c   :  { %789 = vrot.lane.b32.xlu1 %v742_v60, %s8074_s11  ;;  %v6166_v60 = vld [vmem:[%s6589_s19] ss:$0 sm:$0xff] }
 0x50d   :  { %v782_v4 = vpop.permute.xlu0 %781 }
 0x514   :  { %745 = vrot.lane.b32.xlu1 %v6772_v18, %s8082_s2  ;;  %v795_v18 = vsel %vm253_vm1, %v6835_v8, %v774_v3  ;;  %v6884_v8 = vld [vmem:[%s6564_s25] ss:$0 sm:$0xff]  ;;  %v923_v3 = vld [vmem:[%s6579_s8 + $0x10] sm:$0xff] }
 0x515   :  { %v798_v5 = vsel %vm797_vm2, %v795_v18, %v782_v4  ;;  %v922_v4 = vld [vmem:[%s6579_s8 + $0x8] sm:$0xff] }
 0x517   :  { %v694_v63 = vpop.f32.mrf.mxu1 }
 0x518   :  { %v700_v1 = vsel %vm253_vm1, %v694_v63, -inf }
 0x519   :  { %701 = vmax.xlane.f32.xlu2 %v700_v1 }
 0x531   :  { %775 = vrot.lane.b32.xlu2 %v508_v55, %s8078_s7 }
 0x57e   :  { %v790_v6 = vpop.permute.xlu1 %789 }
 0x57f   :  { %v801_v7 = vsel %vm800_vm3, %v798_v5, %v790_v6  ;;  %v921_v5 = vld [vmem:[%s6579_s8] sm:$0xff] }
 0x580   :  { %5696 = vmatmul.msk.f32.vlgmr.msrb.gmra.mxu2 %vm182_vm0, %v801_v7 }
 0x586   :  { %v746_v9 = vpop.permute.xlu1 %745 }
 0x587   :  { %766 = vmatpush.msra.mxu3 %v746_v9 }
 0x589   :  { %5708 = vmatpush.xpose.msk.msrb.mxu3 %vm987_vm8, %v924_v2 }
 0x58c   :  { %v702_v10 = vpop.xlane.xlu2 %701 }
 0x58d   :  { %v704_v11 = vsub.f32 %v694_v63, %v702_v10  ;;  %v6167_v63 = vld [vmem:[%s6594_s24] ss:$0 sm:$0xff]  ;;  %5709 = vmatpush.xpose.msk.msrb.mxu3 %vm987_vm8, %v923_v3 }
 0x58e   :  { %v6932_v10 = vld [vmem:[%s6574_s3] ss:$0 sm:$0xff] }
 0x58f   :  { %v707_v15 = vmul.f32 1.442695, %v704_v11  ;;  %v6170_v3 = vld [vmem:[%s6599_s30] ss:$0 sm:$0xff] }
 0x591   :  { %6237 = vpow2.f32 %v707_v15  ;;  %5710 = vmatpush.xpose.msk.msrb.mxu3 %vm987_vm8, %v922_v4 }
 0x594   :  { %v776_v44 = vpop.permute.xlu2 %775 }
 0x595   :  { %v796_v48 = vsel %vm253_vm1, %v6837_v14, %v776_v44  ;;  %5711 = vmatpush.xpose.msk.msrb.mxu3 %vm987_vm8, %v921_v5  ;;  %v6171_v5 = vld [vmem:[%s6604_s6] ss:$0 sm:$0xff] }
 0x597   :  { %v6238_v17 = vpop.eup %6237 }
 0x598   :  { %v712_v19 = vsel %vm253_vm1, %v6238_v17, 0.0 }
 0x599   :  { %713 = vadd.xlane.f32.xlu0 %v712_v19 }
 0x5ad   :  { %783 = vrot.lane.b32.xlu0 %v638_v59, %s8076_s10 }
 0x603   :  { %v841_v21 = vpop.f32.mrf.mxu2 }
 0x604   :  { %v842_v22 = vadd.f32 %v6884_v8, %v841_v21 }
 0x606   :  { %v847_v23 = vadd.f32 %v842_v22, %v6756_v12 }
 0x608   :  { %v851_v24 = vsel %vm182_vm0, %v847_v23, 0.0 }
 0x609   :  { %852 = vadd.xlane.f32.xlu1 %v851_v24 }
 0x60c   :  { %v714_v25 = vpop.xlane.xlu0 %713 }
 0x60d   :  { %6239 = vrcp.f32 %v714_v25 }
 0x60e   :  { %6241 = vrcp.f32 %v6529_v28 }
 0x613   :  { %v6240_v26 = vpop.eup %6239 }
 0x614   :  { %v718_v27 = vmul.f32 %v6240_v26, %v6238_v17  ;;  %v6242_v29 = vpop.eup %6241 }
 0x615   :  { %v858_v30 = vmul.f32 32.0, %v6242_v29  ;;  %vm862_vm4 = vweird.f32 %v6242_v29 }
 0x616   :  { %5691 = vmatmul.msk.f32.vlgmr.msra.gmra.mxu3 %vm253_vm1, %v718_v27 }
 0x617   :  { %v859_v32 = vsub.f32 1.0, %v858_v30 }
 0x619   :  { %v860_v33 = vmul.f32 %v6242_v29, %v859_v32 }
 0x61b   :  { %v861_v34 = vadd.f32 %v6242_v29, %v860_v33 }
 0x61d   :  { %v6890_v12 = vsel %vm862_vm4, %v6242_v29, %v861_v34 }
 0x61f   :  { %v784_v47 = vpop.permute.xlu0 %783 }
 0x620   :  { %v799_v49 = vsel %vm797_vm2, %v796_v48, %v784_v47  ;;  %v5722_v47 = vld [vmem:[%s6549_s13 + $0xa0] sm:$0xff]  ;;  %v5721_v48 = vld [vmem:[%s6549_s13 + $0x98] sm:$0xff] }
 0x67c   :  { %v853_v35 = vpop.xlane.xlu1 %852 }
 0x67d   :  { %v864_v36 = vmul.f32 %v6890_v12, %v853_v35 }
 0x67f   :  { %v866_v20 = vsub.f32 %v847_v23, %v864_v36 }
 0x681   :  { %v868_v37 = vmul.f32 %v866_v20, %v866_v20 }
 0x683   :  { %v870_v38 = vsel %vm182_vm0, %v868_v37, 0.0 }
 0x684   :  { %871 = vadd.xlane.f32.xlu1 %v870_v38  ;;  %v5724_v38 = vld [vmem:[%s6549_s13 + $0xb0] sm:$0xff] }
 0x699   :  { %v768_v31 = vpop.f32.mrf.mxu3 }
 0x69a   :  { %791 = vrot.lane.b32.xlu2 %v768_v31, %s8074_s11 }
 0x6f4   :  { %v792_v50 = vpop.permute.xlu2 %791 }
 0x6f5   :  { %v802_v51 = vsel %vm800_vm3, %v799_v49, %v792_v50  ;;  %v5720_v49 = vld [vmem:[%s6549_s13 + $0x90] sm:$0xff]  ;;  %v5719_v50 = vld [vmem:[%s6549_s13 + $0x88] sm:$0xff] }
 0x6f6   :  { %5697 = vmatmul.msk.f32.gmra.mxu2 %vm182_vm0, %v802_v51  ;;  %v5718_v51 = vld [vmem:[%s6549_s13 + $0x80] sm:$0xff] }
 0x6f7   :  { %v872_v52 = vpop.xlane.xlu1 %871 }
 0x6f8   :  { %v876_v53 = vmul.f32 %v872_v52, %v6890_v12  ;;  %v5717_v52 = vld [vmem:[%s6549_s13 + $0x78] sm:$0xff] }
 0x6fa   :  { %v878_v54 = vadd.f32 1e-05, %v876_v53  ;;  %v5716_v53 = vld [vmem:[%s6549_s13 + $0x70] sm:$0xff] }
 0x6fc   :  { %6243 = vrsqrt.f32 %v878_v54  ;;  %vm886_vm6 = vweird.f32 %v878_v54 }
 0x702   :  { %v6244_v55 = vpop.eup %6243 }
 0x703   :  { %v881_v56 = vmul.f32 %v6244_v55, %v878_v54  ;;  %vm887_vm5 = vweird.f32 %v6244_v55  ;;  %v5715_v54 = vld [vmem:[%s6549_s13 + $0x68] sm:$0xff] }
 0x704   :  { %vm888_vm7 = vmor %vm886_vm6, %vm887_vm5 }
 0x705   :  { %v882_v57 = vmul.f32 %v6244_v55, %v881_v56 }
 0x707   :  { %v883_v58 = vmul.f32 0.5, %v882_v57 }
 0x709   :  { %v884_v14 = vsub.f32 1.5, %v883_v58 }
 0x70b   :  { %v885_v59 = vmul.f32 %v6244_v55, %v884_v14 }
 0x70d   :  { %v889_v61 = vsel %vm888_vm7, %v6244_v55, %v885_v59  ;;  %v5714_v55 = vld [vmem:[%s6549_s13 + $0x60] sm:$0xff] }
 0x70e   :  { %v900_v62 = vmul.f32 %v889_v61, %v866_v20  ;;  %v5725_v20 = vld [vmem:[%s6549_s13 + $0xb8] sm:$0xff]  ;;  %s8105_s13 = sld [smem:[#allocation5_spill]] }
 0x70f   :  { %5732 = vmatpush.xpose.msk.msrb.mxu0 %vm182_vm0, %v5725_v20 }
 0x710   :  { %v905_v0 = vmul.f32 %v6166_v60, %v900_v62 }
 0x712   :  { %v910_v1 = vadd.f32 %v6167_v63, %v905_v0 }
 0x713   :  { %5733 = vmatpush.xpose.msk.msrb.mxu0 %vm182_vm0, %v5724_v38 }
 0x714   :  { %5706 = vmatmul.msk.f32.vlgmr.msra.gmra.mxu2 %vm182_vm0, %v910_v1 }
 0x717   :  { %5734 = vmatpush.xpose.msk.msrb.mxu0 %vm182_vm0, %v5723_v40 }
 0x71b   :  { %5735 = vmatpush.xpose.msk.msrb.mxu0 %vm182_vm0, %v5722_v47 }
 0x71f   :  { %5736 = vmatpush.xpose.msk.msrb.mxu0 %vm182_vm0, %v5721_v48 }
 0x723   :  { %5737 = vmatpush.xpose.msk.msrb.mxu0 %vm182_vm0, %v5720_v49 }
 0x727   :  { %5738 = vmatpush.xpose.msk.msrb.mxu0 %vm182_vm0, %v5719_v50 }
 0x72b   :  { %5739 = vmatpush.xpose.msk.msrb.mxu0 %vm182_vm0, %v5718_v51 }
 0x72f   :  { %5740 = vmatpush.xpose.msk.msrb.mxu0 %vm182_vm0, %v5717_v52 }
 0x733   :  { %5741 = vmatpush.xpose.msk.msrb.mxu0 %vm182_vm0, %v5716_v53 }
 0x737   :  { %5742 = vmatpush.xpose.msk.msrb.mxu0 %vm182_vm0, %v5715_v54 }
 0x73b   :  { %5743 = vmatpush.xpose.msk.msrb.mxu0 %vm182_vm0, %v5714_v55 }
 0x779   :  { %v844_v18 = vpop.f32.mrf.mxu2 }
 0x77a   :  { %v845_v6 = vadd.f32 %v6884_v8, %v844_v18 }
 0x77c   :  { %v848_v7 = vadd.f32 %v845_v6, %v6761_v13  ;;  %v6939_v13 = vld [vmem:[%s6584_s14] ss:$0 sm:$0xff] }
 0x77e   :  { %v854_v9 = vsel %vm182_vm0, %v848_v7, 0.0 }
 0x77f   :  { %855 = vadd.xlane.f32.xlu2 %v854_v9 }
 0x797   :  { %v976_v11 = vpop.f32.mrf.mxu2 }
 0x798   :  { %v977_v15 = vadd.f32 %v6932_v10, %v976_v11 }
 0x79a   :  { %v982_v17 = vmax.f32 %v977_v15, 0.0 }
 0x79c   :  { %5712 = vmatmul.msk.f32.vlgmr.msrb.gmra.mxu3 %vm987_vm8, %v982_v17  ;;  %v6172_v17 = vld [vmem:[%s6554_s17 + $0x1] ss:$0 sm:$0xff]  ;;  %s8106_s17 = sld [smem:[#allocation8_spill]] }
 0x7f2   :  { %v856_v19 = vpop.xlane.xlu2 %855 }
 0x7f3   :  { %v865_v21 = vmul.f32 %v6890_v12, %v856_v19 }
 0x7f5   :  { %v867_v8 = vsub.f32 %v848_v7, %v865_v21 }
 0x7f7   :  { %v869_v22 = vmul.f32 %v867_v8, %v867_v8 }
 0x7f9   :  { %v873_v23 = vsel %vm182_vm0, %v869_v22, 0.0 }
 0x7fa   :  { %874 = vadd.xlane.f32.xlu1 %v873_v23 }
 0x81f   :  { %v1023_v24 = vpop.f32.mrf.mxu3 }
 0x820   :  { %v1024_v25 = vadd.f32 %v6939_v13, %v1023_v24 }
 0x822   :  { %v1029_v26 = vadd.f32 %v1024_v25, %v910_v1 }
 0x824   :  { %v1033_v27 = vsel %vm182_vm0, %v1029_v26, 0.0 }
 0x825   :  { %1034 = vadd.xlane.f32.xlu0 %v1033_v27 }
 0x86d   :  { %v875_v28 = vpop.xlane.xlu1 %874 }
 0x86e   :  { %v877_v29 = vmul.f32 %v875_v28, %v6890_v12 }
 0x870   :  { %v879_v30 = vadd.f32 1e-05, %v877_v29 }
 0x872   :  { %6245 = vrsqrt.f32 %v879_v30  ;;  %vm896_vm10 = vweird.f32 %v879_v30 }
 0x878   :  { %v6246_v32 = vpop.eup %6245 }
 0x879   :  { %v891_v33 = vmul.f32 %v6246_v32, %v879_v30  ;;  %vm897_vm9 = vweird.f32 %v6246_v32 }
 0x87a   :  { %vm898_vm11 = vmor %vm896_vm10, %vm897_vm9 }
 0x87b   :  { %v892_v34 = vmul.f32 %v6246_v32, %v891_v33 }
 0x87d   :  { %v893_v35 = vmul.f32 0.5, %v892_v34 }
 0x87f   :  { %v894_v36 = vsub.f32 1.5, %v893_v35 }
 0x881   :  { %v895_v37 = vmul.f32 %v6246_v32, %v894_v36 }
 0x883   :  { %v899_v31 = vsel %vm898_vm11, %v6246_v32, %v895_v37 }
 0x884   :  { %v901_v39 = vmul.f32 %v899_v31, %v867_v8 }
 0x886   :  { %v906_v16 = vmul.f32 %v6166_v60, %v901_v39 }
 0x888   :  { %v911_v41 = vadd.f32 %v6167_v63, %v906_v16 }
 0x88a   :  { %5707 = vmatmul.msk.f32.gmra.mxu2 %vm182_vm0, %v911_v41 }
 0x898   :  { %v1035_v42 = vpop.xlane.xlu0 %1034 }
 0x899   :  { %v1039_v43 = vmul.f32 %v1035_v42, %v6890_v12 }
 0x89b   :  { %v1041_v44 = vsub.f32 %v1029_v26, %v1039_v43 }
 0x89d   :  { %v1043_v45 = vmul.f32 %v1041_v44, %v1041_v44 }
 0x89f   :  { %v1045_v46 = vsel %vm182_vm0, %v1043_v45, 0.0 }
 0x8a0   :  { %1046 = vadd.xlane.f32.xlu1 %v1045_v46 }
 0x90d   :  { %v979_v56 = vpop.f32.mrf.mxu2 }
 0x90e   :  { %v980_v57 = vadd.f32 %v6932_v10, %v979_v56 }
 0x910   :  { %v983_v58 = vmax.f32 %v980_v57, 0.0 }
 0x912   :  { %5713 = vmatmul.msk.f32.gmra.mxu3 %vm987_vm8, %v983_v58 }
 0x913   :  { %v1047_v14 = vpop.xlane.xlu1 %1046 }
 0x914   :  { %v1051_v59 = vmul.f32 %v1047_v14, %v6890_v12 }
 0x916   :  { %v1053_v60 = vadd.f32 1e-05, %v1051_v59 }
 0x918   :  { %6247 = vrsqrt.f32 %v1053_v60  ;;  %vm1061_vm13 = vweird.f32 %v1053_v60 }
 0x91e   :  { %v6248_v61 = vpop.eup %6247 }
 0x91f   :  { %v1056_v62 = vmul.f32 %v6248_v61, %v1053_v60  ;;  %vm1062_vm12 = vweird.f32 %v6248_v61 }
 0x920   :  { %vm1063_vm14 = vmor %vm1061_vm13, %vm1062_vm12 }
 0x921   :  { %v1057_v63 = vmul.f32 %v6248_v61, %v1056_v62 }
 0x923   :  { %v1058_v0 = vmul.f32 0.5, %v1057_v63 }
 0x925   :  { %v1059_v1 = vsub.f32 1.5, %v1058_v0 }
 0x927   :  { %v1060_v2 = vmul.f32 %v6248_v61, %v1059_v1 }
 0x929   :  { %v1064_v4 = vsel %vm1063_vm14, %v6248_v61, %v1060_v2 }
 0x92a   :  { %v1075_v18 = vmul.f32 %v1064_v4, %v1041_v44 }
 0x92c   :  { %v1080_v6 = vmul.f32 %v6170_v3, %v1075_v18 }
 0x92e   :  { %v6976_v7 = vadd.f32 %v6171_v5, %v1080_v6 }
 0x930   :  { %5744 = vmatmul.msk.f32.vlgmr.msrb.gmra.mxu0 %vm182_vm0, %v6976_v7 }
 0x995   :  { %v1026_v9 = vpop.f32.mrf.mxu3 }
 0x996   :  { %v1027_v10 = vadd.f32 %v6939_v13, %v1026_v9 }
 0x998   :  { %v1030_v11 = vadd.f32 %v1027_v10, %v911_v41 }
 0x99a   :  { %v1036_v15 = vsel %vm182_vm0, %v1030_v11, 0.0 }
 0x99b   :  { %1037 = vadd.xlane.f32.xlu1 %v1036_v15 }
 0x9ad   :  { %v1171_v19 = vpop.f32.mrf.mxu0 }
 0x9ae   :  { %v6983_v21 = vadd.f32 %v6172_v17, %v1171_v19 }
 0x9b0   :  { %v6991_v26 = vmul.f32 0.35355338, %v6983_v21 }
 0x9b4   :  { %1180 = vrot.lane.b32.xlu1 %v6983_v21, %s6516_s15 }
 0xa0e   :  { %v1038_v8 = vpop.xlane.xlu1 %1037 }
 0xa0f   :  { %v1040_v22 = vmul.f32 %v1038_v8, %v6890_v12 }
 0xa11   :  { %v1042_v23 = vsub.f32 %v1030_v11, %v1040_v22 }
 0xa13   :  { %v1044_v24 = vmul.f32 %v1042_v23, %v1042_v23 }
 0xa15   :  { %v1048_v25 = vsel %vm182_vm0, %v1044_v24, 0.0 }
 0xa16   :  { %1049 = vadd.xlane.f32.xlu2 %v1048_v25 }
 0xa26   :  { %v1181_v13 = vpop.permute.xlu1 %1180 }
 0xa27   :  { %5746 = vmatpush.xpose.msk.msra.mxu1 %vm253_vm1, %v1181_v13 }
 0xa2a   :  { %5747 = vmatmul.msk.f32.vlgmr.msra.gmra.mxu1 %vm253_vm1, %v6991_v26 }
 0xa2e   :  { %1311 = vrot.lane.b32.xlu2 %v6983_v21, %s6515_s0 }
 0xa89   :  { %v1050_v27 = vpop.xlane.xlu2 %1049 }
 0xa8a   :  { %v1052_v28 = vmul.f32 %v1050_v27, %v6890_v12 }
 0xa8c   :  { %v1054_v29 = vadd.f32 1e-05, %v1052_v28 }
 0xa8e   :  { %6249 = vrsqrt.f32 %v1054_v29  ;;  %vm1071_vm4 = vweird.f32 %v1054_v29 }
 0xa91   :  { %v1312_v49 = vpop.permute.xlu2 %1311 }
 0xa94   :  { %v6250_v30 = vpop.eup %6249 }
 0xa95   :  { %v1066_v32 = vmul.f32 %v6250_v30, %v1054_v29  ;;  %vm1072_vm15 = vweird.f32 %v6250_v30 }
 0xa96   :  { %vm1073_vm5 = vmor %vm1071_vm4, %vm1072_vm15 }
 0xa97   :  { %v1067_v33 = vmul.f32 %v6250_v30, %v1066_v32 }
 0xa99   :  { %v1068_v34 = vmul.f32 0.5, %v1067_v33 }
 0xa9b   :  { %v1069_v35 = vsub.f32 1.5, %v1068_v34 }
 0xa9d   :  { %v1070_v36 = vmul.f32 %v6250_v30, %v1069_v35 }
 0xa9f   :  { %v1074_v20 = vsel %vm1073_vm5, %v6250_v30, %v1070_v36 }
 0xaa0   :  { %v1076_v37 = vmul.f32 %v1074_v20, %v1042_v23 }
 0xaa2   :  { %v1081_v38 = vmul.f32 %v6170_v3, %v1076_v37 }
 0xaa4   :  { %v6998_v31 = vadd.f32 %v6171_v5, %v1081_v38 }
 0xaa6   :  { %5745 = vmatmul.msk.f32.gmra.mxu0 %vm182_vm0, %v6998_v31 }
 0xaa7   :  { %v1204_v39 = vpop.f32.mrf.mxu1 }
 0xaa8   :  { %v1235_v16 = vsel %vm253_vm1, %v1204_v39, -inf }
 0xaa9   :  { %1236 = vmax.xlane.f32.xlu0 %v1235_v16 }
 0xabd   :  { %1257 = vrot.lane.b32.xlu0 %v6983_v21, %s6520_s22 }
 0xb1c   :  { %v1237_v40 = vpop.xlane.xlu0 %1236 }
 0xb1d   :  { %v1241_v41 = vsub.f32 %v1204_v39, %v1237_v40 }
 0xb1f   :  { %v1243_v42 = vmul.f32 1.442695, %v1241_v41 }
 0xb21   :  { %6251 = vpow2.f32 %v1243_v42 }
 0xb23   :  { %v1174_v43 = vpop.f32.mrf.mxu0 }
 0xb24   :  { %v7005_v44 = vadd.f32 %v6172_v17, %v1174_v43 }
 0xb26   :  { %1208 = vrot.lane.b32.xlu1 %v7005_v44, %s6516_s15  ;;  %v1178_v45 = vmul.f32 0.35355338, %v7005_v44 }
 0xb27   :  { %v6252_v46 = vpop.eup %6251 }
 0xb28   :  { %1337 = vrot.lane.b32.xlu0 %v1178_v45, %s6517_s5  ;;  %v1247_v47 = vsel %vm253_vm1, %v6252_v46, 0.0 }
 0xb29   :  { %1248 = vadd.xlane.f32.xlu2 %v1247_v47 }
 0xb2e   :  { %1309 = vrot.lane.b32.xlu1 %v6991_v26, %s6517_s5 }
 0xb2f   :  { %v1258_v48 = vpop.permute.xlu0 %1257 }
 0xb30   :  { %1278 = vmatpush.msrb.mxu1 %v1258_v48 }
 0xb32   :  { %5752 = vmatpush.xpose.msk.msra.mxu1 %vm253_vm1, %v1312_v49 }
 0xb36   :  { %1339 = vrot.lane.b32.xlu1 %v7005_v44, %s6515_s0 }
 0xb3e   :  { %1441 = vrot.lane.b32.xlu1 %v6983_v21, %s6518_s16 }
 0xb41   :  { %1439 = vrot.lane.b32.xlu2 %v6991_v26, %s6521_s23 }
 0xb98   :  { %v1209_v50 = vpop.permute.xlu1 %1208 }
 0xb99   :  { %5748 = vmatpush.xpose.msk.msra.mxu3 %vm253_vm1, %v1209_v50 }
 0xb9a   :  { %v1338_v56 = vpop.permute.xlu0 %1337 }
 0xb9c   :  { %v1249_v51 = vpop.xlane.xlu2 %1248  ;;  %5749 = vmatmul.msk.f32.vlgmr.msra.gmra.mxu3 %vm253_vm1, %v1178_v45 }
 0xb9d   :  { %6253 = vrcp.f32 %v1249_v51 }
 0xba0   :  { %v1310_v52 = vpop.permute.xlu1 %1309 }
 0xba3   :  { %v6254_v53 = vpop.eup %6253 }
 0xba4   :  { %v1255_v54 = vmul.f32 %v6254_v53, %v6252_v46  ;;  %v1440_v58 = vpop.permute.xlu2 %1439 }
 0xba6   :  { %5750 = vmatmul.msk.f32.vlgmr.msrb.gmra.mxu1 %vm253_vm1, %v1255_v54 }
 0xba8   :  { %v1340_v55 = vpop.permute.xlu1 %1339 }
 0xba9   :  { %5754 = vmatpush.xpose.msk.msrb.mxu2 %vm253_vm1, %v1340_v55 }
 0xbac   :  { %5755 = vmatmul.msk.f32.vlgmr.msrb.gmra.mxu2 %vm253_vm1, %v1338_v56 }
 0xbae   :  { %5753 = vmatmul.msk.f32.vlgmr.msra.gmra.mxu1 %vm253_vm1, %v1310_v52 }
 0xbb0   :  { %v1442_v57 = vpop.permute.xlu1 %1441 }
 0xbb1   :  { %5758 = vmatpush.xpose.msk.msra.mxu2 %vm253_vm1, %v1442_v57 }
 0xbb4   :  { %5759 = vmatmul.msk.f32.vlgmr.msra.gmra.mxu2 %vm253_vm1, %v1440_v58 }
 0xc1f   :  { %v1232_v14 = vpop.f32.mrf.mxu3 }
 0xc20   :  { %v1238_v59 = vsel %vm253_vm1, %v1232_v14, -inf }
 0xc21   :  { %1239 = vmax.xlane.f32.xlu0 %v1238_v59 }
 0xc23   :  { %v7030_v60 = vpop.f32.mrf.mxu1 }
 0xc2b   :  { %v1334_v61 = vpop.f32.mrf.mxu1 }
 0xc2c   :  { %v1365_v62 = vsel %vm253_vm1, %v1334_v61, -inf }
 0xc2d   :  { %1366 = vmax.xlane.f32.xlu1 %v1365_v62 }
 0xc2f   :  { %v1362_v63 = vpop.f32.mrf.mxu2 }
 0xc30   :  { %v1368_v0 = vsel %vm253_vm1, %v1362_v63, -inf }
 0xc31   :  { %1369 = vmax.xlane.f32.xlu2 %v1368_v0 }
 0xc37   :  { %v1464_v1 = vpop.f32.mrf.mxu2 }
 0xc38   :  { %v1495_v2 = vsel %vm253_vm1, %v1464_v1, -inf }
 0xc39   :  { %1496 = vmax.xlane.f32.xlu0 %v1495_v2 }
 0xc49   :  { %1469 = vrot.lane.b32.xlu2 %v7005_v44, %s6518_s16 }
 0xc4d   :  { %1283 = vrot.lane.b32.xlu0 %v7005_v44, %s6520_s22 }
 0xc55   :  { %1467 = vrot.lane.b32.xlu0 %v1178_v45, %s6521_s23 }
 0xc5d   :  { %1569 = vrot.lane.b32.xlu0 %v6991_v26, %s6523_s28 }
 0xc65   :  { %1413 = vrot.lane.b32.xlu0 %v7005_v44, %s6519_s18 }
 0xc6d   :  { %1517 = vrot.lane.b32.xlu0 %v6983_v21, %s8080_s1 }
 0xc75   :  { %1599 = vrot.lane.b32.xlu0 %v7005_v44, %s6522_s26 }
 0xc7d   :  { %1597 = vrot.lane.b32.xlu0 %v1178_v45, %s6523_s28 }
 0xc94   :  { %v1240_v3 = vpop.xlane.xlu0 %1239 }
 0xc95   :  { %v1242_v4 = vsub.f32 %v1232_v14, %v1240_v3 }
 0xc97   :  { %v1245_v18 = vmul.f32 1.442695, %v1242_v4 }
 0xc99   :  { %6255 = vpow2.f32 %v1245_v18 }
 0xc9f   :  { %v6256_v5 = vpop.eup %6255 }
 0xca0   :  { %v1367_v6 = vpop.xlane.xlu1 %1366  ;;  %v1250_v9 = vsel %vm253_vm1, %v6256_v5, 0.0 }
 0xca1   :  { %v1371_v10 = vsub.f32 %v1334_v61, %v1367_v6  ;;  %1251 = vadd.xlane.f32.xlu1 %v1250_v9 }
 0xca3   :  { %v1373_v11 = vmul.f32 1.442695, %v1371_v10 }
 0xca4   :  { %v1370_v23 = vpop.xlane.xlu2 %1369 }
 0xca5   :  { %6257 = vpow2.f32 %v1373_v11  ;;  %v1372_v25 = vsub.f32 %v1362_v63, %v1370_v23  ;;  %v2081_v23 = vld [vmem:[%s6619_s27 + $0x50] sm:$0xff] }
 0xca7   :  { %v1375_v13 = vmul.f32 1.442695, %v1372_v25  ;;  %v2079_v25 = vld [vmem:[%s6619_s27 + $0x40] sm:$0xff] }
 0xca9   :  { %6259 = vpow2.f32 %v1375_v13 }
 0xcab   :  { %v6258_v15 = vpop.eup %6257 }
 0xcac   :  { %v1377_v17 = vsel %vm253_vm1, %v6258_v15, 0.0  ;;  %v1497_v19 = vpop.xlane.xlu0 %1496  ;;  %v1470_v36 = vpop.permute.xlu2 %1469 }
 0xcad   :  { %1378 = vadd.xlane.f32.xlu2 %v1377_v17  ;;  %v1501_v27 = vsub.f32 %v1464_v1, %v1497_v19 }
 0xcaf   :  { %v6260_v29 = vpop.eup %6259  ;;  %v1503_v30 = vmul.f32 1.442695, %v1501_v27  ;;  %v2077_v27 = vld [vmem:[%s6619_s27 + $0x30] sm:$0xff] }
 0xcb0   :  { %v1380_v32 = vsel %vm253_vm1, %v6260_v29, 0.0 }
 0xcb1   :  { %6261 = vpow2.f32 %v1503_v30 }
 0xcb7   :  { %v6262_v33 = vpop.eup %6261 }
 0xcb8   :  { %v1507_v34 = vsel %vm253_vm1, %v6262_v33, 0.0 }
 0xcba   :  { %1387 = vrot.lane.b32.xlu1 %v6983_v21, %s6519_s18 }
 0xcbf   :  { %v1284_v8 = vpop.permute.xlu0 %1283 }
 0xcc0   :  { %1304 = vmatpush.msrb.mxu3 %v1284_v8 }
 0xcc5   :  { %1571 = vrot.lane.b32.xlu2 %v6983_v21, %s6522_s26 }
 0xcc7   :  { %v1468_v22 = vpop.permute.xlu0 %1467 }
 0xccf   :  { %v1570_v24 = vpop.permute.xlu0 %1569 }
 0xcd7   :  { %v1414_v26 = vpop.permute.xlu0 %1413 }
 0xcd8   :  { %1434 = vmatpush.msrb.mxu1 %v1414_v26  ;;  %v2078_v26 = vld [vmem:[%s6619_s27 + $0x38] sm:$0xff] }
 0xcdf   :  { %v1518_v28 = vpop.permute.xlu0 %1517 }
 0xce0   :  { %1538 = vmatpush.msra.mxu1 %v1518_v28 }
 0xce4   :  { %1381 = vadd.xlane.f32.xlu1 %v1380_v32  ;;  %v2076_v32 = vld [vmem:[%s6619_s27 + $0x28] sm:$0xff] }
 0xce7   :  { %v1600_v46 = vpop.permute.xlu0 %1599 }
 0xcee   :  { %1508 = vadd.xlane.f32.xlu2 %v1507_v34  ;;  %v2074_v34 = vld [vmem:[%s6619_s27 + $0x18] sm:$0xff] }
 0xcef   :  { %v1598_v50 = vpop.permute.xlu0 %1597 }
 0xd14   :  { %v1252_v35 = vpop.xlane.xlu1 %1251 }
 0xd15   :  { %6263 = vrcp.f32 %v1252_v35  ;;  %v2073_v35 = vld [vmem:[%s6619_s27 + $0x10] sm:$0xff] }
 0xd1b   :  { %v6264_v20 = vpop.eup %6263 }
 0xd1c   :  { %v1256_v37 = vmul.f32 %v6264_v20, %v6256_v5  ;;  %v2071_v20 = vld [vmem:[%s6619_s27] sm:$0xff] }
 0xd1e   :  { %5751 = vmatmul.msk.f32.vlgmr.msrb.gmra.mxu3 %vm253_vm1, %v1256_v37 }
 0xd20   :  { %v1379_v38 = vpop.xlane.xlu2 %1378 }
 0xd21   :  { %6265 = vrcp.f32 %v1379_v38 }
 0xd27   :  { %v6266_v39 = vpop.eup %6265 }
 0xd28   :  { %v1385_v16 = vmul.f32 %v6266_v39, %v6258_v15  ;;  %v1572_v41 = vpop.permute.xlu2 %1571 }
 0xd2c   :  { %v1388_v40 = vpop.permute.xlu1 %1387 }
 0xd2d   :  { %1408 = vmatpush.msra.mxu3 %v1388_v40 }
 0xd2e   :  { %5756 = vmatmul.msk.f32.vlgmr.msra.gmra.mxu3 %vm253_vm1, %v1385_v16  ;;  %v7112_v16 = vld [vmem:[%s8105_s13] sm:$0xff] }
 0xd2f   :  { %5760 = vmatpush.xpose.msk.msrb.mxu3 %vm253_vm1, %v1470_v36  ;;  %v2072_v36 = vld [vmem:[%s6619_s27 + $0x8] sm:$0xff] }
 0xd33   :  { %5764 = vmatpush.xpose.msk.msra.mxu3 %vm253_vm1, %v1572_v41 }
 0xd36   :  { %5761 = vmatmul.msk.f32.vlgmr.msrb.gmra.mxu3 %vm253_vm1, %v1468_v22  ;;  %v2082_v22 = vld [vmem:[%s6619_s27 + $0x58] sm:$0xff] }
 0xd3e   :  { %5765 = vmatmul.msk.f32.vlgmr.msra.gmra.mxu3 %vm253_vm1, %v1570_v24  ;;  %v2080_v24 = vld [vmem:[%s6619_s27 + $0x48] sm:$0xff] }
 0xd57   :  { %v1382_v42 = vpop.xlane.xlu1 %1381 }
 0xd58   :  { %6267 = vrcp.f32 %v1382_v42  ;;  %v5730_v42 = vld [vmem:[%s6559_s21 + $0x38] sm:$0xff] }
 0xd59   :  { %5770 = vmatpush.xpose.msk.msrb.mxu3 %vm182_vm0, %v5730_v42 }
 0xd5e   :  { %v6268_v43 = vpop.eup %6267 }
 0xd5f   :  { %v1386_v45 = vmul.f32 %v6268_v43, %v6260_v29  ;;  %v5729_v43 = vld [vmem:[%s6559_s21 + $0x30] sm:$0xff] }
 0xd60   :  { %5771 = vmatpush.xpose.msk.msrb.mxu3 %vm182_vm0, %v5729_v43 }
 0xd61   :  { %v1509_v47 = vpop.xlane.xlu2 %1508  ;;  %5757 = vmatmul.msk.f32.vlgmr.msrb.gmra.mxu1 %vm253_vm1, %v1386_v45  ;;  %v5728_v45 = vld [vmem:[%s6559_s21 + $0x28] sm:$0xff] }
 0xd62   :  { %6269 = vrcp.f32 %v1509_v47  ;;  %5766 = vmatpush.xpose.msk.msrb.mxu1 %vm253_vm1, %v1600_v46  ;;  %v5727_v46 = vld [vmem:[%s6559_s21 + $0x20] sm:$0xff]  ;;  %s8107_s21 = sld [smem:[#allocation9_spill]] }
 0xd64   :  { %5772 = vmatpush.xpose.msk.msrb.mxu3 %vm182_vm0, %v5728_v45 }
 0xd68   :  { %v6270_v48 = vpop.eup %6269  ;;  %5773 = vmatpush.xpose.msk.msrb.mxu3 %vm182_vm0, %v5727_v46 }
 0xd69   :  { %v1515_v49 = vmul.f32 %v6270_v48, %v6262_v33  ;;  %v2075_v33 = vld [vmem:[%s6619_s27 + $0x20] sm:$0xff] }
 0xd6a   :  { %v7128_v48 = vld [vmem:[%s8106_s17] ss:$0 sm:$0xff] }
 0xd6b   :  { %5762 = vmatmul.msk.f32.vlgmr.msra.gmra.mxu1 %vm253_vm1, %v1515_v49 }
 0xd73   :  { %5767 = vmatmul.msk.f32.vlgmr.msrb.gmra.mxu1 %vm253_vm1, %v1598_v50 }
 0xda1   :  { %v7067_v51 = vpop.f32.mrf.mxu3 }
 0xdb1   :  { %v1410_v52 = vpop.f32.mrf.mxu3 }
 0xdb9   :  { %v1492_v53 = vpop.f32.mrf.mxu3 }
 0xdba   :  { %v1498_v54 = vsel %vm253_vm1, %v1492_v53, -inf }
 0xdbb   :  { %1499 = vmax.xlane.f32.xlu0 %v1498_v54 }
 0xdc1   :  { %v1594_v55 = vpop.f32.mrf.mxu3 }
 0xdc2   :  { %v1625_v56 = vsel %vm253_vm1, %v1594_v55, -inf }
 0xdc3   :  { %1626 = vmax.xlane.f32.xlu1 %v1625_v56 }
 0xdcf   :  { %1673 = vrot.lane.b32.xlu0 %v7005_v44, %s8082_s2 }
 0xdde   :  { %v1436_v57 = vpop.f32.mrf.mxu1 }
 0xde8   :  { %v1540_v58 = vpop.f32.mrf.mxu1 }
 0xdf0   :  { %v1622_v14 = vpop.f32.mrf.mxu1 }
 0xdf1   :  { %v1628_v59 = vsel %vm253_vm1, %v1622_v14, -inf }
 0xdf2   :  { %1629 = vmax.xlane.f32.xlu1 %v1628_v59 }
 0xe2e   :  { %v1500_v61 = vpop.xlane.xlu0 %1499 }
 0xe2f   :  { %v1502_v62 = vsub.f32 %v1492_v53, %v1500_v61 }
 0xe31   :  { %v1505_v63 = vmul.f32 1.442695, %v1502_v62 }
 0xe33   :  { %6271 = vpow2.f32 %v1505_v63 }
 0xe36   :  { %v1627_v0 = vpop.xlane.xlu1 %1626 }
 0xe37   :  { %v1631_v1 = vsub.f32 %v1594_v55, %v1627_v0 }
 0xe39   :  { %v6272_v2 = vpop.eup %6271  ;;  %v1633_v3 = vmul.f32 1.442695, %v1631_v1  ;;  %v6174_v1 = vld [vmem:[%s6564_s25 + $0x1] ss:$0 sm:$0xff]  ;;  %s8108_s25 = sld [smem:[#allocation10_spill]] }
 0xe3a   :  { %v1510_v4 = vsel %vm253_vm1, %v6272_v2, 0.0 }
 0xe3b   :  { %6273 = vpow2.f32 %v1633_v3  ;;  %1511 = vadd.xlane.f32.xlu2 %v1510_v4 }
 0xe41   :  { %v6274_v18 = vpop.eup %6273  ;;  %v1674_v5 = vpop.permute.xlu0 %1673 }
 0xe42   :  { %1694 = vmatpush.msra.mxu0 %v1674_v5  ;;  %v1637_v6 = vsel %vm253_vm1, %v6274_v18, 0.0 }
 0xe43   :  { %1638 = vadd.xlane.f32.xlu1 %v1637_v6 }
 0xe44   :  { %5810 = vmatpush.xpose.msk.msrb.mxu0 %vm182_vm0, %v2082_v22 }
 0xe48   :  { %5811 = vmatpush.xpose.msk.msrb.mxu0 %vm182_vm0, %v2081_v23 }
 0xe4c   :  { %5812 = vmatpush.xpose.msk.msrb.mxu0 %vm182_vm0, %v2080_v24 }
 0xe50   :  { %5813 = vmatpush.xpose.msk.msrb.mxu0 %vm182_vm0, %v2079_v25 }
 0xe53   :  { %1543 = vrot.lane.b32.xlu2 %v7005_v44, %s8080_s1 }
 0xe54   :  { %5814 = vmatpush.xpose.msk.msrb.mxu0 %vm182_vm0, %v2078_v26  ;;  %v5784_v26 = vld [vmem:[%s6569_s29 + $0x70] sm:$0xff] }
 0xe58   :  { %5815 = vmatpush.xpose.msk.msrb.mxu0 %vm182_vm0, %v2077_v27  ;;  %v5783_v27 = vld [vmem:[%s6569_s29 + $0x68] sm:$0xff] }
 0xe5c   :  { %1647 = vrot.lane.b32.xlu1 %v6983_v21, %s8082_s2  ;;  %5816 = vmatpush.xpose.msk.msrb.mxu0 %vm182_vm0, %v2076_v32  ;;  %v5781_v32 = vld [vmem:[%s6569_s29 + $0x58] sm:$0xff] }
 0xe60   :  { %5817 = vmatpush.xpose.msk.msrb.mxu0 %vm182_vm0, %v2075_v33 }
 0xe64   :  { %1701 = vrot.lane.b32.xlu1 %v1410_v52, %s8078_s7  ;;  %5818 = vmatpush.xpose.msk.msrb.mxu0 %vm182_vm0, %v2074_v34  ;;  %v5780_v34 = vld [vmem:[%s6569_s29 + $0x50] sm:$0xff] }
 0xe65   :  { %v1630_v9 = vpop.xlane.xlu1 %1629 }
 0xe66   :  { %v1632_v10 = vsub.f32 %v1622_v14, %v1630_v9 }
 0xe68   :  { %v1635_v11 = vmul.f32 1.442695, %v1632_v10  ;;  %5819 = vmatpush.xpose.msk.msrb.mxu0 %vm182_vm0, %v2073_v35  ;;  %v7161_v10 = vld [vmem:[%s8105_s13 + $0x8] sm:$0xff]  ;;  %s8117_s13 = sld [smem:[#allocation15_spill]] }
 0xe69   :  { %v5779_v35 = vld [vmem:[%s6569_s29 + $0x48] sm:$0xff] }
 0xe6a   :  { %6275 = vpow2.f32 %v1635_v11 }
 0xe6c   :  { %1709 = vrot.lane.b32.xlu1 %v1540_v58, %s8076_s10  ;;  %5820 = vmatpush.xpose.msk.msrb.mxu0 %vm182_vm0, %v2072_v36  ;;  %v5778_v36 = vld [vmem:[%s6569_s29 + $0x40] sm:$0xff] }
 0xe70   :  { %v6276_v15 = vpop.eup %6275  ;;  %5821 = vmatpush.xpose.msk.msrb.mxu0 %vm182_vm0, %v2071_v20 }
 0xe71   :  { %v1640_v44 = vsel %vm253_vm1, %v6276_v15, 0.0 }
 0xe74   :  { %1703 = vrot.lane.b32.xlu1 %v1436_v57, %s8078_s7 }
 0xe7c   :  { %1641 = vadd.xlane.f32.xlu2 %v1640_v44 }
 0xeae   :  { %v1512_v17 = vpop.xlane.xlu2 %1511 }
 0xeaf   :  { %6277 = vrcp.f32 %v1512_v17 }
 0xeb5   :  { %v6278_v21 = vpop.eup %6277 }
 0xeb6   :  { %v1516_v19 = vmul.f32 %v6278_v21, %v6272_v2  ;;  %v1544_v8 = vpop.permute.xlu2 %1543  ;;  %v1639_v13 = vpop.xlane.xlu1 %1638 }
 0xeb7   :  { %1564 = vmatpush.msrb.mxu2 %v1544_v8  ;;  %6279 = vrcp.f32 %v1639_v13 }
 0xeb8   :  { %5763 = vmatmul.msk.f32.vlgmr.msrb.gmra.mxu2 %vm253_vm1, %v1516_v19 }
 0xebd   :  { %v6280_v28 = vpop.eup %6279 }
 0xebe   :  { %v1645_v29 = vmul.f32 %v6280_v28, %v6274_v18  ;;  %v5782_v28 = vld [vmem:[%s6569_s29 + $0x60] sm:$0xff] }
 0xece   :  { %v1648_v30 = vpop.permute.xlu1 %1647 }
 0xecf   :  { %1668 = vmatpush.msra.mxu2 %v1648_v30 }
 0xed0   :  { %5768 = vmatmul.msk.f32.vlgmr.msra.gmra.mxu2 %vm253_vm1, %v1645_v29 }
 0xed6   :  { %v1702_v52 = vpop.permute.xlu1 %1701 }
 0xed7   :  { %v1723_v54 = vsel %vm253_vm1, %v7030_v60, %v1702_v52  ;;  %v6176_v52 = vld [vmem:[%s6594_s24 + $0x1] ss:$0 sm:$0xff]  ;;  %s8114_s24 = sld [smem:[#allocation12_spill]] }
 0xede   :  { %v1710_v53 = vpop.permute.xlu1 %1709 }
 0xedf   :  { %v1725_v55 = vsel %vm797_vm2, %v1723_v54, %v1710_v53 }
 0xee6   :  { %v1704_v58 = vpop.permute.xlu1 %1703 }
 0xee7   :  { %v1724_v59 = vsel %vm253_vm1, %v7067_v51, %v1704_v58 }
 0xeef   :  { %v1642_v37 = vpop.xlane.xlu2 %1641 }
 0xef0   :  { %6281 = vrcp.f32 %v1642_v37 }
 0xef6   :  { %v6282_v38 = vpop.eup %6281 }
 0xef7   :  { %v1646_v39 = vmul.f32 %v6282_v38, %v6276_v15 }
 0xef9   :  { %5769 = vmatmul.msk.f32.vlgmr.msra.gmra.mxu0 %vm253_vm1, %v1646_v39 }
 0xf01   :  { %5822 = vmatmul.msk.f32.vlgmr.msrb.gmra.mxu0 %vm182_vm0, %v7112_v16 }
 0xf09   :  { %5823 = vmatmul.msk.f32.gmra.mxu0 %vm182_vm0, %v7161_v10 }
 0xf3b   :  { %v1566_v40 = vpop.f32.mrf.mxu2 }
 0xf53   :  { %v1670_v41 = vpop.f32.mrf.mxu2 }
 0xf54   :  { %1717 = vrot.lane.b32.xlu0 %v1670_v41, %s8074_s11 }
 0xf5c   :  { %1711 = vrot.lane.b32.xlu0 %v1566_v40, %s8076_s10 }
 0xf76   :  { %v1696_v47 = vpop.f32.mrf.mxu0 }
 0xf77   :  { %1719 = vrot.lane.b32.xlu1 %v1696_v47, %s8074_s11  ;;  %v6175_v47 = vld [vmem:[%s6589_s19 + $0x1] ss:$0 sm:$0xff]  ;;  %s8113_s19 = sld [smem:[#allocation20_spill]] }
 0xf7e   :  { %v2151_v49 = vpop.f32.mrf.mxu0 }
 0xf7f   :  { %v7131_v50 = vadd.f32 %v7128_v48, %v2151_v49 }
 0xf81   :  { %2160 = vrot.lane.b32.xlu0 %v7131_v50, %s6516_s15  ;;  %v7146_v0 = vmul.f32 0.35355338, %v7131_v50 }
 0xf86   :  { %v2154_v29 = vpop.f32.mrf.mxu0 }
 0xf87   :  { %v7185_v30 = vadd.f32 %v7128_v48, %v2154_v29 }
 0xf89   :  { %v7192_v33 = vmul.f32 0.35355338, %v7185_v30 }
 0xfc6   :  { %v1718_v56 = vpop.permute.xlu0 %1717 }
 0xfc7   :  { %v1727_v57 = vsel %vm800_vm3, %v1725_v55, %v1718_v56 }
 0xfc8   :  { %5774 = vmatmul.msk.f32.vlgmr.msrb.gmra.mxu3 %vm182_vm0, %v1727_v57 }
 0xfce   :  { %v1712_v14 = vpop.permute.xlu0 %1711 }
 0xfcf   :  { %v1726_v61 = vsel %vm797_vm2, %v1724_v59, %v1712_v14 }
 0xfe9   :  { %v1720_v62 = vpop.permute.xlu1 %1719 }
 0xfea   :  { %v1728_v63 = vsel %vm800_vm3, %v1726_v61, %v1720_v62 }
 0xfeb   :  { %5775 = vmatmul.msk.f32.gmra.mxu3 %vm182_vm0, %v1728_v63  ;;  %v5790_v63 = vld [vmem:[%s6579_s8 + $0x38] sm:$0xff] }
 0xfec   :  { %5802 = vmatpush.xpose.msk.msrb.mxu2 %vm987_vm8, %v5790_v63 }
 0xff3   :  { %v2161_v60 = vpop.permute.xlu0 %2160 }
 0xff4   :  { %5824 = vmatpush.xpose.msk.msra.mxu3 %vm253_vm1, %v2161_v60 }
 0xff7   :  { %5825 = vmatmul.msk.f32.vlgmr.msra.gmra.mxu3 %vm253_vm1, %v7146_v0 }
0x104b   :  { %v1767_v2 = vpop.f32.mrf.mxu3 }
0x104c   :  { %v1768_v51 = vadd.f32 %v6174_v1, %v1767_v2 }
0x104e   :  { %v1773_v3 = vadd.f32 %v1768_v51, %v6976_v7 }
0x1050   :  { %v1779_v4 = vsel %vm182_vm0, %v1773_v3, 0.0 }
0x1051   :  { %1780 = vadd.xlane.f32.xlu1 %v1779_v4  ;;  %v5788_v4 = vld [vmem:[%s6579_s8 + $0x28] sm:$0xff] }
0x106a   :  { %2237 = vrot.lane.b32.xlu1 %v7131_v50, %s6520_s22 }
0x106e   :  { %v1770_v18 = vpop.f32.mrf.mxu3 }
0x106f   :  { %v1771_v5 = vadd.f32 %v6174_v1, %v1770_v18  ;;  %v5789_v1 = vld [vmem:[%s6579_s8 + $0x30] sm:$0xff] }
0x1070   :  { %5803 = vmatpush.xpose.msk.msrb.mxu2 %vm987_vm8, %v5789_v1 }
0x1071   :  { %v1774_v6 = vadd.f32 %v1771_v5, %v6998_v31  ;;  %v5785_v31 = vld [vmem:[%s6569_s29 + $0x78] sm:$0xff]  ;;  %s8109_s29 = sld [smem:[#allocation11_spill]] }
0x1072   :  { %2367 = vrot.lane.b32.xlu1 %v7131_v50, %s6519_s18  ;;  %5792 = vmatpush.xpose.msk.msra.mxu1 %vm182_vm0, %v5785_v31 }
0x1073   :  { %v1782_v9 = vsel %vm182_vm0, %v1774_v6, 0.0 }
0x1074   :  { %1783 = vadd.xlane.f32.xlu2 %v1782_v9  ;;  %5804 = vmatpush.xpose.msk.msrb.mxu2 %vm987_vm8, %v5788_v4 }
0x1076   :  { %5793 = vmatpush.xpose.msk.msra.mxu1 %vm182_vm0, %v5784_v26 }
0x107a   :  { %v2184_v25 = vpop.f32.mrf.mxu3  ;;  %5794 = vmatpush.xpose.msk.msra.mxu1 %vm182_vm0, %v5783_v27  ;;  %2317 = vrot.lane.b32.xlu1 %v7192_v33, %s6517_s5 }
0x107b   :  { %v2215_v13 = vsel %vm253_vm1, %v2184_v25, -inf }
0x107e   :  { %5795 = vmatpush.xpose.msk.msra.mxu1 %vm182_vm0, %v5782_v28 }
0x1082   :  { %5796 = vmatpush.xpose.msk.msra.mxu1 %vm182_vm0, %v5781_v32 }
0x1086   :  { %5797 = vmatpush.xpose.msk.msra.mxu1 %vm182_vm0, %v5780_v34 }
0x108a   :  { %5798 = vmatpush.xpose.msk.msra.mxu1 %vm182_vm0, %v5779_v35 }
0x108e   :  { %5799 = vmatpush.xpose.msk.msra.mxu1 %vm182_vm0, %v5778_v36 }
0x10c4   :  { %v1781_v7 = vpop.xlane.xlu1 %1780 }
0x10c5   :  { %v1785_v11 = vmul.f32 %v1781_v7, %v6890_v12  ;;  %v5787_v7 = vld [vmem:[%s6579_s8 + $0x20] sm:$0xff]  ;;  %s8111_s8 = sld [smem:[#allocation7_spill]] }
0x10c6   :  { %5805 = vmatpush.xpose.msk.msrb.mxu2 %vm987_vm8, %v5787_v7 }
0x10c7   :  { %v1787_v15 = vsub.f32 %v1773_v3, %v1785_v11 }
0x10c9   :  { %v1789_v44 = vmul.f32 %v1787_v15, %v1787_v15 }
0x10cb   :  { %v1791_v17 = vsel %vm182_vm0, %v1789_v44, 0.0 }
0x10cc   :  { %1792 = vadd.xlane.f32.xlu0 %v1791_v17  ;;  %v6177_v17 = vld [vmem:[%s6574_s3 + $0x1] ss:$0 sm:$0xff]  ;;  %s8110_s3 = sld [smem:[#allocation6_spill]] }
0x10dc   :  { %v2238_v21 = vpop.permute.xlu1 %2237 }
0x10dd   :  { %2258 = vmatpush.msrb.mxu3 %v2238_v21 }
0x10e0   :  { %2291 = vrot.lane.b32.xlu0 %v7131_v50, %s6515_s0 }
0x10e7   :  { %v1784_v19 = vpop.xlane.xlu2 %1783 }
0x10e8   :  { %v1786_v8 = vmul.f32 %v1784_v19, %v6890_v12 }
0x10ea   :  { %v7172_v22 = vsub.f32 %v1774_v6, %v1786_v8 }
0x10ec   :  { %v1790_v23 = vmul.f32 %v7172_v22, %v7172_v22 }
0x10ee   :  { %v1794_v24 = vsel %vm182_vm0, %v1790_v23, 0.0 }
0x10ef   :  { %1795 = vadd.xlane.f32.xlu2 %v1794_v24 }
0x10f7   :  { %2216 = vmax.xlane.f32.xlu2 %v2215_v13 }
0x110f   :  { %2188 = vrot.lane.b32.xlu2 %v7185_v30, %s6516_s15 }
0x113f   :  { %v1793_v20 = vpop.xlane.xlu0 %1792 }
0x1140   :  { %v1797_v37 = vmul.f32 %v1793_v20, %v6890_v12 }
0x1142   :  { %v1799_v38 = vadd.f32 1e-05, %v1797_v37 }
0x1144   :  { %6283 = vrsqrt.f32 %v1799_v38  ;;  %vm1807_vm7 = vweird.f32 %v1799_v38 }
0x114a   :  { %v6284_v39 = vpop.eup %6283 }
0x114b   :  { %v1802_v40 = vmul.f32 %v6284_v39, %v1799_v38  ;;  %vm1808_vm6 = vweird.f32 %v6284_v39 }
0x114c   :  { %vm1809_vm9 = vmor %vm1807_vm7, %vm1808_vm6 }
0x114d   :  { %v1803_v41 = vmul.f32 %v6284_v39, %v1802_v40 }
0x114f   :  { %v1804_v42 = vmul.f32 0.5, %v1803_v41 }
0x1151   :  { %v1805_v43 = vsub.f32 1.5, %v1804_v42 }
0x1152   :  { %v2292_v45 = vpop.permute.xlu0 %2291 }
0x1153   :  { %v1806_v46 = vmul.f32 %v6284_v39, %v1805_v43  ;;  %5830 = vmatpush.xpose.msk.msra.mxu3 %vm253_vm1, %v2292_v45 }
0x1155   :  { %v1810_v48 = vsel %vm1809_vm9, %v6284_v39, %v1806_v46  ;;  %v2368_v46 = vpop.permute.xlu1 %2367 }
0x1156   :  { %v1821_v49 = vmul.f32 %v1810_v48, %v1787_v15 }
0x1158   :  { %v1826_v53 = vmul.f32 %v6175_v47, %v1821_v49 }
0x115a   :  { %v7206_v54 = vadd.f32 %v6176_v52, %v1826_v53 }
0x115c   :  { %5800 = vmatmul.msk.f32.vlgmr.msra.gmra.mxu1 %vm182_vm0, %v7206_v54 }
0x115d   :  { %v2318_v53 = vpop.permute.xlu1 %2317 }
0x1162   :  { %v1796_v55 = vpop.xlane.xlu2 %1795 }
0x1163   :  { %v1798_v56 = vmul.f32 %v1796_v55, %v6890_v12 }
0x1165   :  { %v1800_v57 = vadd.f32 1e-05, %v1798_v56 }
0x1167   :  { %6285 = vrsqrt.f32 %v1800_v57  ;;  %vm1817_vm11 = vweird.f32 %v1800_v57 }
0x116a   :  { %v2217_v58 = vpop.xlane.xlu2 %2216 }
0x116b   :  { %v2221_v14 = vsub.f32 %v2184_v25, %v2217_v58 }
0x116d   :  { %v6286_v59 = vpop.eup %6285  ;;  %v2223_v61 = vmul.f32 1.442695, %v2221_v14 }
0x116e   :  { %v1812_v62 = vmul.f32 %v6286_v59, %v1800_v57  ;;  %vm1818_vm10 = vweird.f32 %v6286_v59 }
0x116f   :  { %6287 = vpow2.f32 %v2223_v61  ;;  %vm1819_vm12 = vmor %vm1817_vm11, %vm1818_vm10 }
0x1170   :  { %v1813_v60 = vmul.f32 %v6286_v59, %v1812_v62 }
0x1172   :  { %v1814_v2 = vmul.f32 0.5, %v1813_v60  ;;  %v2189_v44 = vpop.permute.xlu2 %2188 }
0x1173   :  { %5826 = vmatpush.xpose.msk.msra.mxu2 %vm253_vm1, %v2189_v44 }
0x1174   :  { %v1815_v51 = vsub.f32 1.5, %v1814_v2 }
0x1175   :  { %v6288_v3 = vpop.eup %6287 }
0x1176   :  { %v1816_v18 = vmul.f32 %v6286_v59, %v1815_v51  ;;  %v2227_v5 = vsel %vm253_vm1, %v6288_v3, 0.0 }
0x1177   :  { %2228 = vadd.xlane.f32.xlu2 %v2227_v5 }
0x1178   :  { %v1820_v6 = vsel %vm1819_vm12, %v6286_v59, %v1816_v18 }
0x1179   :  { %v1822_v9 = vmul.f32 %v1820_v6, %v7172_v22 }
0x117b   :  { %v1827_v11 = vmul.f32 %v6175_v47, %v1822_v9 }
0x117d   :  { %v7221_v15 = vadd.f32 %v6176_v52, %v1827_v11 }
0x117f   :  { %5801 = vmatmul.msk.f32.gmra.mxu1 %vm182_vm0, %v7221_v15 }
0x118f   :  { %2289 = vrot.lane.b32.xlu2 %v7146_v0, %s6517_s5 }
0x11d9   :  { %v1901_v31 = vpop.f32.mrf.mxu1 }
0x11da   :  { %v1902_v21 = vadd.f32 %v6177_v17, %v1901_v31 }
0x11dc   :  { %v1907_v19 = vmax.f32 %v1902_v21, 0.0 }
0x11de   :  { %5806 = vmatmul.msk.f32.vlgmr.msrb.gmra.mxu2 %vm987_vm8, %v1907_v19 }
0x11ea   :  { %v2229_v8 = vpop.xlane.xlu2 %2228 }
0x11eb   :  { %6289 = vrcp.f32 %v2229_v8 }
0x11f1   :  { %v6290_v22 = vpop.eup %6289 }
0x11f2   :  { %v2235_v23 = vmul.f32 %v6290_v22, %v6288_v3  ;;  %v2290_v24 = vpop.permute.xlu2 %2289 }
0x11f4   :  { %5828 = vmatmul.msk.f32.vlgmr.msrb.gmra.mxu3 %vm253_vm1, %v2235_v23 }
0x11fc   :  { %v1904_v25 = vpop.f32.mrf.mxu1  ;;  %5831 = vmatmul.msk.f32.vlgmr.msra.gmra.mxu3 %vm253_vm1, %v2290_v24 }
0x11fd   :  { %v1905_v13 = vadd.f32 %v6177_v17, %v1904_v25 }
0x11ff   :  { %v1908_v26 = vmax.f32 %v1905_v13, 0.0 }
0x1201   :  { %5807 = vmatmul.msk.f32.gmra.mxu2 %vm987_vm8, %v1908_v26 }
0x1209   :  { %5827 = vmatmul.msk.f32.vlgmr.msra.gmra.mxu2 %vm253_vm1, %v7192_v33 }
0x1261   :  { %v7237_v28 = vpop.f32.mrf.mxu2 }
0x1277   :  { %v7235_v27 = vpop.f32.mrf.mxu3 }
0x127f   :  { %v2314_v29 = vpop.f32.mrf.mxu3 }
0x1280   :  { %v2345_v32 = vsel %vm253_vm1, %v2314_v29, -inf }
0x1281   :  { %2346 = vmax.xlane.f32.xlu0 %v2345_v32 }
0x1284   :  { %v7240_v34 = vpop.f32.mrf.mxu2 }
0x128c   :  { %v2212_v35 = vpop.f32.mrf.mxu2 }
0x128d   :  { %v2218_v36 = vsel %vm253_vm1, %v2212_v35, -inf }
0x128e   :  { %2219 = vmax.xlane.f32.xlu2 %v2218_v36 }
0x1295   :  { %2263 = vrot.lane.b32.xlu0 %v7185_v30, %s6520_s22 }
0x129d   :  { %2449 = vrot.lane.b32.xlu0 %v7185_v30, %s6518_s16 }
0x12a5   :  { %2447 = vrot.lane.b32.xlu0 %v7192_v33, %s6521_s23 }
0x12ad   :  { %2419 = vrot.lane.b32.xlu0 %v7146_v0, %s6521_s23 }
0x12f4   :  { %v2347_v20 = vpop.xlane.xlu0 %2346 }
0x12f5   :  { %v2351_v37 = vsub.f32 %v2314_v29, %v2347_v20 }
0x12f7   :  { %v2353_v38 = vmul.f32 1.442695, %v2351_v37 }
0x12f9   :  { %6291 = vpow2.f32 %v2353_v38 }
0x12ff   :  { %v6292_v39 = vpop.eup %6291 }
0x1300   :  { %v2357_v40 = vsel %vm253_vm1, %v6292_v39, 0.0 }
0x1301   :  { %v2220_v41 = vpop.xlane.xlu2 %2219  ;;  %2358 = vadd.xlane.f32.xlu2 %v2357_v40 }
0x1302   :  { %v2222_v42 = vsub.f32 %v2212_v35, %v2220_v41 }
0x1304   :  { %v2225_v43 = vmul.f32 1.442695, %v2222_v42 }
0x1306   :  { %6293 = vpow2.f32 %v2225_v43 }
0x1307   :  { %v2264_v45 = vpop.permute.xlu0 %2263 }
0x1308   :  { %2284 = vmatpush.msrb.mxu2 %v2264_v45 }
0x130a   :  { %2388 = vmatpush.msra.mxu2 %v2368_v46 }
0x130c   :  { %v6294_v47 = vpop.eup %6293 }
0x130d   :  { %v2230_v48 = vsel %vm253_vm1, %v6294_v47, 0.0 }
0x130e   :  { %2231 = vadd.xlane.f32.xlu1 %v2230_v48 }
0x130f   :  { %v2450_v49 = vpop.permute.xlu0 %2449 }
0x1317   :  { %v2448_v56 = vpop.permute.xlu0 %2447 }
0x1319   :  { %2319 = vrot.lane.b32.xlu2 %v7185_v30, %s6515_s0 }
0x131f   :  { %v2420_v14 = vpop.permute.xlu0 %2419 }
0x1321   :  { %2421 = vrot.lane.b32.xlu2 %v7131_v50, %s6518_s16 }
0x1327   :  { %2551 = vrot.lane.b32.xlu1 %v7131_v50, %s6522_s26 }
0x1329   :  { %2549 = vrot.lane.b32.xlu2 %v7146_v0, %s6523_s28 }
0x1374   :  { %v2359_v52 = vpop.xlane.xlu2 %2358 }
0x137c   :  { %v2320_v55 = vpop.permute.xlu2 %2319 }
0x137d   :  { %5832 = vmatpush.xpose.msk.msrb.mxu1 %vm253_vm1, %v2320_v55 }
0x1380   :  { %5833 = vmatmul.msk.f32.vlgmr.msrb.gmra.mxu1 %vm253_vm1, %v2318_v53 }
0x1381   :  { %v2232_v57 = vpop.xlane.xlu1 %2231 }
0x1382   :  { %6295 = vrcp.f32 %v2232_v57 }
0x1383   :  { %6297 = vrcp.f32 %v2359_v52 }
0x1384   :  { %v2422_v58 = vpop.permute.xlu2 %2421 }
0x1385   :  { %5836 = vmatpush.xpose.msk.msra.mxu1 %vm253_vm1, %v2422_v58 }
0x1388   :  { %v6296_v59 = vpop.eup %6295  ;;  %5837 = vmatmul.msk.f32.vlgmr.msra.gmra.mxu1 %vm253_vm1, %v2420_v14  ;;  %v7304_v14 = vld [vmem:[%s6584_s14 + $0x1] ss:$0 sm:$0xff]  ;;  %s8112_s14 = sld [smem:[#allocation19_spill]] }
0x1389   :  { %v2236_v0 = vmul.f32 %v6296_v59, %v6294_v47  ;;  %v6298_v61 = vpop.eup %6297  ;;  %v1948_v59 = vadd.f32 %v7304_v14, %v7237_v28 }
0x138a   :  { %v2365_v62 = vmul.f32 %v6298_v61, %v6292_v39 }
0x138b   :  { %5829 = vmatmul.msk.f32.vlgmr.msrb.gmra.mxu2 %vm253_vm1, %v2236_v0  ;;  %v1953_v0 = vadd.f32 %v1948_v59, %v7206_v54 }
0x138c   :  { %5838 = vmatpush.xpose.msk.msrb.mxu2 %vm253_vm1, %v2450_v49  ;;  %v2550_v60 = vpop.permute.xlu2 %2549 }
0x138d   :  { %v1959_v61 = vsel %vm182_vm0, %v1953_v0, 0.0 }
0x1393   :  { %5834 = vmatmul.msk.f32.vlgmr.msra.gmra.mxu2 %vm253_vm1, %v2365_v62 }
0x1399   :  { %v2552_v63 = vpop.permute.xlu1 %2551 }
0x139a   :  { %5842 = vmatpush.xpose.msk.msra.mxu2 %vm253_vm1, %v2552_v63 }
0x139b   :  { %5839 = vmatmul.msk.f32.vlgmr.msrb.gmra.mxu2 %vm253_vm1, %v2448_v56 }
0x13a3   :  { %5843 = vmatmul.msk.f32.vlgmr.msra.gmra.mxu2 %vm253_vm1, %v2550_v60 }
0x13fd   :  { %v2342_v1 = vpop.f32.mrf.mxu1 }
0x13fe   :  { %v2348_v2 = vsel %vm253_vm1, %v2342_v1, -inf }
0x13ff   :  { %2349 = vmax.xlane.f32.xlu1 %v2348_v2 }
0x1405   :  { %v2444_v51 = vpop.f32.mrf.mxu1 }
0x1406   :  { %v2475_v3 = vsel %vm253_vm1, %v2444_v51, -inf }
0x1407   :  { %2476 = vmax.xlane.f32.xlu0 %v2475_v3 }
0x140e   :  { %v7281_v4 = vpop.f32.mrf.mxu2 }
0x1416   :  { %v2390_v18 = vpop.f32.mrf.mxu2 }
0x1418   :  { %2579 = vrot.lane.b32.xlu1 %v7185_v30, %s6522_s26 }
0x141b   :  { %2577 = vrot.lane.b32.xlu0 %v7192_v33, %s6523_s28 }
0x141e   :  { %v2472_v5 = vpop.f32.mrf.mxu2 }
0x141f   :  { %v2478_v6 = vsel %vm253_vm1, %v2472_v5, -inf }
0x1420   :  { %2497 = vrot.lane.b32.xlu1 %v7131_v50, %s8080_s1 }
0x1426   :  { %v2574_v19 = vpop.f32.mrf.mxu2 }
0x1428   :  { %2627 = vrot.lane.b32.xlu1 %v7131_v50, %s8082_s2  ;;  %v2605_v50 = vsel %vm253_vm1, %v2574_v19, -inf }
0x1452   :  { %2479 = vmax.xlane.f32.xlu1 %v2478_v6  ;;  %v2087_v6 = vld [vmem:[%s8107_s21 + $0x18] sm:$0xff] }
0x1453   :  { %5848 = vmatpush.xpose.msk.msrb.mxu2 %vm182_vm0, %v2087_v6  ;;  %v2820_v6 = vld [vmem:[%s8109_s29 + $0x48] sm:$0xff] }
0x1472   :  { %v2350_v9 = vpop.xlane.xlu1 %2349 }
0x1473   :  { %v2352_v7 = vsub.f32 %v2342_v1, %v2350_v9  ;;  %v2086_v9 = vld [vmem:[%s8107_s21 + $0x10] sm:$0xff] }
0x1474   :  { %5849 = vmatpush.xpose.msk.msrb.mxu2 %vm182_vm0, %v2086_v9  ;;  %v2818_v9 = vld [vmem:[%s8109_s29 + $0x38] sm:$0xff] }
0x1475   :  { %v2355_v11 = vmul.f32 1.442695, %v2352_v7 }
0x1477   :  { %6299 = vpow2.f32 %v2355_v11  ;;  %v2085_v11 = vld [vmem:[%s8107_s21 + $0x8] sm:$0xff] }
0x1478   :  { %5850 = vmatpush.xpose.msk.msrb.mxu2 %vm182_vm0, %v2085_v11  ;;  %v2816_v11 = vld [vmem:[%s8109_s29 + $0x28] sm:$0xff] }
0x147a   :  { %v2477_v44 = vpop.xlane.xlu0 %2476 }
0x147b   :  { %v2481_v33 = vsub.f32 %v2444_v51, %v2477_v44  ;;  %v2084_v44 = vld [vmem:[%s8107_s21] sm:$0xff] }
0x147c   :  { %5851 = vmatpush.xpose.msk.msrb.mxu2 %vm182_vm0, %v2084_v44  ;;  %v2815_v44 = vld [vmem:[%s8109_s29 + $0x20] sm:$0xff] }
0x147d   :  { %v6300_v17 = vpop.eup %6299  ;;  %v2483_v21 = vmul.f32 1.442695, %v2481_v33 }
0x147e   :  { %v2360_v31 = vsel %vm253_vm1, %v6300_v17, 0.0 }
0x147f   :  { %2361 = vadd.xlane.f32.xlu2 %v2360_v31  ;;  %6301 = vpow2.f32 %v2483_v21 }
0x1485   :  { %v6302_v22 = vpop.eup %6301 }
0x1486   :  { %v2487_v24 = vsel %vm253_vm1, %v6302_v22, 0.0 }
0x1487   :  { %2606 = vmax.xlane.f32.xlu2 %v2605_v50 }
0x148a   :  { %v2580_v8 = vpop.permute.xlu1 %2579 }
0x148b   :  { %5844 = vmatpush.xpose.msk.msra.mxu0 %vm253_vm1, %v2580_v8 }
0x148d   :  { %v2578_v23 = vpop.permute.xlu0 %2577 }
0x148e   :  { %5845 = vmatmul.msk.f32.vlgmr.msra.gmra.mxu0 %vm253_vm1, %v2578_v23 }
0x148f   :  { %2488 = vadd.xlane.f32.xlu2 %v2487_v24 }
0x1492   :  { %v2498_v35 = vpop.permute.xlu1 %2497 }
0x149a   :  { %v2628_v42 = vpop.permute.xlu1 %2627 }
0x14a7   :  { %2393 = vrot.lane.b32.xlu2 %v7185_v30, %s6519_s18 }
0x14c5   :  { %v2480_v46 = vpop.xlane.xlu1 %2479 }
0x14c6   :  { %v2482_v47 = vsub.f32 %v2472_v5, %v2480_v46 }
0x14c8   :  { %v2485_v48 = vmul.f32 1.442695, %v2482_v47  ;;  %v7341_v47 = vld [vmem:[%s8108_s25] ss:$0 sm:$0xff] }
0x14f2   :  { %v2362_v25 = vpop.xlane.xlu2 %2361 }
0x14fa   :  { %v2607_v13 = vpop.xlane.xlu2 %2606 }
0x14fb   :  { %v2611_v26 = vsub.f32 %v2574_v19, %v2607_v13 }
0x14fd   :  { %v2613_v29 = vmul.f32 1.442695, %v2611_v26 }
0x14ff   :  { %6303 = vpow2.f32 %v2613_v29 }
0x1500   :  { %6305 = vrcp.f32 %v2362_v25 }
0x1502   :  { %v2489_v32 = vpop.xlane.xlu2 %2488 }
0x1503   :  { %6307 = vrcp.f32 %v2489_v32 }
0x1504   :  { %6309 = vpow2.f32 %v2485_v48 }
0x1505   :  { %v6304_v36 = vpop.eup %6303 }
0x1506   :  { %v2617_v20 = vsel %vm253_vm1, %v6304_v36, 0.0  ;;  %v6306_v37 = vpop.eup %6305 }
0x1507   :  { %2618 = vadd.xlane.f32.xlu0 %v2617_v20  ;;  %v2366_v38 = vmul.f32 %v6306_v37, %v6300_v17 }
0x1509   :  { %v6308_v43 = vpop.eup %6307 }
0x150a   :  { %v2394_v39 = vpop.permute.xlu2 %2393  ;;  %v2495_v45 = vmul.f32 %v6308_v43, %v6302_v22  ;;  %v6310_v49 = vpop.eup %6309 }
0x150b   :  { %2414 = vmatpush.msrb.mxu3 %v2394_v39  ;;  %v2602_v40 = vpop.f32.mrf.mxu0  ;;  %v2490_v52 = vsel %vm253_vm1, %v6310_v49, 0.0  ;;  %v7332_v39 = vld [vmem:[%s6599_s30 + $0x1] ss:$0 sm:$0xff]  ;;  %s8115_s30 = sld [smem:[#allocation13_spill]] }
0x150c   :  { %5835 = vmatmul.msk.f32.vlgmr.msrb.gmra.mxu3 %vm253_vm1, %v2366_v38  ;;  %v2608_v41 = vsel %vm253_vm1, %v2602_v40, -inf }
0x150d   :  { %2518 = vmatpush.msra.mxu3 %v2498_v35  ;;  %2609 = vmax.xlane.f32.xlu2 %v2608_v41 }
0x150f   :  { %2648 = vmatpush.msrb.mxu3 %v2628_v42  ;;  %v7335_v42 = vld [vmem:[%s6604_s6 + $0x1] ss:$0 sm:$0xff]  ;;  %s8116_s6 = sld [smem:[#allocation14_spill]] }
0x1514   :  { %5840 = vmatmul.msk.f32.vlgmr.msra.gmra.mxu3 %vm253_vm1, %v2495_v45 }
0x151b   :  { %2681 = vrot.lane.b32.xlu0 %v2390_v18, %s8078_s7 }
0x1545   :  { %2491 = vadd.xlane.f32.xlu0 %v2490_v52 }
0x157a   :  { %v2619_v53 = vpop.xlane.xlu0 %2618 }
0x157b   :  { %6311 = vrcp.f32 %v2619_v53 }
0x1580   :  { %v2610_v28 = vpop.xlane.xlu2 %2609 }
0x1581   :  { %v6312_v55 = vpop.eup %6311  ;;  %v2612_v3 = vsub.f32 %v2602_v40, %v2610_v28 }
0x1582   :  { %v2625_v56 = vmul.f32 %v6312_v55, %v6304_v36 }
0x1583   :  { %v2615_v18 = vmul.f32 1.442695, %v2612_v3 }
0x1584   :  { %5846 = vmatmul.msk.f32.vlgmr.msrb.gmra.mxu3 %vm253_vm1, %v2625_v56 }
0x158d   :  { %v2682_v62 = vpop.permute.xlu0 %2681 }
0x158e   :  { %v2703_v50 = vsel %vm253_vm1, %v7235_v27, %v2682_v62 }
0x158f   :  { %v2416_v57 = vpop.f32.mrf.mxu3 }
0x1597   :  { %v2520_v58 = vpop.f32.mrf.mxu3 }
0x1598   :  { %2689 = vrot.lane.b32.xlu1 %v2520_v58, %s8076_s10 }
0x15a0   :  { %2523 = vrot.lane.b32.xlu1 %v7185_v30, %s8080_s1  ;;  %s8123_s1 = sld [smem:[#allocation23_spill]] }
0x15a8   :  { %2653 = vrot.lane.b32.xlu1 %v7185_v30, %s8082_s2  ;;  %s8124_s2 = sld [smem:[#allocation24_spill]] }
0x15b8   :  { %v2492_v63 = vpop.xlane.xlu0 %2491 }
0x15b9   :  { %6313 = vrcp.f32 %v2492_v63 }
0x15ba   :  { %6315 = vpow2.f32 %v2615_v18  ;;  %v2822_v18 = vld [vmem:[%s8109_s29 + $0x58] sm:$0xff] }
0x15bb   :  { %5860 = vmatpush.xpose.msk.msra.mxu3 %vm182_vm0, %v2822_v18 }
0x15bf   :  { %v6314_v30 = vpop.eup %6313 }
0x15c0   :  { %v2496_v2 = vmul.f32 %v6314_v30, %v6310_v49  ;;  %v6316_v5 = vpop.eup %6315 }
0x15c1   :  { %v2620_v7 = vsel %vm253_vm1, %v6316_v5, 0.0 }
0x15d2   :  { %1960 = vadd.xlane.f32.xlu1 %v1959_v61 }
0x1607   :  { %v2650_v60 = vpop.f32.mrf.mxu3 }
0x1608   :  { %2697 = vrot.lane.b32.xlu2 %v2650_v60, %s8074_s11 }
0x160a   :  { %v2690_v1 = vpop.permute.xlu1 %2689 }
0x160b   :  { %v2705_v8 = vsel %vm797_vm2, %v2703_v50, %v2690_v1 }
0x1612   :  { %v2524_v51 = vpop.permute.xlu1 %2523 }
0x1613   :  { %2544 = vmatpush.msrb.mxu1 %v2524_v51 }
0x1614   :  { %5841 = vmatmul.msk.f32.vlgmr.msrb.gmra.mxu1 %vm253_vm1, %v2496_v2 }
0x161a   :  { %v2654_v54 = vpop.permute.xlu1 %2653 }
0x161b   :  { %2674 = vmatpush.msra.mxu1 %v2654_v54 }
0x1631   :  { %2621 = vadd.xlane.f32.xlu2 %v2620_v7  ;;  %v2817_v7 = vld [vmem:[%s8109_s29 + $0x30] sm:$0xff] }
0x1645   :  { %v1961_v17 = vpop.xlane.xlu1 %1960 }
0x1646   :  { %v1965_v33 = vmul.f32 %v1961_v17, %v6890_v12 }
0x1648   :  { %v1967_v31 = vsub.f32 %v1953_v0, %v1965_v33  ;;  %v2814_v33 = vld [vmem:[%s8109_s29 + $0x18] sm:$0xff] }
0x1649   :  { %2683 = vrot.lane.b32.xlu2 %v2416_v57, %s8078_s7  ;;  %v1951_v57 = vadd.f32 %v7304_v14, %v7240_v34  ;;  %5854 = vmatpush.xpose.msk.msrb.mxu0 %vm182_vm0, %v2814_v33 }
0x164a   :  { %v1969_v21 = vmul.f32 %v1967_v31, %v1967_v31 }
0x164b   :  { %v1954_v59 = vadd.f32 %v1951_v57, %v7221_v15 }
0x164c   :  { %v1971_v19 = vsel %vm182_vm0, %v1969_v21, 0.0 }
0x164d   :  { %1972 = vadd.xlane.f32.xlu0 %v1971_v19 }
0x1662   :  { %v2698_v22 = vpop.permute.xlu2 %2697 }
0x1663   :  { %v2707_v23 = vsel %vm800_vm3, %v2705_v8, %v2698_v22  ;;  %v2813_v8 = vld [vmem:[%s8109_s29 + $0x10] sm:$0xff] }
0x1664   :  { %5852 = vmatmul.msk.f32.vlgmr.msrb.gmra.mxu2 %vm182_vm0, %v2707_v23  ;;  %5855 = vmatpush.xpose.msk.msrb.mxu0 %vm182_vm0, %v2813_v8 }
0x1691   :  { %v2546_v55 = vpop.f32.mrf.mxu1 }
0x16a4   :  { %v2622_v24 = vpop.xlane.xlu2 %2621 }
0x16a5   :  { %6317 = vrcp.f32 %v2622_v24 }
0x16ab   :  { %v6318_v25 = vpop.eup %6317 }
0x16ac   :  { %v2626_v13 = vmul.f32 %v6318_v25, %v6316_v5  ;;  %v2684_v30 = vpop.permute.xlu2 %2683  ;;  %v2821_v5 = vld [vmem:[%s8109_s29 + $0x50] sm:$0xff]  ;;  %v2812_v25 = vld [vmem:[%s8109_s29 + $0x8] sm:$0xff] }
0x16ad   :  { %v2704_v51 = vsel %vm253_vm1, %v7281_v4, %v2684_v30  ;;  %5861 = vmatpush.xpose.msk.msra.mxu3 %vm182_vm0, %v2821_v5  ;;  %v2819_v4 = vld [vmem:[%s8109_s29 + $0x40] sm:$0xff]  ;;  %5856 = vmatpush.xpose.msk.msrb.mxu0 %vm182_vm0, %v2812_v25 }
0x16ae   :  { %5847 = vmatmul.msk.f32.vlgmr.msra.gmra.mxu1 %vm253_vm1, %v2626_v13  ;;  %v2811_v13 = vld [vmem:[%s8109_s29] sm:$0xff] }
0x16b1   :  { %5862 = vmatpush.xpose.msk.msra.mxu3 %vm182_vm0, %v2820_v6  ;;  %5857 = vmatpush.xpose.msk.msrb.mxu0 %vm182_vm0, %v2811_v13 }
0x16b5   :  { %5863 = vmatpush.xpose.msk.msra.mxu3 %vm182_vm0, %v2819_v4 }
0x16b9   :  { %5864 = vmatpush.xpose.msk.msra.mxu3 %vm182_vm0, %v2818_v9  ;;  %v7436_v9 = vld [vmem:[%s8114_s24] ss:$0 sm:$0xff] }
0x16bd   :  { %5865 = vmatpush.xpose.msk.msra.mxu3 %vm182_vm0, %v2817_v7 }
0x16c0   :  { %v1973_v26 = vpop.xlane.xlu0 %1972 }
0x16c1   :  { %v1977_v29 = vmul.f32 %v1973_v26, %v6890_v12  ;;  %5866 = vmatpush.xpose.msk.msra.mxu3 %vm182_vm0, %v2816_v11 }
0x16c3   :  { %v1979_v32 = vadd.f32 1e-05, %v1977_v29 }
0x16c5   :  { %6319 = vrsqrt.f32 %v1979_v32  ;;  %vm1987_vm14 = vweird.f32 %v1979_v32  ;;  %5867 = vmatpush.xpose.msk.msra.mxu3 %vm182_vm0, %v2815_v44 }
0x16cb   :  { %v6320_v27 = vpop.eup %6319 }
0x16cc   :  { %v1982_v35 = vmul.f32 %v6320_v27, %v1979_v32  ;;  %vm1988_vm13 = vweird.f32 %v6320_v27 }
0x16cd   :  { %vm1989_vm15 = vmor %vm1987_vm14, %vm1988_vm13 }
0x16ce   :  { %v1983_v36 = vmul.f32 %v6320_v27, %v1982_v35 }
0x16d0   :  { %v1984_v20 = vmul.f32 0.5, %v1983_v36 }
0x16d2   :  { %v1985_v37 = vsub.f32 1.5, %v1984_v20 }
0x16d4   :  { %v1986_v38 = vmul.f32 %v6320_v27, %v1985_v37 }
0x16d6   :  { %v1990_v40 = vsel %vm1989_vm15, %v6320_v27, %v1986_v38 }
0x16d7   :  { %v2001_v41 = vmul.f32 %v1990_v40, %v1967_v31  ;;  %v7402_v40 = vld [vmem:[%s8110_s3] ss:$0 sm:$0xff]  ;;  %s8118_s3 = sld [smem:[#allocation21_spill]] }
0x16d9   :  { %v2006_v43 = vmul.f32 %v7332_v39, %v2001_v41 }
0x16db   :  { %v2011_v45 = vadd.f32 %v7335_v42, %v2006_v43 }
0x16dd   :  { %v2015_v46 = vsel %vm182_vm0, %v2011_v45, 0.0 }
0x16de   :  { %2016 = vadd.xlane.f32.xlu0 %v2015_v46 }
0x16e7   :  { %v2747_v48 = vpop.f32.mrf.mxu2 }
0x16e8   :  { %v2748_v49 = vadd.f32 %v7341_v47, %v2747_v48 }
0x16ea   :  { %v2753_v52 = vadd.f32 %v2748_v49, %v7112_v16  ;;  %v1962_v16 = vsel %vm182_vm0, %v1954_v59, 0.0 }
0x16ec   :  { %v2757_v53 = vsel %vm182_vm0, %v2753_v52, 0.0 }
0x16ed   :  { %2758 = vadd.xlane.f32.xlu0 %v2757_v53 }
0x1701   :  { %2691 = vrot.lane.b32.xlu0 %v2546_v55, %s8076_s10 }
0x172b   :  { %v2676_v56 = vpop.f32.mrf.mxu1 }
0x172c   :  { %2699 = vrot.lane.b32.xlu1 %v2676_v56, %s8074_s11 }
0x1751   :  { %v2017_v58 = vpop.xlane.xlu0 %2016 }
0x1752   :  { %v2021_v0 = vmul.f32 %v2017_v58, %v6890_v12  ;;  %v7415_v58 = vld [vmem:[%s8112_s14] ss:$0 sm:$0xff] }
0x1754   :  { %v7352_v61 = vsub.f32 %v2011_v45, %v2021_v0  ;;  %v7406_v45 = vld [vmem:[%s8111_s8] ss:$0 sm:$0xff]  ;;  %s8119_s8 = sld [smem:[#allocation22_spill]] }
0x1756   :  { %1963 = vadd.xlane.f32.xlu1 %v1962_v16  ;;  %v2025_v62 = vmul.f32 %v7352_v61, %v7352_v61 }
0x1758   :  { %v2027_v63 = vsel %vm182_vm0, %v2025_v62, 0.0 }
0x1759   :  { %2028 = vadd.xlane.f32.xlu0 %v2027_v63 }
0x1760   :  { %v2759_v60 = vpop.xlane.xlu0 %2758 }
0x1761   :  { %v2763_v34 = vmul.f32 %v2759_v60, %v6890_v12 }
0x1763   :  { %v7359_v15 = vsub.f32 %v2753_v52, %v2763_v34 }
0x1765   :  { %v2767_v14 = vmul.f32 %v7359_v15, %v7359_v15 }
0x1767   :  { %v2769_v1 = vsel %vm182_vm0, %v2767_v14, 0.0 }
0x1768   :  { %2770 = vadd.xlane.f32.xlu2 %v2769_v1 }
0x1773   :  { %v2692_v2 = vpop.permute.xlu0 %2691 }
0x1774   :  { %v2706_v54 = vsel %vm797_vm2, %v2704_v51, %v2692_v2 }
0x179e   :  { %v2700_v28 = vpop.permute.xlu1 %2699 }
0x179f   :  { %v2708_v3 = vsel %vm800_vm3, %v2706_v54, %v2700_v28 }
0x17a0   :  { %5853 = vmatmul.msk.f32.gmra.mxu2 %vm182_vm0, %v2708_v3 }
0x17c9   :  { %v1964_v17 = vpop.xlane.xlu1 %1963 }
0x17ca   :  { %v1966_v31 = vmul.f32 %v1964_v17, %v6890_v12 }
0x17cc   :  { %v7388_v21 = vsub.f32 %v1954_v59, %v1966_v31  ;;  %v2029_v19 = vpop.xlane.xlu0 %2028 }
0x17cd   :  { %v2033_v50 = vmul.f32 %v2029_v19, %v6890_v12 }
0x17ce   :  { %v1970_v22 = vmul.f32 %v7388_v21, %v7388_v21 }
0x17cf   :  { %v2035_v23 = vadd.f32 1e-05, %v2033_v50 }
0x17d0   :  { %v1974_v24 = vsel %vm182_vm0, %v1970_v22, 0.0 }
0x17d1   :  { %6321 = vrsqrt.f32 %v2035_v23  ;;  %1975 = vadd.xlane.f32.xlu0 %v1974_v24  ;;  %vm2043_vm5 = vweird.f32 %v2035_v23 }
0x17d7   :  { %v6322_v26 = vpop.eup %6321 }
0x17d8   :  { %v2038_v29 = vmul.f32 %v6322_v26, %v2035_v23  ;;  %vm2044_vm4 = vweird.f32 %v6322_v26 }
0x17d9   :  { %vm2045_vm6 = vmor %vm2043_vm5, %vm2044_vm4 }
0x17da   :  { %v2039_v32 = vmul.f32 %v6322_v26, %v2038_v29 }
0x17db   :  { %v2771_v27 = vpop.xlane.xlu2 %2770 }
0x17dc   :  { %v2040_v35 = vmul.f32 0.5, %v2039_v32  ;;  %v2775_v36 = vmul.f32 %v2771_v27, %v6890_v12 }
0x17de   :  { %v2041_v20 = vsub.f32 1.5, %v2040_v35  ;;  %v2777_v37 = vadd.f32 1e-05, %v2775_v36 }
0x17e0   :  { %v2042_v38 = vmul.f32 %v6322_v26, %v2041_v20  ;;  %6323 = vrsqrt.f32 %v2777_v37  ;;  %vm2785_vm9 = vweird.f32 %v2777_v37 }
0x17e2   :  { %v2046_v41 = vsel %vm2045_vm6, %v6322_v26, %v2042_v38 }
0x17e3   :  { %v2057_v43 = vmul.f32 %v2046_v41, %v7352_v61  ;;  %v7419_v61 = vld [vmem:[%s8113_s19] ss:$0 sm:$0xff] }
0x17e5   :  { %v2062_v46 = vmul.f32 %v7402_v40, %v2057_v43 }
0x17e6   :  { %v6324_v48 = vpop.eup %6323 }
0x17e7   :  { %v2780_v49 = vmul.f32 %v6324_v48, %v2777_v37  ;;  %v7410_v52 = vadd.f32 %v7406_v45, %v2062_v46  ;;  %vm2786_vm7 = vweird.f32 %v6324_v48 }
0x17e8   :  { %vm2787_vm10 = vmor %vm2785_vm9, %vm2786_vm7 }
0x17e9   :  { %v2781_v53 = vmul.f32 %v6324_v48, %v2780_v49  ;;  %5868 = vmatmul.msk.f32.vlgmr.msra.gmra.mxu3 %vm182_vm0, %v7410_v52 }
0x17eb   :  { %v2782_v55 = vmul.f32 0.5, %v2781_v53 }
0x17ed   :  { %v2783_v56 = vsub.f32 1.5, %v2782_v55 }
0x17ef   :  { %v2784_v57 = vmul.f32 %v6324_v48, %v2783_v56 }
0x17f1   :  { %v2788_v59 = vsel %vm2787_vm10, %v6324_v48, %v2784_v57 }
0x17f2   :  { %v2799_v0 = vmul.f32 %v2788_v59, %v7359_v15 }
0x17f4   :  { %v2804_v16 = vmul.f32 %v7415_v58, %v2799_v0 }
0x17f6   :  { %v7423_v62 = vadd.f32 %v7419_v61, %v2804_v16 }
0x17f8   :  { %5858 = vmatmul.msk.f32.vlgmr.msrb.gmra.mxu0 %vm182_vm0, %v7423_v62 }
0x1823   :  { %v2750_v63 = vpop.f32.mrf.mxu2 }
0x1824   :  { %v2751_v60 = vadd.f32 %v7341_v47, %v2750_v63 }
0x1826   :  { %v2754_v34 = vadd.f32 %v2751_v60, %v7161_v10 }
0x1828   :  { %v2760_v14 = vsel %vm182_vm0, %v2754_v34, 0.0 }
0x1829   :  { %2761 = vadd.xlane.f32.xlu0 %v2760_v14 }
0x1844   :  { %v1976_v1 = vpop.xlane.xlu0 %1975 }
0x1845   :  { %v1978_v15 = vmul.f32 %v1976_v1, %v6890_v12 }
0x1847   :  { %v1980_v30 = vadd.f32 1e-05, %v1978_v15 }
0x1849   :  { %6325 = vrsqrt.f32 %v1980_v30  ;;  %vm1997_vm12 = vweird.f32 %v1980_v30 }
0x184f   :  { %v6326_v2 = vpop.eup %6325 }
0x1850   :  { %v1992_v51 = vmul.f32 %v6326_v2, %v1980_v30  ;;  %vm1998_vm11 = vweird.f32 %v6326_v2 }
0x1851   :  { %vm1999_vm13 = vmor %vm1997_vm12, %vm1998_vm11 }
0x1852   :  { %v1993_v54 = vmul.f32 %v6326_v2, %v1992_v51 }
0x1854   :  { %v1994_v28 = vmul.f32 0.5, %v1993_v54 }
0x1856   :  { %v1995_v3 = vsub.f32 1.5, %v1994_v28 }
0x1858   :  { %v1996_v18 = vmul.f32 %v6326_v2, %v1995_v3 }
0x185a   :  { %v2000_v47 = vsel %vm1999_vm13, %v6326_v2, %v1996_v18 }
0x185b   :  { %v2002_v10 = vmul.f32 %v2000_v47, %v7388_v21 }
0x185d   :  { %v2007_v5 = vmul.f32 %v7332_v39, %v2002_v10 }
0x185f   :  { %v2012_v6 = vadd.f32 %v7335_v42, %v2007_v5 }
0x1861   :  { %v2018_v4 = vsel %vm182_vm0, %v2012_v6, 0.0 }
0x1862   :  { %2019 = vadd.xlane.f32.xlu2 %v2018_v4 }
0x186c   :  { %v2923_v23 = vpop.f32.mrf.mxu3 }
0x1875   :  { %v2867_v7 = vpop.f32.mrf.mxu0 }
0x1876   :  { %v2868_v11 = vadd.f32 %v7436_v9, %v2867_v7 }
0x1878   :  { %v7441_v44 = vmul.f32 0.35355338, %v2868_v11 }
0x187a   :  { %2873 = vrot.lane.b32.xlu2 %v7436_v9, %s6516_s15 }
0x1882   :  { %3057 = vrot.lane.b32.xlu2 %v7441_v44, %s6517_s5 }
0x189c   :  { %v2762_v17 = vpop.xlane.xlu0 %2761 }
0x189d   :  { %v2764_v39 = vmul.f32 %v2762_v17, %v6890_v12 }
0x189f   :  { %v2766_v42 = vsub.f32 %v2754_v34, %v2764_v39 }
0x18a1   :  { %v2768_v33 = vmul.f32 %v2766_v42, %v2766_v42 }
0x18a3   :  { %v2772_v31 = vsel %vm182_vm0, %v2768_v33, 0.0 }
0x18a4   :  { %2773 = vadd.xlane.f32.xlu1 %v2772_v31 }
0x18d5   :  { %v2020_v21 = vpop.xlane.xlu2 %2019 }
0x18d6   :  { %v2022_v19 = vmul.f32 %v2020_v21, %v6890_v12 }
0x18d8   :  { %v2024_v50 = vsub.f32 %v2012_v6, %v2022_v19 }
0x18da   :  { %v2026_v8 = vmul.f32 %v2024_v50, %v2024_v50 }
0x18dc   :  { %v2030_v22 = vsel %vm182_vm0, %v2026_v8, 0.0 }
0x18dd   :  { %2031 = vadd.xlane.f32.xlu0 %v2030_v22  ;;  %v2874_v24 = vpop.permute.xlu2 %2873 }
0x18de   :  { %v7449_v25 = vadd.f32 %v2923_v23, %v2874_v24 }
0x18e0   :  { %5870 = vmatpush.xpose.msk.msrb.mxu1 %vm253_vm1, %v7449_v25  ;;  %3005 = vrot.lane.b32.xlu1 %v7449_v25, %s6516_s15 }
0x18e3   :  { %5871 = vmatmul.msk.f32.vlgmr.msrb.gmra.mxu1 %vm253_vm1, %v7441_v44 }
0x18e5   :  { %v3058_v51 = vpop.permute.xlu2 %3057 }
0x1917   :  { %v2774_v13 = vpop.xlane.xlu1 %2773 }
0x1918   :  { %v2776_v26 = vmul.f32 %v2774_v13, %v6890_v12 }
0x191a   :  { %v2778_v29 = vadd.f32 1e-05, %v2776_v26 }
0x191c   :  { %6327 = vrsqrt.f32 %v2778_v29  ;;  %vm2795_vm15 = vweird.f32 %v2778_v29 }
0x1922   :  { %v6328_v32 = vpop.eup %6327 }
0x1923   :  { %v2790_v27 = vmul.f32 %v6328_v32, %v2778_v29  ;;  %vm2796_vm14 = vweird.f32 %v6328_v32 }
0x1924   :  { %vm2797_vm4 = vmor %vm2795_vm15, %vm2796_vm14 }
0x1925   :  { %v2791_v35 = vmul.f32 %v6328_v32, %v2790_v27 }
0x1927   :  { %v2792_v36 = vmul.f32 0.5, %v2791_v35 }
0x1929   :  { %v2793_v20 = vsub.f32 1.5, %v2792_v36 }
0x192b   :  { %v2794_v37 = vmul.f32 %v6328_v32, %v2793_v20 }
0x192d   :  { %v2798_v38 = vsel %vm2797_vm4, %v6328_v32, %v2794_v37 }
0x192e   :  { %v2800_v41 = vmul.f32 %v2798_v38, %v2766_v42 }
0x1930   :  { %v2805_v43 = vmul.f32 %v7415_v58, %v2800_v41 }
0x1932   :  { %v7460_v46 = vadd.f32 %v7419_v61, %v2805_v43 }
0x1934   :  { %5859 = vmatmul.msk.f32.gmra.mxu0 %vm182_vm0, %v7460_v46 }
0x1950   :  { %v2032_v48 = vpop.xlane.xlu0 %2031 }
0x1951   :  { %v2034_v49 = vmul.f32 %v2032_v48, %v6890_v12 }
0x1952   :  { %v3006_v47 = vpop.permute.xlu1 %3005 }
0x1953   :  { %v2036_v53 = vadd.f32 1e-05, %v2034_v49 }
0x1955   :  { %6329 = vrsqrt.f32 %v2036_v53  ;;  %vm2053_vm6 = vweird.f32 %v2036_v53 }
0x195b   :  { %v6330_v55 = vpop.eup %6329 }
0x195c   :  { %v2048_v56 = vmul.f32 %v6330_v55, %v2036_v53  ;;  %vm2054_vm5 = vweird.f32 %v6330_v55 }
0x195d   :  { %vm2055_vm7 = vmor %vm2053_vm6, %vm2054_vm5 }
0x195e   :  { %v2049_v57 = vmul.f32 %v6330_v55, %v2048_v56 }
0x1960   :  { %v2050_v59 = vmul.f32 0.5, %v2049_v57  ;;  %v2954_v0 = vpop.f32.mrf.mxu1 }
0x1961   :  { %v2983_v16 = vsel %vm253_vm1, %v2954_v0, -inf }
0x1962   :  { %v2051_v63 = vsub.f32 1.5, %v2050_v59  ;;  %2984 = vmax.xlane.f32.xlu0 %v2983_v16 }
0x1964   :  { %v2052_v58 = vmul.f32 %v6330_v55, %v2051_v63 }
0x1966   :  { %v2056_v61 = vsel %vm2055_vm7, %v6330_v55, %v2052_v58 }
0x1967   :  { %v2058_v60 = vmul.f32 %v2056_v61, %v2024_v50 }
0x1969   :  { %v2063_v34 = vmul.f32 %v7402_v40, %v2058_v60 }
0x196b   :  { %v7468_v14 = vadd.f32 %v7406_v45, %v2063_v34 }
0x196d   :  { %5869 = vmatmul.msk.f32.gmra.mxu3 %vm182_vm0, %v7468_v14 }
0x1976   :  { %3059 = vrot.lane.b32.xlu0 %v7449_v25, %s6517_s5 }
0x197e   :  { %3189 = vrot.lane.b32.xlu0 %v7449_v25, %s6521_s23 }
0x1986   :  { %3319 = vrot.lane.b32.xlu0 %v7449_v25, %s6523_s28 }
0x19b1   :  { %v2870_v54 = vpop.f32.mrf.mxu0 }
0x19b2   :  { %v2871_v28 = vadd.f32 %v7436_v9, %v2870_v54 }
0x19b4   :  { %v7488_v10 = vmul.f32 0.35355338, %v2871_v28 }
0x19d5   :  { %v2985_v1 = vpop.xlane.xlu0 %2984 }
0x19d6   :  { %v2989_v15 = vsub.f32 %v2954_v0, %v2985_v1 }
0x19d8   :  { %v2991_v30 = vmul.f32 1.442695, %v2989_v15 }
0x19da   :  { %6331 = vpow2.f32 %v2991_v30 }
0x19e0   :  { %v6332_v40 = vpop.eup %6331 }
0x19e1   :  { %v2995_v45 = vsel %vm253_vm1, %v6332_v40, 0.0 }
0x19e2   :  { %2996 = vadd.xlane.f32.xlu1 %v2995_v45 }
0x19e8   :  { %v3060_v2 = vpop.permute.xlu0 %3059 }
0x19e9   :  { %5876 = vmatpush.xpose.msk.msra.mxu0 %vm253_vm1, %v3060_v2 }
0x19ec   :  { %5877 = vmatmul.msk.f32.vlgmr.msra.gmra.mxu0 %vm253_vm1, %v3058_v51 }
0x19f0   :  { %v2926_v3 = vpop.f32.mrf.mxu3  ;;  %v3190_v9 = vpop.permute.xlu0 %3189 }
0x19f1   :  { %v7482_v18 = vadd.f32 %v2926_v3, %v2874_v24 }
0x19f3   :  { %3087 = vrot.lane.b32.xlu2 %v7482_v18, %s6517_s5  ;;  %5872 = vmatpush.xpose.msk.msra.mxu1 %vm253_vm1, %v7482_v18  ;;  %v6159_v48 = vpack.i.bf16 %v7482_v18, %v7449_v25 }
0x19f6   :  { %5873 = vmatmul.msk.f32.vlgmr.msra.gmra.mxu1 %vm253_vm1, %v7488_v10 }
0x19f7   :  { %3026 = vmatpush.msrb.mxu1 %v3006_v47 }
0x19f8   :  { %v3320_v17 = vpop.permute.xlu0 %3319 }
0x19fb   :  { %3085 = vrot.lane.b32.xlu2 %v7488_v10, %s6517_s5  ;;  %3317 = vrot.lane.b32.xlu1 %v7441_v44, %s6523_s28 }
0x1a03   :  { %3187 = vrot.lane.b32.xlu2 %v7441_v44, %s6521_s23 }
0x1a4d   :  { %v3088_v5 = vpop.permute.xlu2 %3087 }
0x1a4e   :  { %5878 = vmatpush.xpose.msk.msra.mxu1 %vm253_vm1, %v3088_v5 }
0x1a55   :  { %v2997_v6 = vpop.xlane.xlu1 %2996  ;;  %v3086_v11 = vpop.permute.xlu2 %3085 }
0x1a56   :  { %6333 = vrcp.f32 %v2997_v6 }
0x1a5c   :  { %v6334_v4 = vpop.eup %6333 }
0x1a5d   :  { %v3003_v7 = vmul.f32 %v6334_v4, %v6332_v40  ;;  %v3188_v42 = vpop.permute.xlu2 %3187 }
0x1a5f   :  { %5874 = vmatmul.msk.f32.vlgmr.msrb.gmra.mxu1 %vm253_vm1, %v3003_v7 }
0x1a60   :  { %5882 = vmatpush.xpose.msk.msrb.mxu1 %vm253_vm1, %v3190_v9 }
0x1a67   :  { %5879 = vmatmul.msk.f32.vlgmr.msra.gmra.mxu1 %vm253_vm1, %v3086_v11 }
0x1a68   :  { %5888 = vmatpush.xpose.msk.msra.mxu1 %vm253_vm1, %v3320_v17 }
0x1a69   :  { %v3082_v39 = vpop.f32.mrf.mxu0 }
0x1a6a   :  { %v3113_v44 = vsel %vm253_vm1, %v3082_v39, -inf }
0x1a6b   :  { %3114 = vmax.xlane.f32.xlu0 %v3113_v44 }
0x1a6d   :  { %v3318_v21 = vpop.permute.xlu1 %3317 }
0x1a6f   :  { %5883 = vmatmul.msk.f32.vlgmr.msrb.gmra.mxu1 %vm253_vm1, %v3188_v42 }
0x1a73   :  { %v2980_v33 = vpop.f32.mrf.mxu1 }
0x1a74   :  { %v2986_v31 = vsel %vm253_vm1, %v2980_v33, -inf }
0x1a75   :  { %2987 = vmax.xlane.f32.xlu2 %v2986_v31 }
0x1a77   :  { %5889 = vmatmul.msk.f32.vlgmr.msra.gmra.mxu1 %vm253_vm1, %v3318_v21 }
0x1a7f   :  { %3031 = vrot.lane.b32.xlu0 %v7482_v18, %s6516_s15 }
0x1a87   :  { %3215 = vrot.lane.b32.xlu0 %v7488_v10, %s6521_s23 }
0x1adc   :  { %v7511_v19 = vpop.f32.mrf.mxu1 }
0x1ade   :  { %v3115_v50 = vpop.xlane.xlu0 %3114 }
0x1adf   :  { %v3119_v8 = vsub.f32 %v3082_v39, %v3115_v50 }
0x1ae1   :  { %v3121_v22 = vmul.f32 1.442695, %v3119_v8 }
0x1ae3   :  { %6335 = vpow2.f32 %v3121_v22 }
0x1ae4   :  { %v3110_v23 = vpop.f32.mrf.mxu1 }
0x1ae5   :  { %v3116_v43 = vsel %vm253_vm1, %v3110_v23, -inf }
0x1ae8   :  { %v2988_v24 = vpop.xlane.xlu2 %2987 }
0x1ae9   :  { %v6336_v13 = vpop.eup %6335  ;;  %v2990_v26 = vsub.f32 %v2980_v33, %v2988_v24 }
0x1aea   :  { %v3125_v29 = vsel %vm253_vm1, %v6336_v13, 0.0 }
0x1aeb   :  { %v2993_v32 = vmul.f32 1.442695, %v2990_v26  ;;  %3126 = vadd.xlane.f32.xlu2 %v3125_v29 }
0x1aec   :  { %v3212_v27 = vpop.f32.mrf.mxu1 }
0x1aed   :  { %6337 = vpow2.f32 %v2993_v32  ;;  %v3243_v36 = vsel %vm253_vm1, %v3212_v27, -inf }
0x1af1   :  { %v3032_v35 = vpop.permute.xlu0 %3031 }
0x1af2   :  { %3052 = vmatpush.msra.mxu2 %v3032_v35 }
0x1af3   :  { %v6338_v20 = vpop.eup %6337  ;;  %3244 = vmax.xlane.f32.xlu2 %v3243_v36 }
0x1af4   :  { %v3342_v37 = vpop.f32.mrf.mxu1  ;;  %v2998_v38 = vsel %vm253_vm1, %v6338_v20, 0.0 }
0x1af5   :  { %2999 = vadd.xlane.f32.xlu1 %v2998_v38  ;;  %v3373_v41 = vsel %vm253_vm1, %v3342_v37, -inf  ;;  %v2827_v38 = vld [vmem:[%s8115_s30 + $0x18] sm:$0xff] }
0x1af6   :  { %3374 = vmax.xlane.f32.xlu0 %v3373_v41  ;;  %5894 = vmatpush.xpose.msk.msrb.mxu1 %vm182_vm0, %v2827_v38  ;;  %v2826_v41 = vld [vmem:[%s8115_s30 + $0x10] sm:$0xff]  ;;  %v6189_v38 = vld [vmem:[%s8119_s8] ss:$0 sm:$0xff] }
0x1af9   :  { %v3216_v53 = vpop.permute.xlu0 %3215 }
0x1afa   :  { %5895 = vmatpush.xpose.msk.msrb.mxu1 %vm182_vm0, %v2826_v41 }
0x1afd   :  { %3117 = vmax.xlane.f32.xlu1 %v3116_v43  ;;  %v2825_v43 = vld [vmem:[%s8115_s30 + $0x8] sm:$0xff] }
0x1afe   :  { %5896 = vmatpush.xpose.msk.msrb.mxu1 %vm182_vm0, %v2825_v43 }
0x1b0a   :  { %3347 = vrot.lane.b32.xlu0 %v7482_v18, %s6523_s28 }
0x1b0b   :  { %3217 = vrot.lane.b32.xlu2 %v7482_v18, %s6521_s23 }
0x1b16   :  { %6160 = vrot.lane.b32.xlu1 %v6159_v48, %s6515_s0  ;;  %v2824_v48 = vld [vmem:[%s8115_s30] sm:$0xff] }
0x1b17   :  { %5897 = vmatpush.xpose.msk.msrb.mxu1 %vm182_vm0, %v2824_v48 }
0x1b5e   :  { %v3127_v49 = vpop.xlane.xlu2 %3126 }
0x1b66   :  { %v3245_v55 = vpop.xlane.xlu2 %3244 }
0x1b67   :  { %v3249_v56 = vsub.f32 %v3212_v27, %v3245_v55 }
0x1b68   :  { %v3000_v57 = vpop.xlane.xlu1 %2999 }
0x1b69   :  { %v3251_v59 = vmul.f32 1.442695, %v3249_v56  ;;  %6339 = vrcp.f32 %v3000_v57  ;;  %v3375_v0 = vpop.xlane.xlu0 %3374 }
0x1b6a   :  { %v3379_v16 = vsub.f32 %v3342_v37, %v3375_v0 }
0x1b6b   :  { %6341 = vpow2.f32 %v3251_v59 }
0x1b6c   :  { %v3381_v63 = vmul.f32 1.442695, %v3379_v16 }
0x1b6e   :  { %6343 = vpow2.f32 %v3381_v63  ;;  %v3218_v6 = vpop.permute.xlu2 %3217 }
0x1b6f   :  { %v6340_v58 = vpop.eup %6339 }
0x1b70   :  { %v3004_v61 = vmul.f32 %v6340_v58, %v6338_v20  ;;  %v3118_v60 = vpop.xlane.xlu1 %3117 }
0x1b71   :  { %v6342_v34 = vpop.eup %6341  ;;  %v3120_v1 = vsub.f32 %v3110_v23, %v3118_v60 }
0x1b72   :  { %5875 = vmatmul.msk.f32.vlgmr.msra.gmra.mxu2 %vm253_vm1, %v3004_v61  ;;  %v3255_v15 = vsel %vm253_vm1, %v6342_v34, 0.0 }
0x1b73   :  { %v3123_v30 = vmul.f32 1.442695, %v3120_v1  ;;  %3256 = vadd.xlane.f32.xlu1 %v3255_v15 }
0x1b74   :  { %v6344_v40 = vpop.eup %6343 }
0x1b75   :  { %6345 = vpow2.f32 %v3123_v30  ;;  %v3385_v45 = vsel %vm253_vm1, %v6344_v40, 0.0 }
0x1b76   :  { %3386 = vadd.xlane.f32.xlu0 %v3385_v45  ;;  %6347 = vrcp.f32 %v3127_v49  ;;  %v7573_v45 = vld [vmem:[%s8116_s6] ss:$0 sm:$0xff] }
0x1b7b   :  { %v6346_v2 = vpop.eup %6345 }
0x1b7c   :  { %v3128_v51 = vsel %vm253_vm1, %v6346_v2, 0.0  ;;  %v6348_v54 = vpop.eup %6347  ;;  %v3348_v4 = vpop.permute.xlu0 %3347 }
0x1b7d   :  { %3129 = vadd.xlane.f32.xlu2 %v3128_v51  ;;  %v3133_v5 = vmul.f32 %v6348_v54, %v6336_v13 }
0x1b88   :  { %v6161_v28 = vpop.permute.xlu1 %6160 }
0x1b89   :  { %v6163_v3 = vunpack.i.h.bf16 %v6161_v28  ;;  %v6162_v47 = vunpack.i.l.bf16 %v6161_v28 }
0x1b8b   :  { %3156 = vmatpush.msrb.mxu2 %v6162_v47  ;;  %3182 = vmatpush.msrb.mxu0 %v6163_v3 }
0x1b8c   :  { %5880 = vmatmul.msk.f32.vlgmr.msrb.gmra.mxu2 %vm253_vm1, %v3133_v5 }
0x1b8d   :  { %5884 = vmatpush.xpose.msk.msra.mxu2 %vm253_vm1, %v3218_v6 }
0x1b91   :  { %5890 = vmatpush.xpose.msk.msrb.mxu2 %vm253_vm1, %v3348_v4 }
0x1b94   :  { %5885 = vmatmul.msk.f32.vlgmr.msra.gmra.mxu2 %vm253_vm1, %v3216_v53 }
0x1b95   :  { %3345 = vrot.lane.b32.xlu2 %v7488_v10, %s6523_s28 }
0x1b9d   :  { %3265 = vrot.lane.b32.xlu2 %v7449_v25, %s6518_s16 }
0x1ba5   :  { %3395 = vrot.lane.b32.xlu2 %v7449_v25, %s6522_s26 }
0x1be6   :  { %v3257_v7 = vpop.xlane.xlu1 %3256 }
0x1be9   :  { %v3387_v44 = vpop.xlane.xlu0 %3386 }
0x1bf0   :  { %v3130_v9 = vpop.xlane.xlu2 %3129 }
0x1bf1   :  { %6349 = vrcp.f32 %v3130_v9 }
0x1bf2   :  { %6351 = vrcp.f32 %v3257_v7  ;;  %v3586_v7 = vld [vmem:[%s8117_s13 + $0x38] sm:$0xff] }
0x1bf3   :  { %6353 = vrcp.f32 %v3387_v44  ;;  %5900 = vmatpush.xpose.msk.msra.mxu2 %vm182_vm0, %v3586_v7 }
0x1bf5   :  { %v7542_v31 = vpop.f32.mrf.mxu2 }
0x1bf7   :  { %v6350_v11 = vpop.eup %6349 }
0x1bf8   :  { %v3134_v17 = vmul.f32 %v6350_v11, %v6346_v2  ;;  %v3346_v39 = vpop.permute.xlu2 %3345  ;;  %v6352_v42 = vpop.eup %6351  ;;  %v3585_v11 = vld [vmem:[%s8117_s13 + $0x30] sm:$0xff] }
0x1bf9   :  { %5891 = vmatmul.msk.f32.vlgmr.msrb.gmra.mxu2 %vm253_vm1, %v3346_v39  ;;  %v3263_v10 = vmul.f32 %v6352_v42, %v6342_v34  ;;  %v6354_v25 = vpop.eup %6353  ;;  %v3583_v39 = vld [vmem:[%s8117_s13 + $0x20] sm:$0xff]  ;;  %v3582_v42 = vld [vmem:[%s8117_s13 + $0x18] sm:$0xff] }
0x1bfa   :  { %5881 = vmatmul.msk.f32.vlgmr.msrb.gmra.mxu0 %vm253_vm1, %v3134_v17  ;;  %v3393_v21 = vmul.f32 %v6354_v25, %v6344_v40  ;;  %5901 = vmatpush.xpose.msk.msra.mxu2 %vm182_vm0, %v3585_v11  ;;  %v3584_v17 = vld [vmem:[%s8117_s13 + $0x28] sm:$0xff]  ;;  %v3581_v25 = vld [vmem:[%s8117_s13 + $0x10] sm:$0xff] }
0x1bfe   :  { %5902 = vmatpush.xpose.msk.msra.mxu2 %vm182_vm0, %v3584_v17 }
0x1c00   :  { %v3266_v33 = vpop.permute.xlu2 %3265 }
0x1c01   :  { %3286 = vmatpush.msra.mxu0 %v3266_v33 }
0x1c02   :  { %5886 = vmatmul.msk.f32.vlgmr.msra.gmra.mxu0 %vm253_vm1, %v3263_v10  ;;  %5903 = vmatpush.xpose.msk.msra.mxu2 %vm182_vm0, %v3583_v39  ;;  %v5927_v39 = vld [vmem:[%s6619_s27 + $0xb8] sm:$0xff] }
0x1c06   :  { %5904 = vmatpush.xpose.msk.msra.mxu2 %vm182_vm0, %v3582_v42 }
0x1c08   :  { %v3396_v50 = vpop.permute.xlu2 %3395 }
0x1c09   :  { %3416 = vmatpush.msrb.mxu0 %v3396_v50 }
0x1c0a   :  { %5892 = vmatmul.msk.f32.vlgmr.msrb.gmra.mxu0 %vm253_vm1, %v3393_v21  ;;  %5905 = vmatpush.xpose.msk.msra.mxu2 %vm182_vm0, %v3581_v25 }
0x1c0f   :  { %v3158_v8 = vpop.f32.mrf.mxu2 }
0x1c17   :  { %v3240_v22 = vpop.f32.mrf.mxu2 }
0x1c18   :  { %v3246_v23 = vsel %vm253_vm1, %v3240_v22, -inf }
0x1c19   :  { %3247 = vmax.xlane.f32.xlu2 %v3246_v23  ;;  %v3579_v23 = vld [vmem:[%s8117_s13] sm:$0xff] }
0x1c77   :  { %v3184_v24 = vpop.f32.mrf.mxu0 }
0x1c7c   :  { %v3370_v13 = vpop.f32.mrf.mxu2 }
0x1c7d   :  { %v3376_v26 = vsel %vm253_vm1, %v3370_v13, -inf }
0x1c7e   :  { %3377 = vmax.xlane.f32.xlu1 %v3376_v26 }
0x1c7f   :  { %v3288_v29 = vpop.f32.mrf.mxu0 }
0x1c80   :  { %3457 = vrot.lane.b32.xlu0 %v3288_v29, %s8076_s10 }
0x1c87   :  { %v3418_v32 = vpop.f32.mrf.mxu0 }
0x1c88   :  { %3465 = vrot.lane.b32.xlu0 %v3418_v32, %s8074_s11 }
0x1c8c   :  { %v3248_v27 = vpop.xlane.xlu2 %3247 }
0x1c8d   :  { %v3250_v35 = vsub.f32 %v3240_v22, %v3248_v27  ;;  %v3580_v22 = vld [vmem:[%s8117_s13 + $0x8] sm:$0xff] }
0x1c8e   :  { %5906 = vmatpush.xpose.msk.msra.mxu2 %vm182_vm0, %v3580_v22  ;;  %v5923_v22 = vld [vmem:[%s6619_s27 + $0x98] sm:$0xff] }
0x1c8f   :  { %v3253_v36 = vmul.f32 1.442695, %v3250_v35 }
0x1c90   :  { %3291 = vrot.lane.b32.xlu0 %v7482_v18, %s6518_s16 }
0x1c91   :  { %6355 = vpow2.f32 %v3253_v36 }
0x1c92   :  { %5907 = vmatpush.xpose.msk.msra.mxu2 %vm182_vm0, %v3579_v23  ;;  %v5922_v23 = vld [vmem:[%s6619_s27 + $0x90] sm:$0xff] }
0x1c97   :  { %v6356_v20 = vpop.eup %6355  ;;  %3449 = vrot.lane.b32.xlu1 %v3158_v8, %s8078_s7 }
0x1c98   :  { %v3258_v37 = vsel %vm253_vm1, %v6356_v20, 0.0 }
0x1c99   :  { %3259 = vadd.xlane.f32.xlu2 %v3258_v37 }
0x1cb1   :  { %3421 = vrot.lane.b32.xlu2 %v7482_v18, %s6522_s26 }
0x1cf1   :  { %v3378_v49 = vpop.xlane.xlu1 %3377 }
0x1cf2   :  { %v3380_v53 = vsub.f32 %v3370_v13, %v3378_v49  ;;  %v3458_v55 = vpop.permute.xlu0 %3457 }
0x1cf4   :  { %v3383_v56 = vmul.f32 1.442695, %v3380_v53 }
0x1cf6   :  { %6357 = vpow2.f32 %v3383_v56 }
0x1cfa   :  { %v3466_v57 = vpop.permute.xlu0 %3465 }
0x1cfc   :  { %v6358_v59 = vpop.eup %6357 }
0x1cfd   :  { %v3388_v18 = vsel %vm253_vm1, %v6358_v59, 0.0 }
0x1cfe   :  { %3389 = vadd.xlane.f32.xlu1 %v3388_v18 }
0x1d02   :  { %v3292_v0 = vpop.permute.xlu0 %3291 }
0x1d03   :  { %3312 = vmatpush.msrb.mxu3 %v3292_v0 }
0x1d09   :  { %v3450_v16 = vpop.permute.xlu1 %3449 }
0x1d0a   :  { %v3471_v63 = vsel %vm253_vm1, %v7511_v19, %v3450_v16 }
0x1d0b   :  { %v3473_v58 = vsel %vm797_vm2, %v3471_v63, %v3458_v55 }
0x1d0c   :  { %v3260_v61 = vpop.xlane.xlu2 %3259  ;;  %v3475_v60 = vsel %vm800_vm3, %v3473_v58, %v3466_v57 }
0x1d0d   :  { %6359 = vrcp.f32 %v3260_v61  ;;  %5898 = vmatmul.msk.f32.vlgmr.msrb.gmra.mxu1 %vm182_vm0, %v3475_v60 }
0x1d13   :  { %v6360_v34 = vpop.eup %6359 }
0x1d14   :  { %v3264_v1 = vmul.f32 %v6360_v34, %v6356_v20  ;;  %v3422_v15 = vpop.permute.xlu2 %3421  ;;  %v6188_v20 = vld [vmem:[%s8118_s3] ss:$0 sm:$0xff] }
0x1d15   :  { %3442 = vmatpush.msra.mxu3 %v3422_v15 }
0x1d16   :  { %5887 = vmatmul.msk.f32.vlgmr.msrb.gmra.mxu3 %vm253_vm1, %v3264_v1 }
0x1d17   :  { %3451 = vrot.lane.b32.xlu1 %v3184_v24, %s8078_s7  ;;  %s8122_s7 = sld [smem:[#allocation18_spill]]  ;;  %5934 = vmatpush.xpose.msk.msrb.mxu3 %vm182_vm0, %v5927_v39 }
0x1d71   :  { %v3390_v30 = vpop.xlane.xlu1 %3389 }
0x1d72   :  { %6361 = vrcp.f32 %v3390_v30  ;;  %v7623_v30 = vld [vmem:[%s8122_s7] ss:$0 sm:$0xff] }
0x1d78   :  { %v6362_v19 = vpop.eup %6361 }
0x1d79   :  { %v3394_v40 = vmul.f32 %v6362_v19, %v6358_v59 }
0x1d7b   :  { %5893 = vmatmul.msk.f32.vlgmr.msra.gmra.mxu3 %vm253_vm1, %v3394_v40 }
0x1d89   :  { %v3452_v44 = vpop.permute.xlu1 %3451 }
0x1d8a   :  { %v3515_v2 = vpop.f32.mrf.mxu1  ;;  %v3472_v33 = vsel %vm253_vm1, %v7542_v31, %v3452_v44 }
0x1d8b   :  { %v3516_v51 = vadd.f32 %v7573_v45, %v3515_v2 }
0x1d8d   :  { %v3521_v54 = vadd.f32 %v3516_v51, %v7423_v62 }
0x1d8f   :  { %v3525_v28 = vsel %vm182_vm0, %v3521_v54, 0.0 }
0x1d90   :  { %3526 = vadd.xlane.f32.xlu0 %v3525_v28 }
0x1d99   :  { %v3314_v3 = vpop.f32.mrf.mxu3 }
0x1da4   :  { %3459 = vrot.lane.b32.xlu0 %v3314_v3, %s8076_s10  ;;  %s8121_s10 = sld [smem:[#allocation16_spill]] }
0x1daa   :  { %v6190_v16 = vld [vmem:[%s8121_s10] ss:$0 sm:$0xff] }
0x1dfe   :  { %v3444_v47 = vpop.f32.mrf.mxu3 }
0x1dff   :  { %3467 = vrot.lane.b32.xlu1 %v3444_v47, %s8074_s11  ;;  %s8120_s11 = sld [smem:[#allocation17_spill]] }
0x1e03   :  { %v3527_v5 = vpop.xlane.xlu0 %3526 }
0x1e04   :  { %v3531_v6 = vmul.f32 %v3527_v5, %v6890_v12 }
0x1e05   :  { %v3591_v49 = vld [vmem:[%s8120_s11 + $0x18] sm:$0xff]  ;;  %v3590_v53 = vld [vmem:[%s8120_s11 + $0x10] sm:$0xff]  ;;  %v3589_v55 = vld [vmem:[%s8120_s11 + $0x8] sm:$0xff] }
0x1e06   :  { %v3533_v4 = vsub.f32 %v3521_v54, %v3531_v6  ;;  %5910 = vmatpush.xpose.msk.msra.mxu0 %vm987_vm8, %v3591_v49  ;;  %v3588_v0 = vld [vmem:[%s8120_s11] sm:$0xff] }
0x1e08   :  { %v3535_v9 = vmul.f32 %v3533_v4, %v3533_v4 }
0x1e0a   :  { %v3537_v62 = vsel %vm182_vm0, %v3535_v9, 0.0  ;;  %5911 = vmatpush.xpose.msk.msra.mxu0 %vm987_vm8, %v3590_v53 }
0x1e0b   :  { %3538 = vadd.xlane.f32.xlu2 %v3537_v62 }
0x1e0e   :  { %5912 = vmatpush.xpose.msk.msra.mxu0 %vm987_vm8, %v3589_v55 }
0x1e12   :  { %5913 = vmatpush.xpose.msk.msra.mxu0 %vm987_vm8, %v3588_v0 }
0x1e16   :  { %v3460_v10 = vpop.permute.xlu0 %3459 }
0x1e17   :  { %v3474_v21 = vsel %vm797_vm2, %v3472_v33, %v3460_v10 }
0x1e71   :  { %v3468_v50 = vpop.permute.xlu1 %3467 }
0x1e72   :  { %v3476_v8 = vsel %vm800_vm3, %v3474_v21, %v3468_v50  ;;  %v5926_v21 = vld [vmem:[%s6619_s27 + $0xb0] sm:$0xff]  ;;  %v5925_v50 = vld [vmem:[%s6619_s27 + $0xa8] sm:$0xff] }
0x1e73   :  { %5899 = vmatmul.msk.f32.gmra.mxu1 %vm182_vm0, %v3476_v8  ;;  %5935 = vmatpush.xpose.msk.msrb.mxu3 %vm182_vm0, %v5926_v21  ;;  %v5924_v8 = vld [vmem:[%s6619_s27 + $0xa0] sm:$0xff] }
0x1e77   :  { %5936 = vmatpush.xpose.msk.msrb.mxu3 %vm182_vm0, %v5925_v50 }
0x1e7b   :  { %5937 = vmatpush.xpose.msk.msrb.mxu3 %vm182_vm0, %v5924_v8 }
0x1e7e   :  { %v3539_v24 = vpop.xlane.xlu2 %3538 }
0x1e7f   :  { %v3543_v31 = vmul.f32 %v3539_v24, %v6890_v12  ;;  %5938 = vmatpush.xpose.msk.msrb.mxu3 %vm182_vm0, %v5923_v22  ;;  %v5921_v24 = vld [vmem:[%s6619_s27 + $0x88] sm:$0xff] }
0x1e81   :  { %v3545_v13 = vadd.f32 1e-05, %v3543_v31  ;;  %v5920_v31 = vld [vmem:[%s6619_s27 + $0x80] sm:$0xff] }
0x1e83   :  { %6363 = vrsqrt.f32 %v3545_v13  ;;  %vm3553_vm10 = vweird.f32 %v3545_v13  ;;  %5939 = vmatpush.xpose.msk.msrb.mxu3 %vm182_vm0, %v5922_v23 }
0x1e87   :  { %5940 = vmatpush.xpose.msk.msrb.mxu3 %vm182_vm0, %v5921_v24 }
0x1e89   :  { %v6364_v26 = vpop.eup %6363 }
0x1e8a   :  { %v3548_v29 = vmul.f32 %v6364_v26, %v3545_v13  ;;  %vm3554_vm9 = vweird.f32 %v6364_v26  ;;  %v5919_v13 = vld [vmem:[%s6619_s27 + $0x78] sm:$0xff] }
0x1e8b   :  { %vm3555_vm11 = vmor %vm3553_vm10, %vm3554_vm9  ;;  %5941 = vmatpush.xpose.msk.msrb.mxu3 %vm182_vm0, %v5920_v31 }
0x1e8c   :  { %v3549_v32 = vmul.f32 %v6364_v26, %v3548_v29 }
0x1e8e   :  { %v3550_v27 = vmul.f32 0.5, %v3549_v32  ;;  %v5918_v32 = vld [vmem:[%s6619_s27 + $0x70] sm:$0xff] }
0x1e8f   :  { %5942 = vmatpush.xpose.msk.msrb.mxu3 %vm182_vm0, %v5919_v13 }
0x1e90   :  { %v3551_v35 = vsub.f32 1.5, %v3550_v27 }
0x1e92   :  { %v3552_v36 = vmul.f32 %v6364_v26, %v3551_v35  ;;  %v5917_v35 = vld [vmem:[%s6619_s27 + $0x68] sm:$0xff] }
0x1e93   :  { %5943 = vmatpush.xpose.msk.msrb.mxu3 %vm182_vm0, %v5918_v32 }
0x1e94   :  { %v3556_v37 = vsel %vm3555_vm11, %v6364_v26, %v3552_v36  ;;  %v5916_v36 = vld [vmem:[%s6619_s27 + $0x60] sm:$0xff]  ;;  %s8125_s27 = smov 40  }
0x1e95   :  { %v3567_v41 = vmul.f32 %v3556_v37, %v3533_v4 }
0x1e97   :  { %v3572_v43 = vmul.f32 %v6188_v20, %v3567_v41  ;;  %5944 = vmatpush.xpose.msk.msrb.mxu3 %vm182_vm0, %v5917_v35 }
0x1e99   :  { %v3577_v48 = vadd.f32 %v6189_v38, %v3572_v43 }
0x1e9b   :  { %5908 = vmatmul.msk.f32.vlgmr.msra.gmra.mxu2 %vm182_vm0, %v3577_v48  ;;  %5945 = vmatpush.xpose.msk.msrb.mxu3 %vm182_vm0, %v5916_v36 }
0x1ef0   :  { %v3518_v56 = vpop.f32.mrf.mxu1 }
0x1ef1   :  { %v3519_v57 = vadd.f32 %v7573_v45, %v3518_v56  ;;  %v6192_v56 = vld [vmem:[%s8123_s1] ss:$0 sm:$0xff] }
0x1ef3   :  { %v3522_v59 = vadd.f32 %v3519_v57, %v7460_v46 }
0x1ef5   :  { %v3528_v18 = vsel %vm182_vm0, %v3522_v59, 0.0 }
0x1ef6   :  { %3529 = vadd.xlane.f32.xlu2 %v3528_v18 }
0x1f1e   :  { %v3643_v63 = vpop.f32.mrf.mxu2 }
0x1f1f   :  { %v3644_v58 = vadd.f32 %v6190_v16, %v3643_v63 }
0x1f21   :  { %v3649_v61 = vmax.f32 %v3644_v58, 0.0 }
0x1f23   :  { %5914 = vmatmul.msk.f32.vlgmr.msra.gmra.mxu0 %vm987_vm8, %v3649_v61 }
0x1f69   :  { %v3530_v60 = vpop.xlane.xlu2 %3529 }
0x1f6a   :  { %v3532_v34 = vmul.f32 %v3530_v60, %v6890_v12 }
0x1f6c   :  { %v3534_v1 = vsub.f32 %v3522_v59, %v3532_v34  ;;  %v6193_v59 = vld [vmem:[%s8124_s2] ss:$0 sm:$0xff]  ;;  %v6194_v34 = vld [vmem:[%s8106_s17 + $0x1] ss:$0 sm:$0xff]  ;;  %s8128_s17 = smov 16  }
0x1f6e   :  { %v3536_v15 = vmul.f32 %v3534_v1, %v3534_v1 }
0x1f70   :  { %v3540_v46 = vsel %vm182_vm0, %v3536_v15, 0.0 }
0x1f71   :  { %3541 = vadd.xlane.f32.xlu0 %v3540_v46 }
0x1fa0   :  { %v3689_v19 = vpop.f32.mrf.mxu0 }
0x1fa1   :  { %v3690_v40 = vadd.f32 %v7623_v30, %v3689_v19 }
0x1fa3   :  { %v3695_v45 = vadd.f32 %v3690_v40, %v3577_v48 }
0x1fa5   :  { %v3699_v2 = vsel %vm182_vm0, %v3695_v45, 0.0 }
0x1fa6   :  { %3700 = vadd.xlane.f32.xlu1 %v3699_v2 }
0x1fe4   :  { %v3542_v51 = vpop.xlane.xlu0 %3541 }
0x1fe5   :  { %v3544_v54 = vmul.f32 %v3542_v51, %v6890_v12 }
0x1fe7   :  { %v3546_v28 = vadd.f32 1e-05, %v3544_v54 }
0x1fe9   :  { %6365 = vrsqrt.f32 %v3546_v28  ;;  %vm3563_vm13 = vweird.f32 %v3546_v28 }
0x1fef   :  { %v6366_v3 = vpop.eup %6365 }
0x1ff0   :  { %v3558_v47 = vmul.f32 %v6366_v3, %v3546_v28  ;;  %vm3564_vm12 = vweird.f32 %v6366_v3 }
0x1ff1   :  { %vm3565_vm14 = vmor %vm3563_vm13, %vm3564_vm12 }
0x1ff2   :  { %v3559_v5 = vmul.f32 %v6366_v3, %v3558_v47 }
0x1ff4   :  { %v3560_v6 = vmul.f32 0.5, %v3559_v5 }
0x1ff6   :  { %v3561_v4 = vsub.f32 1.5, %v3560_v6 }
0x1ff8   :  { %v3562_v9 = vmul.f32 %v6366_v3, %v3561_v4 }
0x1ffa   :  { %v3566_v62 = vsel %vm3565_vm14, %v6366_v3, %v3562_v9 }
0x1ffb   :  { %v3568_v7 = vmul.f32 %v3566_v62, %v3534_v1 }
0x1ffd   :  { %v3573_v11 = vmul.f32 %v6188_v20, %v3568_v7 }
0x1fff   :  { %v3578_v17 = vadd.f32 %v6189_v38, %v3573_v11 }
0x2001   :  { %5909 = vmatmul.msk.f32.gmra.mxu2 %vm182_vm0, %v3578_v17 }
0x2019   :  { %v3701_v44 = vpop.xlane.xlu1 %3700 }
0x201a   :  { %v3705_v42 = vmul.f32 %v3701_v44, %v6890_v12 }
0x201c   :  { %v3707_v10 = vsub.f32 %v3695_v45, %v3705_v42 }
0x201e   :  { %v3709_v33 = vmul.f32 %v3707_v10, %v3707_v10 }
0x2020   :  { %v3711_v25 = vsel %vm182_vm0, %v3709_v33, 0.0 }
0x2021   :  { %3712 = vadd.xlane.f32.xlu2 %v3711_v25 }
0x2084   :  { %v3646_v26 = vpop.f32.mrf.mxu2 }
0x2085   :  { %v3647_v29 = vadd.f32 %v6190_v16, %v3646_v26 }
0x2087   :  { %v3650_v27 = vmax.f32 %v3647_v29, 0.0 }
0x2089   :  { %5915 = vmatmul.msk.f32.gmra.mxu0 %vm987_vm8, %v3650_v27 }
0x2094   :  { %v3713_v20 = vpop.xlane.xlu2 %3712 }
0x2095   :  { %v3717_v37 = vmul.f32 %v3713_v20, %v6890_v12 }
0x2097   :  { %v3719_v38 = vadd.f32 1e-05, %v3717_v37 }
0x2099   :  { %6367 = vrsqrt.f32 %v3719_v38  ;;  %vm3727_vm4 = vweird.f32 %v3719_v38 }
0x209f   :  { %v6368_v41 = vpop.eup %6367 }
0x20a0   :  { %v3722_v43 = vmul.f32 %v6368_v41, %v3719_v38  ;;  %vm3728_vm15 = vweird.f32 %v6368_v41 }
0x20a1   :  { %vm3729_vm5 = vmor %vm3727_vm4, %vm3728_vm15 }
0x20a2   :  { %v3723_v48 = vmul.f32 %v6368_v41, %v3722_v43 }
0x20a4   :  { %v3724_v49 = vmul.f32 0.5, %v3723_v48 }
0x20a6   :  { %v3725_v53 = vsub.f32 1.5, %v3724_v49 }
0x20a8   :  { %v3726_v55 = vmul.f32 %v6368_v41, %v3725_v53 }
0x20aa   :  { %v3730_v57 = vsel %vm3729_vm5, %v6368_v41, %v3726_v55 }
0x20ab   :  { %v3741_v18 = vmul.f32 %v3730_v57, %v3707_v10 }
0x20ad   :  { %v3746_v0 = vmul.f32 %v6192_v56, %v3741_v18 }
0x20af   :  { %v7659_v16 = vadd.f32 %v6193_v59, %v3746_v0 }
0x20b1   :  { %5946 = vmatmul.msk.f32.vlgmr.msrb.gmra.mxu3 %vm182_vm0, %v7659_v16 }
0x2106   :  { %v3692_v63 = vpop.f32.mrf.mxu0 }
0x2107   :  { %v3693_v58 = vadd.f32 %v7623_v30, %v3692_v63 }
0x2109   :  { %v3696_v61 = vadd.f32 %v3693_v58, %v3578_v17 }
0x210b   :  { %v3702_v60 = vsel %vm182_vm0, %v3696_v61, 0.0 }
0x210c   :  { %3703 = vadd.xlane.f32.xlu2 %v3702_v60 }
0x2134   :  { %v3837_v1 = vpop.f32.mrf.mxu3 }
0x2135   :  { %v7666_v15 = vadd.f32 %v6194_v34, %v3837_v1 }
0x2137   :  { %3846 = vrot.lane.b32.xlu2 %v7666_v15, %s6516_s15  ;;  %v7674_v51 = vmul.f32 0.35355338, %v7666_v15 }
0x217f   :  { %v3704_v46 = vpop.xlane.xlu2 %3703 }
0x2180   :  { %v3706_v19 = vmul.f32 %v3704_v46, %v6890_v12 }
0x2182   :  { %v3708_v40 = vsub.f32 %v3696_v61, %v3706_v19 }
0x2184   :  { %v3710_v45 = vmul.f32 %v3708_v40, %v3708_v40 }
0x2186   :  { %v3714_v2 = vsel %vm182_vm0, %v3710_v45, 0.0 }
0x2187   :  { %3715 = vadd.xlane.f32.xlu0 %v3714_v2 }
0x2191   :  { %v3847_v30 = vpop.permute.xlu2 %3846 }
0x2192   :  { %5948 = vmatpush.xpose.msk.msra.mxu1 %vm253_vm1, %v3847_v30 }
0x2195   :  { %5949 = vmatmul.msk.f32.vlgmr.msra.gmra.mxu1 %vm253_vm1, %v7674_v51 }
0x21fa   :  { %v3716_v54 = vpop.xlane.xlu0 %3715 }
0x21fb   :  { %v3718_v28 = vmul.f32 %v3716_v54, %v6890_v12 }
0x21fd   :  { %v3720_v3 = vadd.f32 1e-05, %v3718_v28 }
0x21ff   :  { %6369 = vrsqrt.f32 %v3720_v3  ;;  %vm3737_vm7 = vweird.f32 %v3720_v3 }
0x2205   :  { %v6370_v47 = vpop.eup %6369 }
0x2206   :  { %v3732_v5 = vmul.f32 %v6370_v47, %v3720_v3  ;;  %vm3738_vm6 = vweird.f32 %v6370_v47 }
0x2207   :  { %vm3739_vm9 = vmor %vm3737_vm7, %vm3738_vm6 }
0x2208   :  { %v3733_v6 = vmul.f32 %v6370_v47, %v3732_v5 }
0x220a   :  { %v3734_v4 = vmul.f32 0.5, %v3733_v6 }
0x220c   :  { %v3735_v9 = vsub.f32 1.5, %v3734_v4 }
0x220e   :  { %v3736_v62 = vmul.f32 %v6370_v47, %v3735_v9 }
0x2210   :  { %v3740_v7 = vsel %vm3739_vm9, %v6370_v47, %v3736_v62 }
0x2211   :  { %v3742_v11 = vmul.f32 %v3740_v7, %v3708_v40 }
0x2212   :  { %v3870_v17 = vpop.f32.mrf.mxu1 }
0x2213   :  { %v3901_v39 = vsel %vm253_vm1, %v3870_v17, -inf  ;;  %v3747_v44 = vmul.f32 %v6192_v56, %v3742_v11 }
0x2214   :  { %3902 = vmax.xlane.f32.xlu1 %v3901_v39 }
0x2215   :  { %v7680_v42 = vadd.f32 %v6193_v59, %v3747_v44 }
0x2217   :  { %5947 = vmatmul.msk.f32.gmra.mxu3 %vm182_vm0, %v7680_v42 }
0x222d   :  { %3923 = vrot.lane.b32.xlu1 %v7666_v15, %s6520_s22 }
0x2235   :  { %3975 = vrot.lane.b32.xlu1 %v7674_v51, %s6517_s5 }
0x2287   :  { %v3903_v10 = vpop.xlane.xlu1 %3902 }
0x2288   :  { %v3907_v33 = vsub.f32 %v3870_v17, %v3903_v10 }
0x228a   :  { %v3909_v25 = vmul.f32 1.442695, %v3907_v33 }
0x228c   :  { %6371 = vpow2.f32 %v3909_v25 }
0x2292   :  { %v6372_v21 = vpop.eup %6371 }
0x2293   :  { %v3913_v50 = vsel %vm253_vm1, %v6372_v21, 0.0 }
0x2294   :  { %3914 = vadd.xlane.f32.xlu2 %v3913_v50 }
0x229a   :  { %v3840_v8 = vpop.f32.mrf.mxu3 }
0x229b   :  { %v7689_v22 = vadd.f32 %v6194_v34, %v3840_v8 }
0x229d   :  { %3874 = vrot.lane.b32.xlu0 %v7689_v22, %s6516_s15  ;;  %v3844_v29 = vmul.f32 0.35355338, %v7689_v22 }
0x229f   :  { %v3924_v23 = vpop.permute.xlu1 %3923 }
0x22a0   :  { %3944 = vmatpush.msrb.mxu1 %v3924_v23 }
0x22a5   :  { %3977 = vrot.lane.b32.xlu0 %v7666_v15, %s6515_s0 }
0x22a7   :  { %v3976_v27 = vpop.permute.xlu1 %3975 }
0x2307   :  { %v3915_v24 = vpop.xlane.xlu2 %3914 }
0x2308   :  { %6373 = vrcp.f32 %v3915_v24 }
0x230e   :  { %v6374_v31 = vpop.eup %6373 }
0x230f   :  { %v3921_v13 = vmul.f32 %v6374_v31, %v6372_v21  ;;  %v3875_v26 = vpop.permute.xlu0 %3874 }
0x2310   :  { %5950 = vmatpush.xpose.msk.msrb.mxu0 %vm253_vm1, %v3875_v26 }
0x2311   :  { %5952 = vmatmul.msk.f32.vlgmr.msrb.gmra.mxu1 %vm253_vm1, %v3921_v13 }
0x2313   :  { %5951 = vmatmul.msk.f32.vlgmr.msrb.gmra.mxu0 %vm253_vm1, %v3844_v29 }
0x2317   :  { %v3978_v32 = vpop.permute.xlu0 %3977 }
0x2318   :  { %5954 = vmatpush.xpose.msk.msra.mxu1 %vm253_vm1, %v3978_v32 }
0x231b   :  { %5955 = vmatmul.msk.f32.vlgmr.msra.gmra.mxu1 %vm253_vm1, %v3976_v27 }
0x238e   :  { %v7701_v35 = vpop.f32.mrf.mxu1 }
0x2390   :  { %v3898_v36 = vpop.f32.mrf.mxu0 }
0x2391   :  { %v3904_v20 = vsel %vm253_vm1, %v3898_v36, -inf }
0x2392   :  { %3905 = vmax.xlane.f32.xlu0 %v3904_v20 }
0x2398   :  { %v4000_v37 = vpop.f32.mrf.mxu1 }
0x2399   :  { %v4031_v38 = vsel %vm253_vm1, %v4000_v37, -inf }
0x239a   :  { %4032 = vmax.xlane.f32.xlu1 %v4031_v38 }
0x23a6   :  { %4005 = vrot.lane.b32.xlu0 %v7689_v22, %s6515_s0 }
0x23ae   :  { %4105 = vrot.lane.b32.xlu0 %v7674_v51, %s6521_s23 }
0x23b3   :  { %4003 = vrot.lane.b32.xlu1 %v3844_v29, %s6517_s5 }
0x23b6   :  { %4133 = vrot.lane.b32.xlu0 %v3844_v29, %s6521_s23 }
0x23bb   :  { %4237 = vrot.lane.b32.xlu1 %v7666_v15, %s6522_s26 }
0x23be   :  { %4265 = vrot.lane.b32.xlu0 %v7689_v22, %s6522_s26 }
0x23c3   :  { %4263 = vrot.lane.b32.xlu1 %v3844_v29, %s6523_s28 }
0x2405   :  { %v3906_v41 = vpop.xlane.xlu0 %3905 }
0x2406   :  { %v3908_v43 = vsub.f32 %v3898_v36, %v3906_v41 }
0x2408   :  { %v3911_v48 = vmul.f32 1.442695, %v3908_v43 }
0x240a   :  { %6375 = vpow2.f32 %v3911_v48 }
0x240d   :  { %v4033_v56 = vpop.xlane.xlu1 %4032 }
0x240e   :  { %v4037_v61 = vsub.f32 %v4000_v37, %v4033_v56 }
0x2410   :  { %v6376_v49 = vpop.eup %6375  ;;  %v4039_v60 = vmul.f32 1.442695, %v4037_v61 }
0x2411   :  { %v3916_v53 = vsel %vm253_vm1, %v6376_v49, 0.0 }
0x2412   :  { %3917 = vadd.xlane.f32.xlu2 %v3916_v53  ;;  %6377 = vpow2.f32 %v4039_v60 }
0x2418   :  { %v4006_v55 = vpop.permute.xlu0 %4005  ;;  %v6378_v34 = vpop.eup %6377 }
0x2419   :  { %5956 = vmatpush.xpose.msk.msrb.mxu2 %vm253_vm1, %v4006_v55  ;;  %v4043_v1 = vsel %vm253_vm1, %v6378_v34, 0.0 }
0x2420   :  { %v4106_v57 = vpop.permute.xlu0 %4105 }
0x2425   :  { %v4004_v59 = vpop.permute.xlu1 %4003 }
0x2426   :  { %5957 = vmatmul.msk.f32.vlgmr.msrb.gmra.mxu2 %vm253_vm1, %v4004_v59 }
0x2428   :  { %v4134_v18 = vpop.permute.xlu0 %4133 }
0x242a   :  { %3949 = vrot.lane.b32.xlu2 %v7689_v22, %s6520_s22  ;;  %s8127_s22 = smov 8  }
0x242d   :  { %v4238_v0 = vpop.permute.xlu1 %4237 }
0x2430   :  { %v4266_v63 = vpop.permute.xlu0 %4265 }
0x2431   :  { %5968 = vmatpush.xpose.msk.msra.mxu3 %vm253_vm1, %v4266_v63 }
0x2432   :  { %4053 = vrot.lane.b32.xlu2 %v7666_v15, %s6519_s18 }
0x2435   :  { %v4264_v58 = vpop.permute.xlu1 %4263 }
0x2436   :  { %5969 = vmatmul.msk.f32.vlgmr.msra.gmra.mxu3 %vm253_vm1, %v4264_v58 }
0x243a   :  { %4107 = vrot.lane.b32.xlu2 %v7666_v15, %s6518_s16 }
0x2442   :  { %4135 = vrot.lane.b32.xlu2 %v7689_v22, %s6518_s16 }
0x246b   :  { %4044 = vadd.xlane.f32.xlu2 %v4043_v1 }
0x2483   :  { %4235 = vrot.lane.b32.xlu2 %v7674_v51, %s6523_s28 }
0x2485   :  { %v3918_v46 = vpop.xlane.xlu2 %3917 }
0x2486   :  { %6379 = vrcp.f32 %v3918_v46 }
0x248c   :  { %v6380_v19 = vpop.eup %6379 }
0x248d   :  { %v3922_v40 = vmul.f32 %v6380_v19, %v6376_v49  ;;  %v3950_v45 = vpop.permute.xlu2 %3949  ;;  %v5991_v19 = vld [vmem:[%s8109_s29 + $0xb8] sm:$0xff] }
0x248e   :  { %3970 = vmatpush.msra.mxu0 %v3950_v45  ;;  %v5988_v45 = vld [vmem:[%s8109_s29 + $0xa0] sm:$0xff] }
0x248f   :  { %5953 = vmatmul.msk.f32.vlgmr.msra.gmra.mxu0 %vm253_vm1, %v3922_v40  ;;  %v5989_v40 = vld [vmem:[%s8109_s29 + $0xa8] sm:$0xff] }
0x2495   :  { %v4054_v2 = vpop.permute.xlu2 %4053 }
0x2496   :  { %4074 = vmatpush.msrb.mxu0 %v4054_v2  ;;  %v5987_v2 = vld [vmem:[%s8109_s29 + $0x98] sm:$0xff] }
0x249d   :  { %v4108_v30 = vpop.permute.xlu2 %4107 }
0x249e   :  { %5960 = vmatpush.xpose.msk.msra.mxu2 %vm253_vm1, %v4108_v30  ;;  %v5986_v30 = vld [vmem:[%s8109_s29 + $0x90] sm:$0xff] }
0x24a1   :  { %5961 = vmatmul.msk.f32.vlgmr.msra.gmra.mxu2 %vm253_vm1, %v4106_v57 }
0x24a5   :  { %v4136_v54 = vpop.permute.xlu2 %4135 }
0x24a6   :  { %5962 = vmatpush.xpose.msk.msra.mxu0 %vm253_vm1, %v4136_v54  ;;  %v5985_v54 = vld [vmem:[%s8109_s29 + $0x88] sm:$0xff] }
0x24a9   :  { %v4028_v28 = vpop.f32.mrf.mxu2 }
0x24aa   :  { %v4034_v51 = vsel %vm253_vm1, %v4028_v28, -inf }
0x24ac   :  { %4035 = vmax.xlane.f32.xlu2 %v4034_v51 }
0x24b9   :  { %v4288_v62 = vpop.f32.mrf.mxu3 }
0x24ba   :  { %v4294_v7 = vsel %vm253_vm1, %v4288_v62, -inf }
0x24de   :  { %v4045_v3 = vpop.xlane.xlu2 %4044 }
0x24df   :  { %6381 = vrcp.f32 %v4045_v3 }
0x24e5   :  { %v6382_v47 = vpop.eup %6381 }
0x24e6   :  { %v4051_v5 = vmul.f32 %v6382_v47, %v6378_v34  ;;  %v4236_v6 = vpop.permute.xlu2 %4235 }
0x24e8   :  { %5958 = vmatmul.msk.f32.vlgmr.msrb.gmra.mxu0 %vm253_vm1, %v4051_v5 }
0x24e9   :  { %5966 = vmatpush.xpose.msk.msrb.mxu0 %vm253_vm1, %v4238_v0 }
0x24f0   :  { %5963 = vmatmul.msk.f32.vlgmr.msra.gmra.mxu0 %vm253_vm1, %v4134_v18 }
0x24f8   :  { %5967 = vmatmul.msk.f32.vlgmr.msrb.gmra.mxu0 %vm253_vm1, %v4236_v6 }
0x250c   :  { %v7745_v11 = vpop.f32.mrf.mxu0 }
0x251f   :  { %v4036_v17 = vpop.xlane.xlu2 %4035 }
0x2520   :  { %v4038_v39 = vsub.f32 %v4028_v28, %v4036_v17  ;;  %v5984_v28 = vld [vmem:[%s8109_s29 + $0x80] sm:$0xff] }
0x2522   :  { %v4041_v10 = vmul.f32 1.442695, %v4038_v39 }
0x2524   :  { %v4130_v4 = vpop.f32.mrf.mxu2  ;;  %6383 = vpow2.f32 %v4041_v10 }
0x2525   :  { %v4161_v9 = vsel %vm253_vm1, %v4130_v4, -inf }
0x2526   :  { %4162 = vmax.xlane.f32.xlu0 %v4161_v9 }
0x252a   :  { %v6384_v21 = vpop.eup %6383 }
0x252b   :  { %v4046_v8 = vsel %vm253_vm1, %v6384_v21, 0.0 }
0x252e   :  { %4295 = vmax.xlane.f32.xlu0 %v4294_v7 }
0x2542   :  { %4079 = vrot.lane.b32.xlu0 %v7689_v22, %s6519_s18  ;;  %s8126_s18 = smov 48  }
0x2565   :  { %v4076_v44 = vpop.f32.mrf.mxu0 }
0x256d   :  { %v4158_v33 = vpop.f32.mrf.mxu0 }
0x256e   :  { %v4164_v25 = vsel %vm253_vm1, %v4158_v33, -inf }
0x256f   :  { %4165 = vmax.xlane.f32.xlu2 %v4164_v25 }
0x2575   :  { %v4260_v50 = vpop.f32.mrf.mxu0 }
0x2576   :  { %v4291_v23 = vsel %vm253_vm1, %v4260_v50, -inf }
0x2577   :  { %4047 = vadd.xlane.f32.xlu2 %v4046_v8  ;;  %4292 = vmax.xlane.f32.xlu1 %v4291_v23 }
0x258f   :  { %4313 = vrot.lane.b32.xlu2 %v7666_v15, %s8125_s27 }
0x2597   :  { %4209 = vrot.lane.b32.xlu2 %v7689_v22, %s8126_s18 }
0x2599   :  { %v4163_v24 = vpop.xlane.xlu0 %4162 }
0x259a   :  { %v4167_v31 = vsub.f32 %v4130_v4, %v4163_v24 }
0x259c   :  { %v4169_v13 = vmul.f32 1.442695, %v4167_v31 }
0x259e   :  { %6385 = vpow2.f32 %v4169_v13 }
0x25a1   :  { %v4296_v32 = vpop.xlane.xlu0 %4295 }
0x25a2   :  { %v4298_v36 = vsub.f32 %v4288_v62, %v4296_v32 }
0x25a4   :  { %v6386_v26 = vpop.eup %6385  ;;  %v4301_v20 = vmul.f32 1.442695, %v4298_v36 }
0x25a5   :  { %v4173_v29 = vsel %vm253_vm1, %v6386_v26, 0.0 }
0x25a6   :  { %4174 = vadd.xlane.f32.xlu1 %v4173_v29  ;;  %6387 = vpow2.f32 %v4301_v20 }
0x25ac   :  { %v6388_v41 = vpop.eup %6387 }
0x25ad   :  { %v4306_v48 = vsel %vm253_vm1, %v6388_v41, 0.0 }
0x25b4   :  { %v4080_v27 = vpop.permute.xlu0 %4079 }
0x25b5   :  { %4100 = vmatpush.msrb.mxu1 %v4080_v27 }
0x25bf   :  { %4183 = vrot.lane.b32.xlu1 %v7666_v15, %s8126_s18 }
0x25e2   :  { %v4166_v37 = vpop.xlane.xlu2 %4165 }
0x25e3   :  { %v4168_v38 = vsub.f32 %v4158_v33, %v4166_v37 }
0x25e5   :  { %v4171_v43 = vmul.f32 1.442695, %v4168_v38 }
0x25e7   :  { %6389 = vpow2.f32 %v4171_v43 }
0x25e9   :  { %4307 = vadd.xlane.f32.xlu1 %v4306_v48 }
0x25ea   :  { %v4048_v49 = vpop.xlane.xlu2 %4047  ;;  %v4293_v53 = vpop.xlane.xlu1 %4292 }
0x25eb   :  { %6391 = vrcp.f32 %v4048_v49  ;;  %v4297_v55 = vsub.f32 %v4260_v50, %v4293_v53  ;;  %v5929_v50 = vld [vmem:[%s8107_s21 + $0x20] sm:$0xff] }
0x25ed   :  { %v6390_v56 = vpop.eup %6389  ;;  %v4299_v57 = vmul.f32 1.442695, %v4297_v55 }
0x25ee   :  { %v4176_v59 = vsel %vm253_vm1, %v6390_v56, 0.0 }
0x25ef   :  { %6393 = vpow2.f32 %v4299_v57  ;;  %4177 = vadd.xlane.f32.xlu0 %v4176_v59 }
0x25f1   :  { %v6392_v15 = vpop.eup %6391 }
0x25f2   :  { %v4052_v18 = vmul.f32 %v6392_v15, %v6384_v21  ;;  %v4314_v0 = vpop.permute.xlu2 %4313  ;;  %v5930_v21 = vld [vmem:[%s8107_s21 + $0x28] sm:$0xff] }
0x25f4   :  { %5959 = vmatmul.msk.f32.vlgmr.msrb.gmra.mxu1 %vm253_vm1, %v4052_v18 }
0x25f5   :  { %v6394_v63 = vpop.eup %6393 }
0x25f6   :  { %v4303_v58 = vsel %vm253_vm1, %v6394_v63, 0.0 }
0x25f7   :  { %4304 = vadd.xlane.f32.xlu2 %v4303_v58 }
0x25fa   :  { %v4210_v61 = vpop.permute.xlu2 %4209 }
0x25fb   :  { %4230 = vmatpush.msrb.mxu2 %v4210_v61 }
0x260f   :  { %4339 = vrot.lane.b32.xlu2 %v7689_v22, %s8125_s27  ;;  %v5990_v22 = vld [vmem:[%s8109_s29 + $0xb0] sm:$0xff]  ;;  %s8129_s27 = smov 24  }
0x2617   :  { %4367 = vrot.lane.b32.xlu2 %v4076_v44, %s8127_s22 }
0x2619   :  { %v4175_v60 = vpop.xlane.xlu1 %4174 }
0x261a   :  { %6395 = vrcp.f32 %v4175_v60 }
0x2620   :  { %v6396_v34 = vpop.eup %6395 }
0x2621   :  { %v4181_v1 = vmul.f32 %v6396_v34, %v6386_v26 }
0x2631   :  { %v4184_v46 = vpop.permute.xlu1 %4183 }
0x2632   :  { %4204 = vmatpush.msra.mxu1 %v4184_v46 }
0x2633   :  { %5964 = vmatmul.msk.f32.vlgmr.msra.gmra.mxu1 %vm253_vm1, %v4181_v1 }
0x2634   :  { %4334 = vmatpush.msrb.mxu1 %v4314_v0 }
0x2636   :  { %6004 = vmatpush.xpose.msk.msra.mxu1 %vm182_vm0, %v5991_v19 }
0x263a   :  { %6005 = vmatpush.xpose.msk.msra.mxu1 %vm182_vm0, %v5990_v22  ;;  %v5983_v22 = vld [vmem:[%s8109_s29 + $0x78] sm:$0xff] }
0x263b   :  { %5998 = vmatpush.xpose.msk.msrb.mxu3 %vm182_vm0, %v5983_v22 }
0x263e   :  { %6006 = vmatpush.xpose.msk.msra.mxu1 %vm182_vm0, %v5989_v40  ;;  %v5982_v40 = vld [vmem:[%s8109_s29 + $0x70] sm:$0xff] }
0x263f   :  { %5999 = vmatpush.xpose.msk.msrb.mxu3 %vm182_vm0, %v5982_v40 }
0x2642   :  { %6007 = vmatpush.xpose.msk.msra.mxu1 %vm182_vm0, %v5988_v45  ;;  %v5981_v45 = vld [vmem:[%s8109_s29 + $0x68] sm:$0xff] }
0x2643   :  { %6000 = vmatpush.xpose.msk.msrb.mxu3 %vm182_vm0, %v5981_v45 }
0x2646   :  { %6008 = vmatpush.xpose.msk.msra.mxu1 %vm182_vm0, %v5987_v2  ;;  %v5980_v2 = vld [vmem:[%s8109_s29 + $0x60] sm:$0xff] }
0x2647   :  { %6001 = vmatpush.xpose.msk.msrb.mxu3 %vm182_vm0, %v5980_v2 }
0x264a   :  { %6009 = vmatpush.xpose.msk.msra.mxu1 %vm182_vm0, %v5986_v30 }
0x264e   :  { %6010 = vmatpush.xpose.msk.msra.mxu1 %vm182_vm0, %v5985_v54 }
0x2652   :  { %6011 = vmatpush.xpose.msk.msra.mxu1 %vm182_vm0, %v5984_v28 }
0x265c   :  { %v4308_v3 = vpop.xlane.xlu1 %4307 }
0x2662   :  { %v4178_v51 = vpop.xlane.xlu0 %4177 }
0x2663   :  { %6397 = vrcp.f32 %v4178_v51 }
0x2664   :  { %6399 = vrcp.f32 %v4308_v3 }
0x2669   :  { %v6398_v47 = vpop.eup %6397 }
0x266a   :  { %v4182_v5 = vmul.f32 %v6398_v47, %v6390_v56  ;;  %v4305_v6 = vpop.xlane.xlu2 %4304  ;;  %v6400_v4 = vpop.eup %6399  ;;  %v7817_v56 = vld [vmem:[%s8114_s24 + $0x1] ss:$0 sm:$0xff] }
0x266b   :  { %6401 = vrcp.f32 %v4305_v6  ;;  %v4312_v62 = vmul.f32 %v6400_v4, %v6388_v41 }
0x266c   :  { %5965 = vmatmul.msk.f32.vlgmr.msrb.gmra.mxu2 %vm253_vm1, %v4182_v5 }
0x2671   :  { %v6402_v9 = vpop.eup %6401  ;;  %v4102_v39 = vpop.f32.mrf.mxu1 }
0x2672   :  { %v4311_v7 = vmul.f32 %v6402_v9, %v6394_v63  ;;  %v4340_v17 = vpop.permute.xlu2 %4339 }
0x2673   :  { %4360 = vmatpush.msra.mxu2 %v4340_v17 }
0x2674   :  { %5970 = vmatmul.msk.f32.vlgmr.msrb.gmra.mxu1 %vm253_vm1, %v4311_v7  ;;  %5971 = vmatmul.msk.f32.vlgmr.msra.gmra.mxu2 %vm253_vm1, %v4312_v62 }
0x267a   :  { %v4368_v8 = vpop.permute.xlu2 %4367 }
0x267b   :  { %v4389_v24 = vsel %vm253_vm1, %v7701_v35, %v4368_v8  ;;  %v6195_v35 = vld [vmem:[%s8108_s25 + $0x1] ss:$0 sm:$0xff] }
0x267c   :  { %6012 = vmatmul.msk.f32.vlgmr.msra.gmra.mxu1 %vm182_vm0, %v7410_v52  ;;  %v5932_v52 = vld [vmem:[%s8107_s21 + $0x38] sm:$0xff] }
0x267d   :  { %5972 = vmatpush.xpose.msk.msra.mxu0 %vm182_vm0, %v5932_v52  ;;  %v6198_v52 = vld [vmem:[%s8113_s19 + $0x1] ss:$0 sm:$0xff] }
0x2684   :  { %6013 = vmatmul.msk.f32.gmra.mxu1 %vm182_vm0, %v7468_v14  ;;  %v5931_v14 = vld [vmem:[%s8107_s21 + $0x30] sm:$0xff] }
0x2685   :  { %5973 = vmatpush.xpose.msk.msra.mxu0 %vm182_vm0, %v5931_v14 }
0x2689   :  { %5974 = vmatpush.xpose.msk.msra.mxu0 %vm182_vm0, %v5930_v21 }
0x268d   :  { %5975 = vmatpush.xpose.msk.msra.mxu0 %vm182_vm0, %v5929_v50 }
0x26b0   :  { %v4206_v44 = vpop.f32.mrf.mxu1 }
0x26b1   :  { %4375 = vrot.lane.b32.xlu2 %v4206_v44, %s8128_s17 }
0x26b9   :  { %4369 = vrot.lane.b32.xlu2 %v4102_v39, %s8127_s22 }
0x26ef   :  { %v4232_v10 = vpop.f32.mrf.mxu2 }
0x26f0   :  { %4377 = vrot.lane.b32.xlu1 %v4232_v10, %s8128_s17  ;;  %v6197_v10 = vld [vmem:[%s8112_s14 + $0x1] ss:$0 sm:$0xff] }
0x26f1   :  { %v4336_v33 = vpop.f32.mrf.mxu1 }
0x26f2   :  { %4383 = vrot.lane.b32.xlu0 %v4336_v33, %s8129_s27 }
0x26f7   :  { %v4362_v25 = vpop.f32.mrf.mxu2 }
0x26f8   :  { %4385 = vrot.lane.b32.xlu2 %v4362_v25, %s8129_s27 }
0x26f9   :  { %v4609_v60 = vpop.f32.mrf.mxu1 }
0x2701   :  { %v4612_v34 = vpop.f32.mrf.mxu1 }
0x270b   :  { %v4376_v23 = vpop.permute.xlu2 %4375 }
0x270c   :  { %v4391_v31 = vsel %vm797_vm2, %v4389_v24, %v4376_v23 }
0x2713   :  { %v4370_v13 = vpop.permute.xlu2 %4369 }
0x2714   :  { %v4390_v27 = vsel %vm253_vm1, %v7745_v11, %v4370_v13 }
0x2752   :  { %v4386_v20 = vpop.permute.xlu2 %4385 }
0x2762   :  { %v4378_v32 = vpop.permute.xlu1 %4377 }
0x2763   :  { %v4392_v36 = vsel %vm797_vm2, %v4390_v27, %v4378_v32 }
0x2764   :  { %v4384_v26 = vpop.permute.xlu0 %4383  ;;  %v4394_v37 = vsel %vm800_vm3, %v4392_v36, %v4386_v20 }
0x2765   :  { %v4393_v29 = vsel %vm800_vm3, %v4391_v31, %v4384_v26 }
0x2766   :  { %5976 = vmatmul.msk.f32.vlgmr.msra.gmra.mxu0 %vm182_vm0, %v4393_v29 }
0x276e   :  { %5977 = vmatmul.msk.f32.gmra.mxu0 %vm182_vm0, %v4394_v37 }
0x27e3   :  { %v4433_v38 = vpop.f32.mrf.mxu0 }
0x27e4   :  { %v4434_v41 = vadd.f32 %v6195_v35, %v4433_v38 }
0x27e6   :  { %v4439_v43 = vadd.f32 %v4434_v41, %v7659_v16 }
0x27e8   :  { %v4445_v48 = vsel %vm182_vm0, %v4439_v43, 0.0 }
0x27e9   :  { %4446 = vadd.xlane.f32.xlu2 %v4445_v48 }
0x27eb   :  { %v4436_v49 = vpop.f32.mrf.mxu0 }
0x27ec   :  { %v4437_v53 = vadd.f32 %v6195_v35, %v4436_v49 }
0x27ee   :  { %v4440_v11 = vadd.f32 %v4437_v53, %v7680_v42 }
0x27f0   :  { %v4448_v55 = vsel %vm182_vm0, %v4440_v11, 0.0 }
0x27f1   :  { %4449 = vadd.xlane.f32.xlu0 %v4448_v55 }
0x2805   :  { %4565 = vrot.lane.b32.xlu0 %v7817_v56, %s6516_s15 }
0x285c   :  { %v4447_v57 = vpop.xlane.xlu2 %4446 }
0x285d   :  { %v4451_v59 = vmul.f32 %v4447_v57, %v6890_v12 }
0x285f   :  { %v4453_v15 = vsub.f32 %v4439_v43, %v4451_v59 }
0x2861   :  { %v4455_v16 = vmul.f32 %v4453_v15, %v4453_v15 }
0x2863   :  { %v4457_v18 = vsel %vm182_vm0, %v4455_v16, 0.0 }
0x2864   :  { %4458 = vadd.xlane.f32.xlu1 %v4457_v18  ;;  %v4450_v0 = vpop.xlane.xlu0 %4449 }
0x2865   :  { %v4452_v42 = vmul.f32 %v4450_v0, %v6890_v12 }
0x2867   :  { %v4454_v63 = vsub.f32 %v4440_v11, %v4452_v42 }
0x2869   :  { %v4456_v58 = vmul.f32 %v4454_v63, %v4454_v63 }
0x286b   :  { %v4460_v61 = vsel %vm182_vm0, %v4456_v58, 0.0 }
0x286c   :  { %4461 = vadd.xlane.f32.xlu2 %v4460_v61 }
0x2877   :  { %v4566_v1 = vpop.permute.xlu0 %4565 }
0x2878   :  { %v7825_v46 = vadd.f32 %v4609_v60, %v4566_v1  ;;  %v7827_v19 = vadd.f32 %v4612_v34, %v4566_v1 }
0x287a   :  { %6014 = vmatpush.xpose.msk.msrb.mxu2 %vm253_vm1, %v7825_v46 }
0x287e   :  { %6016 = vmatpush.xpose.msk.msra.mxu2 %vm253_vm1, %v7827_v19 }
0x2884   :  { %4745 = vrot.lane.b32.xlu2 %v7825_v46, %s6517_s5 }
0x288c   :  { %4773 = vrot.lane.b32.xlu2 %v7827_v19, %s6517_s5 }
0x28d7   :  { %v4459_v30 = vpop.xlane.xlu1 %4458 }
0x28d8   :  { %v4463_v54 = vmul.f32 %v4459_v30, %v6890_v12 }
0x28da   :  { %v4465_v28 = vadd.f32 1e-05, %v4463_v54 }
0x28dc   :  { %6403 = vrsqrt.f32 %v4465_v28  ;;  %vm4473_vm11 = vweird.f32 %v4465_v28 }
0x28df   :  { %v4462_v51 = vpop.xlane.xlu2 %4461 }
0x28e0   :  { %v4464_v3 = vmul.f32 %v4462_v51, %v6890_v12 }
0x28e2   :  { %v6404_v47 = vpop.eup %6403  ;;  %v4466_v5 = vadd.f32 1e-05, %v4464_v3 }
0x28e3   :  { %v4468_v6 = vmul.f32 %v6404_v47, %v4465_v28  ;;  %vm4474_vm10 = vweird.f32 %v6404_v47 }
0x28e4   :  { %6405 = vrsqrt.f32 %v4466_v5  ;;  %vm4475_vm12 = vmor %vm4473_vm11, %vm4474_vm10  ;;  %vm4483_vm14 = vweird.f32 %v4466_v5 }
0x28e5   :  { %v4469_v4 = vmul.f32 %v6404_v47, %v4468_v6 }
0x28e7   :  { %v4470_v9 = vmul.f32 0.5, %v4469_v4  ;;  %v4746_v62 = vpop.permute.xlu2 %4745 }
0x28e8   :  { %6020 = vmatpush.xpose.msk.msra.mxu3 %vm253_vm1, %v4746_v62 }
0x28e9   :  { %v4471_v7 = vsub.f32 1.5, %v4470_v9 }
0x28ea   :  { %v6406_v17 = vpop.eup %6405 }
0x28eb   :  { %v4472_v39 = vmul.f32 %v6404_v47, %v4471_v7  ;;  %v4478_v44 = vmul.f32 %v6406_v17, %v4466_v5  ;;  %vm4484_vm13 = vweird.f32 %v6406_v17 }
0x28ec   :  { %vm4485_vm15 = vmor %vm4483_vm14, %vm4484_vm13 }
0x28ed   :  { %v4476_v33 = vsel %vm4475_vm12, %v6404_v47, %v4472_v39  ;;  %v4479_v25 = vmul.f32 %v6406_v17, %v4478_v44 }
0x28ee   :  { %v4487_v14 = vmul.f32 %v4476_v33, %v4453_v15 }
0x28ef   :  { %v4480_v21 = vmul.f32 0.5, %v4479_v25  ;;  %v4774_v55 = vpop.permute.xlu2 %4773 }
0x28f0   :  { %v4492_v50 = vmul.f32 %v6197_v10, %v4487_v14 }
0x28f1   :  { %v4481_v8 = vsub.f32 1.5, %v4480_v21 }
0x28f2   :  { %v7850_v23 = vadd.f32 %v6198_v52, %v4492_v50 }
0x28f3   :  { %v4482_v24 = vmul.f32 %v6406_v17, %v4481_v8 }
0x28f4   :  { %6002 = vmatmul.msk.f32.vlgmr.msrb.gmra.mxu3 %vm182_vm0, %v7850_v23 }
0x28f5   :  { %v4486_v31 = vsel %vm4485_vm15, %v6406_v17, %v4482_v24 }
0x28f6   :  { %v4488_v13 = vmul.f32 %v4486_v31, %v4454_v63 }
0x28f8   :  { %v4493_v26 = vmul.f32 %v6197_v10, %v4488_v13 }
0x28fa   :  { %v7854_v29 = vadd.f32 %v6198_v52, %v4493_v26 }
0x28fc   :  { %6003 = vmatmul.msk.f32.gmra.mxu3 %vm182_vm0, %v7854_v29 }
0x2977   :  { %v4559_v32 = vpop.f32.mrf.mxu3 }
0x2978   :  { %v4560_v27 = vadd.f32 %v7817_v56, %v4559_v32 }
0x297a   :  { %v4615_v36 = vmul.f32 0.35355338, %v4560_v27 }
0x297c   :  { %4743 = vrot.lane.b32.xlu1 %v4615_v36, %s6517_s5  ;;  %6015 = vmatmul.msk.f32.vlgmr.msrb.gmra.mxu2 %vm253_vm1, %v4615_v36 }
0x297f   :  { %v4562_v20 = vpop.f32.mrf.mxu3 }
0x2980   :  { %v4563_v37 = vadd.f32 %v7817_v56, %v4562_v20 }
0x2982   :  { %v4616_v35 = vmul.f32 0.35355338, %v4563_v37 }
0x2984   :  { %6017 = vmatmul.msk.f32.vlgmr.msra.gmra.mxu2 %vm253_vm1, %v4616_v35 }
0x29ee   :  { %v4744_v38 = vpop.permute.xlu1 %4743 }
0x29ef   :  { %6021 = vmatmul.msk.f32.vlgmr.msra.gmra.mxu3 %vm253_vm1, %v4744_v38 }
0x29ff   :  { %v4640_v41 = vpop.f32.mrf.mxu2 }
0x2a00   :  { %v4669_v43 = vsel %vm253_vm1, %v4640_v41, -inf }
0x2a01   :  { %4670 = vmax.xlane.f32.xlu0 %v4669_v43 }
0x2a07   :  { %v4666_v48 = vpop.f32.mrf.mxu2 }
0x2a08   :  { %v4672_v49 = vsel %vm253_vm1, %v4666_v48, -inf }
0x2a09   :  { %4673 = vmax.xlane.f32.xlu2 %v4672_v49 }
0x2a15   :  { %4691 = vrot.lane.b32.xlu0 %v7825_v46, %s6516_s15 }
0x2a21   :  { %4875 = vrot.lane.b32.xlu2 %v7825_v46, %s6521_s23 }
0x2a29   :  { %4873 = vrot.lane.b32.xlu2 %v4615_v36, %s6521_s23 }
0x2a31   :  { %4717 = vrot.lane.b32.xlu2 %v7827_v19, %s6516_s15 }
0x2a39   :  { %5005 = vrot.lane.b32.xlu2 %v7825_v46, %s6523_s28 }
0x2a41   :  { %5003 = vrot.lane.b32.xlu2 %v4615_v36, %s6523_s28 }
0x2a49   :  { %4903 = vrot.lane.b32.xlu2 %v7827_v19, %s6521_s23 }
0x2a51   :  { %4901 = vrot.lane.b32.xlu2 %v4616_v35, %s6521_s23  ;;  %s6467_s23 = scalar_lea.hbm %s6729_s12, 2 }
0x2a59   :  { %5031 = vrot.lane.b32.xlu2 %v4616_v35, %s6523_s28 }
0x2a72   :  { %v4768_v53 = vpop.f32.mrf.mxu3 }
0x2a73   :  { %v4799_v11 = vsel %vm253_vm1, %v4768_v53, -inf }
0x2a74   :  { %4800 = vmax.xlane.f32.xlu1 %v4799_v11  ;;  %v4671_v56 = vpop.xlane.xlu0 %4670 }
0x2a75   :  { %v4675_v57 = vsub.f32 %v4640_v41, %v4671_v56 }
0x2a77   :  { %v4677_v59 = vmul.f32 1.442695, %v4675_v57 }
0x2a79   :  { %6407 = vpow2.f32 %v4677_v59 }
0x2a7c   :  { %v4674_v15 = vpop.xlane.xlu2 %4673 }
0x2a7d   :  { %v4676_v16 = vsub.f32 %v4666_v48, %v4674_v15 }
0x2a7f   :  { %v6408_v18 = vpop.eup %6407  ;;  %v4679_v0 = vmul.f32 1.442695, %v4676_v16 }
0x2a80   :  { %v4681_v42 = vsel %vm253_vm1, %v6408_v18, 0.0 }
0x2a81   :  { %6409 = vpow2.f32 %v4679_v0  ;;  %4682 = vadd.xlane.f32.xlu0 %v4681_v42 }
0x2a84   :  { %v4876_v63 = vpop.permute.xlu2 %4875 }
0x2a87   :  { %v6410_v58 = vpop.eup %6409  ;;  %v4692_v61 = vpop.permute.xlu0 %4691 }
0x2a88   :  { %4712 = vmatpush.msrb.mxu2 %v4692_v61  ;;  %v4684_v60 = vsel %vm253_vm1, %v6410_v58, 0.0 }
0x2a89   :  { %4685 = vadd.xlane.f32.xlu0 %v4684_v60 }
0x2a8a   :  { %6022 = vmatpush.xpose.msk.msra.mxu2 %vm253_vm1, %v4774_v55 }
0x2a8c   :  { %v4874_v34 = vpop.permute.xlu2 %4873 }
0x2a8d   :  { %4771 = vrot.lane.b32.xlu1 %v4616_v35, %s6517_s5  ;;  %s5607_s5 = sshll.u32 %s6729_s12, 4  ;;  %s5608_s5 = int_to_ptr.hbm [resolvable:$true] %s5607_s5 }
0x2a94   :  { %v4718_v1 = vpop.permute.xlu2 %4717 }
0x2a95   :  { %4738 = vmatpush.msrb.mxu0 %v4718_v1 }
0x2a9c   :  { %v5006_v51 = vpop.permute.xlu2 %5005 }
0x2a9d   :  { %4821 = vrot.lane.b32.xlu0 %v7825_v46, %s6515_s0 }
0x2aa4   :  { %v5004_v9 = vpop.permute.xlu2 %5003 }
0x2aac   :  { %v4904_v7 = vpop.permute.xlu2 %4903 }
0x2ab4   :  { %v4902_v10 = vpop.permute.xlu2 %4901 }
0x2abc   :  { %v5032_v52 = vpop.permute.xlu2 %5031 }
0x2ae7   :  { %v4801_v22 = vpop.xlane.xlu1 %4800 }
0x2ae8   :  { %v4805_v40 = vsub.f32 %v4768_v53, %v4801_v22 }
0x2aea   :  { %v4807_v45 = vmul.f32 1.442695, %v4805_v40 }
0x2aec   :  { %6411 = vpow2.f32 %v4807_v45 }
0x2af2   :  { %v6412_v2 = vpop.eup %6411 }
0x2af3   :  { %v4811_v30 = vsel %vm253_vm1, %v6412_v2, 0.0 }
0x2af4   :  { %4812 = vadd.xlane.f32.xlu1 %v4811_v30  ;;  %v4683_v54 = vpop.xlane.xlu0 %4682 }
0x2af5   :  { %6413 = vrcp.f32 %v4683_v54 }
0x2afb   :  { %v6414_v28 = vpop.eup %6413 }
0x2afc   :  { %v4689_v3 = vmul.f32 %v6414_v28, %v6408_v18  ;;  %v4686_v47 = vpop.xlane.xlu0 %4685 }
0x2afd   :  { %6415 = vrcp.f32 %v4686_v47 }
0x2afe   :  { %6018 = vmatmul.msk.f32.vlgmr.msrb.gmra.mxu2 %vm253_vm1, %v4689_v3 }
0x2aff   :  { %6026 = vmatpush.xpose.msk.msrb.mxu2 %vm253_vm1, %v4876_v63  ;;  %v4772_v4 = vpop.permute.xlu1 %4771 }
0x2b03   :  { %v6416_v5 = vpop.eup %6415 }
0x2b04   :  { %v4690_v6 = vmul.f32 %v6416_v5, %v6410_v58 }
0x2b06   :  { %6019 = vmatmul.msk.f32.vlgmr.msrb.gmra.mxu0 %vm253_vm1, %v4690_v6  ;;  %6023 = vmatmul.msk.f32.vlgmr.msra.gmra.mxu2 %vm253_vm1, %v4772_v4 }
0x2b07   :  { %6032 = vmatpush.xpose.msk.msra.mxu2 %vm253_vm1, %v5006_v51 }
0x2b0d   :  { %5033 = vrot.lane.b32.xlu1 %v7827_v19, %s6523_s28 }
0x2b0e   :  { %6027 = vmatmul.msk.f32.vlgmr.msrb.gmra.mxu2 %vm253_vm1, %v4874_v34 }
0x2b0f   :  { %v4822_v62 = vpop.permute.xlu0 %4821 }
0x2b10   :  { %4842 = vmatpush.msra.mxu0 %v4822_v62 }
0x2b12   :  { %6028 = vmatpush.xpose.msk.msrb.mxu0 %vm253_vm1, %v4904_v7 }
0x2b16   :  { %6033 = vmatmul.msk.f32.vlgmr.msra.gmra.mxu2 %vm253_vm1, %v5004_v9 }
0x2b67   :  { %v4813_v17 = vpop.xlane.xlu1 %4812 }
0x2b68   :  { %6417 = vrcp.f32 %v4813_v17 }
0x2b6e   :  { %v6418_v39 = vpop.eup %6417 }
0x2b6f   :  { %v4819_v44 = vmul.f32 %v6418_v39, %v6412_v2 }
0x2b71   :  { %6024 = vmatmul.msk.f32.vlgmr.msra.gmra.mxu0 %vm253_vm1, %v4819_v44 }
0x2b79   :  { %6029 = vmatmul.msk.f32.vlgmr.msrb.gmra.mxu0 %vm253_vm1, %v4902_v10 }
0x2b7f   :  { %v5034_v33 = vpop.permute.xlu1 %5033 }
0x2b80   :  { %6034 = vmatpush.xpose.msk.msra.mxu0 %vm253_vm1, %v5034_v33 }
0x2b81   :  { %v7901_v25 = vpop.f32.mrf.mxu2 }
0x2b83   :  { %6035 = vmatmul.msk.f32.vlgmr.msra.gmra.mxu0 %vm253_vm1, %v5032_v52  ;;  %v7907_v13 = vpop.f32.mrf.mxu0 }
0x2b89   :  { %v4796_v14 = vpop.f32.mrf.mxu2 }
0x2b8a   :  { %v4802_v21 = vsel %vm253_vm1, %v4796_v14, -inf }
0x2b8b   :  { %4803 = vmax.xlane.f32.xlu0 %v4802_v21  ;;  %v5996_v21 = vld [vmem:[%s8115_s30 + $0x38] sm:$0xff] }
0x2b8c   :  { %6038 = vmatpush.xpose.msk.msrb.mxu2 %vm182_vm0, %v5996_v21  ;;  %v6201_v21 = vld [vmem:[%s8119_s8 + $0x1] ss:$0 sm:$0xff] }
0x2b91   :  { %v4898_v50 = vpop.f32.mrf.mxu2 }
0x2b92   :  { %v4929_v8 = vsel %vm253_vm1, %v4898_v50, -inf }
0x2b93   :  { %4930 = vmax.xlane.f32.xlu2 %v4929_v8  ;;  %v5995_v8 = vld [vmem:[%s8115_s30 + $0x30] sm:$0xff] }
0x2b94   :  { %6039 = vmatpush.xpose.msk.msrb.mxu2 %vm182_vm0, %v5995_v8 }
0x2b99   :  { %v5028_v24 = vpop.f32.mrf.mxu2 }
0x2b9a   :  { %v5059_v31 = vsel %vm253_vm1, %v5028_v24, -inf }
0x2b9b   :  { %5060 = vmax.xlane.f32.xlu1 %v5059_v31  ;;  %v5993_v31 = vld [vmem:[%s8115_s30 + $0x20] sm:$0xff] }
0x2bee   :  { %v4844_v26 = vpop.f32.mrf.mxu0 }
0x2bf6   :  { %v4926_v32 = vpop.f32.mrf.mxu0 }
0x2bf7   :  { %v4932_v27 = vsel %vm253_vm1, %v4926_v32, -inf }
0x2bf8   :  { %4933 = vmax.xlane.f32.xlu0 %v4932_v27 }
0x2bfe   :  { %v4804_v36 = vpop.xlane.xlu0 %4803 }
0x2bff   :  { %v4806_v20 = vsub.f32 %v4796_v14, %v4804_v36 }
0x2c00   :  { %v5056_v37 = vpop.f32.mrf.mxu0 }
0x2c01   :  { %v4809_v35 = vmul.f32 1.442695, %v4806_v20  ;;  %v5062_v38 = vsel %vm253_vm1, %v5056_v37, -inf }
0x2c02   :  { %5063 = vmax.xlane.f32.xlu2 %v5062_v38 }
0x2c03   :  { %6419 = vpow2.f32 %v4809_v35 }
0x2c06   :  { %v4931_v56 = vpop.xlane.xlu2 %4930 }
0x2c07   :  { %v4935_v57 = vsub.f32 %v4898_v50, %v4931_v56 }
0x2c09   :  { %v6420_v41 = vpop.eup %6419  ;;  %v4937_v59 = vmul.f32 1.442695, %v4935_v57 }
0x2c0a   :  { %v4814_v43 = vsel %vm253_vm1, %v6420_v41, 0.0 }
0x2c0b   :  { %4815 = vadd.xlane.f32.xlu0 %v4814_v43 }
0x2c0e   :  { %v5061_v48 = vpop.xlane.xlu1 %5060 }
0x2c0f   :  { %v5065_v49 = vsub.f32 %v5028_v24, %v5061_v48  ;;  %v5994_v24 = vld [vmem:[%s8115_s30 + $0x28] sm:$0xff] }
0x2c10   :  { %6040 = vmatpush.xpose.msk.msrb.mxu2 %vm182_vm0, %v5994_v24 }
0x2c11   :  { %v5067_v53 = vmul.f32 1.442695, %v5065_v49 }
0x2c13   :  { %6421 = vpow2.f32 %v5067_v53 }
0x2c14   :  { %6423 = vpow2.f32 %v4937_v59  ;;  %6041 = vmatpush.xpose.msk.msrb.mxu2 %vm182_vm0, %v5993_v31 }
0x2c19   :  { %v6422_v11 = vpop.eup %6421 }
0x2c1a   :  { %4951 = vrot.lane.b32.xlu2 %v7825_v46, %s6518_s16  ;;  %v5071_v55 = vsel %vm253_vm1, %v6422_v11, 0.0  ;;  %v6424_v15 = vpop.eup %6423 }
0x2c1b   :  { %5072 = vadd.xlane.f32.xlu1 %v5071_v55  ;;  %v4941_v16 = vsel %vm253_vm1, %v6424_v15, 0.0 }
0x2c1f   :  { %4847 = vrot.lane.b32.xlu0 %v7827_v19, %s6515_s0  ;;  %s8130_s0 = sld [smem:[#allocation25_spill]] }
0x2c43   :  { %4942 = vadd.xlane.f32.xlu2 %v4941_v16  ;;  %v6053_v16 = vld [vmem:[%s8117_s13 + $0x78] sm:$0xff] }
0x2c44   :  { %6060 = vmatpush.xpose.msk.msrb.mxu0 %vm182_vm0, %v6053_v16 }
0x2c5b   :  { %4977 = vrot.lane.b32.xlu2 %v7827_v19, %s6518_s16 }
0x2c63   :  { %5107 = vrot.lane.b32.xlu2 %v7827_v19, %s6522_s26 }
0x2c6b   :  { %v4934_v18 = vpop.xlane.xlu0 %4933 }
0x2c6c   :  { %v4936_v0 = vsub.f32 %v4926_v32, %v4934_v18 }
0x2c6e   :  { %v4939_v42 = vmul.f32 1.442695, %v4936_v0 }
0x2c70   :  { %6425 = vpow2.f32 %v4939_v42 }
0x2c75   :  { %v5064_v63 = vpop.xlane.xlu2 %5063 }
0x2c76   :  { %v6426_v58 = vpop.eup %6425  ;;  %v5066_v61 = vsub.f32 %v5056_v37, %v5064_v63 }
0x2c77   :  { %v4944_v60 = vsel %vm253_vm1, %v6426_v58, 0.0 }
0x2c78   :  { %v5069_v34 = vmul.f32 1.442695, %v5066_v61  ;;  %4945 = vadd.xlane.f32.xlu1 %v4944_v60 }
0x2c7a   :  { %6427 = vpow2.f32 %v5069_v34 }
0x2c7d   :  { %v4952_v30 = vpop.permute.xlu2 %4951 }
0x2c7e   :  { %v4816_v40 = vpop.xlane.xlu0 %4815 }
0x2c7f   :  { %6429 = vrcp.f32 %v4816_v40  ;;  %v6050_v40 = vld [vmem:[%s8117_s13 + $0x60] sm:$0xff] }
0x2c80   :  { %v6428_v1 = vpop.eup %6427 }
0x2c81   :  { %v5074_v22 = vsel %vm253_vm1, %v6428_v1, 0.0 }
0x2c82   :  { %5075 = vadd.xlane.f32.xlu0 %v5074_v22  ;;  %v6051_v22 = vld [vmem:[%s8117_s13 + $0x68] sm:$0xff] }
0x2c85   :  { %v6430_v45 = vpop.eup %6429 }
0x2c86   :  { %v4820_v19 = vmul.f32 %v6430_v45, %v6420_v41  ;;  %v6049_v45 = vld [vmem:[%s8117_s13 + $0x58] sm:$0xff] }
0x2c8e   :  { %v5073_v5 = vpop.xlane.xlu1 %5072 }
0x2c91   :  { %5081 = vrot.lane.b32.xlu1 %v7825_v46, %s6522_s26  ;;  %v4848_v2 = vpop.permute.xlu0 %4847 }
0x2c92   :  { %4868 = vmatpush.msrb.mxu3 %v4848_v2  ;;  %v6047_v2 = vld [vmem:[%s8117_s13 + $0x48] sm:$0xff] }
0x2c93   :  { %6025 = vmatmul.msk.f32.vlgmr.msrb.gmra.mxu3 %vm253_vm1, %v4820_v19  ;;  %v6048_v19 = vld [vmem:[%s8117_s13 + $0x50] sm:$0xff] }
0x2c94   :  { %4972 = vmatpush.msra.mxu3 %v4952_v30  ;;  %v6046_v30 = vld [vmem:[%s8117_s13 + $0x40] sm:$0xff] }
0x2c99   :  { %5135 = vrot.lane.b32.xlu1 %v4844_v26, %s8127_s22 }
0x2cb6   :  { %v4943_v54 = vpop.xlane.xlu2 %4942 }
0x2cb7   :  { %6431 = vrcp.f32 %v4943_v54 }
0x2cbd   :  { %v6432_v28 = vpop.eup %6431 }
0x2cbe   :  { %v4949_v51 = vmul.f32 %v6432_v28, %v6424_v15  ;;  %v4978_v3 = vpop.permute.xlu2 %4977 }
0x2cbf   :  { %4998 = vmatpush.msrb.mxu1 %v4978_v3  ;;  %v6058_v3 = vld [vmem:[%s8120_s11 + $0x38] sm:$0xff] }
0x2cc0   :  { %6030 = vmatmul.msk.f32.vlgmr.msra.gmra.mxu3 %vm253_vm1, %v4949_v51 }
0x2cc6   :  { %v5108_v47 = vpop.permute.xlu2 %5107 }
0x2cc7   :  { %5128 = vmatpush.msra.mxu1 %v5108_v47  ;;  %v6057_v47 = vld [vmem:[%s8120_s11 + $0x30] sm:$0xff] }
0x2ceb   :  { %v4946_v46 = vpop.xlane.xlu1 %4945 }
0x2cec   :  { %6433 = vrcp.f32 %v4946_v46 }
0x2cf2   :  { %v6434_v6 = vpop.eup %6433 }
0x2cf3   :  { %v4950_v4 = vmul.f32 %v6434_v6, %v6426_v58 }
0x2cf5   :  { %v5076_v9 = vpop.xlane.xlu0 %5075  ;;  %6031 = vmatmul.msk.f32.vlgmr.msrb.gmra.mxu1 %vm253_vm1, %v4950_v4 }
0x2cf6   :  { %6435 = vrcp.f32 %v5076_v9 }
0x2cf7   :  { %6437 = vrcp.f32 %v5073_v5 }
0x2cfc   :  { %v6436_v62 = vpop.eup %6435 }
0x2cfd   :  { %v5080_v7 = vmul.f32 %v6436_v62, %v6428_v1  ;;  %v6438_v17 = vpop.eup %6437  ;;  %v6052_v1 = vld [vmem:[%s8117_s13 + $0x70] sm:$0xff]  ;;  %v6056_v62 = vld [vmem:[%s8120_s11 + $0x28] sm:$0xff] }
0x2cfe   :  { %v5079_v39 = vmul.f32 %v6438_v17, %v6422_v11  ;;  %6061 = vmatpush.xpose.msk.msrb.mxu0 %vm182_vm0, %v6052_v1 }
0x2cff   :  { %6037 = vmatmul.msk.f32.vlgmr.msra.gmra.mxu1 %vm253_vm1, %v5080_v7 }
0x2d02   :  { %6062 = vmatpush.xpose.msk.msrb.mxu0 %vm182_vm0, %v6051_v22 }
0x2d03   :  { %v5082_v44 = vpop.permute.xlu1 %5081 }
0x2d04   :  { %5102 = vmatpush.msrb.mxu3 %v5082_v44 }
0x2d05   :  { %6036 = vmatmul.msk.f32.vlgmr.msrb.gmra.mxu3 %vm253_vm1, %v5079_v39 }
0x2d06   :  { %6063 = vmatpush.xpose.msk.msrb.mxu0 %vm182_vm0, %v6050_v40  ;;  %6070 = vmatpush.xpose.msk.msra.mxu3 %vm987_vm8, %v6058_v3 }
0x2d0a   :  { %6064 = vmatpush.xpose.msk.msrb.mxu0 %vm182_vm0, %v6049_v45  ;;  %6071 = vmatpush.xpose.msk.msra.mxu3 %vm987_vm8, %v6057_v47 }
0x2d0b   :  { %v5136_v26 = vpop.permute.xlu1 %5135 }
0x2d0c   :  { %v5157_v27 = vsel %vm253_vm1, %v7901_v25, %v5136_v26  ;;  %v6199_v25 = vld [vmem:[%s8116_s6 + $0x1] ss:$0 sm:$0xff] }
0x2d0e   :  { %6065 = vmatpush.xpose.msk.msrb.mxu0 %vm182_vm0, %v6048_v19  ;;  %6072 = vmatpush.xpose.msk.msra.mxu3 %vm987_vm8, %v6056_v62 }
0x2d12   :  { %6066 = vmatpush.xpose.msk.msrb.mxu0 %vm182_vm0, %v6047_v2 }
0x2d16   :  { %v4870_v10 = vpop.f32.mrf.mxu3  ;;  %6067 = vmatpush.xpose.msk.msrb.mxu0 %vm182_vm0, %v6046_v30 }
0x2d43   :  { %v4974_v33 = vpop.f32.mrf.mxu3 }
0x2d44   :  { %5143 = vrot.lane.b32.xlu2 %v4974_v33, %s8128_s17  ;;  %v6200_v33 = vld [vmem:[%s8118_s3 + $0x1] ss:$0 sm:$0xff] }
0x2d4c   :  { %5137 = vrot.lane.b32.xlu2 %v4870_v10, %s8127_s22 }
0x2d72   :  { %v5000_v52 = vpop.f32.mrf.mxu1 }
0x2d7c   :  { %v5130_v14 = vpop.f32.mrf.mxu1 }
0x2d7d   :  { %5153 = vrot.lane.b32.xlu0 %v5130_v14, %s8129_s27 }
0x2d88   :  { %v5104_v50 = vpop.f32.mrf.mxu3 }
0x2d89   :  { %5151 = vrot.lane.b32.xlu1 %v5104_v50, %s8129_s27 }
0x2d91   :  { %5145 = vrot.lane.b32.xlu1 %v5000_v52, %s8128_s17 }
0x2d9e   :  { %v5144_v32 = vpop.permute.xlu2 %5143 }
0x2d9f   :  { %v5159_v36 = vsel %vm797_vm2, %v5157_v27, %v5144_v32 }
0x2da6   :  { %v5138_v35 = vpop.permute.xlu2 %5137 }
0x2da7   :  { %v5158_v38 = vsel %vm253_vm1, %v7907_v13, %v5138_v35 }
0x2def   :  { %v5154_v43 = vpop.permute.xlu0 %5153 }
0x2dfb   :  { %v5152_v20 = vpop.permute.xlu1 %5151 }
0x2dfc   :  { %v5161_v37 = vsel %vm800_vm3, %v5159_v36, %v5152_v20 }
0x2dfd   :  { %6042 = vmatmul.msk.f32.vlgmr.msrb.gmra.mxu2 %vm182_vm0, %v5161_v37 }
0x2e03   :  { %v5146_v41 = vpop.permute.xlu1 %5145 }
0x2e04   :  { %v5160_v48 = vsel %vm797_vm2, %v5158_v38, %v5146_v41  ;;  %v6055_v38 = vld [vmem:[%s8120_s11 + $0x20] sm:$0xff] }
0x2e05   :  { %v5162_v49 = vsel %vm800_vm3, %v5160_v48, %v5154_v43  ;;  %6073 = vmatpush.xpose.msk.msra.mxu3 %vm987_vm8, %v6055_v38  ;;  %v6202_v41 = vld [vmem:[%s8121_s10 + $0x1] ss:$0 sm:$0xff] }
0x2e06   :  { %6043 = vmatmul.msk.f32.gmra.mxu2 %vm182_vm0, %v5162_v49 }
0x2e80   :  { %v5201_v53 = vpop.f32.mrf.mxu2 }
0x2e81   :  { %v5202_v11 = vadd.f32 %v6199_v25, %v5201_v53 }
0x2e83   :  { %v5207_v55 = vadd.f32 %v5202_v11, %v7850_v23 }
0x2e85   :  { %v5213_v56 = vsel %vm182_vm0, %v5207_v55, 0.0 }
0x2e86   :  { %5214 = vadd.xlane.f32.xlu2 %v5213_v56 }
0x2e89   :  { %v5204_v57 = vpop.f32.mrf.mxu2 }
0x2e8a   :  { %v5205_v59 = vadd.f32 %v6199_v25, %v5204_v57 }
0x2e8c   :  { %v5208_v13 = vadd.f32 %v5205_v59, %v7854_v29 }
0x2e8e   :  { %v5216_v15 = vsel %vm182_vm0, %v5208_v13, 0.0 }
0x2e8f   :  { %5217 = vadd.xlane.f32.xlu1 %v5216_v15 }
0x2ef9   :  { %v5215_v18 = vpop.xlane.xlu2 %5214 }
0x2efa   :  { %v5219_v0 = vmul.f32 %v5215_v18, %v6890_v12 }
0x2efc   :  { %v5221_v23 = vsub.f32 %v5207_v55, %v5219_v0  ;;  %v6203_v55 = vld [vmem:[%s8122_s7 + $0x1] ss:$0 sm:$0xff] }
0x2efe   :  { %v5223_v42 = vmul.f32 %v5221_v23, %v5221_v23 }
0x2f00   :  { %v5225_v63 = vsel %vm182_vm0, %v5223_v42, 0.0 }
0x2f01   :  { %5226 = vadd.xlane.f32.xlu0 %v5225_v63 }
0x2f02   :  { %v5218_v29 = vpop.xlane.xlu1 %5217 }
0x2f03   :  { %v5220_v58 = vmul.f32 %v5218_v29, %v6890_v12 }
0x2f05   :  { %v5222_v61 = vsub.f32 %v5208_v13, %v5220_v58 }
0x2f07   :  { %v5224_v60 = vmul.f32 %v5222_v61, %v5222_v61 }
0x2f09   :  { %v5228_v34 = vsel %vm182_vm0, %v5224_v60, 0.0 }
0x2f0a   :  { %5229 = vadd.xlane.f32.xlu2 %v5228_v34 }
0x2f74   :  { %v5227_v54 = vpop.xlane.xlu0 %5226 }
0x2f75   :  { %v5231_v28 = vmul.f32 %v5227_v54, %v6890_v12 }
0x2f77   :  { %v5233_v51 = vadd.f32 1e-05, %v5231_v28 }
0x2f79   :  { %6439 = vrsqrt.f32 %v5233_v51  ;;  %vm5241_vm2 = vweird.f32 %v5233_v51 }
0x2f7d   :  { %v5230_v5 = vpop.xlane.xlu2 %5229 }
0x2f7e   :  { %v5232_v46 = vmul.f32 %v5230_v5, %v6890_v12 }
0x2f7f   :  { %v6440_v6 = vpop.eup %6439 }
0x2f80   :  { %v5236_v4 = vmul.f32 %v6440_v6, %v5233_v51  ;;  %v5234_v9 = vadd.f32 1e-05, %v5232_v46  ;;  %vm5242_vm1 = vweird.f32 %v6440_v6 }
0x2f81   :  { %vm5243_vm3 = vmor %vm5241_vm2, %vm5242_vm1 }
0x2f82   :  { %v5237_v7 = vmul.f32 %v6440_v6, %v5236_v4  ;;  %6441 = vrsqrt.f32 %v5234_v9  ;;  %vm5251_vm5 = vweird.f32 %v5234_v9 }
0x2f84   :  { %v5238_v17 = vmul.f32 0.5, %v5237_v7 }
0x2f86   :  { %v5239_v39 = vsub.f32 1.5, %v5238_v17 }
0x2f88   :  { %v6442_v44 = vpop.eup %6441  ;;  %v5240_v10 = vmul.f32 %v6440_v6, %v5239_v39  ;;  %v6205_v39 = vld [vmem:[%s8124_s2 + $0x1] ss:$0 sm:$0xff] }
0x2f89   :  { %v5246_v52 = vmul.f32 %v6442_v44, %v5234_v9  ;;  %vm5252_vm4 = vweird.f32 %v6442_v44  ;;  %v6204_v9 = vld [vmem:[%s8123_s1 + $0x1] ss:$0 sm:$0xff] }
0x2f8a   :  { %v5244_v14 = vsel %vm5243_vm3, %v6440_v6, %v5240_v10  ;;  %vm5253_vm6 = vmor %vm5251_vm5, %vm5252_vm4  ;;  %vm5527_vm4 = vcmask 1041409  }
0x2f8b   :  { %v5255_v50 = vmul.f32 %v5244_v14, %v5221_v23  ;;  %v5247_v8 = vmul.f32 %v6442_v44, %v5246_v52 }
0x2f8d   :  { %v5260_v24 = vmul.f32 %v6200_v33, %v5255_v50  ;;  %v5248_v31 = vmul.f32 0.5, %v5247_v8 }
0x2f8f   :  { %v5265_v26 = vadd.f32 %v6201_v21, %v5260_v24  ;;  %v5249_v32 = vsub.f32 1.5, %v5248_v31 }
0x2f91   :  { %v5250_v27 = vmul.f32 %v6442_v44, %v5249_v32  ;;  %6068 = vmatmul.msk.f32.vlgmr.msrb.gmra.mxu0 %vm182_vm0, %v5265_v26  ;;  %v5518_v32 = vld [vmem:[%s6719_s9 + $0x78] sm:$0xff] }
0x2f92   :  { %6078 = vmatpush.xpose.msk.msrb.mxu1 %vm182_vm0, %v5518_v32 }
0x2f93   :  { %v5254_v36 = vsel %vm5253_vm6, %v6442_v44, %v5250_v27  ;;  %v5517_v27 = vld [vmem:[%s6719_s9 + $0x70] sm:$0xff] }
0x2f94   :  { %v5256_v20 = vmul.f32 %v5254_v36, %v5222_v61  ;;  %v5516_v36 = vld [vmem:[%s6719_s9 + $0x68] sm:$0xff] }
0x2f96   :  { %v5261_v37 = vmul.f32 %v6200_v33, %v5256_v20  ;;  %6079 = vmatpush.xpose.msk.msrb.mxu1 %vm182_vm0, %v5517_v27  ;;  %v5515_v20 = vld [vmem:[%s6719_s9 + $0x60] sm:$0xff] }
0x2f98   :  { %v5266_v35 = vadd.f32 %v6201_v21, %v5261_v37  ;;  %v5514_v37 = vld [vmem:[%s6719_s9 + $0x58] sm:$0xff] }
0x2f9a   :  { %6069 = vmatmul.msk.f32.gmra.mxu0 %vm182_vm0, %v5266_v35  ;;  %6080 = vmatpush.xpose.msk.msrb.mxu1 %vm182_vm0, %v5516_v36 }
0x2f9e   :  { %6081 = vmatpush.xpose.msk.msrb.mxu1 %vm182_vm0, %v5515_v20 }
0x2fa2   :  { %6082 = vmatpush.xpose.msk.msrb.mxu1 %vm182_vm0, %v5514_v37 }
0x300e   :  { %v5335_v43 = vpop.f32.mrf.mxu0 }
0x300f   :  { %v5336_v48 = vadd.f32 %v6202_v41, %v5335_v43  ;;  %v5513_v43 = vld [vmem:[%s6719_s9 + $0x50] sm:$0xff] }
0x3010   :  { %6083 = vmatpush.xpose.msk.msrb.mxu1 %vm182_vm0, %v5513_v43 }
0x3011   :  { %v5341_v49 = vmax.f32 %v5336_v48, 0.0 }
0x3013   :  { %6074 = vmatmul.msk.f32.vlgmr.msra.gmra.mxu3 %vm987_vm8, %v5341_v49 }
0x3017   :  { %v5338_v25 = vpop.f32.mrf.mxu0 }
0x3018   :  { %v5339_v53 = vadd.f32 %v6202_v41, %v5338_v25 }
0x301a   :  { %v5342_v11 = vmax.f32 %v5339_v53, 0.0 }
0x301c   :  { %6075 = vmatmul.msk.f32.gmra.mxu3 %vm987_vm8, %v5342_v11 }
0x3096   :  { %v5381_v56 = vpop.f32.mrf.mxu3 }
0x3097   :  { %v5382_v57 = vadd.f32 %v6203_v55, %v5381_v56 }
0x3099   :  { %v5387_v59 = vadd.f32 %v5382_v57, %v5265_v26  ;;  %v5512_v57 = vld [vmem:[%s6719_s9 + $0x48] sm:$0xff] }
0x309a   :  { %6084 = vmatpush.xpose.msk.msrb.mxu1 %vm182_vm0, %v5512_v57 }
0x309b   :  { %v5393_v13 = vsel %vm182_vm0, %v5387_v59, 0.0 }
0x309c   :  { %5394 = vadd.xlane.f32.xlu1 %v5393_v13  ;;  %v5510_v13 = vld [vmem:[%s6719_s9 + $0x38] sm:$0xff] }
0x309f   :  { %v5384_v15 = vpop.f32.mrf.mxu3 }
0x30a0   :  { %v5385_v16 = vadd.f32 %v6203_v55, %v5384_v15  ;;  %v5509_v15 = vld [vmem:[%s6719_s9 + $0x30] sm:$0xff] }
0x30a2   :  { %v5388_v18 = vadd.f32 %v5385_v16, %v5266_v35  ;;  %v5508_v16 = vld [vmem:[%s6719_s9 + $0x28] sm:$0xff] }
0x30a4   :  { %v5396_v0 = vsel %vm182_vm0, %v5388_v18, 0.0 }
0x30a5   :  { %5397 = vadd.xlane.f32.xlu2 %v5396_v0  ;;  %v5506_v0 = vld [vmem:[%s6719_s9 + $0x18] sm:$0xff] }
0x310f   :  { %v5395_v23 = vpop.xlane.xlu1 %5394 }
0x3110   :  { %v5399_v42 = vmul.f32 %v5395_v23, %v6890_v12  ;;  %v5505_v23 = vld [vmem:[%s6719_s9 + $0x10] sm:$0xff] }
0x3112   :  { %v5401_v63 = vsub.f32 %v5387_v59, %v5399_v42  ;;  %v5511_v59 = vld [vmem:[%s6719_s9 + $0x40] sm:$0xff] }
0x3113   :  { %6085 = vmatpush.xpose.msk.msrb.mxu1 %vm182_vm0, %v5511_v59 }
0x3114   :  { %v5403_v29 = vmul.f32 %v5401_v63, %v5401_v63 }
0x3116   :  { %v5405_v58 = vsel %vm182_vm0, %v5403_v29, 0.0  ;;  %v5504_v29 = vld [vmem:[%s6719_s9 + $0x8] sm:$0xff] }
0x3117   :  { %5406 = vadd.xlane.f32.xlu1 %v5405_v58  ;;  %6086 = vmatpush.xpose.msk.msrb.mxu1 %vm182_vm0, %v5510_v13 }
0x3118   :  { %v5398_v61 = vpop.xlane.xlu2 %5397 }
0x3119   :  { %v5400_v60 = vmul.f32 %v5398_v61, %v6890_v12  ;;  %v5503_v61 = vld [vmem:[%s6719_s9] sm:$0xff] }
0x311b   :  { %v5402_v34 = vsub.f32 %v5388_v18, %v5400_v60  ;;  %6087 = vmatpush.xpose.msk.msrb.mxu1 %vm182_vm0, %v5509_v15  ;;  %v5507_v18 = vld [vmem:[%s6719_s9 + $0x20] sm:$0xff]  ;;  %s6530_s9 = smov [#allocation2]  }
0x311c   :  { %s5605_s15 = sshll.u32 %s6530_s9, 4  ;;  %s5606_s15 = int_to_ptr.vmem [resolvable:$true] %s5605_s15 }
0x311d   :  { %v5404_v1 = vmul.f32 %v5402_v34, %v5402_v34 }
0x311f   :  { %v5408_v22 = vsel %vm182_vm0, %v5404_v1, 0.0  ;;  %6088 = vmatpush.xpose.msk.msrb.mxu1 %vm182_vm0, %v5508_v16 }
0x3120   :  { %5409 = vadd.xlane.f32.xlu2 %v5408_v22 }
0x3123   :  { %6089 = vmatpush.xpose.msk.msrb.mxu1 %vm182_vm0, %v5507_v18 }
0x3127   :  { %6090 = vmatpush.xpose.msk.msrb.mxu1 %vm182_vm0, %v5506_v0 }
0x312b   :  { %6091 = vmatpush.xpose.msk.msrb.mxu1 %vm182_vm0, %v5505_v23 }
0x312f   :  { %6092 = vmatpush.xpose.msk.msrb.mxu1 %vm182_vm0, %v5504_v29 }
0x3133   :  { %6093 = vmatpush.xpose.msk.msrb.mxu1 %vm182_vm0, %v5503_v61 }
0x318a   :  { %v5407_v40 = vpop.xlane.xlu1 %5406 }
0x318b   :  { %v5411_v45 = vmul.f32 %v5407_v40, %v6890_v12 }
0x318d   :  { %v5413_v19 = vadd.f32 1e-05, %v5411_v45 }
0x318f   :  { %6443 = vrsqrt.f32 %v5413_v19  ;;  %vm5421_vm7 = vweird.f32 %v5413_v19 }
0x3193   :  { %v5410_v2 = vpop.xlane.xlu2 %5409 }
0x3194   :  { %v5412_v30 = vmul.f32 %v5410_v2, %v6890_v12 }
0x3195   :  { %v6444_v54 = vpop.eup %6443 }
0x3196   :  { %v5416_v28 = vmul.f32 %v6444_v54, %v5413_v19  ;;  %v5414_v51 = vadd.f32 1e-05, %v5412_v30  ;;  %vm5422_vm8 = vweird.f32 %v6444_v54 }
0x3197   :  { %vm5423_vm9 = vmor %vm5421_vm7, %vm5422_vm8 }
0x3198   :  { %v5417_v3 = vmul.f32 %v6444_v54, %v5416_v28  ;;  %6445 = vrsqrt.f32 %v5414_v51  ;;  %vm5431_vm11 = vweird.f32 %v5414_v51 }
0x319a   :  { %v5418_v47 = vmul.f32 0.5, %v5417_v3 }
0x319c   :  { %v5419_v5 = vsub.f32 1.5, %v5418_v47 }
0x319e   :  { %v6446_v46 = vpop.eup %6445  ;;  %v5420_v6 = vmul.f32 %v6444_v54, %v5419_v5  ;;  %v6206_v5 = vld [vmem:[%s8130_s0] ss:$0 sm:$0xff] }
0x319f   :  { %v5426_v4 = vmul.f32 %v6446_v46, %v5414_v51  ;;  %vm5432_vm10 = vweird.f32 %v6446_v46 }
0x31a0   :  { %v5424_v62 = vsel %vm5423_vm9, %v6444_v54, %v5420_v6  ;;  %vm5433_vm12 = vmor %vm5431_vm11, %vm5432_vm10 }
0x31a1   :  { %v5427_v7 = vmul.f32 %v6446_v46, %v5426_v4  ;;  %v5435_v17 = vmul.f32 %v5424_v62, %v5401_v63 }
0x31a3   :  { %v5428_v44 = vmul.f32 0.5, %v5427_v7  ;;  %v5440_v10 = vmul.f32 %v6204_v9, %v5435_v17 }
0x31a5   :  { %v5429_v33 = vsub.f32 1.5, %v5428_v44  ;;  %v5445_v52 = vadd.f32 %v6205_v39, %v5440_v10 }
0x31a7   :  { %v5430_v14 = vmul.f32 %v6446_v46, %v5429_v33  ;;  %v5449_v21 = vsel %vm182_vm0, %v5445_v52, 0.0 }
0x31a8   :  { %5450 = vadd.xlane.f32.xlu0 %v5449_v21 }
0x31a9   :  { %v5434_v50 = vsel %vm5433_vm12, %v6446_v46, %v5430_v14  ;;  %v6208_v14 = vld [vmem:[%s6724_s4] ss:$0 sm:$0xff] }
0x31aa   :  { %v5436_v8 = vmul.f32 %v5434_v50, %v5402_v34 }
0x31ac   :  { %v5441_v24 = vmul.f32 %v6204_v9, %v5436_v8  ;;  %v6207_v9 = vld [vmem:[%s6714_s20] ss:$0 sm:$0xff]  ;;  %s6463_s20 = sshra.s32 %s5608_s5, 4  ;;  %s6464_s20 = int_to_ptr.hbm [resolvable:$true] %s6463_s20 }
0x31ad   :  { %s6465_s16 = scalar_lea.hbm %s6464_s20, 2  ;;  %p6468_p1 = scmp.lt.s32.totalorder %s6464_s20, %s6729_s12 }
0x31ae   :  { %v5446_v31 = vadd.f32 %v6205_v39, %v5441_v24  ;;  %p6466_p0 = scmp.ne.s32.totalorder %s6464_s20, %s6465_s16  ;;  %p6469_p2 = scmp.lt.s32.totalorder %s6467_s23, %s6465_s16 }
0x31b0   :  { %v5452_v26 = vsel %vm182_vm0, %v5446_v31, 0.0  ;;  %p6470_p3 = por %p6469_p2, %p6468_p1 }
0x31b1   :  { %5453 = vadd.xlane.f32.xlu1 %v5452_v26 }
0x31b2   :  { %p6471_p4 = pnand %p6470_p3, %p6466_p0 }
0x321b   :  { %v5451_v35 = vpop.xlane.xlu0 %5450 }
0x321c   :  { %v5455_v38 = vmul.f32 %v5451_v35, %v6890_v12 }
0x321e   :  { %v5457_v41 = vsub.f32 %v5445_v52, %v5455_v38 }
0x3220   :  { %v5459_v48 = vmul.f32 %v5457_v41, %v5457_v41 }
0x3222   :  { %v5461_v49 = vsel %vm182_vm0, %v5459_v48, 0.0 }
0x3223   :  { %5462 = vadd.xlane.f32.xlu2 %v5461_v49 }
0x3224   :  { %v5454_v25 = vpop.xlane.xlu1 %5453 }
0x3225   :  { %v5456_v53 = vmul.f32 %v5454_v25, %v6890_v12 }
0x3227   :  { %v5458_v11 = vsub.f32 %v5446_v31, %v5456_v53 }
0x3229   :  { %v5460_v55 = vmul.f32 %v5458_v11, %v5458_v11 }
0x322b   :  { %v5464_v56 = vsel %vm182_vm0, %v5460_v55, 0.0 }
0x322c   :  { %5465 = vadd.xlane.f32.xlu0 %v5464_v56 }
0x3296   :  { %v5463_v42 = vpop.xlane.xlu2 %5462 }
0x3297   :  { %v5467_v63 = vmul.f32 %v5463_v42, %v6890_v12 }
0x3299   :  { %v5469_v58 = vadd.f32 1e-05, %v5467_v63 }
0x329b   :  { %6447 = vrsqrt.f32 %v5469_v58  ;;  %vm5477_vm14 = vweird.f32 %v5469_v58 }
0x329f   :  { %v5466_v60 = vpop.xlane.xlu0 %5465 }
0x32a0   :  { %v5468_v34 = vmul.f32 %v5466_v60, %v6890_v12 }
0x32a1   :  { %v6448_v1 = vpop.eup %6447 }
0x32a2   :  { %v5472_v22 = vmul.f32 %v6448_v1, %v5469_v58  ;;  %v5470_v40 = vadd.f32 1e-05, %v5468_v34  ;;  %vm5478_vm13 = vweird.f32 %v6448_v1 }
0x32a3   :  { %vm5479_vm15 = vmor %vm5477_vm14, %vm5478_vm13 }
0x32a4   :  { %v5473_v45 = vmul.f32 %v6448_v1, %v5472_v22  ;;  %6449 = vrsqrt.f32 %v5470_v40  ;;  %vm5487_vm2 = vweird.f32 %v5470_v40 }
0x32a6   :  { %v5474_v19 = vmul.f32 0.5, %v5473_v45 }
0x32a8   :  { %v5475_v2 = vsub.f32 1.5, %v5474_v19 }
0x32aa   :  { %v6450_v30 = vpop.eup %6449  ;;  %v5476_v54 = vmul.f32 %v6448_v1, %v5475_v2 }
0x32ab   :  { %v5482_v28 = vmul.f32 %v6450_v30, %v5470_v40  ;;  %vm5488_vm1 = vweird.f32 %v6450_v30 }
0x32ac   :  { %v5480_v51 = vsel %vm5479_vm15, %v6448_v1, %v5476_v54  ;;  %vm5489_vm3 = vmor %vm5487_vm2, %vm5488_vm1 }
0x32ad   :  { %v5483_v3 = vmul.f32 %v6450_v30, %v5482_v28  ;;  %v5491_v12 = vmul.f32 %v5480_v51, %v5457_v41 }
0x32af   :  { %v5484_v47 = vmul.f32 0.5, %v5483_v3  ;;  %v5496_v4 = vmul.f32 %v6206_v5, %v5491_v12 }
0x32b1   :  { %v5485_v46 = vsub.f32 1.5, %v5484_v47  ;;  %v5501_v39 = vadd.f32 %v6207_v9, %v5496_v4 }
0x32b3   :  { %v5486_v6 = vmul.f32 %v6450_v30, %v5485_v46  ;;  %v5525_v10 = vrot.slane %v5501_v39, 7 }
0x32b5   :  { %v5490_v62 = vsel %vm5489_vm3, %v6450_v30, %v5486_v6 }
0x32b6   :  { %v5492_v7 = vmul.f32 %v5490_v62, %v5458_v11 }
0x32b8   :  { %v5497_v17 = vmul.f32 %v6206_v5, %v5492_v7 }
0x32ba   :  { %v5502_v44 = vadd.f32 %v6207_v9, %v5497_v17 }
0x32bc   :  { %v5526_v33 = vrot.slane %v5502_v44, 6 }
0x32be   :  { %v5528_v52 = vsel %vm5527_vm4, %v5526_v33, %v5525_v10 }
0x32bf   :  { %6094 = vmatmul.msk.f32.vlgmr.msrb.gmra.mxu1 %vm182_vm0, %v5528_v52 }
0x333c   :  { %v5596_v21 = vpop.f32.mrf.mxu1 }
0x333d   :  { %v5597_v50 = vadd.f32 %v6208_v14, %v5596_v21 }
0x333f   :  { %5599 = vst [vmem:[#allocation2] sm:$0x3] %v5597_v50 }
0x3340   :  { %6474 = shalt.err (!%p6471_p4)
}
0x3341   :  { %5610 = dma.vmem_to_hbm [thread:$0]  %s5606_s15, 32, %s5608_s5, [#allocation3]  }
0x3342   :  { %6475 = dma.done.wait [#allocation3], 32  }
0x3343   :  { %6476 = vsyncadd [#allocation3], 4294967264 }
0x3344   :  { %5615 = vsyncpa [#allocation3], 1 }

</bundles_post_ra>
